<compile_context>
chip_gen: v7x
topology: tpu7x:2x2x1
jax: 0.10.0
libtpu: 0.0.40
codegen_flags: <defaults>
</compile_context>

<pallas_src>
import functools
import math

import jax
import jax.numpy as jnp
from jax.experimental import pallas as pl
from jax.experimental.pallas import tpu as pltpu

# ---------------- model-wide constants ----------------
D_TRUE = 80            # true d_model
DP = 128               # padded d_model (lane-dense)
H = 4                  # attention heads
HD_TRUE = 20           # true head dim
HDP = 32               # padded head dim (head h occupies lanes [h*32, h*32+32))
FFN = 256              # conformer ffn hidden dim (already lane-dense)
KSIZE = 31             # depthwise conv kernel size
PAD_OFF = 16           # sublane-aligned halo offset for the depthwise conv
NSPK = 600             # true number of speakers
NSPKP = 640            # padded logits dim
LN_EPS = 1e-5
BN_EPS = 1e-5


# ---------------- small helpers ----------------
def _pick_len_block(length, bsz, max_rows=512):
    """Pick a length-block bb (divisor of `length`).

    Row blocks are rb = bb*bsz flattened (l, b) rows.  rb must be a multiple of
    16 (bf16 sublane tile) unless bb == length (full array is always legal).
    Blocks are capped at `max_rows` rows (VMEM budget, v7x-safe) and we prefer
    >= 2 grid steps so both v7x TensorCores get work.
    """
    legal = [bb for bb in range(1, length + 1)
             if length % bb == 0 and ((bb * bsz) % 16 == 0 or bb == length)]
    fitting = [bb for bb in legal if bb * bsz <= max_rows]
    # TODO(synk): for awkward L*B, pad the row dim to a multiple of 16 and mask
    # the tail instead of falling back to a single/minimal block.
    pool = fitting if fitting else [min(legal)]
    multi = [bb for bb in pool if bb < length]
    return max(multi) if multi else max(pool)


def _cparams(*sem):
    # Working set per grid step is ~2-3 MiB, so 32 MiB is not a binding limit
    # on any of v5e/v6e/v7x (and stays well under v7x's 64 MiB physical VMEM).
    return pltpu.CompilerParams(dimension_semantics=sem,
                                vmem_limit_bytes=32 * 1024 * 1024)


def _ln(x, g, b, d_true, eps=LN_EPS):
    """LayerNorm over the last axis; only the first d_true lanes are real
    features (the rest are zero padding and g/b are zero there)."""
    inv_d = 1.0 / d_true
    mu = jnp.sum(x, axis=-1, keepdims=True) * inv_d
    mask = jax.lax.broadcasted_iota(jnp.int32, x.shape, x.ndim - 1) < d_true
    diff = jnp.where(mask, x - mu, 0.0)
    var = jnp.sum(diff * diff, axis=-1, keepdims=True) * inv_d
    return diff * jax.lax.rsqrt(var + eps) * g + b


# ---------------- prenet ----------------
def _prenet_kernel(x_ref, w_ref, b_ref, o_ref):
    o_ref[...] = (jnp.dot(x_ref[...], w_ref[...],
                          preferred_element_type=jnp.float32) + b_ref[...])


def pallas_prenet(x, w, b, rb):
    r, f = x.shape
    return pl.pallas_call(
        _prenet_kernel,
        out_shape=jax.ShapeDtypeStruct((r, DP), jnp.float32),
        grid=(r // rb,),
        in_specs=[pl.BlockSpec((rb, f), lambda i: (i, 0)),
                  pl.BlockSpec((f, DP), lambda i: (0, 0)),
                  pl.BlockSpec((1, DP), lambda i: (0, 0))],
        out_specs=pl.BlockSpec((rb, DP), lambda i: (i, 0)),
        compiler_params=_cparams("parallel"),
    )(x, w, b)


# ---------------- KA: FFN1 + attention LN + packed QKV projection ----------------
def _ffn1_qkv_kernel(x_ref, f1g_ref, f1b_ref, f1w1_ref, f1b1_ref, f1w2_ref,
                     f1b2_ref, ag_ref, ab_ref, wqkv_ref, bqkv_ref,
                     x1_ref, qkv_ref, *, d_true):
    x = x_ref[...]                                        # (rb, 128) f32
    # feed-forward module 1 (half-step residual)
    h = _ln(x, f1g_ref[...], f1b_ref[...], d_true)
    h = jnp.dot(h.astype(jnp.bfloat16), f1w1_ref[...],
                preferred_element_type=jnp.float32) + f1b1_ref[...]
    h = h * jax.nn.sigmoid(h)                             # SiLU
    h = jnp.dot(h.astype(jnp.bfloat16), f1w2_ref[...],
                preferred_element_type=jnp.float32) + f1b2_ref[...]
    x1 = x + 0.5 * h
    x1_ref[...] = x1
    # attention layer-norm + one packed (128, 384) Q|K|V projection
    # (softmax scale already folded into the Q columns / bias)
    ha = _ln(x1, ag_ref[...], ab_ref[...], d_true)
    qkv = jnp.dot(ha.astype(jnp.bfloat16), wqkv_ref[...],
                  preferred_element_type=jnp.float32) + bqkv_ref[...]
    qkv_ref[...] = qkv.astype(jnp.bfloat16)


def pallas_ffn1_qkv(x, p_ffn, p_attn, rb):
    r = x.shape[0]
    row = lambda i: (i, 0)
    c2 = lambda i: (0, 0)
    out_shape = (jax.ShapeDtypeStruct((r, DP), jnp.float32),
                 jax.ShapeDtypeStruct((r, 3 * DP), jnp.bfloat16))
    return pl.pallas_call(
        functools.partial(_ffn1_qkv_kernel, d_true=D_TRUE),
        out_shape=out_shape,
        grid=(r // rb,),
        in_specs=[pl.BlockSpec((rb, DP), row),
                  pl.BlockSpec((1, DP), c2), pl.BlockSpec((1, DP), c2),
                  pl.BlockSpec((DP, FFN), c2), pl.BlockSpec((1, FFN), c2),
                  pl.BlockSpec((FFN, DP), c2), pl.BlockSpec((1, DP), c2),
                  pl.BlockSpec((1, DP), c2), pl.BlockSpec((1, DP), c2),
                  pl.BlockSpec((DP, 3 * DP), c2), pl.BlockSpec((1, 3 * DP), c2)],
        out_specs=(pl.BlockSpec((rb, DP), row),
                   pl.BlockSpec((rb, 3 * DP), row)),
        compiler_params=_cparams("parallel"),
    )(x, p_ffn["g"], p_ffn["b"], p_ffn["w1"], p_ffn["b1"], p_ffn["w2"], p_ffn["b2"],
      p_attn["g"], p_attn["b"], p_attn["wqkv"], p_attn["bqkv"])


# ---------------- KB: per-head attention on the packed 128-lane Q/K/V ----------------
def _attention_kernel(qkv_ref, ctx_ref, *, n_heads, hdp):
    qkv = qkv_ref[...]                                    # (bb, t, 384) bf16
    q = qkv[:, :, 0:DP]                                   # 128-lane-aligned slices
    k = qkv[:, :, DP:2 * DP]
    v = qkv[:, :, 2 * DP:3 * DP]
    lane = jax.lax.broadcasted_iota(jnp.int32, q.shape, 2)
    acc = jnp.zeros(q.shape, jnp.float32)
    for hh in range(n_heads):
        sel = (lane >= hh * hdp) & (lane < (hh + 1) * hdp)
        # mask K/V to head hh's lanes: contraction over all 128 lanes then gives
        # exactly the per-head scores / context (other heads' lanes contribute 0).
        kh = jnp.where(sel, k, jnp.zeros_like(k))
        s = jnp.einsum("bqd,bkd->bqk", q, kh, preferred_element_type=jnp.float32)
        s = s - jnp.max(s, axis=-1, keepdims=True)
        p = jnp.exp(s)
        p = p / jnp.sum(p, axis=-1, keepdims=True)        # exact softmax
        vh = jnp.where(sel, v, jnp.zeros_like(v))
        acc = acc + jnp.einsum("bqk,bkd->bqd", p.astype(jnp.bfloat16), vh,
                               preferred_element_type=jnp.float32)
    ctx_ref[...] = acc.astype(jnp.bfloat16)               # head-concat context


def pallas_attention(qkv3, bb):
    length, bsz, _ = qkv3.shape
    return pl.pallas_call(
        functools.partial(_attention_kernel, n_heads=H, hdp=HDP),
        out_shape=jax.ShapeDtypeStruct((length, bsz, DP), jnp.bfloat16),
        grid=(length // bb,),
        in_specs=[pl.BlockSpec((bb, bsz, 3 * DP), lambda i: (i, 0, 0))],
        out_specs=pl.BlockSpec((bb, bsz, DP), lambda i: (i, 0, 0)),
        compiler_params=_cparams("parallel"),
    )(qkv3)


# ---------------- KC: out-proj + conv module + FFN2 + final LN ----------------
def _conv_ffn2_kernel(x1_ref, ctx_ref, bidx_ref, wo_ref, bo_ref,
                      cg_ref, cb_ref, wab_ref, bab_ref, dww_ref, dwb_ref,
                      pw2w_ref, pw2b_ref, f2g_ref, f2b_ref, f2w1_ref, f2b1_ref,
                      f2w2_ref, f2b2_ref, fing_ref, finb_ref,
                      o_ref, buf_ref, *, d_true, t, ksize, pad_off, bn_scale):
    x1 = x1_ref[...]                                      # (rb, 128) f32
    # attention out-projection + bias + residual
    x2 = (x1 + jnp.dot(ctx_ref[...], wo_ref[...],
                       preferred_element_type=jnp.float32) + bo_ref[...])
    # conv module: LN -> packed pointwise conv (value | gate) -> GLU
    hn = _ln(x2, cg_ref[...], cb_ref[...], d_true)
    ab = jnp.dot(hn.astype(jnp.bfloat16), wab_ref[...],
                 preferred_element_type=jnp.float32) + bab_ref[...]
    g = ab[:, :DP] * jax.nn.sigmoid(ab[:, DP:])           # GLU over channels
    # depthwise conv along the conformer time axis (= original batch index),
    # done on the flattened rows: halo scratch gives shifted views, the per-row
    # batch index masks contributions that would cross an l-group boundary.
    rb = x1.shape[0]
    pad = (ksize - 1) // 2
    buf_ref[0:pad_off, :] = jnp.zeros((pad_off, DP), jnp.float32)
    buf_ref[pad_off + rb:pad_off + rb + pad_off, :] = jnp.zeros((pad_off, DP),
                                                                jnp.float32)
    buf_ref[pad_off:pad_off + rb, :] = g
    bidx = bidx_ref[...]                                  # (rb, 1) int32
    w = dww_ref[...]                                      # (31, 128) f32
    acc = jnp.zeros((rb, DP), jnp.float32)
    for kk in range(ksize):
        off = kk - pad
        if off <= -t or off >= t:
            continue                                      # tap never lands in-group
        shifted = buf_ref[pad_off + off:pad_off + off + rb, :]
        valid = (bidx + off >= 0) & (bidx + off < t)
        acc = acc + jnp.where(valid, shifted, 0.0) * w[kk, :][None, :]
    y = (acc + dwb_ref[...]) * bn_scale                   # eval-mode BatchNorm1d
    c = y * jax.nn.sigmoid(y)                             # SiLU
    # pointwise conv 2 + conv residual
    x3 = (x2 + jnp.dot(c.astype(jnp.bfloat16), pw2w_ref[...],
                       preferred_element_type=jnp.float32) + pw2b_ref[...])
    # feed-forward module 2 (half-step residual)
    h = _ln(x3, f2g_ref[...], f2b_ref[...], d_true)
    h = jnp.dot(h.astype(jnp.bfloat16), f2w1_ref[...],
                preferred_element_type=jnp.float32) + f2b1_ref[...]
    h = h * jax.nn.sigmoid(h)
    h = jnp.dot(h.astype(jnp.bfloat16), f2w2_ref[...],
                preferred_element_type=jnp.float32) + f2b2_ref[...]
    x4 = x3 + 0.5 * h
    o_ref[...] = _ln(x4, fing_ref[...], finb_ref[...], d_true)


def pallas_conv_ffn2(x1, ctx, bidx, lp, rb, bsz):
    r = x1.shape[0]
    row = lambda i: (i, 0)
    c2 = lambda i: (0, 0)
    conv, ffn2, attn = lp["conv"], lp["ffn2"], lp["attn"]
    return pl.pallas_call(
        functools.partial(_conv_ffn2_kernel, d_true=D_TRUE, t=bsz, ksize=KSIZE,
                          pad_off=PAD_OFF,
                          bn_scale=1.0 / math.sqrt(1.0 + BN_EPS)),
        out_shape=jax.ShapeDtypeStruct((r, DP), jnp.float32),
        grid=(r // rb,),
        in_specs=[pl.BlockSpec((rb, DP), row),                 # x1 (f32)
                  pl.BlockSpec((rb, DP), row),                 # ctx (bf16)
                  pl.BlockSpec((rb, 1), row),                  # per-row batch idx
                  pl.BlockSpec((DP, DP), c2), pl.BlockSpec((1, DP), c2),      # wo, bo
                  pl.BlockSpec((1, DP), c2), pl.BlockSpec((1, DP), c2),       # conv LN
                  pl.BlockSpec((DP, 2 * DP), c2), pl.BlockSpec((1, 2 * DP), c2),  # wab
                  pl.BlockSpec((KSIZE, DP), c2), pl.BlockSpec((1, DP), c2),   # dw w/b
                  pl.BlockSpec((DP, DP), c2), pl.BlockSpec((1, DP), c2),      # pw2
                  pl.BlockSpec((1, DP), c2), pl.BlockSpec((1, DP), c2),       # ffn2 LN
                  pl.BlockSpec((DP, FFN), c2), pl.BlockSpec((1, FFN), c2),    # ffn2 w1
                  pl.BlockSpec((FFN, DP), c2), pl.BlockSpec((1, DP), c2),     # ffn2 w2
                  pl.BlockSpec((1, DP), c2), pl.BlockSpec((1, DP), c2)],      # final LN
        out_specs=pl.BlockSpec((rb, DP), row),
        scratch_shapes=[pltpu.VMEM((rb + 2 * PAD_OFF, DP), jnp.float32)],
        compiler_params=_cparams("parallel"),
    )(x1, ctx, bidx, attn["wo"], attn["bo"], conv["g"], conv["b"],
      conv["wab"], conv["bab"], conv["dw_w"], conv["dw_b"],
      conv["pw2_w"], conv["pw2_b"], ffn2["g"], ffn2["b"],
      ffn2["w1"], ffn2["b1"], ffn2["w2"], ffn2["b2"], lp["fin_g"], lp["fin_b"])


# ---------------- mean pool (over length) + prediction head ----------------
def _pool_head_kernel(x_ref, w1_ref, b1_ref, w2_ref, b2_ref, o_ref, acc_ref, *,
                      inv_len):
    @pl.when(pl.program_id(0) == 0)
    def _():
        acc_ref[...] = jnp.zeros_like(acc_ref)

    acc_ref[...] += jnp.sum(x_ref[...], axis=0)

    @pl.when(pl.program_id(0) == pl.num_programs(0) - 1)
    def _():
        stats = acc_ref[...] * inv_len
        h = jnp.dot(stats, w1_ref[...], preferred_element_type=jnp.float32) + b1_ref[...]
        h = jnp.maximum(h, 0.0)
        o_ref[...] = (jnp.dot(h, w2_ref[...], preferred_element_type=jnp.float32)
                      + b2_ref[...])


def pallas_pool_head(x3, w1, b1, w2, b2, blk):
    lb, bsz, _ = x3.shape
    return pl.pallas_call(
        functools.partial(_pool_head_kernel, inv_len=1.0 / lb),
        out_shape=jax.ShapeDtypeStruct((bsz, NSPKP), jnp.float32),
        grid=(lb // blk,),
        in_specs=[pl.BlockSpec((blk, bsz, DP), lambda i: (i, 0, 0)),
                  pl.BlockSpec((DP, DP), lambda i: (0, 0)),
                  pl.BlockSpec((1, DP), lambda i: (0, 0)),
                  pl.BlockSpec((DP, NSPKP), lambda i: (0, 0)),
                  pl.BlockSpec((1, NSPKP), lambda i: (0, 0))],
        out_specs=pl.BlockSpec((bsz, NSPKP), lambda i: (0, 0)),
        scratch_shapes=[pltpu.VMEM((bsz, DP), jnp.float32)],
        compiler_params=_cparams("arbitrary"),
    )(x3, w1, b1, w2, b2)


# ---------------- forward pass ----------------
def strong_classifier_forward(params, mels):
    bsz, length, feat = mels.shape
    rows = length * bsz
    bb = _pick_len_block(length, bsz)
    rb = bb * bsz
    # permute(1, 0, 2) of the reference; later reshapes are free (row-major).
    x = jnp.transpose(mels, (1, 0, 2)).reshape(rows, feat)
    x = pallas_prenet(x, params["prenet_w"], params["prenet_b"], rb)  # (L*B, 128)
    # original-batch index of every flattened (l, b) row, for dw-conv masking
    bidx = jnp.tile(jnp.arange(bsz, dtype=jnp.int32), length).reshape(rows, 1)
    for lp in params["layers"]:
        x1, qkv = pallas_ffn1_qkv(x, lp["ffn1"], lp["attn"], rb)
        ctx = pallas_attention(qkv.reshape(length, bsz, 3 * DP), bb)
        x = pallas_conv_ffn2(x1, ctx.reshape(rows, DP), bidx, lp, rb, bsz)
    logits = pallas_pool_head(x.reshape(length, bsz, DP),
                              params["pred_w1"], params["pred_b1"],
                              params["pred_w2"], params["pred_b2"], bb)
    return logits[:, :NSPK]


# ---------------- parameter init (PyTorch-shaped) + kernel-ready prep ----------------
def init_params(key, *, d_model=80, n_spks=600, ffn_dim=256, num_layers=4, ksize=31):
    keys = iter(jax.random.split(key, 256))

    def w(shape, fan_in):
        return jax.random.normal(next(keys), shape, jnp.float32) / math.sqrt(fan_in)

    def b(shape):
        return jax.random.normal(next(keys), shape, jnp.float32) * 0.01

    d = d_model
    params = {
        "prenet_w": w((40, d), 40), "prenet_b": b((d,)),
        "layers": [],
        "pred_w1": w((d, d), d), "pred_b1": b((d,)),
        "pred_w2": w((d, n_spks), d), "pred_b2": b((n_spks,)),
    }
    for _ in range(num_layers):
        params["layers"].append({
            "ffn1": {"ln_g": jnp.ones((d,)), "ln_b": jnp.zeros((d,)),
                     "w1": w((d, ffn_dim), d), "b1": b((ffn_dim,)),
                     "w2": w((ffn_dim, d), ffn_dim), "b2": b((d,))},
            "attn": {"ln_g": jnp.ones((d,)), "ln_b": jnp.zeros((d,)),
                     "in_w": w((d, 3 * d), d), "in_b": b((3 * d,)),
                     "out_w": w((d, d), d), "out_b": b((d,))},
            "conv": {"ln_g": jnp.ones((d,)), "ln_b": jnp.zeros((d,)),
                     "pw1_w": w((d, 2 * d), d), "pw1_b": b((2 * d,)),
                     "dw_w": w((ksize, d), ksize), "dw_b": b((d,)),
                     "pw2_w": w((d, d), d), "pw2_b": b((d,))},
            "ffn2": {"ln_g": jnp.ones((d,)), "ln_b": jnp.zeros((d,)),
                     "w1": w((d, ffn_dim), d), "b1": b((ffn_dim,)),
                     "w2": w((ffn_dim, d), ffn_dim), "b2": b((d,))},
            "final_ln_g": jnp.ones((d,)), "final_ln_b": jnp.zeros((d,)),
        })
    return params


def _pad2(w, rows, cols):
    r, c = w.shape
    return jnp.pad(w, ((0, rows - r), (0, cols - c)))


def _pad_vec(v, n):
    return jnp.pad(v, (0, n - v.shape[0])).reshape(1, n)


def _prep_ffn(f):
    return {"g": _pad_vec(f["ln_g"], DP), "b": _pad_vec(f["ln_b"], DP),
            "w1": _pad2(f["w1"], DP, FFN).astype(jnp.bfloat16),
            "b1": f["b1"].reshape(1, FFN),
            "w2": _pad2(f["w2"], FFN, DP).astype(jnp.bfloat16),
            "b2": _pad_vec(f["b2"], DP)}


def _pack_head_cols(w, b, scale=1.0):
    """(80,80)/(80,) -> (128,128)/(128,) with head h in lanes [h*32, h*32+20)."""
    wp = jnp.zeros((DP, DP), jnp.float32)
    bp = jnp.zeros((DP,), jnp.float32)
    for hh in range(H):
        src = slice(hh * HD_TRUE, (hh + 1) * HD_TRUE)
        dst = slice(hh * HDP, hh * HDP + HD_TRUE)
        wp = wp.at[:D_TRUE, dst].set(w[:, src] * scale)
        bp = bp.at[dst].set(b[src] * scale)
    return wp, bp


def _pack_out_rows(w):
    """(80,80) out_proj -> (128,128) with head h rows at [h*32, h*32+20)."""
    wp = jnp.zeros((DP, DP), jnp.float32)
    for hh in range(H):
        src = slice(hh * HD_TRUE, (hh + 1) * HD_TRUE)
        dst = slice(hh * HDP, hh * HDP + HD_TRUE)
        wp = wp.at[dst, :D_TRUE].set(w[src, :])
    return wp


def _prep_attn(a):
    d = D_TRUE
    in_w, in_b = a["in_w"], a["in_b"]
    scale = 1.0 / math.sqrt(HD_TRUE)
    wq, bq = _pack_head_cols(in_w[:, :d], in_b[:d], scale=scale)
    wk, bk = _pack_head_cols(in_w[:, d:2 * d], in_b[d:2 * d])
    wv, bv = _pack_head_cols(in_w[:, 2 * d:], in_b[2 * d:])
    return {"g": _pad_vec(a["ln_g"], DP), "b": _pad_vec(a["ln_b"], DP),
            "wqkv": jnp.concatenate([wq, wk, wv], axis=1).astype(jnp.bfloat16),
            "bqkv": jnp.concatenate([bq, bk, bv]).reshape(1, 3 * DP),
            "wo": _pack_out_rows(a["out_w"]).astype(jnp.bfloat16),
            "bo": _pad_vec(a["out_b"], DP)}


def _prep_conv(c):
    d = D_TRUE
    wab = jnp.zeros((DP, 2 * DP), jnp.float32)
    wab = wab.at[:d, :d].set(c["pw1_w"][:, :d])            # GLU value branch
    wab = wab.at[:d, DP:DP + d].set(c["pw1_w"][:, d:])      # GLU gate branch
    bab = jnp.zeros((2 * DP,), jnp.float32)
    bab = bab.at[:d].set(c["pw1_b"][:d])
    bab = bab.at[DP:DP + d].set(c["pw1_b"][d:])
    return {"g": _pad_vec(c["ln_g"], DP), "b": _pad_vec(c["ln_b"], DP),
            "wab": wab.astype(jnp.bfloat16), "bab": bab.reshape(1, 2 * DP),
            "dw_w": _pad2(c["dw_w"], KSIZE, DP),
            "dw_b": _pad_vec(c["dw_b"], DP),
            "pw2_w": _pad2(c["pw2_w"], DP, DP).astype(jnp.bfloat16),
            "pw2_b": _pad_vec(c["pw2_b"], DP)}


def prepare_params(raw):
    """Zero-pad to lane-dense shapes, pack heads, fold softmax scale, bf16 weights."""
    prepped = {
        "prenet_w": _pad2(raw["prenet_w"], raw["prenet_w"].shape[0], DP),
        "prenet_b": _pad_vec(raw["prenet_b"], DP),
        "pred_w1": _pad2(raw["pred_w1"], DP, DP),
        "pred_b1": _pad_vec(raw["pred_b1"], DP),
        "pred_w2": _pad2(raw["pred_w2"], DP, NSPKP),
        "pred_b2": _pad_vec(raw["pred_b2"], NSPKP),
        "layers": [],
    }
    for lp in raw["layers"]:
        prepped["layers"].append({
            "ffn1": _prep_ffn(lp["ffn1"]),
            "attn": _prep_attn(lp["attn"]),
            "conv": _prep_conv(lp["conv"]),
            "ffn2": _prep_ffn(lp["ffn2"]),
            "fin_g": _pad_vec(lp["final_ln_g"], DP),
            "fin_b": _pad_vec(lp["final_ln_b"], DP),
        })
    return prepped


if __name__ == "__main__":
    key = jax.random.PRNGKey(0)
    pkey, xkey = jax.random.split(key)
    params = prepare_params(init_params(pkey))       # d_model=80, n_spks=600, 4 layers
    mels = jax.random.normal(xkey, (2, 16, 40), jnp.float32)   # (batch=2, length=16, 40)

    fwd = jax.jit(strong_classifier_forward)
    out = jax.block_until_ready(fwd(params, mels))

    assert out.shape == (2, 600), out.shape
    assert bool(jnp.all(jnp.isfinite(out)))
    print("KERNEL_OK")
</pallas_src>

<mosaic_0001>
module attributes {stable_mosaic.version = 11 : i64} {
  func.func @_prenet_kernel(%arg0: i32, %arg1: memref<16x40xf32, #tpu.memory_space<vmem>>, %arg2: memref<40x128xf32, #tpu.memory_space<vmem>>, %arg3: memref<1x128xf32, #tpu.memory_space<vmem>>, %arg4: memref<16x128xf32, #tpu.memory_space<vmem>>) attributes {dimension_semantics = [#tpu.dimension_semantics<parallel>], iteration_bounds = array<i64: 2>, scalar_prefetch = 0 : i64, scratch_operands = 0 : i64, tpu.core_type = #tpu.core_type<tc>, window_params = [{transform_indices = @transform_0, window_bounds = array<i64: 16, 40>}, {pipeline_mode = #tpu.pipeline_mode<synchronous>, transform_indices = @transform_1, window_bounds = array<i64: 40, 128>}, {pipeline_mode = #tpu.pipeline_mode<synchronous>, transform_indices = @transform_2, window_bounds = array<i64: 1, 128>}, {transform_indices = @transform_3, window_bounds = array<i64: 16, 128>}]} {
    %c0 = arith.constant 0 : index
    %c0_0 = arith.constant 0 : index
    %0 = vector.load %arg1[%c0, %c0_0] : memref<16x40xf32, #tpu.memory_space<vmem>>, vector<16x40xf32>
    %c0_1 = arith.constant 0 : index
    %c0_2 = arith.constant 0 : index
    %1 = vector.load %arg2[%c0_1, %c0_2] : memref<40x128xf32, #tpu.memory_space<vmem>>, vector<40x128xf32>
    %cst = arith.constant dense<0.000000e+00> : vector<16x128xf32>
    %2 = tpu.matmul %0, %1, %cst {dimension_numbers = #tpu.dot_dimension_numbers<[1], [0], [0], [1], [0, 0, 1, 1], [], []>} : vector<16x40xf32>, vector<40x128xf32>, vector<16x128xf32> -> vector<16x128xf32>
    %c0_3 = arith.constant 0 : index
    %c0_4 = arith.constant 0 : index
    %3 = vector.load %arg3[%c0_3, %c0_4] : memref<1x128xf32, #tpu.memory_space<vmem>>, vector<1x128xf32>
    %4 = vector.broadcast %3 : vector<1x128xf32> to vector<16x128xf32>
    %5 = arith.addf %2, %4 : vector<16x128xf32>
    %c0_5 = arith.constant 0 : index
    %c0_6 = arith.constant 0 : index
    %6 = vector.load %arg4[%c0_5, %c0_6] : memref<16x128xf32, #tpu.memory_space<vmem>>, vector<16x128xf32>
    tpu.vector_store %arg4[%c0_5, %c0_6], %5 {strides = array<i32>} : memref<16x128xf32, #tpu.memory_space<vmem>>, vector<16x128xf32>,
    return
  }
  func.func @transform_0(%arg0: i32) -> (i32, i32) {
    %c0_i32 = arith.constant 0 : i32
    %c0_i32_0 = arith.constant 0 : i32
    return %arg0, %c0_i32 : i32, i32
  }
  func.func @transform_1(%arg0: i32) -> (i32, i32) {
    %c0_i32 = arith.constant 0 : i32
    %c0_i32_0 = arith.constant 0 : i32
    %c0_i32_1 = arith.constant 0 : i32
    return %c0_i32, %c0_i32_0 : i32, i32
  }
  func.func @transform_2(%arg0: i32) -> (i32, i32) {
    %c0_i32 = arith.constant 0 : i32
    %c0_i32_0 = arith.constant 0 : i32
    %c0_i32_1 = arith.constant 0 : i32
    return %c0_i32, %c0_i32_0 : i32, i32
  }
  func.func @transform_3(%arg0: i32) -> (i32, i32) {
    %c0_i32 = arith.constant 0 : i32
    %c0_i32_0 = arith.constant 0 : i32
    return %arg0, %c0_i32 : i32, i32
  }
}

module attributes {stable_mosaic.version = 11 : i64} {
  func.func @_ffn1_qkv_kernel(%arg0: i32, %arg1: memref<16x128xf32, #tpu.memory_space<vmem>>, %arg2: memref<1x128xf32, #tpu.memory_space<vmem>>, %arg3: memref<1x128xf32, #tpu.memory_space<vmem>>, %arg4: memref<128x256xbf16, #tpu.memory_space<vmem>>, %arg5: memref<1x256xf32, #tpu.memory_space<vmem>>, %arg6: memref<256x128xbf16, #tpu.memory_space<vmem>>, %arg7: memref<1x128xf32, #tpu.memory_space<vmem>>, %arg8: memref<1x128xf32, #tpu.memory_space<vmem>>, %arg9: memref<1x128xf32, #tpu.memory_space<vmem>>, %arg10: memref<128x384xbf16, #tpu.memory_space<vmem>>, %arg11: memref<1x384xf32, #tpu.memory_space<vmem>>, %arg12: memref<16x128xf32, #tpu.memory_space<vmem>>, %arg13: memref<16x384xbf16, #tpu.memory_space<vmem>>) attributes {dimension_semantics = [#tpu.dimension_semantics<parallel>], iteration_bounds = array<i64: 2>, scalar_prefetch = 0 : i64, scratch_operands = 0 : i64, tpu.core_type = #tpu.core_type<tc>, window_params = [{transform_indices = @transform_0, window_bounds = array<i64: 16, 128>}, {pipeline_mode = #tpu.pipeline_mode<synchronous>, transform_indices = @transform_1, window_bounds = array<i64: 1, 128>}, {pipeline_mode = #tpu.pipeline_mode<synchronous>, transform_indices = @transform_2, window_bounds = array<i64: 1, 128>}, {pipeline_mode = #tpu.pipeline_mode<synchronous>, transform_indices = @transform_3, window_bounds = array<i64: 128, 256>}, {pipeline_mode = #tpu.pipeline_mode<synchronous>, transform_indices = @transform_4, window_bounds = array<i64: 1, 256>}, {pipeline_mode = #tpu.pipeline_mode<synchronous>, transform_indices = @transform_5, window_bounds = array<i64: 256, 128>}, {pipeline_mode = #tpu.pipeline_mode<synchronous>, transform_indices = @transform_6, window_bounds = array<i64: 1, 128>}, {pipeline_mode = #tpu.pipeline_mode<synchronous>, transform_indices = @transform_7, window_bounds = array<i64: 1, 128>}, {pipeline_mode = #tpu.pipeline_mode<synchronous>, transform_indices = @transform_8, window_bounds = array<i64: 1, 128>}, {pipeline_mode = #tpu.pipeline_mode<synchronous>, transform_indices = @transform_9, window_bounds = array<i64: 128, 384>}, {pipeline_mode = #tpu.pipeline_mode<synchronous>, transform_indices = @transform_10, window_bounds = array<i64: 1, 384>}, {transform_indices = @transform_11, window_bounds = array<i64: 16, 128>}, {transform_indices = @transform_12, window_bounds = array<i64: 16, 384>}]} {
    %c0 = arith.constant 0 : index
    %c0_0 = arith.constant 0 : index
    %0 = vector.load %arg1[%c0, %c0_0] : memref<16x128xf32, #tpu.memory_space<vmem>>, vector<16x128xf32>
    %c0_1 = arith.constant 0 : index
    %c0_2 = arith.constant 0 : index
    %1 = vector.load %arg2[%c0_1, %c0_2] : memref<1x128xf32, #tpu.memory_space<vmem>>, vector<1x128xf32>
    %c0_3 = arith.constant 0 : index
    %c0_4 = arith.constant 0 : index
    %2 = vector.load %arg3[%c0_3, %c0_4] : memref<1x128xf32, #tpu.memory_space<vmem>>, vector<1x128xf32>
    %cst = arith.constant dense<0.000000e+00> : vector<16xf32>
    %3 = vector.multi_reduction <add>, %0, %cst [1] : vector<16x128xf32> to vector<16xf32>
    %4 = vector.shape_cast %3 : vector<16xf32> to vector<16x1xf32>
    %cst_5 = arith.constant 1.250000e-02 : f32
    %5 = vector.broadcast %cst_5 : f32 to vector<16x1xf32>
    %6 = arith.mulf %4, %5 : vector<16x1xf32>
    %7 = tpu.iota {dimensions = array<i32: 1>} : vector<16x128xi32>
    %c80_i32 = arith.constant 80 : i32
    %8 = vector.broadcast %c80_i32 : i32 to vector<16x128xi32>
    %9 = arith.cmpi slt, %7, %8 : vector<16x128xi32>
    %10 = vector.broadcast %6 : vector<16x1xf32> to vector<16x128xf32>
    %11 = arith.subf %0, %10 : vector<16x128xf32>
    %cst_6 = arith.constant 0.000000e+00 : f32
    %12 = vector.broadcast %cst_6 : f32 to vector<16x128xf32>
    %13 = arith.select %9, %11, %12 : vector<16x128xi1>, vector<16x128xf32>
    %14 = arith.mulf %13, %13 : vector<16x128xf32>
    %cst_7 = arith.constant dense<0.000000e+00> : vector<16xf32>
    %15 = vector.multi_reduction <add>, %14, %cst_7 [1] : vector<16x128xf32> to vector<16xf32>
    %16 = vector.shape_cast %15 : vector<16xf32> to vector<16x1xf32>
    %cst_8 = arith.constant 1.250000e-02 : f32
    %17 = vector.broadcast %cst_8 : f32 to vector<16x1xf32>
    %18 = arith.mulf %16, %17 : vector<16x1xf32>
    %cst_9 = arith.constant 9.99999974E-6 : f32
    %19 = vector.broadcast %cst_9 : f32 to vector<16x1xf32>
    %20 = arith.addf %18, %19 : vector<16x1xf32>
    %21 = math.rsqrt %20 : vector<16x1xf32>
    %22 = vector.broadcast %21 : vector<16x1xf32> to vector<16x128xf32>
    %23 = arith.mulf %13, %22 : vector<16x128xf32>
    %24 = vector.broadcast %1 : vector<1x128xf32> to vector<16x128xf32>
    %25 = arith.mulf %23, %24 : vector<16x128xf32>
    %26 = vector.broadcast %2 : vector<1x128xf32> to vector<16x128xf32>
    %27 = arith.addf %25, %26 : vector<16x128xf32>
    %28 = arith.truncf %27 : vector<16x128xf32> to vector<16x128xbf16>
    %c0_10 = arith.constant 0 : index
    %c0_11 = arith.constant 0 : index
    %29 = vector.load %arg4[%c0_10, %c0_11] : memref<128x256xbf16, #tpu.memory_space<vmem>>, vector<128x256xbf16>
    %cst_12 = arith.constant dense<0.000000e+00> : vector<16x256xf32>
    %30 = tpu.matmul %28, %29, %cst_12 {dimension_numbers = #tpu.dot_dimension_numbers<[1], [0], [0], [1], [0, 0, 1, 1], [], []>} : vector<16x128xbf16>, vector<128x256xbf16>, vector<16x256xf32> -> vector<16x256xf32>
    %c0_13 = arith.constant 0 : index
    %c0_14 = arith.constant 0 : index
    %31 = vector.load %arg5[%c0_13, %c0_14] : memref<1x256xf32, #tpu.memory_space<vmem>>, vector<1x256xf32>
    %32 = vector.broadcast %31 : vector<1x256xf32> to vector<16x256xf32>
    %33 = arith.addf %30, %32 : vector<16x256xf32>
    %34 = arith.negf %33 : vector<16x256xf32>
    %35 = math.exp %34 : vector<16x256xf32>
    %cst_15 = arith.constant 1.000000e+00 : f32
    %36 = vector.broadcast %cst_15 : f32 to vector<16x256xf32>
    %37 = arith.addf %36, %35 : vector<16x256xf32>
    %38 = arith.divf %36, %37 : vector<16x256xf32>
    %39 = arith.mulf %33, %38 : vector<16x256xf32>
    %40 = arith.truncf %39 : vector<16x256xf32> to vector<16x256xbf16>
    %c0_16 = arith.constant 0 : index
    %c0_17 = arith.constant 0 : index
    %41 = vector.load %arg6[%c0_16, %c0_17] : memref<256x128xbf16, #tpu.memory_space<vmem>>, vector<256x128xbf16>
    %cst_18 = arith.constant dense<0.000000e+00> : vector<16x128xf32>
    %42 = tpu.matmul %40, %41, %cst_18 {dimension_numbers = #tpu.dot_dimension_numbers<[1], [0], [0], [1], [0, 0, 1, 1], [], []>} : vector<16x256xbf16>, vector<256x128xbf16>, vector<16x128xf32> -> vector<16x128xf32>
    %c0_19 = arith.constant 0 : index
    %c0_20 = arith.constant 0 : index
    %43 = vector.load %arg7[%c0_19, %c0_20] : memref<1x128xf32, #tpu.memory_space<vmem>>, vector<1x128xf32>
    %44 = vector.broadcast %43 : vector<1x128xf32> to vector<16x128xf32>
    %45 = arith.addf %42, %44 : vector<16x128xf32>
    %cst_21 = arith.constant 5.000000e-01 : f32
    %46 = vector.broadcast %cst_21 : f32 to vector<16x128xf32>
    %47 = arith.mulf %46, %45 : vector<16x128xf32>
    %48 = arith.addf %0, %47 : vector<16x128xf32>
    %c0_22 = arith.constant 0 : index
    %c0_23 = arith.constant 0 : index
    %49 = vector.load %arg12[%c0_22, %c0_23] : memref<16x128xf32, #tpu.memory_space<vmem>>, vector<16x128xf32>
    tpu.vector_store %arg12[%c0_22, %c0_23], %48 {strides = array<i32>} : memref<16x128xf32, #tpu.memory_space<vmem>>, vector<16x128xf32>,
    %c0_24 = arith.constant 0 : index
    %c0_25 = arith.constant 0 : index
    %50 = vector.load %arg8[%c0_24, %c0_25] : memref<1x128xf32, #tpu.memory_space<vmem>>, vector<1x128xf32>
    %c0_26 = arith.constant 0 : index
    %c0_27 = arith.constant 0 : index
    %51 = vector.load %arg9[%c0_26, %c0_27] : memref<1x128xf32, #tpu.memory_space<vmem>>, vector<1x128xf32>
    %cst_28 = arith.constant dense<0.000000e+00> : vector<16xf32>
    %52 = vector.multi_reduction <add>, %48, %cst_28 [1] : vector<16x128xf32> to vector<16xf32>
    %53 = vector.shape_cast %52 : vector<16xf32> to vector<16x1xf32>
    %cst_29 = arith.constant 1.250000e-02 : f32
    %54 = vector.broadcast %cst_29 : f32 to vector<16x1xf32>
    %55 = arith.mulf %53, %54 : vector<16x1xf32>
    %56 = tpu.iota {dimensions = array<i32: 1>} : vector<16x128xi32>
    %c80_i32_30 = arith.constant 80 : i32
    %57 = vector.broadcast %c80_i32_30 : i32 to vector<16x128xi32>
    %58 = arith.cmpi slt, %56, %57 : vector<16x128xi32>
    %59 = vector.broadcast %55 : vector<16x1xf32> to vector<16x128xf32>
    %60 = arith.subf %48, %59 : vector<16x128xf32>
    %cst_31 = arith.constant 0.000000e+00 : f32
    %61 = vector.broadcast %cst_31 : f32 to vector<16x128xf32>
    %62 = arith.select %58, %60, %61 : vector<16x128xi1>, vector<16x128xf32>
    %63 = arith.mulf %62, %62 : vector<16x128xf32>
    %cst_32 = arith.constant dense<0.000000e+00> : vector<16xf32>
    %64 = vector.multi_reduction <add>, %63, %cst_32 [1] : vector<16x128xf32> to vector<16xf32>
    %65 = vector.shape_cast %64 : vector<16xf32> to vector<16x1xf32>
    %cst_33 = arith.constant 1.250000e-02 : f32
    %66 = vector.broadcast %cst_33 : f32 to vector<16x1xf32>
    %67 = arith.mulf %65, %66 : vector<16x1xf32>
    %cst_34 = arith.constant 9.99999974E-6 : f32
    %68 = vector.broadcast %cst_34 : f32 to vector<16x1xf32>
    %69 = arith.addf %67, %68 : vector<16x1xf32>
    %70 = math.rsqrt %69 : vector<16x1xf32>
    %71 = vector.broadcast %70 : vector<16x1xf32> to vector<16x128xf32>
    %72 = arith.mulf %62, %71 : vector<16x128xf32>
    %73 = vector.broadcast %50 : vector<1x128xf32> to vector<16x128xf32>
    %74 = arith.mulf %72, %73 : vector<16x128xf32>
    %75 = vector.broadcast %51 : vector<1x128xf32> to vector<16x128xf32>
    %76 = arith.addf %74, %75 : vector<16x128xf32>
    %77 = arith.truncf %76 : vector<16x128xf32> to vector<16x128xbf16>
    %c0_35 = arith.constant 0 : index
    %c0_36 = arith.constant 0 : index
    %78 = vector.load %arg10[%c0_35, %c0_36] : memref<128x384xbf16, #tpu.memory_space<vmem>>, vector<128x384xbf16>
    %cst_37 = arith.constant dense<0.000000e+00> : vector<16x384xf32>
    %79 = tpu.matmul %77, %78, %cst_37 {dimension_numbers = #tpu.dot_dimension_numbers<[1], [0], [0], [1], [0, 0, 1, 1], [], []>} : vector<16x128xbf16>, vector<128x384xbf16>, vector<16x384xf32> -> vector<16x384xf32>
    %c0_38 = arith.constant 0 : index
    %c0_39 = arith.constant 0 : index
    %80 = vector.load %arg11[%c0_38, %c0_39] : memref<1x384xf32, #tpu.memory_space<vmem>>, vector<1x384xf32>
    %81 = vector.broadcast %80 : vector<1x384xf32> to vector<16x384xf32>
    %82 = arith.addf %79, %81 : vector<16x384xf32>
    %83 = arith.truncf %82 : vector<16x384xf32> to vector<16x384xbf16>
    %c0_40 = arith.constant 0 : index
    %c0_41 = arith.constant 0 : index
    %84 = vector.load %arg13[%c0_40, %c0_41] : memref<16x384xbf16, #tpu.memory_space<vmem>>, vector<16x384xbf16>
    tpu.vector_store %arg13[%c0_40, %c0_41], %83 {strides = array<i32>} : memref<16x384xbf16, #tpu.memory_space<vmem>>, vector<16x384xbf16>,
    return
  }
  func.func @transform_0(%arg0: i32) -> (i32, i32) {
    %c0_i32 = arith.constant 0 : i32
    %c0_i32_0 = arith.constant 0 : i32
    return %arg0, %c0_i32 : i32, i32
  }
  func.func @transform_1(%arg0: i32) -> (i32, i32) {
    %c0_i32 = arith.constant 0 : i32
    %c0_i32_0 = arith.constant 0 : i32
    %c0_i32_1 = arith.constant 0 : i32
    return %c0_i32, %c0_i32_0 : i32, i32
  }
  func.func @transform_2(%arg0: i32) -> (i32, i32) {
    %c0_i32 = arith.constant 0 : i32
    %c0_i32_0 = arith.constant 0 : i32
    %c0_i32_1 = arith.constant 0 : i32
    return %c0_i32, %c0_i32_0 : i32, i32
  }
  func.func @transform_3(%arg0: i32) -> (i32, i32) {
    %c0_i32 = arith.constant 0 : i32
    %c0_i32_0 = arith.constant 0 : i32
    %c0_i32_1 = arith.constant 0 : i32
    return %c0_i32, %c0_i32_0 : i32, i32
  }
  func.func @transform_4(%arg0: i32) -> (i32, i32) {
    %c0_i32 = arith.constant 0 : i32
    %c0_i32_0 = arith.constant 0 : i32
    %c0_i32_1 = arith.constant 0 : i32
    return %c0_i32, %c0_i32_0 : i32, i32
  }
  func.func @transform_5(%arg0: i32) -> (i32, i32) {
    %c0_i32 = arith.constant 0 : i32
    %c0_i32_0 = arith.constant 0 : i32
    %c0_i32_1 = arith.constant 0 : i32
    return %c0_i32, %c0_i32_0 : i32, i32
  }
  func.func @transform_6(%arg0: i32) -> (i32, i32) {
    %c0_i32 = arith.constant 0 : i32
    %c0_i32_0 = arith.constant 0 : i32
    %c0_i32_1 = arith.constant 0 : i32
    return %c0_i32, %c0_i32_0 : i32, i32
  }
  func.func @transform_7(%arg0: i32) -> (i32, i32) {
    %c0_i32 = arith.constant 0 : i32
    %c0_i32_0 = arith.constant 0 : i32
    %c0_i32_1 = arith.constant 0 : i32
    return %c0_i32, %c0_i32_0 : i32, i32
  }
  func.func @transform_8(%arg0: i32) -> (i32, i32) {
    %c0_i32 = arith.constant 0 : i32
    %c0_i32_0 = arith.constant 0 : i32
    %c0_i32_1 = arith.constant 0 : i32
    return %c0_i32, %c0_i32_0 : i32, i32
  }
  func.func @transform_9(%arg0: i32) -> (i32, i32) {
    %c0_i32 = arith.constant 0 : i32
    %c0_i32_0 = arith.constant 0 : i32
    %c0_i32_1 = arith.constant 0 : i32
    return %c0_i32, %c0_i32_0 : i32, i32
  }
  func.func @transform_10(%arg0: i32) -> (i32, i32) {
    %c0_i32 = arith.constant 0 : i32
    %c0_i32_0 = arith.constant 0 : i32
    %c0_i32_1 = arith.constant 0 : i32
    return %c0_i32, %c0_i32_0 : i32, i32
  }
  func.func @transform_11(%arg0: i32) -> (i32, i32) {
    %c0_i32 = arith.constant 0 : i32
    %c0_i32_0 = arith.constant 0 : i32
    return %arg0, %c0_i32 : i32, i32
  }
  func.func @transform_12(%arg0: i32) -> (i32, i32) {
    %c0_i32 = arith.constant 0 : i32
    %c0_i32_0 = arith.constant 0 : i32
    return %arg0, %c0_i32 : i32, i32
  }
}

module attributes {stable_mosaic.version = 11 : i64} {
  func.func @_attention_kernel(%arg0: i32, %arg1: memref<8x2x384xbf16, #tpu.memory_space<vmem>>, %arg2: memref<8x2x128xbf16, #tpu.memory_space<vmem>>) attributes {dimension_semantics = [#tpu.dimension_semantics<parallel>], iteration_bounds = array<i64: 2>, scalar_prefetch = 0 : i64, scratch_operands = 0 : i64, tpu.core_type = #tpu.core_type<tc>, window_params = [{transform_indices = @transform_0, window_bounds = array<i64: 8, 2, 384>}, {transform_indices = @transform_1, window_bounds = array<i64: 8, 2, 128>}]} {
    %c0 = arith.constant 0 : index
    %c0_0 = arith.constant 0 : index
    %c0_1 = arith.constant 0 : index
    %0 = vector.load %arg1[%c0, %c0_0, %c0_1] : memref<8x2x384xbf16, #tpu.memory_space<vmem>>, vector<8x2x384xbf16>
    %1 = vector.extract_strided_slice %0 {offsets = [0, 0, 0], sizes = [8, 2, 128], strides = [1, 1, 1]} : vector<8x2x384xbf16> to vector<8x2x128xbf16>
    %2 = vector.extract_strided_slice %0 {offsets = [0, 0, 128], sizes = [8, 2, 128], strides = [1, 1, 1]} : vector<8x2x384xbf16> to vector<8x2x128xbf16>
    %3 = vector.extract_strided_slice %0 {offsets = [0, 0, 256], sizes = [8, 2, 128], strides = [1, 1, 1]} : vector<8x2x384xbf16> to vector<8x2x128xbf16>
    %4 = tpu.iota {dimensions = array<i32: 2>} : vector<8x2x128xi32>
    %cst = arith.constant 0.000000e+00 : f32
    %5 = vector.broadcast %cst : f32 to vector<8x2x128xf32>
    %c0_i32 = arith.constant 0 : i32
    %6 = vector.broadcast %c0_i32 : i32 to vector<8x2x128xi32>
    %7 = arith.cmpi sge, %4, %6 : vector<8x2x128xi32>
    %c32_i32 = arith.constant 32 : i32
    %8 = vector.broadcast %c32_i32 : i32 to vector<8x2x128xi32>
    %9 = arith.cmpi slt, %4, %8 : vector<8x2x128xi32>
    %10 = arith.andi %7, %9 : vector<8x2x128xi1>
    %cst_2 = arith.constant 0.000000e+00 : bf16
    %11 = vector.broadcast %cst_2 : bf16 to vector<8x2x128xbf16>
    %12 = arith.select %10, %2, %11 : vector<8x2x128xi1>, vector<8x2x128xbf16>
    "tpu.trace_start"() <{level = 10 : i32, message = "bqd,bkd->bqk"}> : () -> ()
    %cst_3 = arith.constant dense<0.000000e+00> : vector<8x2x2xf32>
    %13 = tpu.matmul %1, %12, %cst_3 {dimension_numbers = #tpu.dot_dimension_numbers<[2], [2], [1], [1], [0, 0, 0, 1, 1, 1], [0], [0]>} : vector<8x2x128xbf16>, vector<8x2x128xbf16>, vector<8x2x2xf32> -> vector<8x2x2xf32>
    "tpu.trace_stop"() : () -> ()
    %cst_4 = arith.constant dense<0xFF800000> : vector<8x2xf32>
    %14 = vector.multi_reduction <maximumf>, %13, %cst_4 [2] : vector<8x2x2xf32> to vector<8x2xf32>
    %15 = vector.shape_cast %14 : vector<8x2xf32> to vector<8x2x1xf32>
    %16 = vector.broadcast %15 : vector<8x2x1xf32> to vector<8x2x2xf32>
    %17 = arith.subf %13, %16 : vector<8x2x2xf32>
    %18 = math.exp %17 : vector<8x2x2xf32>
    %cst_5 = arith.constant dense<0.000000e+00> : vector<8x2xf32>
    %19 = vector.multi_reduction <add>, %18, %cst_5 [2] : vector<8x2x2xf32> to vector<8x2xf32>
    %20 = vector.shape_cast %19 : vector<8x2xf32> to vector<8x2x1xf32>
    %21 = vector.broadcast %20 : vector<8x2x1xf32> to vector<8x2x2xf32>
    %22 = arith.divf %18, %21 : vector<8x2x2xf32>
    %cst_6 = arith.constant 0.000000e+00 : bf16
    %23 = vector.broadcast %cst_6 : bf16 to vector<8x2x128xbf16>
    %24 = arith.select %10, %3, %23 : vector<8x2x128xi1>, vector<8x2x128xbf16>
    %25 = arith.truncf %22 : vector<8x2x2xf32> to vector<8x2x2xbf16>
    "tpu.trace_start"() <{level = 10 : i32, message = "bqk,bkd->bqd"}> : () -> ()
    %cst_7 = arith.constant dense<0.000000e+00> : vector<8x2x128xf32>
    %26 = tpu.matmul %25, %24, %cst_7 {dimension_numbers = #tpu.dot_dimension_numbers<[2], [1], [1], [2], [0, 0, 0, 1, 1, 2], [0], [0]>} : vector<8x2x2xbf16>, vector<8x2x128xbf16>, vector<8x2x128xf32> -> vector<8x2x128xf32>
    "tpu.trace_stop"() : () -> ()
    %27 = arith.addf %5, %26 : vector<8x2x128xf32>
    %c32_i32_8 = arith.constant 32 : i32
    %28 = vector.broadcast %c32_i32_8 : i32 to vector<8x2x128xi32>
    %29 = arith.cmpi sge, %4, %28 : vector<8x2x128xi32>
    %c64_i32 = arith.constant 64 : i32
    %30 = vector.broadcast %c64_i32 : i32 to vector<8x2x128xi32>
    %31 = arith.cmpi slt, %4, %30 : vector<8x2x128xi32>
    %32 = arith.andi %29, %31 : vector<8x2x128xi1>
    %cst_9 = arith.constant 0.000000e+00 : bf16
    %33 = vector.broadcast %cst_9 : bf16 to vector<8x2x128xbf16>
    %34 = arith.select %32, %2, %33 : vector<8x2x128xi1>, vector<8x2x128xbf16>
    "tpu.trace_start"() <{level = 10 : i32, message = "bqd,bkd->bqk"}> : () -> ()
    %cst_10 = arith.constant dense<0.000000e+00> : vector<8x2x2xf32>
    %35 = tpu.matmul %1, %34, %cst_10 {dimension_numbers = #tpu.dot_dimension_numbers<[2], [2], [1], [1], [0, 0, 0, 1, 1, 1], [0], [0]>} : vector<8x2x128xbf16>, vector<8x2x128xbf16>, vector<8x2x2xf32> -> vector<8x2x2xf32>
    "tpu.trace_stop"() : () -> ()
    %cst_11 = arith.constant dense<0xFF800000> : vector<8x2xf32>
    %36 = vector.multi_reduction <maximumf>, %35, %cst_11 [2] : vector<8x2x2xf32> to vector<8x2xf32>
    %37 = vector.shape_cast %36 : vector<8x2xf32> to vector<8x2x1xf32>
    %38 = vector.broadcast %37 : vector<8x2x1xf32> to vector<8x2x2xf32>
    %39 = arith.subf %35, %38 : vector<8x2x2xf32>
    %40 = math.exp %39 : vector<8x2x2xf32>
    %cst_12 = arith.constant dense<0.000000e+00> : vector<8x2xf32>
    %41 = vector.multi_reduction <add>, %40, %cst_12 [2] : vector<8x2x2xf32> to vector<8x2xf32>
    %42 = vector.shape_cast %41 : vector<8x2xf32> to vector<8x2x1xf32>
    %43 = vector.broadcast %42 : vector<8x2x1xf32> to vector<8x2x2xf32>
    %44 = arith.divf %40, %43 : vector<8x2x2xf32>
    %cst_13 = arith.constant 0.000000e+00 : bf16
    %45 = vector.broadcast %cst_13 : bf16 to vector<8x2x128xbf16>
    %46 = arith.select %32, %3, %45 : vector<8x2x128xi1>, vector<8x2x128xbf16>
    %47 = arith.truncf %44 : vector<8x2x2xf32> to vector<8x2x2xbf16>
    "tpu.trace_start"() <{level = 10 : i32, message = "bqk,bkd->bqd"}> : () -> ()
    %cst_14 = arith.constant dense<0.000000e+00> : vector<8x2x128xf32>
    %48 = tpu.matmul %47, %46, %cst_14 {dimension_numbers = #tpu.dot_dimension_numbers<[2], [1], [1], [2], [0, 0, 0, 1, 1, 2], [0], [0]>} : vector<8x2x2xbf16>, vector<8x2x128xbf16>, vector<8x2x128xf32> -> vector<8x2x128xf32>
    "tpu.trace_stop"() : () -> ()
    %49 = arith.addf %27, %48 : vector<8x2x128xf32>
    %c64_i32_15 = arith.constant 64 : i32
    %50 = vector.broadcast %c64_i32_15 : i32 to vector<8x2x128xi32>
    %51 = arith.cmpi sge, %4, %50 : vector<8x2x128xi32>
    %c96_i32 = arith.constant 96 : i32
    %52 = vector.broadcast %c96_i32 : i32 to vector<8x2x128xi32>
    %53 = arith.cmpi slt, %4, %52 : vector<8x2x128xi32>
    %54 = arith.andi %51, %53 : vector<8x2x128xi1>
    %cst_16 = arith.constant 0.000000e+00 : bf16
    %55 = vector.broadcast %cst_16 : bf16 to vector<8x2x128xbf16>
    %56 = arith.select %54, %2, %55 : vector<8x2x128xi1>, vector<8x2x128xbf16>
    "tpu.trace_start"() <{level = 10 : i32, message = "bqd,bkd->bqk"}> : () -> ()
    %cst_17 = arith.constant dense<0.000000e+00> : vector<8x2x2xf32>
    %57 = tpu.matmul %1, %56, %cst_17 {dimension_numbers = #tpu.dot_dimension_numbers<[2], [2], [1], [1], [0, 0, 0, 1, 1, 1], [0], [0]>} : vector<8x2x128xbf16>, vector<8x2x128xbf16>, vector<8x2x2xf32> -> vector<8x2x2xf32>
    "tpu.trace_stop"() : () -> ()
    %cst_18 = arith.constant dense<0xFF800000> : vector<8x2xf32>
    %58 = vector.multi_reduction <maximumf>, %57, %cst_18 [2] : vector<8x2x2xf32> to vector<8x2xf32>
    %59 = vector.shape_cast %58 : vector<8x2xf32> to vector<8x2x1xf32>
    %60 = vector.broadcast %59 : vector<8x2x1xf32> to vector<8x2x2xf32>
    %61 = arith.subf %57, %60 : vector<8x2x2xf32>
    %62 = math.exp %61 : vector<8x2x2xf32>
    %cst_19 = arith.constant dense<0.000000e+00> : vector<8x2xf32>
    %63 = vector.multi_reduction <add>, %62, %cst_19 [2] : vector<8x2x2xf32> to vector<8x2xf32>
    %64 = vector.shape_cast %63 : vector<8x2xf32> to vector<8x2x1xf32>
    %65 = vector.broadcast %64 : vector<8x2x1xf32> to vector<8x2x2xf32>
    %66 = arith.divf %62, %65 : vector<8x2x2xf32>
    %cst_20 = arith.constant 0.000000e+00 : bf16
    %67 = vector.broadcast %cst_20 : bf16 to vector<8x2x128xbf16>
    %68 = arith.select %54, %3, %67 : vector<8x2x128xi1>, vector<8x2x128xbf16>
    %69 = arith.truncf %66 : vector<8x2x2xf32> to vector<8x2x2xbf16>
    "tpu.trace_start"() <{level = 10 : i32, message = "bqk,bkd->bqd"}> : () -> ()
    %cst_21 = arith.constant dense<0.000000e+00> : vector<8x2x128xf32>
    %70 = tpu.matmul %69, %68, %cst_21 {dimension_numbers = #tpu.dot_dimension_numbers<[2], [1], [1], [2], [0, 0, 0, 1, 1, 2], [0], [0]>} : vector<8x2x2xbf16>, vector<8x2x128xbf16>, vector<8x2x128xf32> -> vector<8x2x128xf32>
    "tpu.trace_stop"() : () -> ()
    %71 = arith.addf %49, %70 : vector<8x2x128xf32>
    %c96_i32_22 = arith.constant 96 : i32
    %72 = vector.broadcast %c96_i32_22 : i32 to vector<8x2x128xi32>
    %73 = arith.cmpi sge, %4, %72 : vector<8x2x128xi32>
    %c128_i32 = arith.constant 128 : i32
    %74 = vector.broadcast %c128_i32 : i32 to vector<8x2x128xi32>
    %75 = arith.cmpi slt, %4, %74 : vector<8x2x128xi32>
    %76 = arith.andi %73, %75 : vector<8x2x128xi1>
    %cst_23 = arith.constant 0.000000e+00 : bf16
    %77 = vector.broadcast %cst_23 : bf16 to vector<8x2x128xbf16>
    %78 = arith.select %76, %2, %77 : vector<8x2x128xi1>, vector<8x2x128xbf16>
    "tpu.trace_start"() <{level = 10 : i32, message = "bqd,bkd->bqk"}> : () -> ()
    %cst_24 = arith.constant dense<0.000000e+00> : vector<8x2x2xf32>
    %79 = tpu.matmul %1, %78, %cst_24 {dimension_numbers = #tpu.dot_dimension_numbers<[2], [2], [1], [1], [0, 0, 0, 1, 1, 1], [0], [0]>} : vector<8x2x128xbf16>, vector<8x2x128xbf16>, vector<8x2x2xf32> -> vector<8x2x2xf32>
    "tpu.trace_stop"() : () -> ()
    %cst_25 = arith.constant dense<0xFF800000> : vector<8x2xf32>
    %80 = vector.multi_reduction <maximumf>, %79, %cst_25 [2] : vector<8x2x2xf32> to vector<8x2xf32>
    %81 = vector.shape_cast %80 : vector<8x2xf32> to vector<8x2x1xf32>
    %82 = vector.broadcast %81 : vector<8x2x1xf32> to vector<8x2x2xf32>
    %83 = arith.subf %79, %82 : vector<8x2x2xf32>
    %84 = math.exp %83 : vector<8x2x2xf32>
    %cst_26 = arith.constant dense<0.000000e+00> : vector<8x2xf32>
    %85 = vector.multi_reduction <add>, %84, %cst_26 [2] : vector<8x2x2xf32> to vector<8x2xf32>
    %86 = vector.shape_cast %85 : vector<8x2xf32> to vector<8x2x1xf32>
    %87 = vector.broadcast %86 : vector<8x2x1xf32> to vector<8x2x2xf32>
    %88 = arith.divf %84, %87 : vector<8x2x2xf32>
    %cst_27 = arith.constant 0.000000e+00 : bf16
    %89 = vector.broadcast %cst_27 : bf16 to vector<8x2x128xbf16>
    %90 = arith.select %76, %3, %89 : vector<8x2x128xi1>, vector<8x2x128xbf16>
    %91 = arith.truncf %88 : vector<8x2x2xf32> to vector<8x2x2xbf16>
    "tpu.trace_start"() <{level = 10 : i32, message = "bqk,bkd->bqd"}> : () -> ()
    %cst_28 = arith.constant dense<0.000000e+00> : vector<8x2x128xf32>
    %92 = tpu.matmul %91, %90, %cst_28 {dimension_numbers = #tpu.dot_dimension_numbers<[2], [1], [1], [2], [0, 0, 0, 1, 1, 2], [0], [0]>} : vector<8x2x2xbf16>, vector<8x2x128xbf16>, vector<8x2x128xf32> -> vector<8x2x128xf32>
    "tpu.trace_stop"() : () -> ()
    %93 = arith.addf %71, %92 : vector<8x2x128xf32>
    %94 = arith.truncf %93 : vector<8x2x128xf32> to vector<8x2x128xbf16>
    %c0_29 = arith.constant 0 : index
    %c0_30 = arith.constant 0 : index
    %c0_31 = arith.constant 0 : index
    %95 = vector.load %arg2[%c0_29, %c0_30, %c0_31] : memref<8x2x128xbf16, #tpu.memory_space<vmem>>, vector<8x2x128xbf16>
    tpu.vector_store %arg2[%c0_29, %c0_30, %c0_31], %94 {strides = array<i32>} : memref<8x2x128xbf16, #tpu.memory_space<vmem>>, vector<8x2x128xbf16>,
    return
  }
  func.func @transform_0(%arg0: i32) -> (i32, i32, i32) {
    %c0_i32 = arith.constant 0 : i32
    %c0_i32_0 = arith.constant 0 : i32
    %c0_i32_1 = arith.constant 0 : i32
    return %arg0, %c0_i32, %c0_i32_0 : i32, i32, i32
  }
  func.func @transform_1(%arg0: i32) -> (i32, i32, i32) {
    %c0_i32 = arith.constant 0 : i32
    %c0_i32_0 = arith.constant 0 : i32
    %c0_i32_1 = arith.constant 0 : i32
    return %arg0, %c0_i32, %c0_i32_0 : i32, i32, i32
  }
}

module attributes {stable_mosaic.version = 11 : i64} {
  func.func @_conv_ffn2_kernel(%arg0: i32, %arg1: memref<16x128xf32, #tpu.memory_space<vmem>>, %arg2: memref<16x128xbf16, #tpu.memory_space<vmem>>, %arg3: memref<16x1xi32, #tpu.memory_space<vmem>>, %arg4: memref<128x128xbf16, #tpu.memory_space<vmem>>, %arg5: memref<1x128xf32, #tpu.memory_space<vmem>>, %arg6: memref<1x128xf32, #tpu.memory_space<vmem>>, %arg7: memref<1x128xf32, #tpu.memory_space<vmem>>, %arg8: memref<128x256xbf16, #tpu.memory_space<vmem>>, %arg9: memref<1x256xf32, #tpu.memory_space<vmem>>, %arg10: memref<31x128xf32, #tpu.memory_space<vmem>>, %arg11: memref<1x128xf32, #tpu.memory_space<vmem>>, %arg12: memref<128x128xbf16, #tpu.memory_space<vmem>>, %arg13: memref<1x128xf32, #tpu.memory_space<vmem>>, %arg14: memref<1x128xf32, #tpu.memory_space<vmem>>, %arg15: memref<1x128xf32, #tpu.memory_space<vmem>>, %arg16: memref<128x256xbf16, #tpu.memory_space<vmem>>, %arg17: memref<1x256xf32, #tpu.memory_space<vmem>>, %arg18: memref<256x128xbf16, #tpu.memory_space<vmem>>, %arg19: memref<1x128xf32, #tpu.memory_space<vmem>>, %arg20: memref<1x128xf32, #tpu.memory_space<vmem>>, %arg21: memref<1x128xf32, #tpu.memory_space<vmem>>, %arg22: memref<16x128xf32, #tpu.memory_space<vmem>>, %arg23: memref<48x128xf32, #tpu.memory_space<vmem>>) attributes {dimension_semantics = [#tpu.dimension_semantics<parallel>], iteration_bounds = array<i64: 2>, scalar_prefetch = 0 : i64, scratch_operands = 1 : i64, tpu.core_type = #tpu.core_type<tc>, window_params = [{transform_indices = @transform_0, window_bounds = array<i64: 16, 128>}, {transform_indices = @transform_1, window_bounds = array<i64: 16, 128>}, {transform_indices = @transform_2, window_bounds = array<i64: 16, 1>}, {pipeline_mode = #tpu.pipeline_mode<synchronous>, transform_indices = @transform_3, window_bounds = array<i64: 128, 128>}, {pipeline_mode = #tpu.pipeline_mode<synchronous>, transform_indices = @transform_4, window_bounds = array<i64: 1, 128>}, {pipeline_mode = #tpu.pipeline_mode<synchronous>, transform_indices = @transform_5, window_bounds = array<i64: 1, 128>}, {pipeline_mode = #tpu.pipeline_mode<synchronous>, transform_indices = @transform_6, window_bounds = array<i64: 1, 128>}, {pipeline_mode = #tpu.pipeline_mode<synchronous>, transform_indices = @transform_7, window_bounds = array<i64: 128, 256>}, {pipeline_mode = #tpu.pipeline_mode<synchronous>, transform_indices = @transform_8, window_bounds = array<i64: 1, 256>}, {pipeline_mode = #tpu.pipeline_mode<synchronous>, transform_indices = @transform_9, window_bounds = array<i64: 31, 128>}, {pipeline_mode = #tpu.pipeline_mode<synchronous>, transform_indices = @transform_10, window_bounds = array<i64: 1, 128>}, {pipeline_mode = #tpu.pipeline_mode<synchronous>, transform_indices = @transform_11, window_bounds = array<i64: 128, 128>}, {pipeline_mode = #tpu.pipeline_mode<synchronous>, transform_indices = @transform_12, window_bounds = array<i64: 1, 128>}, {pipeline_mode = #tpu.pipeline_mode<synchronous>, transform_indices = @transform_13, window_bounds = array<i64: 1, 128>}, {pipeline_mode = #tpu.pipeline_mode<synchronous>, transform_indices = @transform_14, window_bounds = array<i64: 1, 128>}, {pipeline_mode = #tpu.pipeline_mode<synchronous>, transform_indices = @transform_15, window_bounds = array<i64: 128, 256>}, {pipeline_mode = #tpu.pipeline_mode<synchronous>, transform_indices = @transform_16, window_bounds = array<i64: 1, 256>}, {pipeline_mode = #tpu.pipeline_mode<synchronous>, transform_indices = @transform_17, window_bounds = array<i64: 256, 128>}, {pipeline_mode = #tpu.pipeline_mode<synchronous>, transform_indices = @transform_18, window_bounds = array<i64: 1, 128>}, {pipeline_mode = #tpu.pipeline_mode<synchronous>, transform_indices = @transform_19, window_bounds = array<i64: 1, 128>}, {pipeline_mode = #tpu.pipeline_mode<synchronous>, transform_indices = @transform_20, window_bounds = array<i64: 1, 128>}, {transform_indices = @transform_21, window_bounds = array<i64: 16, 128>}]} {
    %c0 = arith.constant 0 : index
    %c0_0 = arith.constant 0 : index
    %0 = vector.load %arg1[%c0, %c0_0] : memref<16x128xf32, #tpu.memory_space<vmem>>, vector<16x128xf32>
    %c0_1 = arith.constant 0 : index
    %c0_2 = arith.constant 0 : index
    %1 = vector.load %arg2[%c0_1, %c0_2] : memref<16x128xbf16, #tpu.memory_space<vmem>>, vector<16x128xbf16>
    %c0_3 = arith.constant 0 : index
    %c0_4 = arith.constant 0 : index
    %2 = vector.load %arg4[%c0_3, %c0_4] : memref<128x128xbf16, #tpu.memory_space<vmem>>, vector<128x128xbf16>
    %cst = arith.constant dense<0.000000e+00> : vector<16x128xf32>
    %3 = tpu.matmul %1, %2, %cst {dimension_numbers = #tpu.dot_dimension_numbers<[1], [0], [0], [1], [0, 0, 1, 1], [], []>} : vector<16x128xbf16>, vector<128x128xbf16>, vector<16x128xf32> -> vector<16x128xf32>
    %4 = arith.addf %0, %3 : vector<16x128xf32>
    %c0_5 = arith.constant 0 : index
    %c0_6 = arith.constant 0 : index
    %5 = vector.load %arg5[%c0_5, %c0_6] : memref<1x128xf32, #tpu.memory_space<vmem>>, vector<1x128xf32>
    %6 = vector.broadcast %5 : vector<1x128xf32> to vector<16x128xf32>
    %7 = arith.addf %4, %6 : vector<16x128xf32>
    %c0_7 = arith.constant 0 : index
    %c0_8 = arith.constant 0 : index
    %8 = vector.load %arg6[%c0_7, %c0_8] : memref<1x128xf32, #tpu.memory_space<vmem>>, vector<1x128xf32>
    %c0_9 = arith.constant 0 : index
    %c0_10 = arith.constant 0 : index
    %9 = vector.load %arg7[%c0_9, %c0_10] : memref<1x128xf32, #tpu.memory_space<vmem>>, vector<1x128xf32>
    %cst_11 = arith.constant dense<0.000000e+00> : vector<16xf32>
    %10 = vector.multi_reduction <add>, %7, %cst_11 [1] : vector<16x128xf32> to vector<16xf32>
    %11 = vector.shape_cast %10 : vector<16xf32> to vector<16x1xf32>
    %cst_12 = arith.constant 1.250000e-02 : f32
    %12 = vector.broadcast %cst_12 : f32 to vector<16x1xf32>
    %13 = arith.mulf %11, %12 : vector<16x1xf32>
    %14 = tpu.iota {dimensions = array<i32: 1>} : vector<16x128xi32>
    %c80_i32 = arith.constant 80 : i32
    %15 = vector.broadcast %c80_i32 : i32 to vector<16x128xi32>
    %16 = arith.cmpi slt, %14, %15 : vector<16x128xi32>
    %17 = vector.broadcast %13 : vector<16x1xf32> to vector<16x128xf32>
    %18 = arith.subf %7, %17 : vector<16x128xf32>
    %cst_13 = arith.constant 0.000000e+00 : f32
    %19 = vector.broadcast %cst_13 : f32 to vector<16x128xf32>
    %20 = arith.select %16, %18, %19 : vector<16x128xi1>, vector<16x128xf32>
    %21 = arith.mulf %20, %20 : vector<16x128xf32>
    %cst_14 = arith.constant dense<0.000000e+00> : vector<16xf32>
    %22 = vector.multi_reduction <add>, %21, %cst_14 [1] : vector<16x128xf32> to vector<16xf32>
    %23 = vector.shape_cast %22 : vector<16xf32> to vector<16x1xf32>
    %cst_15 = arith.constant 1.250000e-02 : f32
    %24 = vector.broadcast %cst_15 : f32 to vector<16x1xf32>
    %25 = arith.mulf %23, %24 : vector<16x1xf32>
    %cst_16 = arith.constant 9.99999974E-6 : f32
    %26 = vector.broadcast %cst_16 : f32 to vector<16x1xf32>
    %27 = arith.addf %25, %26 : vector<16x1xf32>
    %28 = math.rsqrt %27 : vector<16x1xf32>
    %29 = vector.broadcast %28 : vector<16x1xf32> to vector<16x128xf32>
    %30 = arith.mulf %20, %29 : vector<16x128xf32>
    %31 = vector.broadcast %8 : vector<1x128xf32> to vector<16x128xf32>
    %32 = arith.mulf %30, %31 : vector<16x128xf32>
    %33 = vector.broadcast %9 : vector<1x128xf32> to vector<16x128xf32>
    %34 = arith.addf %32, %33 : vector<16x128xf32>
    %35 = arith.truncf %34 : vector<16x128xf32> to vector<16x128xbf16>
    %c0_17 = arith.constant 0 : index
    %c0_18 = arith.constant 0 : index
    %36 = vector.load %arg8[%c0_17, %c0_18] : memref<128x256xbf16, #tpu.memory_space<vmem>>, vector<128x256xbf16>
    %cst_19 = arith.constant dense<0.000000e+00> : vector<16x256xf32>
    %37 = tpu.matmul %35, %36, %cst_19 {dimension_numbers = #tpu.dot_dimension_numbers<[1], [0], [0], [1], [0, 0, 1, 1], [], []>} : vector<16x128xbf16>, vector<128x256xbf16>, vector<16x256xf32> -> vector<16x256xf32>
    %c0_20 = arith.constant 0 : index
    %c0_21 = arith.constant 0 : index
    %38 = vector.load %arg9[%c0_20, %c0_21] : memref<1x256xf32, #tpu.memory_space<vmem>>, vector<1x256xf32>
    %39 = vector.broadcast %38 : vector<1x256xf32> to vector<16x256xf32>
    %40 = arith.addf %37, %39 : vector<16x256xf32>
    %41 = vector.extract_strided_slice %40 {offsets = [0, 0], sizes = [16, 128], strides = [1, 1]} : vector<16x256xf32> to vector<16x128xf32>
    %42 = vector.extract_strided_slice %40 {offsets = [0, 128], sizes = [16, 128], strides = [1, 1]} : vector<16x256xf32> to vector<16x128xf32>
    %43 = arith.negf %42 : vector<16x128xf32>
    %44 = math.exp %43 : vector<16x128xf32>
    %cst_22 = arith.constant 1.000000e+00 : f32
    %45 = vector.broadcast %cst_22 : f32 to vector<16x128xf32>
    %46 = arith.addf %45, %44 : vector<16x128xf32>
    %47 = arith.divf %45, %46 : vector<16x128xf32>
    %48 = arith.mulf %41, %47 : vector<16x128xf32>
    %cst_23 = arith.constant 0.000000e+00 : f32
    %49 = vector.broadcast %cst_23 : f32 to vector<16x128xf32>
    %c0_24 = arith.constant 0 : index
    %c0_25 = arith.constant 0 : index
    %50 = vector.load %arg23[%c0_24, %c0_25] : memref<48x128xf32, #tpu.memory_space<vmem>>, vector<16x128xf32>
    tpu.vector_store %arg23[%c0_24, %c0_25], %49 {strides = array<i32>} : memref<48x128xf32, #tpu.memory_space<vmem>>, vector<16x128xf32>,
    %cst_26 = arith.constant 0.000000e+00 : f32
    %51 = vector.broadcast %cst_26 : f32 to vector<16x128xf32>
    %c32 = arith.constant 32 : index
    %c0_27 = arith.constant 0 : index
    %52 = vector.load %arg23[%c32, %c0_27] : memref<48x128xf32, #tpu.memory_space<vmem>>, vector<16x128xf32>
    tpu.vector_store %arg23[%c32, %c0_27], %51 {strides = array<i32>} : memref<48x128xf32, #tpu.memory_space<vmem>>, vector<16x128xf32>,
    %c16 = arith.constant 16 : index
    %c0_28 = arith.constant 0 : index
    %53 = vector.load %arg23[%c16, %c0_28] : memref<48x128xf32, #tpu.memory_space<vmem>>, vector<16x128xf32>
    tpu.vector_store %arg23[%c16, %c0_28], %48 {strides = array<i32>} : memref<48x128xf32, #tpu.memory_space<vmem>>, vector<16x128xf32>,
    %c0_29 = arith.constant 0 : index
    %c0_30 = arith.constant 0 : index
    %54 = vector.load %arg3[%c0_29, %c0_30] : memref<16x1xi32, #tpu.memory_space<vmem>>, vector<16x1xi32>
    %c0_31 = arith.constant 0 : index
    %c0_32 = arith.constant 0 : index
    %55 = vector.load %arg10[%c0_31, %c0_32] : memref<31x128xf32, #tpu.memory_space<vmem>>, vector<31x128xf32>
    %cst_33 = arith.constant 0.000000e+00 : f32
    %56 = vector.broadcast %cst_33 : f32 to vector<16x128xf32>
    %c15 = arith.constant 15 : index
    %c0_34 = arith.constant 0 : index
    %57 = vector.load %arg23[%c15, %c0_34] : memref<48x128xf32, #tpu.memory_space<vmem>>, vector<16x128xf32>
    %c-1_i32 = arith.constant -1 : i32
    %58 = vector.broadcast %c-1_i32 : i32 to vector<16x1xi32>
    %59 = arith.addi %54, %58 : vector<16x1xi32>
    %c0_i32 = arith.constant 0 : i32
    %60 = vector.broadcast %c0_i32 : i32 to vector<16x1xi32>
    %61 = arith.cmpi sge, %59, %60 : vector<16x1xi32>
    %c-1_i32_35 = arith.constant -1 : i32
    %62 = vector.broadcast %c-1_i32_35 : i32 to vector<16x1xi32>
    %63 = arith.addi %54, %62 : vector<16x1xi32>
    %c2_i32 = arith.constant 2 : i32
    %64 = vector.broadcast %c2_i32 : i32 to vector<16x1xi32>
    %65 = arith.cmpi slt, %63, %64 : vector<16x1xi32>
    %66 = arith.andi %61, %65 : vector<16x1xi1>
    %cst_36 = arith.constant 0.000000e+00 : f32
    %67 = vector.shape_cast %66 : vector<16x1xi1> to vector<16x1xi1>
    %68 = vector.broadcast %67 : vector<16x1xi1> to vector<16x128xi1>
    %69 = vector.broadcast %cst_36 : f32 to vector<16x128xf32>
    %70 = arith.select %68, %57, %69 : vector<16x128xi1>, vector<16x128xf32>
    %71 = vector.extract_strided_slice %55 {offsets = [14, 0], sizes = [1, 128], strides = [1, 1]} : vector<31x128xf32> to vector<1x128xf32>
    %72 = vector.shape_cast %71 : vector<1x128xf32> to vector<128xf32>
    %73 = vector.shape_cast %72 : vector<128xf32> to vector<1x128xf32>
    %74 = vector.broadcast %73 : vector<1x128xf32> to vector<16x128xf32>
    %75 = arith.mulf %70, %74 : vector<16x128xf32>
    %76 = arith.addf %56, %75 : vector<16x128xf32>
    %c16_37 = arith.constant 16 : index
    %c0_38 = arith.constant 0 : index
    %77 = vector.load %arg23[%c16_37, %c0_38] : memref<48x128xf32, #tpu.memory_space<vmem>>, vector<16x128xf32>
    %c0_i32_39 = arith.constant 0 : i32
    %78 = vector.broadcast %c0_i32_39 : i32 to vector<16x1xi32>
    %79 = arith.addi %54, %78 : vector<16x1xi32>
    %c0_i32_40 = arith.constant 0 : i32
    %80 = vector.broadcast %c0_i32_40 : i32 to vector<16x1xi32>
    %81 = arith.cmpi sge, %79, %80 : vector<16x1xi32>
    %c0_i32_41 = arith.constant 0 : i32
    %82 = vector.broadcast %c0_i32_41 : i32 to vector<16x1xi32>
    %83 = arith.addi %54, %82 : vector<16x1xi32>
    %c2_i32_42 = arith.constant 2 : i32
    %84 = vector.broadcast %c2_i32_42 : i32 to vector<16x1xi32>
    %85 = arith.cmpi slt, %83, %84 : vector<16x1xi32>
    %86 = arith.andi %81, %85 : vector<16x1xi1>
    %cst_43 = arith.constant 0.000000e+00 : f32
    %87 = vector.shape_cast %86 : vector<16x1xi1> to vector<16x1xi1>
    %88 = vector.broadcast %87 : vector<16x1xi1> to vector<16x128xi1>
    %89 = vector.broadcast %cst_43 : f32 to vector<16x128xf32>
    %90 = arith.select %88, %77, %89 : vector<16x128xi1>, vector<16x128xf32>
    %91 = vector.extract_strided_slice %55 {offsets = [15, 0], sizes = [1, 128], strides = [1, 1]} : vector<31x128xf32> to vector<1x128xf32>
    %92 = vector.shape_cast %91 : vector<1x128xf32> to vector<128xf32>
    %93 = vector.shape_cast %92 : vector<128xf32> to vector<1x128xf32>
    %94 = vector.broadcast %93 : vector<1x128xf32> to vector<16x128xf32>
    %95 = arith.mulf %90, %94 : vector<16x128xf32>
    %96 = arith.addf %76, %95 : vector<16x128xf32>
    %c17 = arith.constant 17 : index
    %c0_44 = arith.constant 0 : index
    %97 = vector.load %arg23[%c17, %c0_44] : memref<48x128xf32, #tpu.memory_space<vmem>>, vector<16x128xf32>
    %c1_i32 = arith.constant 1 : i32
    %98 = vector.broadcast %c1_i32 : i32 to vector<16x1xi32>
    %99 = arith.addi %54, %98 : vector<16x1xi32>
    %c0_i32_45 = arith.constant 0 : i32
    %100 = vector.broadcast %c0_i32_45 : i32 to vector<16x1xi32>
    %101 = arith.cmpi sge, %99, %100 : vector<16x1xi32>
    %c1_i32_46 = arith.constant 1 : i32
    %102 = vector.broadcast %c1_i32_46 : i32 to vector<16x1xi32>
    %103 = arith.addi %54, %102 : vector<16x1xi32>
    %c2_i32_47 = arith.constant 2 : i32
    %104 = vector.broadcast %c2_i32_47 : i32 to vector<16x1xi32>
    %105 = arith.cmpi slt, %103, %104 : vector<16x1xi32>
    %106 = arith.andi %101, %105 : vector<16x1xi1>
    %cst_48 = arith.constant 0.000000e+00 : f32
    %107 = vector.shape_cast %106 : vector<16x1xi1> to vector<16x1xi1>
    %108 = vector.broadcast %107 : vector<16x1xi1> to vector<16x128xi1>
    %109 = vector.broadcast %cst_48 : f32 to vector<16x128xf32>
    %110 = arith.select %108, %97, %109 : vector<16x128xi1>, vector<16x128xf32>
    %111 = vector.extract_strided_slice %55 {offsets = [16, 0], sizes = [1, 128], strides = [1, 1]} : vector<31x128xf32> to vector<1x128xf32>
    %112 = vector.shape_cast %111 : vector<1x128xf32> to vector<128xf32>
    %113 = vector.shape_cast %112 : vector<128xf32> to vector<1x128xf32>
    %114 = vector.broadcast %113 : vector<1x128xf32> to vector<16x128xf32>
    %115 = arith.mulf %110, %114 : vector<16x128xf32>
    %116 = arith.addf %96, %115 : vector<16x128xf32>
    %c0_49 = arith.constant 0 : index
    %c0_50 = arith.constant 0 : index
    %117 = vector.load %arg11[%c0_49, %c0_50] : memref<1x128xf32, #tpu.memory_space<vmem>>, vector<1x128xf32>
    %118 = vector.broadcast %117 : vector<1x128xf32> to vector<16x128xf32>
    %119 = arith.addf %116, %118 : vector<16x128xf32>
    %cst_51 = arith.constant 0.999994993 : f32
    %120 = vector.broadcast %cst_51 : f32 to vector<16x128xf32>
    %121 = arith.mulf %119, %120 : vector<16x128xf32>
    %122 = arith.negf %121 : vector<16x128xf32>
    %123 = math.exp %122 : vector<16x128xf32>
    %cst_52 = arith.constant 1.000000e+00 : f32
    %124 = vector.broadcast %cst_52 : f32 to vector<16x128xf32>
    %125 = arith.addf %124, %123 : vector<16x128xf32>
    %126 = arith.divf %124, %125 : vector<16x128xf32>
    %127 = arith.mulf %121, %126 : vector<16x128xf32>
    %128 = arith.truncf %127 : vector<16x128xf32> to vector<16x128xbf16>
    %c0_53 = arith.constant 0 : index
    %c0_54 = arith.constant 0 : index
    %129 = vector.load %arg12[%c0_53, %c0_54] : memref<128x128xbf16, #tpu.memory_space<vmem>>, vector<128x128xbf16>
    %cst_55 = arith.constant dense<0.000000e+00> : vector<16x128xf32>
    %130 = tpu.matmul %128, %129, %cst_55 {dimension_numbers = #tpu.dot_dimension_numbers<[1], [0], [0], [1], [0, 0, 1, 1], [], []>} : vector<16x128xbf16>, vector<128x128xbf16>, vector<16x128xf32> -> vector<16x128xf32>
    %131 = arith.addf %7, %130 : vector<16x128xf32>
    %c0_56 = arith.constant 0 : index
    %c0_57 = arith.constant 0 : index
    %132 = vector.load %arg13[%c0_56, %c0_57] : memref<1x128xf32, #tpu.memory_space<vmem>>, vector<1x128xf32>
    %133 = vector.broadcast %132 : vector<1x128xf32> to vector<16x128xf32>
    %134 = arith.addf %131, %133 : vector<16x128xf32>
    %c0_58 = arith.constant 0 : index
    %c0_59 = arith.constant 0 : index
    %135 = vector.load %arg14[%c0_58, %c0_59] : memref<1x128xf32, #tpu.memory_space<vmem>>, vector<1x128xf32>
    %c0_60 = arith.constant 0 : index
    %c0_61 = arith.constant 0 : index
    %136 = vector.load %arg15[%c0_60, %c0_61] : memref<1x128xf32, #tpu.memory_space<vmem>>, vector<1x128xf32>
    %cst_62 = arith.constant dense<0.000000e+00> : vector<16xf32>
    %137 = vector.multi_reduction <add>, %134, %cst_62 [1] : vector<16x128xf32> to vector<16xf32>
    %138 = vector.shape_cast %137 : vector<16xf32> to vector<16x1xf32>
    %cst_63 = arith.constant 1.250000e-02 : f32
    %139 = vector.broadcast %cst_63 : f32 to vector<16x1xf32>
    %140 = arith.mulf %138, %139 : vector<16x1xf32>
    %141 = tpu.iota {dimensions = array<i32: 1>} : vector<16x128xi32>
    %c80_i32_64 = arith.constant 80 : i32
    %142 = vector.broadcast %c80_i32_64 : i32 to vector<16x128xi32>
    %143 = arith.cmpi slt, %141, %142 : vector<16x128xi32>
    %144 = vector.broadcast %140 : vector<16x1xf32> to vector<16x128xf32>
    %145 = arith.subf %134, %144 : vector<16x128xf32>
    %cst_65 = arith.constant 0.000000e+00 : f32
    %146 = vector.broadcast %cst_65 : f32 to vector<16x128xf32>
    %147 = arith.select %143, %145, %146 : vector<16x128xi1>, vector<16x128xf32>
    %148 = arith.mulf %147, %147 : vector<16x128xf32>
    %cst_66 = arith.constant dense<0.000000e+00> : vector<16xf32>
    %149 = vector.multi_reduction <add>, %148, %cst_66 [1] : vector<16x128xf32> to vector<16xf32>
    %150 = vector.shape_cast %149 : vector<16xf32> to vector<16x1xf32>
    %cst_67 = arith.constant 1.250000e-02 : f32
    %151 = vector.broadcast %cst_67 : f32 to vector<16x1xf32>
    %152 = arith.mulf %150, %151 : vector<16x1xf32>
    %cst_68 = arith.constant 9.99999974E-6 : f32
    %153 = vector.broadcast %cst_68 : f32 to vector<16x1xf32>
    %154 = arith.addf %152, %153 : vector<16x1xf32>
    %155 = math.rsqrt %154 : vector<16x1xf32>
    %156 = vector.broadcast %155 : vector<16x1xf32> to vector<16x128xf32>
    %157 = arith.mulf %147, %156 : vector<16x128xf32>
    %158 = vector.broadcast %135 : vector<1x128xf32> to vector<16x128xf32>
    %159 = arith.mulf %157, %158 : vector<16x128xf32>
    %160 = vector.broadcast %136 : vector<1x128xf32> to vector<16x128xf32>
    %161 = arith.addf %159, %160 : vector<16x128xf32>
    %162 = arith.truncf %161 : vector<16x128xf32> to vector<16x128xbf16>
    %c0_69 = arith.constant 0 : index
    %c0_70 = arith.constant 0 : index
    %163 = vector.load %arg16[%c0_69, %c0_70] : memref<128x256xbf16, #tpu.memory_space<vmem>>, vector<128x256xbf16>
    %cst_71 = arith.constant dense<0.000000e+00> : vector<16x256xf32>
    %164 = tpu.matmul %162, %163, %cst_71 {dimension_numbers = #tpu.dot_dimension_numbers<[1], [0], [0], [1], [0, 0, 1, 1], [], []>} : vector<16x128xbf16>, vector<128x256xbf16>, vector<16x256xf32> -> vector<16x256xf32>
    %c0_72 = arith.constant 0 : index
    %c0_73 = arith.constant 0 : index
    %165 = vector.load %arg17[%c0_72, %c0_73] : memref<1x256xf32, #tpu.memory_space<vmem>>, vector<1x256xf32>
    %166 = vector.broadcast %165 : vector<1x256xf32> to vector<16x256xf32>
    %167 = arith.addf %164, %166 : vector<16x256xf32>
    %168 = arith.negf %167 : vector<16x256xf32>
    %169 = math.exp %168 : vector<16x256xf32>
    %cst_74 = arith.constant 1.000000e+00 : f32
    %170 = vector.broadcast %cst_74 : f32 to vector<16x256xf32>
    %171 = arith.addf %170, %169 : vector<16x256xf32>
    %172 = arith.divf %170, %171 : vector<16x256xf32>
    %173 = arith.mulf %167, %172 : vector<16x256xf32>
    %174 = arith.truncf %173 : vector<16x256xf32> to vector<16x256xbf16>
    %c0_75 = arith.constant 0 : index
    %c0_76 = arith.constant 0 : index
    %175 = vector.load %arg18[%c0_75, %c0_76] : memref<256x128xbf16, #tpu.memory_space<vmem>>, vector<256x128xbf16>
    %cst_77 = arith.constant dense<0.000000e+00> : vector<16x128xf32>
    %176 = tpu.matmul %174, %175, %cst_77 {dimension_numbers = #tpu.dot_dimension_numbers<[1], [0], [0], [1], [0, 0, 1, 1], [], []>} : vector<16x256xbf16>, vector<256x128xbf16>, vector<16x128xf32> -> vector<16x128xf32>
    %c0_78 = arith.constant 0 : index
    %c0_79 = arith.constant 0 : index
    %177 = vector.load %arg19[%c0_78, %c0_79] : memref<1x128xf32, #tpu.memory_space<vmem>>, vector<1x128xf32>
    %178 = vector.broadcast %177 : vector<1x128xf32> to vector<16x128xf32>
    %179 = arith.addf %176, %178 : vector<16x128xf32>
    %cst_80 = arith.constant 5.000000e-01 : f32
    %180 = vector.broadcast %cst_80 : f32 to vector<16x128xf32>
    %181 = arith.mulf %180, %179 : vector<16x128xf32>
    %182 = arith.addf %134, %181 : vector<16x128xf32>
    %c0_81 = arith.constant 0 : index
    %c0_82 = arith.constant 0 : index
    %183 = vector.load %arg20[%c0_81, %c0_82] : memref<1x128xf32, #tpu.memory_space<vmem>>, vector<1x128xf32>
    %c0_83 = arith.constant 0 : index
    %c0_84 = arith.constant 0 : index
    %184 = vector.load %arg21[%c0_83, %c0_84] : memref<1x128xf32, #tpu.memory_space<vmem>>, vector<1x128xf32>
    %cst_85 = arith.constant dense<0.000000e+00> : vector<16xf32>
    %185 = vector.multi_reduction <add>, %182, %cst_85 [1] : vector<16x128xf32> to vector<16xf32>
    %186 = vector.shape_cast %185 : vector<16xf32> to vector<16x1xf32>
    %cst_86 = arith.constant 1.250000e-02 : f32
    %187 = vector.broadcast %cst_86 : f32 to vector<16x1xf32>
    %188 = arith.mulf %186, %187 : vector<16x1xf32>
    %189 = tpu.iota {dimensions = array<i32: 1>} : vector<16x128xi32>
    %c80_i32_87 = arith.constant 80 : i32
    %190 = vector.broadcast %c80_i32_87 : i32 to vector<16x128xi32>
    %191 = arith.cmpi slt, %189, %190 : vector<16x128xi32>
    %192 = vector.broadcast %188 : vector<16x1xf32> to vector<16x128xf32>
    %193 = arith.subf %182, %192 : vector<16x128xf32>
    %cst_88 = arith.constant 0.000000e+00 : f32
    %194 = vector.broadcast %cst_88 : f32 to vector<16x128xf32>
    %195 = arith.select %191, %193, %194 : vector<16x128xi1>, vector<16x128xf32>
    %196 = arith.mulf %195, %195 : vector<16x128xf32>
    %cst_89 = arith.constant dense<0.000000e+00> : vector<16xf32>
    %197 = vector.multi_reduction <add>, %196, %cst_89 [1] : vector<16x128xf32> to vector<16xf32>
    %198 = vector.shape_cast %197 : vector<16xf32> to vector<16x1xf32>
    %cst_90 = arith.constant 1.250000e-02 : f32
    %199 = vector.broadcast %cst_90 : f32 to vector<16x1xf32>
    %200 = arith.mulf %198, %199 : vector<16x1xf32>
    %cst_91 = arith.constant 9.99999974E-6 : f32
    %201 = vector.broadcast %cst_91 : f32 to vector<16x1xf32>
    %202 = arith.addf %200, %201 : vector<16x1xf32>
    %203 = math.rsqrt %202 : vector<16x1xf32>
    %204 = vector.broadcast %203 : vector<16x1xf32> to vector<16x128xf32>
    %205 = arith.mulf %195, %204 : vector<16x128xf32>
    %206 = vector.broadcast %183 : vector<1x128xf32> to vector<16x128xf32>
    %207 = arith.mulf %205, %206 : vector<16x128xf32>
    %208 = vector.broadcast %184 : vector<1x128xf32> to vector<16x128xf32>
    %209 = arith.addf %207, %208 : vector<16x128xf32>
    %c0_92 = arith.constant 0 : index
    %c0_93 = arith.constant 0 : index
    %210 = vector.load %arg22[%c0_92, %c0_93] : memref<16x128xf32, #tpu.memory_space<vmem>>, vector<16x128xf32>
    tpu.vector_store %arg22[%c0_92, %c0_93], %209 {strides = array<i32>} : memref<16x128xf32, #tpu.memory_space<vmem>>, vector<16x128xf32>,
    return
  }
  func.func @transform_0(%arg0: i32) -> (i32, i32) {
    %c0_i32 = arith.constant 0 : i32
    %c0_i32_0 = arith.constant 0 : i32
    return %arg0, %c0_i32 : i32, i32
  }
  func.func @transform_1(%arg0: i32) -> (i32, i32) {
    %c0_i32 = arith.constant 0 : i32
    %c0_i32_0 = arith.constant 0 : i32
    return %arg0, %c0_i32 : i32, i32
  }
  func.func @transform_2(%arg0: i32) -> (i32, i32) {
    %c0_i32 = arith.constant 0 : i32
    %c0_i32_0 = arith.constant 0 : i32
    return %arg0, %c0_i32 : i32, i32
  }
  func.func @transform_3(%arg0: i32) -> (i32, i32) {
    %c0_i32 = arith.constant 0 : i32
    %c0_i32_0 = arith.constant 0 : i32
    %c0_i32_1 = arith.constant 0 : i32
    return %c0_i32, %c0_i32_0 : i32, i32
  }
  func.func @transform_4(%arg0: i32) -> (i32, i32) {
    %c0_i32 = arith.constant 0 : i32
    %c0_i32_0 = arith.constant 0 : i32
    %c0_i32_1 = arith.constant 0 : i32
    return %c0_i32, %c0_i32_0 : i32, i32
  }
  func.func @transform_5(%arg0: i32) -> (i32, i32) {
    %c0_i32 = arith.constant 0 : i32
    %c0_i32_0 = arith.constant 0 : i32
    %c0_i32_1 = arith.constant 0 : i32
    return %c0_i32, %c0_i32_0 : i32, i32
  }
  func.func @transform_6(%arg0: i32) -> (i32, i32) {
    %c0_i32 = arith.constant 0 : i32
    %c0_i32_0 = arith.constant 0 : i32
    %c0_i32_1 = arith.constant 0 : i32
    return %c0_i32, %c0_i32_0 : i32, i32
  }
  func.func @transform_7(%arg0: i32) -> (i32, i32) {
    %c0_i32 = arith.constant 0 : i32
    %c0_i32_0 = arith.constant 0 : i32
    %c0_i32_1 = arith.constant 0 : i32
    return %c0_i32, %c0_i32_0 : i32, i32
  }
  func.func @transform_8(%arg0: i32) -> (i32, i32) {
    %c0_i32 = arith.constant 0 : i32
    %c0_i32_0 = arith.constant 0 : i32
    %c0_i32_1 = arith.constant 0 : i32
    return %c0_i32, %c0_i32_0 : i32, i32
  }
  func.func @transform_9(%arg0: i32) -> (i32, i32) {
    %c0_i32 = arith.constant 0 : i32
    %c0_i32_0 = arith.constant 0 : i32
    %c0_i32_1 = arith.constant 0 : i32
    return %c0_i32, %c0_i32_0 : i32, i32
  }
  func.func @transform_10(%arg0: i32) -> (i32, i32) {
    %c0_i32 = arith.constant 0 : i32
    %c0_i32_0 = arith.constant 0 : i32
    %c0_i32_1 = arith.constant 0 : i32
    return %c0_i32, %c0_i32_0 : i32, i32
  }
  func.func @transform_11(%arg0: i32) -> (i32, i32) {
    %c0_i32 = arith.constant 0 : i32
    %c0_i32_0 = arith.constant 0 : i32
    %c0_i32_1 = arith.constant 0 : i32
    return %c0_i32, %c0_i32_0 : i32, i32
  }
  func.func @transform_12(%arg0: i32) -> (i32, i32) {
    %c0_i32 = arith.constant 0 : i32
    %c0_i32_0 = arith.constant 0 : i32
    %c0_i32_1 = arith.constant 0 : i32
    return %c0_i32, %c0_i32_0 : i32, i32
  }
  func.func @transform_13(%arg0: i32) -> (i32, i32) {
    %c0_i32 = arith.constant 0 : i32
    %c0_i32_0 = arith.constant 0 : i32
    %c0_i32_1 = arith.constant 0 : i32
    return %c0_i32, %c0_i32_0 : i32, i32
  }
  func.func @transform_14(%arg0: i32) -> (i32, i32) {
    %c0_i32 = arith.constant 0 : i32
    %c0_i32_0 = arith.constant 0 : i32
    %c0_i32_1 = arith.constant 0 : i32
    return %c0_i32, %c0_i32_0 : i32, i32
  }
  func.func @transform_15(%arg0: i32) -> (i32, i32) {
    %c0_i32 = arith.constant 0 : i32
    %c0_i32_0 = arith.constant 0 : i32
    %c0_i32_1 = arith.constant 0 : i32
    return %c0_i32, %c0_i32_0 : i32, i32
  }
  func.func @transform_16(%arg0: i32) -> (i32, i32) {
    %c0_i32 = arith.constant 0 : i32
    %c0_i32_0 = arith.constant 0 : i32
    %c0_i32_1 = arith.constant 0 : i32
    return %c0_i32, %c0_i32_0 : i32, i32
  }
  func.func @transform_17(%arg0: i32) -> (i32, i32) {
    %c0_i32 = arith.constant 0 : i32
    %c0_i32_0 = arith.constant 0 : i32
    %c0_i32_1 = arith.constant 0 : i32
    return %c0_i32, %c0_i32_0 : i32, i32
  }
  func.func @transform_18(%arg0: i32) -> (i32, i32) {
    %c0_i32 = arith.constant 0 : i32
    %c0_i32_0 = arith.constant 0 : i32
    %c0_i32_1 = arith.constant 0 : i32
    return %c0_i32, %c0_i32_0 : i32, i32
  }
  func.func @transform_19(%arg0: i32) -> (i32, i32) {
    %c0_i32 = arith.constant 0 : i32
    %c0_i32_0 = arith.constant 0 : i32
    %c0_i32_1 = arith.constant 0 : i32
    return %c0_i32, %c0_i32_0 : i32, i32
  }
  func.func @transform_20(%arg0: i32) -> (i32, i32) {
    %c0_i32 = arith.constant 0 : i32
    %c0_i32_0 = arith.constant 0 : i32
    %c0_i32_1 = arith.constant 0 : i32
    return %c0_i32, %c0_i32_0 : i32, i32
  }
  func.func @transform_21(%arg0: i32) -> (i32, i32) {
    %c0_i32 = arith.constant 0 : i32
    %c0_i32_0 = arith.constant 0 : i32
    return %arg0, %c0_i32 : i32, i32
  }
}

module attributes {stable_mosaic.version = 11 : i64} {
  func.func @_ffn1_qkv_kernel(%arg0: i32, %arg1: memref<16x128xf32, #tpu.memory_space<vmem>>, %arg2: memref<1x128xf32, #tpu.memory_space<vmem>>, %arg3: memref<1x128xf32, #tpu.memory_space<vmem>>, %arg4: memref<128x256xbf16, #tpu.memory_space<vmem>>, %arg5: memref<1x256xf32, #tpu.memory_space<vmem>>, %arg6: memref<256x128xbf16, #tpu.memory_space<vmem>>, %arg7: memref<1x128xf32, #tpu.memory_space<vmem>>, %arg8: memref<1x128xf32, #tpu.memory_space<vmem>>, %arg9: memref<1x128xf32, #tpu.memory_space<vmem>>, %arg10: memref<128x384xbf16, #tpu.memory_space<vmem>>, %arg11: memref<1x384xf32, #tpu.memory_space<vmem>>, %arg12: memref<16x128xf32, #tpu.memory_space<vmem>>, %arg13: memref<16x384xbf16, #tpu.memory_space<vmem>>) attributes {dimension_semantics = [#tpu.dimension_semantics<parallel>], iteration_bounds = array<i64: 2>, scalar_prefetch = 0 : i64, scratch_operands = 0 : i64, tpu.core_type = #tpu.core_type<tc>, window_params = [{transform_indices = @transform_0, window_bounds = array<i64: 16, 128>}, {pipeline_mode = #tpu.pipeline_mode<synchronous>, transform_indices = @transform_1, window_bounds = array<i64: 1, 128>}, {pipeline_mode = #tpu.pipeline_mode<synchronous>, transform_indices = @transform_2, window_bounds = array<i64: 1, 128>}, {pipeline_mode = #tpu.pipeline_mode<synchronous>, transform_indices = @transform_3, window_bounds = array<i64: 128, 256>}, {pipeline_mode = #tpu.pipeline_mode<synchronous>, transform_indices = @transform_4, window_bounds = array<i64: 1, 256>}, {pipeline_mode = #tpu.pipeline_mode<synchronous>, transform_indices = @transform_5, window_bounds = array<i64: 256, 128>}, {pipeline_mode = #tpu.pipeline_mode<synchronous>, transform_indices = @transform_6, window_bounds = array<i64: 1, 128>}, {pipeline_mode = #tpu.pipeline_mode<synchronous>, transform_indices = @transform_7, window_bounds = array<i64: 1, 128>}, {pipeline_mode = #tpu.pipeline_mode<synchronous>, transform_indices = @transform_8, window_bounds = array<i64: 1, 128>}, {pipeline_mode = #tpu.pipeline_mode<synchronous>, transform_indices = @transform_9, window_bounds = array<i64: 128, 384>}, {pipeline_mode = #tpu.pipeline_mode<synchronous>, transform_indices = @transform_10, window_bounds = array<i64: 1, 384>}, {transform_indices = @transform_11, window_bounds = array<i64: 16, 128>}, {transform_indices = @transform_12, window_bounds = array<i64: 16, 384>}]} {
    %c0 = arith.constant 0 : index
    %c0_0 = arith.constant 0 : index
    %0 = vector.load %arg1[%c0, %c0_0] : memref<16x128xf32, #tpu.memory_space<vmem>>, vector<16x128xf32>
    %c0_1 = arith.constant 0 : index
    %c0_2 = arith.constant 0 : index
    %1 = vector.load %arg2[%c0_1, %c0_2] : memref<1x128xf32, #tpu.memory_space<vmem>>, vector<1x128xf32>
    %c0_3 = arith.constant 0 : index
    %c0_4 = arith.constant 0 : index
    %2 = vector.load %arg3[%c0_3, %c0_4] : memref<1x128xf32, #tpu.memory_space<vmem>>, vector<1x128xf32>
    %cst = arith.constant dense<0.000000e+00> : vector<16xf32>
    %3 = vector.multi_reduction <add>, %0, %cst [1] : vector<16x128xf32> to vector<16xf32>
    %4 = vector.shape_cast %3 : vector<16xf32> to vector<16x1xf32>
    %cst_5 = arith.constant 1.250000e-02 : f32
    %5 = vector.broadcast %cst_5 : f32 to vector<16x1xf32>
    %6 = arith.mulf %4, %5 : vector<16x1xf32>
    %7 = tpu.iota {dimensions = array<i32: 1>} : vector<16x128xi32>
    %c80_i32 = arith.constant 80 : i32
    %8 = vector.broadcast %c80_i32 : i32 to vector<16x128xi32>
    %9 = arith.cmpi slt, %7, %8 : vector<16x128xi32>
    %10 = vector.broadcast %6 : vector<16x1xf32> to vector<16x128xf32>
    %11 = arith.subf %0, %10 : vector<16x128xf32>
    %cst_6 = arith.constant 0.000000e+00 : f32
    %12 = vector.broadcast %cst_6 : f32 to vector<16x128xf32>
    %13 = arith.select %9, %11, %12 : vector<16x128xi1>, vector<16x128xf32>
    %14 = arith.mulf %13, %13 : vector<16x128xf32>
    %cst_7 = arith.constant dense<0.000000e+00> : vector<16xf32>
    %15 = vector.multi_reduction <add>, %14, %cst_7 [1] : vector<16x128xf32> to vector<16xf32>
    %16 = vector.shape_cast %15 : vector<16xf32> to vector<16x1xf32>
    %cst_8 = arith.constant 1.250000e-02 : f32
    %17 = vector.broadcast %cst_8 : f32 to vector<16x1xf32>
    %18 = arith.mulf %16, %17 : vector<16x1xf32>
    %cst_9 = arith.constant 9.99999974E-6 : f32
    %19 = vector.broadcast %cst_9 : f32 to vector<16x1xf32>
    %20 = arith.addf %18, %19 : vector<16x1xf32>
    %21 = math.rsqrt %20 : vector<16x1xf32>
    %22 = vector.broadcast %21 : vector<16x1xf32> to vector<16x128xf32>
    %23 = arith.mulf %13, %22 : vector<16x128xf32>
    %24 = vector.broadcast %1 : vector<1x128xf32> to vector<16x128xf32>
    %25 = arith.mulf %23, %24 : vector<16x128xf32>
    %26 = vector.broadcast %2 : vector<1x128xf32> to vector<16x128xf32>
    %27 = arith.addf %25, %26 : vector<16x128xf32>
    %28 = arith.truncf %27 : vector<16x128xf32> to vector<16x128xbf16>
    %c0_10 = arith.constant 0 : index
    %c0_11 = arith.constant 0 : index
    %29 = vector.load %arg4[%c0_10, %c0_11] : memref<128x256xbf16, #tpu.memory_space<vmem>>, vector<128x256xbf16>
    %cst_12 = arith.constant dense<0.000000e+00> : vector<16x256xf32>
    %30 = tpu.matmul %28, %29, %cst_12 {dimension_numbers = #tpu.dot_dimension_numbers<[1], [0], [0], [1], [0, 0, 1, 1], [], []>} : vector<16x128xbf16>, vector<128x256xbf16>, vector<16x256xf32> -> vector<16x256xf32>
    %c0_13 = arith.constant 0 : index
    %c0_14 = arith.constant 0 : index
    %31 = vector.load %arg5[%c0_13, %c0_14] : memref<1x256xf32, #tpu.memory_space<vmem>>, vector<1x256xf32>
    %32 = vector.broadcast %31 : vector<1x256xf32> to vector<16x256xf32>
    %33 = arith.addf %30, %32 : vector<16x256xf32>
    %34 = arith.negf %33 : vector<16x256xf32>
    %35 = math.exp %34 : vector<16x256xf32>
    %cst_15 = arith.constant 1.000000e+00 : f32
    %36 = vector.broadcast %cst_15 : f32 to vector<16x256xf32>
    %37 = arith.addf %36, %35 : vector<16x256xf32>
    %38 = arith.divf %36, %37 : vector<16x256xf32>
    %39 = arith.mulf %33, %38 : vector<16x256xf32>
    %40 = arith.truncf %39 : vector<16x256xf32> to vector<16x256xbf16>
    %c0_16 = arith.constant 0 : index
    %c0_17 = arith.constant 0 : index
    %41 = vector.load %arg6[%c0_16, %c0_17] : memref<256x128xbf16, #tpu.memory_space<vmem>>, vector<256x128xbf16>
    %cst_18 = arith.constant dense<0.000000e+00> : vector<16x128xf32>
    %42 = tpu.matmul %40, %41, %cst_18 {dimension_numbers = #tpu.dot_dimension_numbers<[1], [0], [0], [1], [0, 0, 1, 1], [], []>} : vector<16x256xbf16>, vector<256x128xbf16>, vector<16x128xf32> -> vector<16x128xf32>
    %c0_19 = arith.constant 0 : index
    %c0_20 = arith.constant 0 : index
    %43 = vector.load %arg7[%c0_19, %c0_20] : memref<1x128xf32, #tpu.memory_space<vmem>>, vector<1x128xf32>
    %44 = vector.broadcast %43 : vector<1x128xf32> to vector<16x128xf32>
    %45 = arith.addf %42, %44 : vector<16x128xf32>
    %cst_21 = arith.constant 5.000000e-01 : f32
    %46 = vector.broadcast %cst_21 : f32 to vector<16x128xf32>
    %47 = arith.mulf %46, %45 : vector<16x128xf32>
    %48 = arith.addf %0, %47 : vector<16x128xf32>
    %c0_22 = arith.constant 0 : index
    %c0_23 = arith.constant 0 : index
    %49 = vector.load %arg12[%c0_22, %c0_23] : memref<16x128xf32, #tpu.memory_space<vmem>>, vector<16x128xf32>
    tpu.vector_store %arg12[%c0_22, %c0_23], %48 {strides = array<i32>} : memref<16x128xf32, #tpu.memory_space<vmem>>, vector<16x128xf32>,
    %c0_24 = arith.constant 0 : index
    %c0_25 = arith.constant 0 : index
    %50 = vector.load %arg8[%c0_24, %c0_25] : memref<1x128xf32, #tpu.memory_space<vmem>>, vector<1x128xf32>
    %c0_26 = arith.constant 0 : index
    %c0_27 = arith.constant 0 : index
    %51 = vector.load %arg9[%c0_26, %c0_27] : memref<1x128xf32, #tpu.memory_space<vmem>>, vector<1x128xf32>
    %cst_28 = arith.constant dense<0.000000e+00> : vector<16xf32>
    %52 = vector.multi_reduction <add>, %48, %cst_28 [1] : vector<16x128xf32> to vector<16xf32>
    %53 = vector.shape_cast %52 : vector<16xf32> to vector<16x1xf32>
    %cst_29 = arith.constant 1.250000e-02 : f32
    %54 = vector.broadcast %cst_29 : f32 to vector<16x1xf32>
    %55 = arith.mulf %53, %54 : vector<16x1xf32>
    %56 = tpu.iota {dimensions = array<i32: 1>} : vector<16x128xi32>
    %c80_i32_30 = arith.constant 80 : i32
    %57 = vector.broadcast %c80_i32_30 : i32 to vector<16x128xi32>
    %58 = arith.cmpi slt, %56, %57 : vector<16x128xi32>
    %59 = vector.broadcast %55 : vector<16x1xf32> to vector<16x128xf32>
    %60 = arith.subf %48, %59 : vector<16x128xf32>
    %cst_31 = arith.constant 0.000000e+00 : f32
    %61 = vector.broadcast %cst_31 : f32 to vector<16x128xf32>
    %62 = arith.select %58, %60, %61 : vector<16x128xi1>, vector<16x128xf32>
    %63 = arith.mulf %62, %62 : vector<16x128xf32>
    %cst_32 = arith.constant dense<0.000000e+00> : vector<16xf32>
    %64 = vector.multi_reduction <add>, %63, %cst_32 [1] : vector<16x128xf32> to vector<16xf32>
    %65 = vector.shape_cast %64 : vector<16xf32> to vector<16x1xf32>
    %cst_33 = arith.constant 1.250000e-02 : f32
    %66 = vector.broadcast %cst_33 : f32 to vector<16x1xf32>
    %67 = arith.mulf %65, %66 : vector<16x1xf32>
    %cst_34 = arith.constant 9.99999974E-6 : f32
    %68 = vector.broadcast %cst_34 : f32 to vector<16x1xf32>
    %69 = arith.addf %67, %68 : vector<16x1xf32>
    %70 = math.rsqrt %69 : vector<16x1xf32>
    %71 = vector.broadcast %70 : vector<16x1xf32> to vector<16x128xf32>
    %72 = arith.mulf %62, %71 : vector<16x128xf32>
    %73 = vector.broadcast %50 : vector<1x128xf32> to vector<16x128xf32>
    %74 = arith.mulf %72, %73 : vector<16x128xf32>
    %75 = vector.broadcast %51 : vector<1x128xf32> to vector<16x128xf32>
    %76 = arith.addf %74, %75 : vector<16x128xf32>
    %77 = arith.truncf %76 : vector<16x128xf32> to vector<16x128xbf16>
    %c0_35 = arith.constant 0 : index
    %c0_36 = arith.constant 0 : index
    %78 = vector.load %arg10[%c0_35, %c0_36] : memref<128x384xbf16, #tpu.memory_space<vmem>>, vector<128x384xbf16>
    %cst_37 = arith.constant dense<0.000000e+00> : vector<16x384xf32>
    %79 = tpu.matmul %77, %78, %cst_37 {dimension_numbers = #tpu.dot_dimension_numbers<[1], [0], [0], [1], [0, 0, 1, 1], [], []>} : vector<16x128xbf16>, vector<128x384xbf16>, vector<16x384xf32> -> vector<16x384xf32>
    %c0_38 = arith.constant 0 : index
    %c0_39 = arith.constant 0 : index
    %80 = vector.load %arg11[%c0_38, %c0_39] : memref<1x384xf32, #tpu.memory_space<vmem>>, vector<1x384xf32>
    %81 = vector.broadcast %80 : vector<1x384xf32> to vector<16x384xf32>
    %82 = arith.addf %79, %81 : vector<16x384xf32>
    %83 = arith.truncf %82 : vector<16x384xf32> to vector<16x384xbf16>
    %c0_40 = arith.constant 0 : index
    %c0_41 = arith.constant 0 : index
    %84 = vector.load %arg13[%c0_40, %c0_41] : memref<16x384xbf16, #tpu.memory_space<vmem>>, vector<16x384xbf16>
    tpu.vector_store %arg13[%c0_40, %c0_41], %83 {strides = array<i32>} : memref<16x384xbf16, #tpu.memory_space<vmem>>, vector<16x384xbf16>,
    return
  }
  func.func @transform_0(%arg0: i32) -> (i32, i32) {
    %c0_i32 = arith.constant 0 : i32
    %c0_i32_0 = arith.constant 0 : i32
    return %arg0, %c0_i32 : i32, i32
  }
  func.func @transform_1(%arg0: i32) -> (i32, i32) {
    %c0_i32 = arith.constant 0 : i32
    %c0_i32_0 = arith.constant 0 : i32
    %c0_i32_1 = arith.constant 0 : i32
    return %c0_i32, %c0_i32_0 : i32, i32
  }
  func.func @transform_2(%arg0: i32) -> (i32, i32) {
    %c0_i32 = arith.constant 0 : i32
    %c0_i32_0 = arith.constant 0 : i32
    %c0_i32_1 = arith.constant 0 : i32
    return %c0_i32, %c0_i32_0 : i32, i32
  }
  func.func @transform_3(%arg0: i32) -> (i32, i32) {
    %c0_i32 = arith.constant 0 : i32
    %c0_i32_0 = arith.constant 0 : i32
    %c0_i32_1 = arith.constant 0 : i32
    return %c0_i32, %c0_i32_0 : i32, i32
  }
  func.func @transform_4(%arg0: i32) -> (i32, i32) {
    %c0_i32 = arith.constant 0 : i32
    %c0_i32_0 = arith.constant 0 : i32
    %c0_i32_1 = arith.constant 0 : i32
    return %c0_i32, %c0_i32_0 : i32, i32
  }
  func.func @transform_5(%arg0: i32) -> (i32, i32) {
    %c0_i32 = arith.constant 0 : i32
    %c0_i32_0 = arith.constant 0 : i32
    %c0_i32_1 = arith.constant 0 : i32
    return %c0_i32, %c0_i32_0 : i32, i32
  }
  func.func @transform_6(%arg0: i32) -> (i32, i32) {
    %c0_i32 = arith.constant 0 : i32
    %c0_i32_0 = arith.constant 0 : i32
    %c0_i32_1 = arith.constant 0 : i32
    return %c0_i32, %c0_i32_0 : i32, i32
  }
  func.func @transform_7(%arg0: i32) -> (i32, i32) {
    %c0_i32 = arith.constant 0 : i32
    %c0_i32_0 = arith.constant 0 : i32
    %c0_i32_1 = arith.constant 0 : i32
    return %c0_i32, %c0_i32_0 : i32, i32
  }
  func.func @transform_8(%arg0: i32) -> (i32, i32) {
    %c0_i32 = arith.constant 0 : i32
    %c0_i32_0 = arith.constant 0 : i32
    %c0_i32_1 = arith.constant 0 : i32
    return %c0_i32, %c0_i32_0 : i32, i32
  }
  func.func @transform_9(%arg0: i32) -> (i32, i32) {
    %c0_i32 = arith.constant 0 : i32
    %c0_i32_0 = arith.constant 0 : i32
    %c0_i32_1 = arith.constant 0 : i32
    return %c0_i32, %c0_i32_0 : i32, i32
  }
  func.func @transform_10(%arg0: i32) -> (i32, i32) {
    %c0_i32 = arith.constant 0 : i32
    %c0_i32_0 = arith.constant 0 : i32
    %c0_i32_1 = arith.constant 0 : i32
    return %c0_i32, %c0_i32_0 : i32, i32
  }
  func.func @transform_11(%arg0: i32) -> (i32, i32) {
    %c0_i32 = arith.constant 0 : i32
    %c0_i32_0 = arith.constant 0 : i32
    return %arg0, %c0_i32 : i32, i32
  }
  func.func @transform_12(%arg0: i32) -> (i32, i32) {
    %c0_i32 = arith.constant 0 : i32
    %c0_i32_0 = arith.constant 0 : i32
    return %arg0, %c0_i32 : i32, i32
  }
}

module attributes {stable_mosaic.version = 11 : i64} {
  func.func @_conv_ffn2_kernel(%arg0: i32, %arg1: memref<16x128xf32, #tpu.memory_space<vmem>>, %arg2: memref<16x128xbf16, #tpu.memory_space<vmem>>, %arg3: memref<16x1xi32, #tpu.memory_space<vmem>>, %arg4: memref<128x128xbf16, #tpu.memory_space<vmem>>, %arg5: memref<1x128xf32, #tpu.memory_space<vmem>>, %arg6: memref<1x128xf32, #tpu.memory_space<vmem>>, %arg7: memref<1x128xf32, #tpu.memory_space<vmem>>, %arg8: memref<128x256xbf16, #tpu.memory_space<vmem>>, %arg9: memref<1x256xf32, #tpu.memory_space<vmem>>, %arg10: memref<31x128xf32, #tpu.memory_space<vmem>>, %arg11: memref<1x128xf32, #tpu.memory_space<vmem>>, %arg12: memref<128x128xbf16, #tpu.memory_space<vmem>>, %arg13: memref<1x128xf32, #tpu.memory_space<vmem>>, %arg14: memref<1x128xf32, #tpu.memory_space<vmem>>, %arg15: memref<1x128xf32, #tpu.memory_space<vmem>>, %arg16: memref<128x256xbf16, #tpu.memory_space<vmem>>, %arg17: memref<1x256xf32, #tpu.memory_space<vmem>>, %arg18: memref<256x128xbf16, #tpu.memory_space<vmem>>, %arg19: memref<1x128xf32, #tpu.memory_space<vmem>>, %arg20: memref<1x128xf32, #tpu.memory_space<vmem>>, %arg21: memref<1x128xf32, #tpu.memory_space<vmem>>, %arg22: memref<16x128xf32, #tpu.memory_space<vmem>>, %arg23: memref<48x128xf32, #tpu.memory_space<vmem>>) attributes {dimension_semantics = [#tpu.dimension_semantics<parallel>], iteration_bounds = array<i64: 2>, scalar_prefetch = 0 : i64, scratch_operands = 1 : i64, tpu.core_type = #tpu.core_type<tc>, window_params = [{transform_indices = @transform_0, window_bounds = array<i64: 16, 128>}, {transform_indices = @transform_1, window_bounds = array<i64: 16, 128>}, {transform_indices = @transform_2, window_bounds = array<i64: 16, 1>}, {pipeline_mode = #tpu.pipeline_mode<synchronous>, transform_indices = @transform_3, window_bounds = array<i64: 128, 128>}, {pipeline_mode = #tpu.pipeline_mode<synchronous>, transform_indices = @transform_4, window_bounds = array<i64: 1, 128>}, {pipeline_mode = #tpu.pipeline_mode<synchronous>, transform_indices = @transform_5, window_bounds = array<i64: 1, 128>}, {pipeline_mode = #tpu.pipeline_mode<synchronous>, transform_indices = @transform_6, window_bounds = array<i64: 1, 128>}, {pipeline_mode = #tpu.pipeline_mode<synchronous>, transform_indices = @transform_7, window_bounds = array<i64: 128, 256>}, {pipeline_mode = #tpu.pipeline_mode<synchronous>, transform_indices = @transform_8, window_bounds = array<i64: 1, 256>}, {pipeline_mode = #tpu.pipeline_mode<synchronous>, transform_indices = @transform_9, window_bounds = array<i64: 31, 128>}, {pipeline_mode = #tpu.pipeline_mode<synchronous>, transform_indices = @transform_10, window_bounds = array<i64: 1, 128>}, {pipeline_mode = #tpu.pipeline_mode<synchronous>, transform_indices = @transform_11, window_bounds = array<i64: 128, 128>}, {pipeline_mode = #tpu.pipeline_mode<synchronous>, transform_indices = @transform_12, window_bounds = array<i64: 1, 128>}, {pipeline_mode = #tpu.pipeline_mode<synchronous>, transform_indices = @transform_13, window_bounds = array<i64: 1, 128>}, {pipeline_mode = #tpu.pipeline_mode<synchronous>, transform_indices = @transform_14, window_bounds = array<i64: 1, 128>}, {pipeline_mode = #tpu.pipeline_mode<synchronous>, transform_indices = @transform_15, window_bounds = array<i64: 128, 256>}, {pipeline_mode = #tpu.pipeline_mode<synchronous>, transform_indices = @transform_16, window_bounds = array<i64: 1, 256>}, {pipeline_mode = #tpu.pipeline_mode<synchronous>, transform_indices = @transform_17, window_bounds = array<i64: 256, 128>}, {pipeline_mode = #tpu.pipeline_mode<synchronous>, transform_indices = @transform_18, window_bounds = array<i64: 1, 128>}, {pipeline_mode = #tpu.pipeline_mode<synchronous>, transform_indices = @transform_19, window_bounds = array<i64: 1, 128>}, {pipeline_mode = #tpu.pipeline_mode<synchronous>, transform_indices = @transform_20, window_bounds = array<i64: 1, 128>}, {transform_indices = @transform_21, window_bounds = array<i64: 16, 128>}]} {
    %c0 = arith.constant 0 : index
    %c0_0 = arith.constant 0 : index
    %0 = vector.load %arg1[%c0, %c0_0] : memref<16x128xf32, #tpu.memory_space<vmem>>, vector<16x128xf32>
    %c0_1 = arith.constant 0 : index
    %c0_2 = arith.constant 0 : index
    %1 = vector.load %arg2[%c0_1, %c0_2] : memref<16x128xbf16, #tpu.memory_space<vmem>>, vector<16x128xbf16>
    %c0_3 = arith.constant 0 : index
    %c0_4 = arith.constant 0 : index
    %2 = vector.load %arg4[%c0_3, %c0_4] : memref<128x128xbf16, #tpu.memory_space<vmem>>, vector<128x128xbf16>
    %cst = arith.constant dense<0.000000e+00> : vector<16x128xf32>
    %3 = tpu.matmul %1, %2, %cst {dimension_numbers = #tpu.dot_dimension_numbers<[1], [0], [0], [1], [0, 0, 1, 1], [], []>} : vector<16x128xbf16>, vector<128x128xbf16>, vector<16x128xf32> -> vector<16x128xf32>
    %4 = arith.addf %0, %3 : vector<16x128xf32>
    %c0_5 = arith.constant 0 : index
    %c0_6 = arith.constant 0 : index
    %5 = vector.load %arg5[%c0_5, %c0_6] : memref<1x128xf32, #tpu.memory_space<vmem>>, vector<1x128xf32>
    %6 = vector.broadcast %5 : vector<1x128xf32> to vector<16x128xf32>
    %7 = arith.addf %4, %6 : vector<16x128xf32>
    %c0_7 = arith.constant 0 : index
    %c0_8 = arith.constant 0 : index
    %8 = vector.load %arg6[%c0_7, %c0_8] : memref<1x128xf32, #tpu.memory_space<vmem>>, vector<1x128xf32>
    %c0_9 = arith.constant 0 : index
    %c0_10 = arith.constant 0 : index
    %9 = vector.load %arg7[%c0_9, %c0_10] : memref<1x128xf32, #tpu.memory_space<vmem>>, vector<1x128xf32>
    %cst_11 = arith.constant dense<0.000000e+00> : vector<16xf32>
    %10 = vector.multi_reduction <add>, %7, %cst_11 [1] : vector<16x128xf32> to vector<16xf32>
    %11 = vector.shape_cast %10 : vector<16xf32> to vector<16x1xf32>
    %cst_12 = arith.constant 1.250000e-02 : f32
    %12 = vector.broadcast %cst_12 : f32 to vector<16x1xf32>
    %13 = arith.mulf %11, %12 : vector<16x1xf32>
    %14 = tpu.iota {dimensions = array<i32: 1>} : vector<16x128xi32>
    %c80_i32 = arith.constant 80 : i32
    %15 = vector.broadcast %c80_i32 : i32 to vector<16x128xi32>
    %16 = arith.cmpi slt, %14, %15 : vector<16x128xi32>
    %17 = vector.broadcast %13 : vector<16x1xf32> to vector<16x128xf32>
    %18 = arith.subf %7, %17 : vector<16x128xf32>
    %cst_13 = arith.constant 0.000000e+00 : f32
    %19 = vector.broadcast %cst_13 : f32 to vector<16x128xf32>
    %20 = arith.select %16, %18, %19 : vector<16x128xi1>, vector<16x128xf32>
    %21 = arith.mulf %20, %20 : vector<16x128xf32>
    %cst_14 = arith.constant dense<0.000000e+00> : vector<16xf32>
    %22 = vector.multi_reduction <add>, %21, %cst_14 [1] : vector<16x128xf32> to vector<16xf32>
    %23 = vector.shape_cast %22 : vector<16xf32> to vector<16x1xf32>
    %cst_15 = arith.constant 1.250000e-02 : f32
    %24 = vector.broadcast %cst_15 : f32 to vector<16x1xf32>
    %25 = arith.mulf %23, %24 : vector<16x1xf32>
    %cst_16 = arith.constant 9.99999974E-6 : f32
    %26 = vector.broadcast %cst_16 : f32 to vector<16x1xf32>
    %27 = arith.addf %25, %26 : vector<16x1xf32>
    %28 = math.rsqrt %27 : vector<16x1xf32>
    %29 = vector.broadcast %28 : vector<16x1xf32> to vector<16x128xf32>
    %30 = arith.mulf %20, %29 : vector<16x128xf32>
    %31 = vector.broadcast %8 : vector<1x128xf32> to vector<16x128xf32>
    %32 = arith.mulf %30, %31 : vector<16x128xf32>
    %33 = vector.broadcast %9 : vector<1x128xf32> to vector<16x128xf32>
    %34 = arith.addf %32, %33 : vector<16x128xf32>
    %35 = arith.truncf %34 : vector<16x128xf32> to vector<16x128xbf16>
    %c0_17 = arith.constant 0 : index
    %c0_18 = arith.constant 0 : index
    %36 = vector.load %arg8[%c0_17, %c0_18] : memref<128x256xbf16, #tpu.memory_space<vmem>>, vector<128x256xbf16>
    %cst_19 = arith.constant dense<0.000000e+00> : vector<16x256xf32>
    %37 = tpu.matmul %35, %36, %cst_19 {dimension_numbers = #tpu.dot_dimension_numbers<[1], [0], [0], [1], [0, 0, 1, 1], [], []>} : vector<16x128xbf16>, vector<128x256xbf16>, vector<16x256xf32> -> vector<16x256xf32>
    %c0_20 = arith.constant 0 : index
    %c0_21 = arith.constant 0 : index
    %38 = vector.load %arg9[%c0_20, %c0_21] : memref<1x256xf32, #tpu.memory_space<vmem>>, vector<1x256xf32>
    %39 = vector.broadcast %38 : vector<1x256xf32> to vector<16x256xf32>
    %40 = arith.addf %37, %39 : vector<16x256xf32>
    %41 = vector.extract_strided_slice %40 {offsets = [0, 0], sizes = [16, 128], strides = [1, 1]} : vector<16x256xf32> to vector<16x128xf32>
    %42 = vector.extract_strided_slice %40 {offsets = [0, 128], sizes = [16, 128], strides = [1, 1]} : vector<16x256xf32> to vector<16x128xf32>
    %43 = arith.negf %42 : vector<16x128xf32>
    %44 = math.exp %43 : vector<16x128xf32>
    %cst_22 = arith.constant 1.000000e+00 : f32
    %45 = vector.broadcast %cst_22 : f32 to vector<16x128xf32>
    %46 = arith.addf %45, %44 : vector<16x128xf32>
    %47 = arith.divf %45, %46 : vector<16x128xf32>
    %48 = arith.mulf %41, %47 : vector<16x128xf32>
    %cst_23 = arith.constant 0.000000e+00 : f32
    %49 = vector.broadcast %cst_23 : f32 to vector<16x128xf32>
    %c0_24 = arith.constant 0 : index
    %c0_25 = arith.constant 0 : index
    %50 = vector.load %arg23[%c0_24, %c0_25] : memref<48x128xf32, #tpu.memory_space<vmem>>, vector<16x128xf32>
    tpu.vector_store %arg23[%c0_24, %c0_25], %49 {strides = array<i32>} : memref<48x128xf32, #tpu.memory_space<vmem>>, vector<16x128xf32>,
    %cst_26 = arith.constant 0.000000e+00 : f32
    %51 = vector.broadcast %cst_26 : f32 to vector<16x128xf32>
    %c32 = arith.constant 32 : index
    %c0_27 = arith.constant 0 : index
    %52 = vector.load %arg23[%c32, %c0_27] : memref<48x128xf32, #tpu.memory_space<vmem>>, vector<16x128xf32>
    tpu.vector_store %arg23[%c32, %c0_27], %51 {strides = array<i32>} : memref<48x128xf32, #tpu.memory_space<vmem>>, vector<16x128xf32>,
    %c16 = arith.constant 16 : index
    %c0_28 = arith.constant 0 : index
    %53 = vector.load %arg23[%c16, %c0_28] : memref<48x128xf32, #tpu.memory_space<vmem>>, vector<16x128xf32>
    tpu.vector_store %arg23[%c16, %c0_28], %48 {strides = array<i32>} : memref<48x128xf32, #tpu.memory_space<vmem>>, vector<16x128xf32>,
    %c0_29 = arith.constant 0 : index
    %c0_30 = arith.constant 0 : index
    %54 = vector.load %arg3[%c0_29, %c0_30] : memref<16x1xi32, #tpu.memory_space<vmem>>, vector<16x1xi32>
    %c0_31 = arith.constant 0 : index
    %c0_32 = arith.constant 0 : index
    %55 = vector.load %arg10[%c0_31, %c0_32] : memref<31x128xf32, #tpu.memory_space<vmem>>, vector<31x128xf32>
    %cst_33 = arith.constant 0.000000e+00 : f32
    %56 = vector.broadcast %cst_33 : f32 to vector<16x128xf32>
    %c15 = arith.constant 15 : index
    %c0_34 = arith.constant 0 : index
    %57 = vector.load %arg23[%c15, %c0_34] : memref<48x128xf32, #tpu.memory_space<vmem>>, vector<16x128xf32>
    %c-1_i32 = arith.constant -1 : i32
    %58 = vector.broadcast %c-1_i32 : i32 to vector<16x1xi32>
    %59 = arith.addi %54, %58 : vector<16x1xi32>
    %c0_i32 = arith.constant 0 : i32
    %60 = vector.broadcast %c0_i32 : i32 to vector<16x1xi32>
    %61 = arith.cmpi sge, %59, %60 : vector<16x1xi32>
    %c-1_i32_35 = arith.constant -1 : i32
    %62 = vector.broadcast %c-1_i32_35 : i32 to vector<16x1xi32>
    %63 = arith.addi %54, %62 : vector<16x1xi32>
    %c2_i32 = arith.constant 2 : i32
    %64 = vector.broadcast %c2_i32 : i32 to vector<16x1xi32>
    %65 = arith.cmpi slt, %63, %64 : vector<16x1xi32>
    %66 = arith.andi %61, %65 : vector<16x1xi1>
    %cst_36 = arith.constant 0.000000e+00 : f32
    %67 = vector.shape_cast %66 : vector<16x1xi1> to vector<16x1xi1>
    %68 = vector.broadcast %67 : vector<16x1xi1> to vector<16x128xi1>
    %69 = vector.broadcast %cst_36 : f32 to vector<16x128xf32>
    %70 = arith.select %68, %57, %69 : vector<16x128xi1>, vector<16x128xf32>
    %71 = vector.extract_strided_slice %55 {offsets = [14, 0], sizes = [1, 128], strides = [1, 1]} : vector<31x128xf32> to vector<1x128xf32>
    %72 = vector.shape_cast %71 : vector<1x128xf32> to vector<128xf32>
    %73 = vector.shape_cast %72 : vector<128xf32> to vector<1x128xf32>
    %74 = vector.broadcast %73 : vector<1x128xf32> to vector<16x128xf32>
    %75 = arith.mulf %70, %74 : vector<16x128xf32>
    %76 = arith.addf %56, %75 : vector<16x128xf32>
    %c16_37 = arith.constant 16 : index
    %c0_38 = arith.constant 0 : index
    %77 = vector.load %arg23[%c16_37, %c0_38] : memref<48x128xf32, #tpu.memory_space<vmem>>, vector<16x128xf32>
    %c0_i32_39 = arith.constant 0 : i32
    %78 = vector.broadcast %c0_i32_39 : i32 to vector<16x1xi32>
    %79 = arith.addi %54, %78 : vector<16x1xi32>
    %c0_i32_40 = arith.constant 0 : i32
    %80 = vector.broadcast %c0_i32_40 : i32 to vector<16x1xi32>
    %81 = arith.cmpi sge, %79, %80 : vector<16x1xi32>
    %c0_i32_41 = arith.constant 0 : i32
    %82 = vector.broadcast %c0_i32_41 : i32 to vector<16x1xi32>
    %83 = arith.addi %54, %82 : vector<16x1xi32>
    %c2_i32_42 = arith.constant 2 : i32
    %84 = vector.broadcast %c2_i32_42 : i32 to vector<16x1xi32>
    %85 = arith.cmpi slt, %83, %84 : vector<16x1xi32>
    %86 = arith.andi %81, %85 : vector<16x1xi1>
    %cst_43 = arith.constant 0.000000e+00 : f32
    %87 = vector.shape_cast %86 : vector<16x1xi1> to vector<16x1xi1>
    %88 = vector.broadcast %87 : vector<16x1xi1> to vector<16x128xi1>
    %89 = vector.broadcast %cst_43 : f32 to vector<16x128xf32>
    %90 = arith.select %88, %77, %89 : vector<16x128xi1>, vector<16x128xf32>
    %91 = vector.extract_strided_slice %55 {offsets = [15, 0], sizes = [1, 128], strides = [1, 1]} : vector<31x128xf32> to vector<1x128xf32>
    %92 = vector.shape_cast %91 : vector<1x128xf32> to vector<128xf32>
    %93 = vector.shape_cast %92 : vector<128xf32> to vector<1x128xf32>
    %94 = vector.broadcast %93 : vector<1x128xf32> to vector<16x128xf32>
    %95 = arith.mulf %90, %94 : vector<16x128xf32>
    %96 = arith.addf %76, %95 : vector<16x128xf32>
    %c17 = arith.constant 17 : index
    %c0_44 = arith.constant 0 : index
    %97 = vector.load %arg23[%c17, %c0_44] : memref<48x128xf32, #tpu.memory_space<vmem>>, vector<16x128xf32>
    %c1_i32 = arith.constant 1 : i32
    %98 = vector.broadcast %c1_i32 : i32 to vector<16x1xi32>
    %99 = arith.addi %54, %98 : vector<16x1xi32>
    %c0_i32_45 = arith.constant 0 : i32
    %100 = vector.broadcast %c0_i32_45 : i32 to vector<16x1xi32>
    %101 = arith.cmpi sge, %99, %100 : vector<16x1xi32>
    %c1_i32_46 = arith.constant 1 : i32
    %102 = vector.broadcast %c1_i32_46 : i32 to vector<16x1xi32>
    %103 = arith.addi %54, %102 : vector<16x1xi32>
    %c2_i32_47 = arith.constant 2 : i32
    %104 = vector.broadcast %c2_i32_47 : i32 to vector<16x1xi32>
    %105 = arith.cmpi slt, %103, %104 : vector<16x1xi32>
    %106 = arith.andi %101, %105 : vector<16x1xi1>
    %cst_48 = arith.constant 0.000000e+00 : f32
    %107 = vector.shape_cast %106 : vector<16x1xi1> to vector<16x1xi1>
    %108 = vector.broadcast %107 : vector<16x1xi1> to vector<16x128xi1>
    %109 = vector.broadcast %cst_48 : f32 to vector<16x128xf32>
    %110 = arith.select %108, %97, %109 : vector<16x128xi1>, vector<16x128xf32>
    %111 = vector.extract_strided_slice %55 {offsets = [16, 0], sizes = [1, 128], strides = [1, 1]} : vector<31x128xf32> to vector<1x128xf32>
    %112 = vector.shape_cast %111 : vector<1x128xf32> to vector<128xf32>
    %113 = vector.shape_cast %112 : vector<128xf32> to vector<1x128xf32>
    %114 = vector.broadcast %113 : vector<1x128xf32> to vector<16x128xf32>
    %115 = arith.mulf %110, %114 : vector<16x128xf32>
    %116 = arith.addf %96, %115 : vector<16x128xf32>
    %c0_49 = arith.constant 0 : index
    %c0_50 = arith.constant 0 : index
    %117 = vector.load %arg11[%c0_49, %c0_50] : memref<1x128xf32, #tpu.memory_space<vmem>>, vector<1x128xf32>
    %118 = vector.broadcast %117 : vector<1x128xf32> to vector<16x128xf32>
    %119 = arith.addf %116, %118 : vector<16x128xf32>
    %cst_51 = arith.constant 0.999994993 : f32
    %120 = vector.broadcast %cst_51 : f32 to vector<16x128xf32>
    %121 = arith.mulf %119, %120 : vector<16x128xf32>
    %122 = arith.negf %121 : vector<16x128xf32>
    %123 = math.exp %122 : vector<16x128xf32>
    %cst_52 = arith.constant 1.000000e+00 : f32
    %124 = vector.broadcast %cst_52 : f32 to vector<16x128xf32>
    %125 = arith.addf %124, %123 : vector<16x128xf32>
    %126 = arith.divf %124, %125 : vector<16x128xf32>
    %127 = arith.mulf %121, %126 : vector<16x128xf32>
    %128 = arith.truncf %127 : vector<16x128xf32> to vector<16x128xbf16>
    %c0_53 = arith.constant 0 : index
    %c0_54 = arith.constant 0 : index
    %129 = vector.load %arg12[%c0_53, %c0_54] : memref<128x128xbf16, #tpu.memory_space<vmem>>, vector<128x128xbf16>
    %cst_55 = arith.constant dense<0.000000e+00> : vector<16x128xf32>
    %130 = tpu.matmul %128, %129, %cst_55 {dimension_numbers = #tpu.dot_dimension_numbers<[1], [0], [0], [1], [0, 0, 1, 1], [], []>} : vector<16x128xbf16>, vector<128x128xbf16>, vector<16x128xf32> -> vector<16x128xf32>
    %131 = arith.addf %7, %130 : vector<16x128xf32>
    %c0_56 = arith.constant 0 : index
    %c0_57 = arith.constant 0 : index
    %132 = vector.load %arg13[%c0_56, %c0_57] : memref<1x128xf32, #tpu.memory_space<vmem>>, vector<1x128xf32>
    %133 = vector.broadcast %132 : vector<1x128xf32> to vector<16x128xf32>
    %134 = arith.addf %131, %133 : vector<16x128xf32>
    %c0_58 = arith.constant 0 : index
    %c0_59 = arith.constant 0 : index
    %135 = vector.load %arg14[%c0_58, %c0_59] : memref<1x128xf32, #tpu.memory_space<vmem>>, vector<1x128xf32>
    %c0_60 = arith.constant 0 : index
    %c0_61 = arith.constant 0 : index
    %136 = vector.load %arg15[%c0_60, %c0_61] : memref<1x128xf32, #tpu.memory_space<vmem>>, vector<1x128xf32>
    %cst_62 = arith.constant dense<0.000000e+00> : vector<16xf32>
    %137 = vector.multi_reduction <add>, %134, %cst_62 [1] : vector<16x128xf32> to vector<16xf32>
    %138 = vector.shape_cast %137 : vector<16xf32> to vector<16x1xf32>
    %cst_63 = arith.constant 1.250000e-02 : f32
    %139 = vector.broadcast %cst_63 : f32 to vector<16x1xf32>
    %140 = arith.mulf %138, %139 : vector<16x1xf32>
    %141 = tpu.iota {dimensions = array<i32: 1>} : vector<16x128xi32>
    %c80_i32_64 = arith.constant 80 : i32
    %142 = vector.broadcast %c80_i32_64 : i32 to vector<16x128xi32>
    %143 = arith.cmpi slt, %141, %142 : vector<16x128xi32>
    %144 = vector.broadcast %140 : vector<16x1xf32> to vector<16x128xf32>
    %145 = arith.subf %134, %144 : vector<16x128xf32>
    %cst_65 = arith.constant 0.000000e+00 : f32
    %146 = vector.broadcast %cst_65 : f32 to vector<16x128xf32>
    %147 = arith.select %143, %145, %146 : vector<16x128xi1>, vector<16x128xf32>
    %148 = arith.mulf %147, %147 : vector<16x128xf32>
    %cst_66 = arith.constant dense<0.000000e+00> : vector<16xf32>
    %149 = vector.multi_reduction <add>, %148, %cst_66 [1] : vector<16x128xf32> to vector<16xf32>
    %150 = vector.shape_cast %149 : vector<16xf32> to vector<16x1xf32>
    %cst_67 = arith.constant 1.250000e-02 : f32
    %151 = vector.broadcast %cst_67 : f32 to vector<16x1xf32>
    %152 = arith.mulf %150, %151 : vector<16x1xf32>
    %cst_68 = arith.constant 9.99999974E-6 : f32
    %153 = vector.broadcast %cst_68 : f32 to vector<16x1xf32>
    %154 = arith.addf %152, %153 : vector<16x1xf32>
    %155 = math.rsqrt %154 : vector<16x1xf32>
    %156 = vector.broadcast %155 : vector<16x1xf32> to vector<16x128xf32>
    %157 = arith.mulf %147, %156 : vector<16x128xf32>
    %158 = vector.broadcast %135 : vector<1x128xf32> to vector<16x128xf32>
    %159 = arith.mulf %157, %158 : vector<16x128xf32>
    %160 = vector.broadcast %136 : vector<1x128xf32> to vector<16x128xf32>
    %161 = arith.addf %159, %160 : vector<16x128xf32>
    %162 = arith.truncf %161 : vector<16x128xf32> to vector<16x128xbf16>
    %c0_69 = arith.constant 0 : index
    %c0_70 = arith.constant 0 : index
    %163 = vector.load %arg16[%c0_69, %c0_70] : memref<128x256xbf16, #tpu.memory_space<vmem>>, vector<128x256xbf16>
    %cst_71 = arith.constant dense<0.000000e+00> : vector<16x256xf32>
    %164 = tpu.matmul %162, %163, %cst_71 {dimension_numbers = #tpu.dot_dimension_numbers<[1], [0], [0], [1], [0, 0, 1, 1], [], []>} : vector<16x128xbf16>, vector<128x256xbf16>, vector<16x256xf32> -> vector<16x256xf32>
    %c0_72 = arith.constant 0 : index
    %c0_73 = arith.constant 0 : index
    %165 = vector.load %arg17[%c0_72, %c0_73] : memref<1x256xf32, #tpu.memory_space<vmem>>, vector<1x256xf32>
    %166 = vector.broadcast %165 : vector<1x256xf32> to vector<16x256xf32>
    %167 = arith.addf %164, %166 : vector<16x256xf32>
    %168 = arith.negf %167 : vector<16x256xf32>
    %169 = math.exp %168 : vector<16x256xf32>
    %cst_74 = arith.constant 1.000000e+00 : f32
    %170 = vector.broadcast %cst_74 : f32 to vector<16x256xf32>
    %171 = arith.addf %170, %169 : vector<16x256xf32>
    %172 = arith.divf %170, %171 : vector<16x256xf32>
    %173 = arith.mulf %167, %172 : vector<16x256xf32>
    %174 = arith.truncf %173 : vector<16x256xf32> to vector<16x256xbf16>
    %c0_75 = arith.constant 0 : index
    %c0_76 = arith.constant 0 : index
    %175 = vector.load %arg18[%c0_75, %c0_76] : memref<256x128xbf16, #tpu.memory_space<vmem>>, vector<256x128xbf16>
    %cst_77 = arith.constant dense<0.000000e+00> : vector<16x128xf32>
    %176 = tpu.matmul %174, %175, %cst_77 {dimension_numbers = #tpu.dot_dimension_numbers<[1], [0], [0], [1], [0, 0, 1, 1], [], []>} : vector<16x256xbf16>, vector<256x128xbf16>, vector<16x128xf32> -> vector<16x128xf32>
    %c0_78 = arith.constant 0 : index
    %c0_79 = arith.constant 0 : index
    %177 = vector.load %arg19[%c0_78, %c0_79] : memref<1x128xf32, #tpu.memory_space<vmem>>, vector<1x128xf32>
    %178 = vector.broadcast %177 : vector<1x128xf32> to vector<16x128xf32>
    %179 = arith.addf %176, %178 : vector<16x128xf32>
    %cst_80 = arith.constant 5.000000e-01 : f32
    %180 = vector.broadcast %cst_80 : f32 to vector<16x128xf32>
    %181 = arith.mulf %180, %179 : vector<16x128xf32>
    %182 = arith.addf %134, %181 : vector<16x128xf32>
    %c0_81 = arith.constant 0 : index
    %c0_82 = arith.constant 0 : index
    %183 = vector.load %arg20[%c0_81, %c0_82] : memref<1x128xf32, #tpu.memory_space<vmem>>, vector<1x128xf32>
    %c0_83 = arith.constant 0 : index
    %c0_84 = arith.constant 0 : index
    %184 = vector.load %arg21[%c0_83, %c0_84] : memref<1x128xf32, #tpu.memory_space<vmem>>, vector<1x128xf32>
    %cst_85 = arith.constant dense<0.000000e+00> : vector<16xf32>
    %185 = vector.multi_reduction <add>, %182, %cst_85 [1] : vector<16x128xf32> to vector<16xf32>
    %186 = vector.shape_cast %185 : vector<16xf32> to vector<16x1xf32>
    %cst_86 = arith.constant 1.250000e-02 : f32
    %187 = vector.broadcast %cst_86 : f32 to vector<16x1xf32>
    %188 = arith.mulf %186, %187 : vector<16x1xf32>
    %189 = tpu.iota {dimensions = array<i32: 1>} : vector<16x128xi32>
    %c80_i32_87 = arith.constant 80 : i32
    %190 = vector.broadcast %c80_i32_87 : i32 to vector<16x128xi32>
    %191 = arith.cmpi slt, %189, %190 : vector<16x128xi32>
    %192 = vector.broadcast %188 : vector<16x1xf32> to vector<16x128xf32>
    %193 = arith.subf %182, %192 : vector<16x128xf32>
    %cst_88 = arith.constant 0.000000e+00 : f32
    %194 = vector.broadcast %cst_88 : f32 to vector<16x128xf32>
    %195 = arith.select %191, %193, %194 : vector<16x128xi1>, vector<16x128xf32>
    %196 = arith.mulf %195, %195 : vector<16x128xf32>
    %cst_89 = arith.constant dense<0.000000e+00> : vector<16xf32>
    %197 = vector.multi_reduction <add>, %196, %cst_89 [1] : vector<16x128xf32> to vector<16xf32>
    %198 = vector.shape_cast %197 : vector<16xf32> to vector<16x1xf32>
    %cst_90 = arith.constant 1.250000e-02 : f32
    %199 = vector.broadcast %cst_90 : f32 to vector<16x1xf32>
    %200 = arith.mulf %198, %199 : vector<16x1xf32>
    %cst_91 = arith.constant 9.99999974E-6 : f32
    %201 = vector.broadcast %cst_91 : f32 to vector<16x1xf32>
    %202 = arith.addf %200, %201 : vector<16x1xf32>
    %203 = math.rsqrt %202 : vector<16x1xf32>
    %204 = vector.broadcast %203 : vector<16x1xf32> to vector<16x128xf32>
    %205 = arith.mulf %195, %204 : vector<16x128xf32>
    %206 = vector.broadcast %183 : vector<1x128xf32> to vector<16x128xf32>
    %207 = arith.mulf %205, %206 : vector<16x128xf32>
    %208 = vector.broadcast %184 : vector<1x128xf32> to vector<16x128xf32>
    %209 = arith.addf %207, %208 : vector<16x128xf32>
    %c0_92 = arith.constant 0 : index
    %c0_93 = arith.constant 0 : index
    %210 = vector.load %arg22[%c0_92, %c0_93] : memref<16x128xf32, #tpu.memory_space<vmem>>, vector<16x128xf32>
    tpu.vector_store %arg22[%c0_92, %c0_93], %209 {strides = array<i32>} : memref<16x128xf32, #tpu.memory_space<vmem>>, vector<16x128xf32>,
    return
  }
  func.func @transform_0(%arg0: i32) -> (i32, i32) {
    %c0_i32 = arith.constant 0 : i32
    %c0_i32_0 = arith.constant 0 : i32
    return %arg0, %c0_i32 : i32, i32
  }
  func.func @transform_1(%arg0: i32) -> (i32, i32) {
    %c0_i32 = arith.constant 0 : i32
    %c0_i32_0 = arith.constant 0 : i32
    return %arg0, %c0_i32 : i32, i32
  }
  func.func @transform_2(%arg0: i32) -> (i32, i32) {
    %c0_i32 = arith.constant 0 : i32
    %c0_i32_0 = arith.constant 0 : i32
    return %arg0, %c0_i32 : i32, i32
  }
  func.func @transform_3(%arg0: i32) -> (i32, i32) {
    %c0_i32 = arith.constant 0 : i32
    %c0_i32_0 = arith.constant 0 : i32
    %c0_i32_1 = arith.constant 0 : i32
    return %c0_i32, %c0_i32_0 : i32, i32
  }
  func.func @transform_4(%arg0: i32) -> (i32, i32) {
    %c0_i32 = arith.constant 0 : i32
    %c0_i32_0 = arith.constant 0 : i32
    %c0_i32_1 = arith.constant 0 : i32
    return %c0_i32, %c0_i32_0 : i32, i32
  }
  func.func @transform_5(%arg0: i32) -> (i32, i32) {
    %c0_i32 = arith.constant 0 : i32
    %c0_i32_0 = arith.constant 0 : i32
    %c0_i32_1 = arith.constant 0 : i32
    return %c0_i32, %c0_i32_0 : i32, i32
  }
  func.func @transform_6(%arg0: i32) -> (i32, i32) {
    %c0_i32 = arith.constant 0 : i32
    %c0_i32_0 = arith.constant 0 : i32
    %c0_i32_1 = arith.constant 0 : i32
    return %c0_i32, %c0_i32_0 : i32, i32
  }
  func.func @transform_7(%arg0: i32) -> (i32, i32) {
    %c0_i32 = arith.constant 0 : i32
    %c0_i32_0 = arith.constant 0 : i32
    %c0_i32_1 = arith.constant 0 : i32
    return %c0_i32, %c0_i32_0 : i32, i32
  }
  func.func @transform_8(%arg0: i32) -> (i32, i32) {
    %c0_i32 = arith.constant 0 : i32
    %c0_i32_0 = arith.constant 0 : i32
    %c0_i32_1 = arith.constant 0 : i32
    return %c0_i32, %c0_i32_0 : i32, i32
  }
  func.func @transform_9(%arg0: i32) -> (i32, i32) {
    %c0_i32 = arith.constant 0 : i32
    %c0_i32_0 = arith.constant 0 : i32
    %c0_i32_1 = arith.constant 0 : i32
    return %c0_i32, %c0_i32_0 : i32, i32
  }
  func.func @transform_10(%arg0: i32) -> (i32, i32) {
    %c0_i32 = arith.constant 0 : i32
    %c0_i32_0 = arith.constant 0 : i32
    %c0_i32_1 = arith.constant 0 : i32
    return %c0_i32, %c0_i32_0 : i32, i32
  }
  func.func @transform_11(%arg0: i32) -> (i32, i32) {
    %c0_i32 = arith.constant 0 : i32
    %c0_i32_0 = arith.constant 0 : i32
    %c0_i32_1 = arith.constant 0 : i32
    return %c0_i32, %c0_i32_0 : i32, i32
  }
  func.func @transform_12(%arg0: i32) -> (i32, i32) {
    %c0_i32 = arith.constant 0 : i32
    %c0_i32_0 = arith.constant 0 : i32
    %c0_i32_1 = arith.constant 0 : i32
    return %c0_i32, %c0_i32_0 : i32, i32
  }
  func.func @transform_13(%arg0: i32) -> (i32, i32) {
    %c0_i32 = arith.constant 0 : i32
    %c0_i32_0 = arith.constant 0 : i32
    %c0_i32_1 = arith.constant 0 : i32
    return %c0_i32, %c0_i32_0 : i32, i32
  }
  func.func @transform_14(%arg0: i32) -> (i32, i32) {
    %c0_i32 = arith.constant 0 : i32
    %c0_i32_0 = arith.constant 0 : i32
    %c0_i32_1 = arith.constant 0 : i32
    return %c0_i32, %c0_i32_0 : i32, i32
  }
  func.func @transform_15(%arg0: i32) -> (i32, i32) {
    %c0_i32 = arith.constant 0 : i32
    %c0_i32_0 = arith.constant 0 : i32
    %c0_i32_1 = arith.constant 0 : i32
    return %c0_i32, %c0_i32_0 : i32, i32
  }
  func.func @transform_16(%arg0: i32) -> (i32, i32) {
    %c0_i32 = arith.constant 0 : i32
    %c0_i32_0 = arith.constant 0 : i32
    %c0_i32_1 = arith.constant 0 : i32
    return %c0_i32, %c0_i32_0 : i32, i32
  }
  func.func @transform_17(%arg0: i32) -> (i32, i32) {
    %c0_i32 = arith.constant 0 : i32
    %c0_i32_0 = arith.constant 0 : i32
    %c0_i32_1 = arith.constant 0 : i32
    return %c0_i32, %c0_i32_0 : i32, i32
  }
  func.func @transform_18(%arg0: i32) -> (i32, i32) {
    %c0_i32 = arith.constant 0 : i32
    %c0_i32_0 = arith.constant 0 : i32
    %c0_i32_1 = arith.constant 0 : i32
    return %c0_i32, %c0_i32_0 : i32, i32
  }
  func.func @transform_19(%arg0: i32) -> (i32, i32) {
    %c0_i32 = arith.constant 0 : i32
    %c0_i32_0 = arith.constant 0 : i32
    %c0_i32_1 = arith.constant 0 : i32
    return %c0_i32, %c0_i32_0 : i32, i32
  }
  func.func @transform_20(%arg0: i32) -> (i32, i32) {
    %c0_i32 = arith.constant 0 : i32
    %c0_i32_0 = arith.constant 0 : i32
    %c0_i32_1 = arith.constant 0 : i32
    return %c0_i32, %c0_i32_0 : i32, i32
  }
  func.func @transform_21(%arg0: i32) -> (i32, i32) {
    %c0_i32 = arith.constant 0 : i32
    %c0_i32_0 = arith.constant 0 : i32
    return %arg0, %c0_i32 : i32, i32
  }
}

module attributes {stable_mosaic.version = 11 : i64} {
  func.func @_ffn1_qkv_kernel(%arg0: i32, %arg1: memref<16x128xf32, #tpu.memory_space<vmem>>, %arg2: memref<1x128xf32, #tpu.memory_space<vmem>>, %arg3: memref<1x128xf32, #tpu.memory_space<vmem>>, %arg4: memref<128x256xbf16, #tpu.memory_space<vmem>>, %arg5: memref<1x256xf32, #tpu.memory_space<vmem>>, %arg6: memref<256x128xbf16, #tpu.memory_space<vmem>>, %arg7: memref<1x128xf32, #tpu.memory_space<vmem>>, %arg8: memref<1x128xf32, #tpu.memory_space<vmem>>, %arg9: memref<1x128xf32, #tpu.memory_space<vmem>>, %arg10: memref<128x384xbf16, #tpu.memory_space<vmem>>, %arg11: memref<1x384xf32, #tpu.memory_space<vmem>>, %arg12: memref<16x128xf32, #tpu.memory_space<vmem>>, %arg13: memref<16x384xbf16, #tpu.memory_space<vmem>>) attributes {dimension_semantics = [#tpu.dimension_semantics<parallel>], iteration_bounds = array<i64: 2>, scalar_prefetch = 0 : i64, scratch_operands = 0 : i64, tpu.core_type = #tpu.core_type<tc>, window_params = [{transform_indices = @transform_0, window_bounds = array<i64: 16, 128>}, {pipeline_mode = #tpu.pipeline_mode<synchronous>, transform_indices = @transform_1, window_bounds = array<i64: 1, 128>}, {pipeline_mode = #tpu.pipeline_mode<synchronous>, transform_indices = @transform_2, window_bounds = array<i64: 1, 128>}, {pipeline_mode = #tpu.pipeline_mode<synchronous>, transform_indices = @transform_3, window_bounds = array<i64: 128, 256>}, {pipeline_mode = #tpu.pipeline_mode<synchronous>, transform_indices = @transform_4, window_bounds = array<i64: 1, 256>}, {pipeline_mode = #tpu.pipeline_mode<synchronous>, transform_indices = @transform_5, window_bounds = array<i64: 256, 128>}, {pipeline_mode = #tpu.pipeline_mode<synchronous>, transform_indices = @transform_6, window_bounds = array<i64: 1, 128>}, {pipeline_mode = #tpu.pipeline_mode<synchronous>, transform_indices = @transform_7, window_bounds = array<i64: 1, 128>}, {pipeline_mode = #tpu.pipeline_mode<synchronous>, transform_indices = @transform_8, window_bounds = array<i64: 1, 128>}, {pipeline_mode = #tpu.pipeline_mode<synchronous>, transform_indices = @transform_9, window_bounds = array<i64: 128, 384>}, {pipeline_mode = #tpu.pipeline_mode<synchronous>, transform_indices = @transform_10, window_bounds = array<i64: 1, 384>}, {transform_indices = @transform_11, window_bounds = array<i64: 16, 128>}, {transform_indices = @transform_12, window_bounds = array<i64: 16, 384>}]} {
    %c0 = arith.constant 0 : index
    %c0_0 = arith.constant 0 : index
    %0 = vector.load %arg1[%c0, %c0_0] : memref<16x128xf32, #tpu.memory_space<vmem>>, vector<16x128xf32>
    %c0_1 = arith.constant 0 : index
    %c0_2 = arith.constant 0 : index
    %1 = vector.load %arg2[%c0_1, %c0_2] : memref<1x128xf32, #tpu.memory_space<vmem>>, vector<1x128xf32>
    %c0_3 = arith.constant 0 : index
    %c0_4 = arith.constant 0 : index
    %2 = vector.load %arg3[%c0_3, %c0_4] : memref<1x128xf32, #tpu.memory_space<vmem>>, vector<1x128xf32>
    %cst = arith.constant dense<0.000000e+00> : vector<16xf32>
    %3 = vector.multi_reduction <add>, %0, %cst [1] : vector<16x128xf32> to vector<16xf32>
    %4 = vector.shape_cast %3 : vector<16xf32> to vector<16x1xf32>
    %cst_5 = arith.constant 1.250000e-02 : f32
    %5 = vector.broadcast %cst_5 : f32 to vector<16x1xf32>
    %6 = arith.mulf %4, %5 : vector<16x1xf32>
    %7 = tpu.iota {dimensions = array<i32: 1>} : vector<16x128xi32>
    %c80_i32 = arith.constant 80 : i32
    %8 = vector.broadcast %c80_i32 : i32 to vector<16x128xi32>
    %9 = arith.cmpi slt, %7, %8 : vector<16x128xi32>
    %10 = vector.broadcast %6 : vector<16x1xf32> to vector<16x128xf32>
    %11 = arith.subf %0, %10 : vector<16x128xf32>
    %cst_6 = arith.constant 0.000000e+00 : f32
    %12 = vector.broadcast %cst_6 : f32 to vector<16x128xf32>
    %13 = arith.select %9, %11, %12 : vector<16x128xi1>, vector<16x128xf32>
    %14 = arith.mulf %13, %13 : vector<16x128xf32>
    %cst_7 = arith.constant dense<0.000000e+00> : vector<16xf32>
    %15 = vector.multi_reduction <add>, %14, %cst_7 [1] : vector<16x128xf32> to vector<16xf32>
    %16 = vector.shape_cast %15 : vector<16xf32> to vector<16x1xf32>
    %cst_8 = arith.constant 1.250000e-02 : f32
    %17 = vector.broadcast %cst_8 : f32 to vector<16x1xf32>
    %18 = arith.mulf %16, %17 : vector<16x1xf32>
    %cst_9 = arith.constant 9.99999974E-6 : f32
    %19 = vector.broadcast %cst_9 : f32 to vector<16x1xf32>
    %20 = arith.addf %18, %19 : vector<16x1xf32>
    %21 = math.rsqrt %20 : vector<16x1xf32>
    %22 = vector.broadcast %21 : vector<16x1xf32> to vector<16x128xf32>
    %23 = arith.mulf %13, %22 : vector<16x128xf32>
    %24 = vector.broadcast %1 : vector<1x128xf32> to vector<16x128xf32>
    %25 = arith.mulf %23, %24 : vector<16x128xf32>
    %26 = vector.broadcast %2 : vector<1x128xf32> to vector<16x128xf32>
    %27 = arith.addf %25, %26 : vector<16x128xf32>
    %28 = arith.truncf %27 : vector<16x128xf32> to vector<16x128xbf16>
    %c0_10 = arith.constant 0 : index
    %c0_11 = arith.constant 0 : index
    %29 = vector.load %arg4[%c0_10, %c0_11] : memref<128x256xbf16, #tpu.memory_space<vmem>>, vector<128x256xbf16>
    %cst_12 = arith.constant dense<0.000000e+00> : vector<16x256xf32>
    %30 = tpu.matmul %28, %29, %cst_12 {dimension_numbers = #tpu.dot_dimension_numbers<[1], [0], [0], [1], [0, 0, 1, 1], [], []>} : vector<16x128xbf16>, vector<128x256xbf16>, vector<16x256xf32> -> vector<16x256xf32>
    %c0_13 = arith.constant 0 : index
    %c0_14 = arith.constant 0 : index
    %31 = vector.load %arg5[%c0_13, %c0_14] : memref<1x256xf32, #tpu.memory_space<vmem>>, vector<1x256xf32>
    %32 = vector.broadcast %31 : vector<1x256xf32> to vector<16x256xf32>
    %33 = arith.addf %30, %32 : vector<16x256xf32>
    %34 = arith.negf %33 : vector<16x256xf32>
    %35 = math.exp %34 : vector<16x256xf32>
    %cst_15 = arith.constant 1.000000e+00 : f32
    %36 = vector.broadcast %cst_15 : f32 to vector<16x256xf32>
    %37 = arith.addf %36, %35 : vector<16x256xf32>
    %38 = arith.divf %36, %37 : vector<16x256xf32>
    %39 = arith.mulf %33, %38 : vector<16x256xf32>
    %40 = arith.truncf %39 : vector<16x256xf32> to vector<16x256xbf16>
    %c0_16 = arith.constant 0 : index
    %c0_17 = arith.constant 0 : index
    %41 = vector.load %arg6[%c0_16, %c0_17] : memref<256x128xbf16, #tpu.memory_space<vmem>>, vector<256x128xbf16>
    %cst_18 = arith.constant dense<0.000000e+00> : vector<16x128xf32>
    %42 = tpu.matmul %40, %41, %cst_18 {dimension_numbers = #tpu.dot_dimension_numbers<[1], [0], [0], [1], [0, 0, 1, 1], [], []>} : vector<16x256xbf16>, vector<256x128xbf16>, vector<16x128xf32> -> vector<16x128xf32>
    %c0_19 = arith.constant 0 : index
    %c0_20 = arith.constant 0 : index
    %43 = vector.load %arg7[%c0_19, %c0_20] : memref<1x128xf32, #tpu.memory_space<vmem>>, vector<1x128xf32>
    %44 = vector.broadcast %43 : vector<1x128xf32> to vector<16x128xf32>
    %45 = arith.addf %42, %44 : vector<16x128xf32>
    %cst_21 = arith.constant 5.000000e-01 : f32
    %46 = vector.broadcast %cst_21 : f32 to vector<16x128xf32>
    %47 = arith.mulf %46, %45 : vector<16x128xf32>
    %48 = arith.addf %0, %47 : vector<16x128xf32>
    %c0_22 = arith.constant 0 : index
    %c0_23 = arith.constant 0 : index
    %49 = vector.load %arg12[%c0_22, %c0_23] : memref<16x128xf32, #tpu.memory_space<vmem>>, vector<16x128xf32>
    tpu.vector_store %arg12[%c0_22, %c0_23], %48 {strides = array<i32>} : memref<16x128xf32, #tpu.memory_space<vmem>>, vector<16x128xf32>,
    %c0_24 = arith.constant 0 : index
    %c0_25 = arith.constant 0 : index
    %50 = vector.load %arg8[%c0_24, %c0_25] : memref<1x128xf32, #tpu.memory_space<vmem>>, vector<1x128xf32>
    %c0_26 = arith.constant 0 : index
    %c0_27 = arith.constant 0 : index
    %51 = vector.load %arg9[%c0_26, %c0_27] : memref<1x128xf32, #tpu.memory_space<vmem>>, vector<1x128xf32>
    %cst_28 = arith.constant dense<0.000000e+00> : vector<16xf32>
    %52 = vector.multi_reduction <add>, %48, %cst_28 [1] : vector<16x128xf32> to vector<16xf32>
    %53 = vector.shape_cast %52 : vector<16xf32> to vector<16x1xf32>
    %cst_29 = arith.constant 1.250000e-02 : f32
    %54 = vector.broadcast %cst_29 : f32 to vector<16x1xf32>
    %55 = arith.mulf %53, %54 : vector<16x1xf32>
    %56 = tpu.iota {dimensions = array<i32: 1>} : vector<16x128xi32>
    %c80_i32_30 = arith.constant 80 : i32
    %57 = vector.broadcast %c80_i32_30 : i32 to vector<16x128xi32>
    %58 = arith.cmpi slt, %56, %57 : vector<16x128xi32>
    %59 = vector.broadcast %55 : vector<16x1xf32> to vector<16x128xf32>
    %60 = arith.subf %48, %59 : vector<16x128xf32>
    %cst_31 = arith.constant 0.000000e+00 : f32
    %61 = vector.broadcast %cst_31 : f32 to vector<16x128xf32>
    %62 = arith.select %58, %60, %61 : vector<16x128xi1>, vector<16x128xf32>
    %63 = arith.mulf %62, %62 : vector<16x128xf32>
    %cst_32 = arith.constant dense<0.000000e+00> : vector<16xf32>
    %64 = vector.multi_reduction <add>, %63, %cst_32 [1] : vector<16x128xf32> to vector<16xf32>
    %65 = vector.shape_cast %64 : vector<16xf32> to vector<16x1xf32>
    %cst_33 = arith.constant 1.250000e-02 : f32
    %66 = vector.broadcast %cst_33 : f32 to vector<16x1xf32>
    %67 = arith.mulf %65, %66 : vector<16x1xf32>
    %cst_34 = arith.constant 9.99999974E-6 : f32
    %68 = vector.broadcast %cst_34 : f32 to vector<16x1xf32>
    %69 = arith.addf %67, %68 : vector<16x1xf32>
    %70 = math.rsqrt %69 : vector<16x1xf32>
    %71 = vector.broadcast %70 : vector<16x1xf32> to vector<16x128xf32>
    %72 = arith.mulf %62, %71 : vector<16x128xf32>
    %73 = vector.broadcast %50 : vector<1x128xf32> to vector<16x128xf32>
    %74 = arith.mulf %72, %73 : vector<16x128xf32>
    %75 = vector.broadcast %51 : vector<1x128xf32> to vector<16x128xf32>
    %76 = arith.addf %74, %75 : vector<16x128xf32>
    %77 = arith.truncf %76 : vector<16x128xf32> to vector<16x128xbf16>
    %c0_35 = arith.constant 0 : index
    %c0_36 = arith.constant 0 : index
    %78 = vector.load %arg10[%c0_35, %c0_36] : memref<128x384xbf16, #tpu.memory_space<vmem>>, vector<128x384xbf16>
    %cst_37 = arith.constant dense<0.000000e+00> : vector<16x384xf32>
    %79 = tpu.matmul %77, %78, %cst_37 {dimension_numbers = #tpu.dot_dimension_numbers<[1], [0], [0], [1], [0, 0, 1, 1], [], []>} : vector<16x128xbf16>, vector<128x384xbf16>, vector<16x384xf32> -> vector<16x384xf32>
    %c0_38 = arith.constant 0 : index
    %c0_39 = arith.constant 0 : index
    %80 = vector.load %arg11[%c0_38, %c0_39] : memref<1x384xf32, #tpu.memory_space<vmem>>, vector<1x384xf32>
    %81 = vector.broadcast %80 : vector<1x384xf32> to vector<16x384xf32>
    %82 = arith.addf %79, %81 : vector<16x384xf32>
    %83 = arith.truncf %82 : vector<16x384xf32> to vector<16x384xbf16>
    %c0_40 = arith.constant 0 : index
    %c0_41 = arith.constant 0 : index
    %84 = vector.load %arg13[%c0_40, %c0_41] : memref<16x384xbf16, #tpu.memory_space<vmem>>, vector<16x384xbf16>
    tpu.vector_store %arg13[%c0_40, %c0_41], %83 {strides = array<i32>} : memref<16x384xbf16, #tpu.memory_space<vmem>>, vector<16x384xbf16>,
    return
  }
  func.func @transform_0(%arg0: i32) -> (i32, i32) {
    %c0_i32 = arith.constant 0 : i32
    %c0_i32_0 = arith.constant 0 : i32
    return %arg0, %c0_i32 : i32, i32
  }
  func.func @transform_1(%arg0: i32) -> (i32, i32) {
    %c0_i32 = arith.constant 0 : i32
    %c0_i32_0 = arith.constant 0 : i32
    %c0_i32_1 = arith.constant 0 : i32
    return %c0_i32, %c0_i32_0 : i32, i32
  }
  func.func @transform_2(%arg0: i32) -> (i32, i32) {
    %c0_i32 = arith.constant 0 : i32
    %c0_i32_0 = arith.constant 0 : i32
    %c0_i32_1 = arith.constant 0 : i32
    return %c0_i32, %c0_i32_0 : i32, i32
  }
  func.func @transform_3(%arg0: i32) -> (i32, i32) {
    %c0_i32 = arith.constant 0 : i32
    %c0_i32_0 = arith.constant 0 : i32
    %c0_i32_1 = arith.constant 0 : i32
    return %c0_i32, %c0_i32_0 : i32, i32
  }
  func.func @transform_4(%arg0: i32) -> (i32, i32) {
    %c0_i32 = arith.constant 0 : i32
    %c0_i32_0 = arith.constant 0 : i32
    %c0_i32_1 = arith.constant 0 : i32
    return %c0_i32, %c0_i32_0 : i32, i32
  }
  func.func @transform_5(%arg0: i32) -> (i32, i32) {
    %c0_i32 = arith.constant 0 : i32
    %c0_i32_0 = arith.constant 0 : i32
    %c0_i32_1 = arith.constant 0 : i32
    return %c0_i32, %c0_i32_0 : i32, i32
  }
  func.func @transform_6(%arg0: i32) -> (i32, i32) {
    %c0_i32 = arith.constant 0 : i32
    %c0_i32_0 = arith.constant 0 : i32
    %c0_i32_1 = arith.constant 0 : i32
    return %c0_i32, %c0_i32_0 : i32, i32
  }
  func.func @transform_7(%arg0: i32) -> (i32, i32) {
    %c0_i32 = arith.constant 0 : i32
    %c0_i32_0 = arith.constant 0 : i32
    %c0_i32_1 = arith.constant 0 : i32
    return %c0_i32, %c0_i32_0 : i32, i32
  }
  func.func @transform_8(%arg0: i32) -> (i32, i32) {
    %c0_i32 = arith.constant 0 : i32
    %c0_i32_0 = arith.constant 0 : i32
    %c0_i32_1 = arith.constant 0 : i32
    return %c0_i32, %c0_i32_0 : i32, i32
  }
  func.func @transform_9(%arg0: i32) -> (i32, i32) {
    %c0_i32 = arith.constant 0 : i32
    %c0_i32_0 = arith.constant 0 : i32
    %c0_i32_1 = arith.constant 0 : i32
    return %c0_i32, %c0_i32_0 : i32, i32
  }
  func.func @transform_10(%arg0: i32) -> (i32, i32) {
    %c0_i32 = arith.constant 0 : i32
    %c0_i32_0 = arith.constant 0 : i32
    %c0_i32_1 = arith.constant 0 : i32
    return %c0_i32, %c0_i32_0 : i32, i32
  }
  func.func @transform_11(%arg0: i32) -> (i32, i32) {
    %c0_i32 = arith.constant 0 : i32
    %c0_i32_0 = arith.constant 0 : i32
    return %arg0, %c0_i32 : i32, i32
  }
  func.func @transform_12(%arg0: i32) -> (i32, i32) {
    %c0_i32 = arith.constant 0 : i32
    %c0_i32_0 = arith.constant 0 : i32
    return %arg0, %c0_i32 : i32, i32
  }
}

module attributes {stable_mosaic.version = 11 : i64} {
  func.func @_conv_ffn2_kernel(%arg0: i32, %arg1: memref<16x128xf32, #tpu.memory_space<vmem>>, %arg2: memref<16x128xbf16, #tpu.memory_space<vmem>>, %arg3: memref<16x1xi32, #tpu.memory_space<vmem>>, %arg4: memref<128x128xbf16, #tpu.memory_space<vmem>>, %arg5: memref<1x128xf32, #tpu.memory_space<vmem>>, %arg6: memref<1x128xf32, #tpu.memory_space<vmem>>, %arg7: memref<1x128xf32, #tpu.memory_space<vmem>>, %arg8: memref<128x256xbf16, #tpu.memory_space<vmem>>, %arg9: memref<1x256xf32, #tpu.memory_space<vmem>>, %arg10: memref<31x128xf32, #tpu.memory_space<vmem>>, %arg11: memref<1x128xf32, #tpu.memory_space<vmem>>, %arg12: memref<128x128xbf16, #tpu.memory_space<vmem>>, %arg13: memref<1x128xf32, #tpu.memory_space<vmem>>, %arg14: memref<1x128xf32, #tpu.memory_space<vmem>>, %arg15: memref<1x128xf32, #tpu.memory_space<vmem>>, %arg16: memref<128x256xbf16, #tpu.memory_space<vmem>>, %arg17: memref<1x256xf32, #tpu.memory_space<vmem>>, %arg18: memref<256x128xbf16, #tpu.memory_space<vmem>>, %arg19: memref<1x128xf32, #tpu.memory_space<vmem>>, %arg20: memref<1x128xf32, #tpu.memory_space<vmem>>, %arg21: memref<1x128xf32, #tpu.memory_space<vmem>>, %arg22: memref<16x128xf32, #tpu.memory_space<vmem>>, %arg23: memref<48x128xf32, #tpu.memory_space<vmem>>) attributes {dimension_semantics = [#tpu.dimension_semantics<parallel>], iteration_bounds = array<i64: 2>, scalar_prefetch = 0 : i64, scratch_operands = 1 : i64, tpu.core_type = #tpu.core_type<tc>, window_params = [{transform_indices = @transform_0, window_bounds = array<i64: 16, 128>}, {transform_indices = @transform_1, window_bounds = array<i64: 16, 128>}, {transform_indices = @transform_2, window_bounds = array<i64: 16, 1>}, {pipeline_mode = #tpu.pipeline_mode<synchronous>, transform_indices = @transform_3, window_bounds = array<i64: 128, 128>}, {pipeline_mode = #tpu.pipeline_mode<synchronous>, transform_indices = @transform_4, window_bounds = array<i64: 1, 128>}, {pipeline_mode = #tpu.pipeline_mode<synchronous>, transform_indices = @transform_5, window_bounds = array<i64: 1, 128>}, {pipeline_mode = #tpu.pipeline_mode<synchronous>, transform_indices = @transform_6, window_bounds = array<i64: 1, 128>}, {pipeline_mode = #tpu.pipeline_mode<synchronous>, transform_indices = @transform_7, window_bounds = array<i64: 128, 256>}, {pipeline_mode = #tpu.pipeline_mode<synchronous>, transform_indices = @transform_8, window_bounds = array<i64: 1, 256>}, {pipeline_mode = #tpu.pipeline_mode<synchronous>, transform_indices = @transform_9, window_bounds = array<i64: 31, 128>}, {pipeline_mode = #tpu.pipeline_mode<synchronous>, transform_indices = @transform_10, window_bounds = array<i64: 1, 128>}, {pipeline_mode = #tpu.pipeline_mode<synchronous>, transform_indices = @transform_11, window_bounds = array<i64: 128, 128>}, {pipeline_mode = #tpu.pipeline_mode<synchronous>, transform_indices = @transform_12, window_bounds = array<i64: 1, 128>}, {pipeline_mode = #tpu.pipeline_mode<synchronous>, transform_indices = @transform_13, window_bounds = array<i64: 1, 128>}, {pipeline_mode = #tpu.pipeline_mode<synchronous>, transform_indices = @transform_14, window_bounds = array<i64: 1, 128>}, {pipeline_mode = #tpu.pipeline_mode<synchronous>, transform_indices = @transform_15, window_bounds = array<i64: 128, 256>}, {pipeline_mode = #tpu.pipeline_mode<synchronous>, transform_indices = @transform_16, window_bounds = array<i64: 1, 256>}, {pipeline_mode = #tpu.pipeline_mode<synchronous>, transform_indices = @transform_17, window_bounds = array<i64: 256, 128>}, {pipeline_mode = #tpu.pipeline_mode<synchronous>, transform_indices = @transform_18, window_bounds = array<i64: 1, 128>}, {pipeline_mode = #tpu.pipeline_mode<synchronous>, transform_indices = @transform_19, window_bounds = array<i64: 1, 128>}, {pipeline_mode = #tpu.pipeline_mode<synchronous>, transform_indices = @transform_20, window_bounds = array<i64: 1, 128>}, {transform_indices = @transform_21, window_bounds = array<i64: 16, 128>}]} {
    %c0 = arith.constant 0 : index
    %c0_0 = arith.constant 0 : index
    %0 = vector.load %arg1[%c0, %c0_0] : memref<16x128xf32, #tpu.memory_space<vmem>>, vector<16x128xf32>
    %c0_1 = arith.constant 0 : index
    %c0_2 = arith.constant 0 : index
    %1 = vector.load %arg2[%c0_1, %c0_2] : memref<16x128xbf16, #tpu.memory_space<vmem>>, vector<16x128xbf16>
    %c0_3 = arith.constant 0 : index
    %c0_4 = arith.constant 0 : index
    %2 = vector.load %arg4[%c0_3, %c0_4] : memref<128x128xbf16, #tpu.memory_space<vmem>>, vector<128x128xbf16>
    %cst = arith.constant dense<0.000000e+00> : vector<16x128xf32>
    %3 = tpu.matmul %1, %2, %cst {dimension_numbers = #tpu.dot_dimension_numbers<[1], [0], [0], [1], [0, 0, 1, 1], [], []>} : vector<16x128xbf16>, vector<128x128xbf16>, vector<16x128xf32> -> vector<16x128xf32>
    %4 = arith.addf %0, %3 : vector<16x128xf32>
    %c0_5 = arith.constant 0 : index
    %c0_6 = arith.constant 0 : index
    %5 = vector.load %arg5[%c0_5, %c0_6] : memref<1x128xf32, #tpu.memory_space<vmem>>, vector<1x128xf32>
    %6 = vector.broadcast %5 : vector<1x128xf32> to vector<16x128xf32>
    %7 = arith.addf %4, %6 : vector<16x128xf32>
    %c0_7 = arith.constant 0 : index
    %c0_8 = arith.constant 0 : index
    %8 = vector.load %arg6[%c0_7, %c0_8] : memref<1x128xf32, #tpu.memory_space<vmem>>, vector<1x128xf32>
    %c0_9 = arith.constant 0 : index
    %c0_10 = arith.constant 0 : index
    %9 = vector.load %arg7[%c0_9, %c0_10] : memref<1x128xf32, #tpu.memory_space<vmem>>, vector<1x128xf32>
    %cst_11 = arith.constant dense<0.000000e+00> : vector<16xf32>
    %10 = vector.multi_reduction <add>, %7, %cst_11 [1] : vector<16x128xf32> to vector<16xf32>
    %11 = vector.shape_cast %10 : vector<16xf32> to vector<16x1xf32>
    %cst_12 = arith.constant 1.250000e-02 : f32
    %12 = vector.broadcast %cst_12 : f32 to vector<16x1xf32>
    %13 = arith.mulf %11, %12 : vector<16x1xf32>
    %14 = tpu.iota {dimensions = array<i32: 1>} : vector<16x128xi32>
    %c80_i32 = arith.constant 80 : i32
    %15 = vector.broadcast %c80_i32 : i32 to vector<16x128xi32>
    %16 = arith.cmpi slt, %14, %15 : vector<16x128xi32>
    %17 = vector.broadcast %13 : vector<16x1xf32> to vector<16x128xf32>
    %18 = arith.subf %7, %17 : vector<16x128xf32>
    %cst_13 = arith.constant 0.000000e+00 : f32
    %19 = vector.broadcast %cst_13 : f32 to vector<16x128xf32>
    %20 = arith.select %16, %18, %19 : vector<16x128xi1>, vector<16x128xf32>
    %21 = arith.mulf %20, %20 : vector<16x128xf32>
    %cst_14 = arith.constant dense<0.000000e+00> : vector<16xf32>
    %22 = vector.multi_reduction <add>, %21, %cst_14 [1] : vector<16x128xf32> to vector<16xf32>
    %23 = vector.shape_cast %22 : vector<16xf32> to vector<16x1xf32>
    %cst_15 = arith.constant 1.250000e-02 : f32
    %24 = vector.broadcast %cst_15 : f32 to vector<16x1xf32>
    %25 = arith.mulf %23, %24 : vector<16x1xf32>
    %cst_16 = arith.constant 9.99999974E-6 : f32
    %26 = vector.broadcast %cst_16 : f32 to vector<16x1xf32>
    %27 = arith.addf %25, %26 : vector<16x1xf32>
    %28 = math.rsqrt %27 : vector<16x1xf32>
    %29 = vector.broadcast %28 : vector<16x1xf32> to vector<16x128xf32>
    %30 = arith.mulf %20, %29 : vector<16x128xf32>
    %31 = vector.broadcast %8 : vector<1x128xf32> to vector<16x128xf32>
    %32 = arith.mulf %30, %31 : vector<16x128xf32>
    %33 = vector.broadcast %9 : vector<1x128xf32> to vector<16x128xf32>
    %34 = arith.addf %32, %33 : vector<16x128xf32>
    %35 = arith.truncf %34 : vector<16x128xf32> to vector<16x128xbf16>
    %c0_17 = arith.constant 0 : index
    %c0_18 = arith.constant 0 : index
    %36 = vector.load %arg8[%c0_17, %c0_18] : memref<128x256xbf16, #tpu.memory_space<vmem>>, vector<128x256xbf16>
    %cst_19 = arith.constant dense<0.000000e+00> : vector<16x256xf32>
    %37 = tpu.matmul %35, %36, %cst_19 {dimension_numbers = #tpu.dot_dimension_numbers<[1], [0], [0], [1], [0, 0, 1, 1], [], []>} : vector<16x128xbf16>, vector<128x256xbf16>, vector<16x256xf32> -> vector<16x256xf32>
    %c0_20 = arith.constant 0 : index
    %c0_21 = arith.constant 0 : index
    %38 = vector.load %arg9[%c0_20, %c0_21] : memref<1x256xf32, #tpu.memory_space<vmem>>, vector<1x256xf32>
    %39 = vector.broadcast %38 : vector<1x256xf32> to vector<16x256xf32>
    %40 = arith.addf %37, %39 : vector<16x256xf32>
    %41 = vector.extract_strided_slice %40 {offsets = [0, 0], sizes = [16, 128], strides = [1, 1]} : vector<16x256xf32> to vector<16x128xf32>
    %42 = vector.extract_strided_slice %40 {offsets = [0, 128], sizes = [16, 128], strides = [1, 1]} : vector<16x256xf32> to vector<16x128xf32>
    %43 = arith.negf %42 : vector<16x128xf32>
    %44 = math.exp %43 : vector<16x128xf32>
    %cst_22 = arith.constant 1.000000e+00 : f32
    %45 = vector.broadcast %cst_22 : f32 to vector<16x128xf32>
    %46 = arith.addf %45, %44 : vector<16x128xf32>
    %47 = arith.divf %45, %46 : vector<16x128xf32>
    %48 = arith.mulf %41, %47 : vector<16x128xf32>
    %cst_23 = arith.constant 0.000000e+00 : f32
    %49 = vector.broadcast %cst_23 : f32 to vector<16x128xf32>
    %c0_24 = arith.constant 0 : index
    %c0_25 = arith.constant 0 : index
    %50 = vector.load %arg23[%c0_24, %c0_25] : memref<48x128xf32, #tpu.memory_space<vmem>>, vector<16x128xf32>
    tpu.vector_store %arg23[%c0_24, %c0_25], %49 {strides = array<i32>} : memref<48x128xf32, #tpu.memory_space<vmem>>, vector<16x128xf32>,
    %cst_26 = arith.constant 0.000000e+00 : f32
    %51 = vector.broadcast %cst_26 : f32 to vector<16x128xf32>
    %c32 = arith.constant 32 : index
    %c0_27 = arith.constant 0 : index
    %52 = vector.load %arg23[%c32, %c0_27] : memref<48x128xf32, #tpu.memory_space<vmem>>, vector<16x128xf32>
    tpu.vector_store %arg23[%c32, %c0_27], %51 {strides = array<i32>} : memref<48x128xf32, #tpu.memory_space<vmem>>, vector<16x128xf32>,
    %c16 = arith.constant 16 : index
    %c0_28 = arith.constant 0 : index
    %53 = vector.load %arg23[%c16, %c0_28] : memref<48x128xf32, #tpu.memory_space<vmem>>, vector<16x128xf32>
    tpu.vector_store %arg23[%c16, %c0_28], %48 {strides = array<i32>} : memref<48x128xf32, #tpu.memory_space<vmem>>, vector<16x128xf32>,
    %c0_29 = arith.constant 0 : index
    %c0_30 = arith.constant 0 : index
    %54 = vector.load %arg3[%c0_29, %c0_30] : memref<16x1xi32, #tpu.memory_space<vmem>>, vector<16x1xi32>
    %c0_31 = arith.constant 0 : index
    %c0_32 = arith.constant 0 : index
    %55 = vector.load %arg10[%c0_31, %c0_32] : memref<31x128xf32, #tpu.memory_space<vmem>>, vector<31x128xf32>
    %cst_33 = arith.constant 0.000000e+00 : f32
    %56 = vector.broadcast %cst_33 : f32 to vector<16x128xf32>
    %c15 = arith.constant 15 : index
    %c0_34 = arith.constant 0 : index
    %57 = vector.load %arg23[%c15, %c0_34] : memref<48x128xf32, #tpu.memory_space<vmem>>, vector<16x128xf32>
    %c-1_i32 = arith.constant -1 : i32
    %58 = vector.broadcast %c-1_i32 : i32 to vector<16x1xi32>
    %59 = arith.addi %54, %58 : vector<16x1xi32>
    %c0_i32 = arith.constant 0 : i32
    %60 = vector.broadcast %c0_i32 : i32 to vector<16x1xi32>
    %61 = arith.cmpi sge, %59, %60 : vector<16x1xi32>
    %c-1_i32_35 = arith.constant -1 : i32
    %62 = vector.broadcast %c-1_i32_35 : i32 to vector<16x1xi32>
    %63 = arith.addi %54, %62 : vector<16x1xi32>
    %c2_i32 = arith.constant 2 : i32
    %64 = vector.broadcast %c2_i32 : i32 to vector<16x1xi32>
    %65 = arith.cmpi slt, %63, %64 : vector<16x1xi32>
    %66 = arith.andi %61, %65 : vector<16x1xi1>
    %cst_36 = arith.constant 0.000000e+00 : f32
    %67 = vector.shape_cast %66 : vector<16x1xi1> to vector<16x1xi1>
    %68 = vector.broadcast %67 : vector<16x1xi1> to vector<16x128xi1>
    %69 = vector.broadcast %cst_36 : f32 to vector<16x128xf32>
    %70 = arith.select %68, %57, %69 : vector<16x128xi1>, vector<16x128xf32>
    %71 = vector.extract_strided_slice %55 {offsets = [14, 0], sizes = [1, 128], strides = [1, 1]} : vector<31x128xf32> to vector<1x128xf32>
    %72 = vector.shape_cast %71 : vector<1x128xf32> to vector<128xf32>
    %73 = vector.shape_cast %72 : vector<128xf32> to vector<1x128xf32>
    %74 = vector.broadcast %73 : vector<1x128xf32> to vector<16x128xf32>
    %75 = arith.mulf %70, %74 : vector<16x128xf32>
    %76 = arith.addf %56, %75 : vector<16x128xf32>
    %c16_37 = arith.constant 16 : index
    %c0_38 = arith.constant 0 : index
    %77 = vector.load %arg23[%c16_37, %c0_38] : memref<48x128xf32, #tpu.memory_space<vmem>>, vector<16x128xf32>
    %c0_i32_39 = arith.constant 0 : i32
    %78 = vector.broadcast %c0_i32_39 : i32 to vector<16x1xi32>
    %79 = arith.addi %54, %78 : vector<16x1xi32>
    %c0_i32_40 = arith.constant 0 : i32
    %80 = vector.broadcast %c0_i32_40 : i32 to vector<16x1xi32>
    %81 = arith.cmpi sge, %79, %80 : vector<16x1xi32>
    %c0_i32_41 = arith.constant 0 : i32
    %82 = vector.broadcast %c0_i32_41 : i32 to vector<16x1xi32>
    %83 = arith.addi %54, %82 : vector<16x1xi32>
    %c2_i32_42 = arith.constant 2 : i32
    %84 = vector.broadcast %c2_i32_42 : i32 to vector<16x1xi32>
    %85 = arith.cmpi slt, %83, %84 : vector<16x1xi32>
    %86 = arith.andi %81, %85 : vector<16x1xi1>
    %cst_43 = arith.constant 0.000000e+00 : f32
    %87 = vector.shape_cast %86 : vector<16x1xi1> to vector<16x1xi1>
    %88 = vector.broadcast %87 : vector<16x1xi1> to vector<16x128xi1>
    %89 = vector.broadcast %cst_43 : f32 to vector<16x128xf32>
    %90 = arith.select %88, %77, %89 : vector<16x128xi1>, vector<16x128xf32>
    %91 = vector.extract_strided_slice %55 {offsets = [15, 0], sizes = [1, 128], strides = [1, 1]} : vector<31x128xf32> to vector<1x128xf32>
    %92 = vector.shape_cast %91 : vector<1x128xf32> to vector<128xf32>
    %93 = vector.shape_cast %92 : vector<128xf32> to vector<1x128xf32>
    %94 = vector.broadcast %93 : vector<1x128xf32> to vector<16x128xf32>
    %95 = arith.mulf %90, %94 : vector<16x128xf32>
    %96 = arith.addf %76, %95 : vector<16x128xf32>
    %c17 = arith.constant 17 : index
    %c0_44 = arith.constant 0 : index
    %97 = vector.load %arg23[%c17, %c0_44] : memref<48x128xf32, #tpu.memory_space<vmem>>, vector<16x128xf32>
    %c1_i32 = arith.constant 1 : i32
    %98 = vector.broadcast %c1_i32 : i32 to vector<16x1xi32>
    %99 = arith.addi %54, %98 : vector<16x1xi32>
    %c0_i32_45 = arith.constant 0 : i32
    %100 = vector.broadcast %c0_i32_45 : i32 to vector<16x1xi32>
    %101 = arith.cmpi sge, %99, %100 : vector<16x1xi32>
    %c1_i32_46 = arith.constant 1 : i32
    %102 = vector.broadcast %c1_i32_46 : i32 to vector<16x1xi32>
    %103 = arith.addi %54, %102 : vector<16x1xi32>
    %c2_i32_47 = arith.constant 2 : i32
    %104 = vector.broadcast %c2_i32_47 : i32 to vector<16x1xi32>
    %105 = arith.cmpi slt, %103, %104 : vector<16x1xi32>
    %106 = arith.andi %101, %105 : vector<16x1xi1>
    %cst_48 = arith.constant 0.000000e+00 : f32
    %107 = vector.shape_cast %106 : vector<16x1xi1> to vector<16x1xi1>
    %108 = vector.broadcast %107 : vector<16x1xi1> to vector<16x128xi1>
    %109 = vector.broadcast %cst_48 : f32 to vector<16x128xf32>
    %110 = arith.select %108, %97, %109 : vector<16x128xi1>, vector<16x128xf32>
    %111 = vector.extract_strided_slice %55 {offsets = [16, 0], sizes = [1, 128], strides = [1, 1]} : vector<31x128xf32> to vector<1x128xf32>
    %112 = vector.shape_cast %111 : vector<1x128xf32> to vector<128xf32>
    %113 = vector.shape_cast %112 : vector<128xf32> to vector<1x128xf32>
    %114 = vector.broadcast %113 : vector<1x128xf32> to vector<16x128xf32>
    %115 = arith.mulf %110, %114 : vector<16x128xf32>
    %116 = arith.addf %96, %115 : vector<16x128xf32>
    %c0_49 = arith.constant 0 : index
    %c0_50 = arith.constant 0 : index
    %117 = vector.load %arg11[%c0_49, %c0_50] : memref<1x128xf32, #tpu.memory_space<vmem>>, vector<1x128xf32>
    %118 = vector.broadcast %117 : vector<1x128xf32> to vector<16x128xf32>
    %119 = arith.addf %116, %118 : vector<16x128xf32>
    %cst_51 = arith.constant 0.999994993 : f32
    %120 = vector.broadcast %cst_51 : f32 to vector<16x128xf32>
    %121 = arith.mulf %119, %120 : vector<16x128xf32>
    %122 = arith.negf %121 : vector<16x128xf32>
    %123 = math.exp %122 : vector<16x128xf32>
    %cst_52 = arith.constant 1.000000e+00 : f32
    %124 = vector.broadcast %cst_52 : f32 to vector<16x128xf32>
    %125 = arith.addf %124, %123 : vector<16x128xf32>
    %126 = arith.divf %124, %125 : vector<16x128xf32>
    %127 = arith.mulf %121, %126 : vector<16x128xf32>
    %128 = arith.truncf %127 : vector<16x128xf32> to vector<16x128xbf16>
    %c0_53 = arith.constant 0 : index
    %c0_54 = arith.constant 0 : index
    %129 = vector.load %arg12[%c0_53, %c0_54] : memref<128x128xbf16, #tpu.memory_space<vmem>>, vector<128x128xbf16>
    %cst_55 = arith.constant dense<0.000000e+00> : vector<16x128xf32>
    %130 = tpu.matmul %128, %129, %cst_55 {dimension_numbers = #tpu.dot_dimension_numbers<[1], [0], [0], [1], [0, 0, 1, 1], [], []>} : vector<16x128xbf16>, vector<128x128xbf16>, vector<16x128xf32> -> vector<16x128xf32>
    %131 = arith.addf %7, %130 : vector<16x128xf32>
    %c0_56 = arith.constant 0 : index
    %c0_57 = arith.constant 0 : index
    %132 = vector.load %arg13[%c0_56, %c0_57] : memref<1x128xf32, #tpu.memory_space<vmem>>, vector<1x128xf32>
    %133 = vector.broadcast %132 : vector<1x128xf32> to vector<16x128xf32>
    %134 = arith.addf %131, %133 : vector<16x128xf32>
    %c0_58 = arith.constant 0 : index
    %c0_59 = arith.constant 0 : index
    %135 = vector.load %arg14[%c0_58, %c0_59] : memref<1x128xf32, #tpu.memory_space<vmem>>, vector<1x128xf32>
    %c0_60 = arith.constant 0 : index
    %c0_61 = arith.constant 0 : index
    %136 = vector.load %arg15[%c0_60, %c0_61] : memref<1x128xf32, #tpu.memory_space<vmem>>, vector<1x128xf32>
    %cst_62 = arith.constant dense<0.000000e+00> : vector<16xf32>
    %137 = vector.multi_reduction <add>, %134, %cst_62 [1] : vector<16x128xf32> to vector<16xf32>
    %138 = vector.shape_cast %137 : vector<16xf32> to vector<16x1xf32>
    %cst_63 = arith.constant 1.250000e-02 : f32
    %139 = vector.broadcast %cst_63 : f32 to vector<16x1xf32>
    %140 = arith.mulf %138, %139 : vector<16x1xf32>
    %141 = tpu.iota {dimensions = array<i32: 1>} : vector<16x128xi32>
    %c80_i32_64 = arith.constant 80 : i32
    %142 = vector.broadcast %c80_i32_64 : i32 to vector<16x128xi32>
    %143 = arith.cmpi slt, %141, %142 : vector<16x128xi32>
    %144 = vector.broadcast %140 : vector<16x1xf32> to vector<16x128xf32>
    %145 = arith.subf %134, %144 : vector<16x128xf32>
    %cst_65 = arith.constant 0.000000e+00 : f32
    %146 = vector.broadcast %cst_65 : f32 to vector<16x128xf32>
    %147 = arith.select %143, %145, %146 : vector<16x128xi1>, vector<16x128xf32>
    %148 = arith.mulf %147, %147 : vector<16x128xf32>
    %cst_66 = arith.constant dense<0.000000e+00> : vector<16xf32>
    %149 = vector.multi_reduction <add>, %148, %cst_66 [1] : vector<16x128xf32> to vector<16xf32>
    %150 = vector.shape_cast %149 : vector<16xf32> to vector<16x1xf32>
    %cst_67 = arith.constant 1.250000e-02 : f32
    %151 = vector.broadcast %cst_67 : f32 to vector<16x1xf32>
    %152 = arith.mulf %150, %151 : vector<16x1xf32>
    %cst_68 = arith.constant 9.99999974E-6 : f32
    %153 = vector.broadcast %cst_68 : f32 to vector<16x1xf32>
    %154 = arith.addf %152, %153 : vector<16x1xf32>
    %155 = math.rsqrt %154 : vector<16x1xf32>
    %156 = vector.broadcast %155 : vector<16x1xf32> to vector<16x128xf32>
    %157 = arith.mulf %147, %156 : vector<16x128xf32>
    %158 = vector.broadcast %135 : vector<1x128xf32> to vector<16x128xf32>
    %159 = arith.mulf %157, %158 : vector<16x128xf32>
    %160 = vector.broadcast %136 : vector<1x128xf32> to vector<16x128xf32>
    %161 = arith.addf %159, %160 : vector<16x128xf32>
    %162 = arith.truncf %161 : vector<16x128xf32> to vector<16x128xbf16>
    %c0_69 = arith.constant 0 : index
    %c0_70 = arith.constant 0 : index
    %163 = vector.load %arg16[%c0_69, %c0_70] : memref<128x256xbf16, #tpu.memory_space<vmem>>, vector<128x256xbf16>
    %cst_71 = arith.constant dense<0.000000e+00> : vector<16x256xf32>
    %164 = tpu.matmul %162, %163, %cst_71 {dimension_numbers = #tpu.dot_dimension_numbers<[1], [0], [0], [1], [0, 0, 1, 1], [], []>} : vector<16x128xbf16>, vector<128x256xbf16>, vector<16x256xf32> -> vector<16x256xf32>
    %c0_72 = arith.constant 0 : index
    %c0_73 = arith.constant 0 : index
    %165 = vector.load %arg17[%c0_72, %c0_73] : memref<1x256xf32, #tpu.memory_space<vmem>>, vector<1x256xf32>
    %166 = vector.broadcast %165 : vector<1x256xf32> to vector<16x256xf32>
    %167 = arith.addf %164, %166 : vector<16x256xf32>
    %168 = arith.negf %167 : vector<16x256xf32>
    %169 = math.exp %168 : vector<16x256xf32>
    %cst_74 = arith.constant 1.000000e+00 : f32
    %170 = vector.broadcast %cst_74 : f32 to vector<16x256xf32>
    %171 = arith.addf %170, %169 : vector<16x256xf32>
    %172 = arith.divf %170, %171 : vector<16x256xf32>
    %173 = arith.mulf %167, %172 : vector<16x256xf32>
    %174 = arith.truncf %173 : vector<16x256xf32> to vector<16x256xbf16>
    %c0_75 = arith.constant 0 : index
    %c0_76 = arith.constant 0 : index
    %175 = vector.load %arg18[%c0_75, %c0_76] : memref<256x128xbf16, #tpu.memory_space<vmem>>, vector<256x128xbf16>
    %cst_77 = arith.constant dense<0.000000e+00> : vector<16x128xf32>
    %176 = tpu.matmul %174, %175, %cst_77 {dimension_numbers = #tpu.dot_dimension_numbers<[1], [0], [0], [1], [0, 0, 1, 1], [], []>} : vector<16x256xbf16>, vector<256x128xbf16>, vector<16x128xf32> -> vector<16x128xf32>
    %c0_78 = arith.constant 0 : index
    %c0_79 = arith.constant 0 : index
    %177 = vector.load %arg19[%c0_78, %c0_79] : memref<1x128xf32, #tpu.memory_space<vmem>>, vector<1x128xf32>
    %178 = vector.broadcast %177 : vector<1x128xf32> to vector<16x128xf32>
    %179 = arith.addf %176, %178 : vector<16x128xf32>
    %cst_80 = arith.constant 5.000000e-01 : f32
    %180 = vector.broadcast %cst_80 : f32 to vector<16x128xf32>
    %181 = arith.mulf %180, %179 : vector<16x128xf32>
    %182 = arith.addf %134, %181 : vector<16x128xf32>
    %c0_81 = arith.constant 0 : index
    %c0_82 = arith.constant 0 : index
    %183 = vector.load %arg20[%c0_81, %c0_82] : memref<1x128xf32, #tpu.memory_space<vmem>>, vector<1x128xf32>
    %c0_83 = arith.constant 0 : index
    %c0_84 = arith.constant 0 : index
    %184 = vector.load %arg21[%c0_83, %c0_84] : memref<1x128xf32, #tpu.memory_space<vmem>>, vector<1x128xf32>
    %cst_85 = arith.constant dense<0.000000e+00> : vector<16xf32>
    %185 = vector.multi_reduction <add>, %182, %cst_85 [1] : vector<16x128xf32> to vector<16xf32>
    %186 = vector.shape_cast %185 : vector<16xf32> to vector<16x1xf32>
    %cst_86 = arith.constant 1.250000e-02 : f32
    %187 = vector.broadcast %cst_86 : f32 to vector<16x1xf32>
    %188 = arith.mulf %186, %187 : vector<16x1xf32>
    %189 = tpu.iota {dimensions = array<i32: 1>} : vector<16x128xi32>
    %c80_i32_87 = arith.constant 80 : i32
    %190 = vector.broadcast %c80_i32_87 : i32 to vector<16x128xi32>
    %191 = arith.cmpi slt, %189, %190 : vector<16x128xi32>
    %192 = vector.broadcast %188 : vector<16x1xf32> to vector<16x128xf32>
    %193 = arith.subf %182, %192 : vector<16x128xf32>
    %cst_88 = arith.constant 0.000000e+00 : f32
    %194 = vector.broadcast %cst_88 : f32 to vector<16x128xf32>
    %195 = arith.select %191, %193, %194 : vector<16x128xi1>, vector<16x128xf32>
    %196 = arith.mulf %195, %195 : vector<16x128xf32>
    %cst_89 = arith.constant dense<0.000000e+00> : vector<16xf32>
    %197 = vector.multi_reduction <add>, %196, %cst_89 [1] : vector<16x128xf32> to vector<16xf32>
    %198 = vector.shape_cast %197 : vector<16xf32> to vector<16x1xf32>
    %cst_90 = arith.constant 1.250000e-02 : f32
    %199 = vector.broadcast %cst_90 : f32 to vector<16x1xf32>
    %200 = arith.mulf %198, %199 : vector<16x1xf32>
    %cst_91 = arith.constant 9.99999974E-6 : f32
    %201 = vector.broadcast %cst_91 : f32 to vector<16x1xf32>
    %202 = arith.addf %200, %201 : vector<16x1xf32>
    %203 = math.rsqrt %202 : vector<16x1xf32>
    %204 = vector.broadcast %203 : vector<16x1xf32> to vector<16x128xf32>
    %205 = arith.mulf %195, %204 : vector<16x128xf32>
    %206 = vector.broadcast %183 : vector<1x128xf32> to vector<16x128xf32>
    %207 = arith.mulf %205, %206 : vector<16x128xf32>
    %208 = vector.broadcast %184 : vector<1x128xf32> to vector<16x128xf32>
    %209 = arith.addf %207, %208 : vector<16x128xf32>
    %c0_92 = arith.constant 0 : index
    %c0_93 = arith.constant 0 : index
    %210 = vector.load %arg22[%c0_92, %c0_93] : memref<16x128xf32, #tpu.memory_space<vmem>>, vector<16x128xf32>
    tpu.vector_store %arg22[%c0_92, %c0_93], %209 {strides = array<i32>} : memref<16x128xf32, #tpu.memory_space<vmem>>, vector<16x128xf32>,
    return
  }
  func.func @transform_0(%arg0: i32) -> (i32, i32) {
    %c0_i32 = arith.constant 0 : i32
    %c0_i32_0 = arith.constant 0 : i32
    return %arg0, %c0_i32 : i32, i32
  }
  func.func @transform_1(%arg0: i32) -> (i32, i32) {
    %c0_i32 = arith.constant 0 : i32
    %c0_i32_0 = arith.constant 0 : i32
    return %arg0, %c0_i32 : i32, i32
  }
  func.func @transform_2(%arg0: i32) -> (i32, i32) {
    %c0_i32 = arith.constant 0 : i32
    %c0_i32_0 = arith.constant 0 : i32
    return %arg0, %c0_i32 : i32, i32
  }
  func.func @transform_3(%arg0: i32) -> (i32, i32) {
    %c0_i32 = arith.constant 0 : i32
    %c0_i32_0 = arith.constant 0 : i32
    %c0_i32_1 = arith.constant 0 : i32
    return %c0_i32, %c0_i32_0 : i32, i32
  }
  func.func @transform_4(%arg0: i32) -> (i32, i32) {
    %c0_i32 = arith.constant 0 : i32
    %c0_i32_0 = arith.constant 0 : i32
    %c0_i32_1 = arith.constant 0 : i32
    return %c0_i32, %c0_i32_0 : i32, i32
  }
  func.func @transform_5(%arg0: i32) -> (i32, i32) {
    %c0_i32 = arith.constant 0 : i32
    %c0_i32_0 = arith.constant 0 : i32
    %c0_i32_1 = arith.constant 0 : i32
    return %c0_i32, %c0_i32_0 : i32, i32
  }
  func.func @transform_6(%arg0: i32) -> (i32, i32) {
    %c0_i32 = arith.constant 0 : i32
    %c0_i32_0 = arith.constant 0 : i32
    %c0_i32_1 = arith.constant 0 : i32
    return %c0_i32, %c0_i32_0 : i32, i32
  }
  func.func @transform_7(%arg0: i32) -> (i32, i32) {
    %c0_i32 = arith.constant 0 : i32
    %c0_i32_0 = arith.constant 0 : i32
    %c0_i32_1 = arith.constant 0 : i32
    return %c0_i32, %c0_i32_0 : i32, i32
  }
  func.func @transform_8(%arg0: i32) -> (i32, i32) {
    %c0_i32 = arith.constant 0 : i32
    %c0_i32_0 = arith.constant 0 : i32
    %c0_i32_1 = arith.constant 0 : i32
    return %c0_i32, %c0_i32_0 : i32, i32
  }
  func.func @transform_9(%arg0: i32) -> (i32, i32) {
    %c0_i32 = arith.constant 0 : i32
    %c0_i32_0 = arith.constant 0 : i32
    %c0_i32_1 = arith.constant 0 : i32
    return %c0_i32, %c0_i32_0 : i32, i32
  }
  func.func @transform_10(%arg0: i32) -> (i32, i32) {
    %c0_i32 = arith.constant 0 : i32
    %c0_i32_0 = arith.constant 0 : i32
    %c0_i32_1 = arith.constant 0 : i32
    return %c0_i32, %c0_i32_0 : i32, i32
  }
  func.func @transform_11(%arg0: i32) -> (i32, i32) {
    %c0_i32 = arith.constant 0 : i32
    %c0_i32_0 = arith.constant 0 : i32
    %c0_i32_1 = arith.constant 0 : i32
    return %c0_i32, %c0_i32_0 : i32, i32
  }
  func.func @transform_12(%arg0: i32) -> (i32, i32) {
    %c0_i32 = arith.constant 0 : i32
    %c0_i32_0 = arith.constant 0 : i32
    %c0_i32_1 = arith.constant 0 : i32
    return %c0_i32, %c0_i32_0 : i32, i32
  }
  func.func @transform_13(%arg0: i32) -> (i32, i32) {
    %c0_i32 = arith.constant 0 : i32
    %c0_i32_0 = arith.constant 0 : i32
    %c0_i32_1 = arith.constant 0 : i32
    return %c0_i32, %c0_i32_0 : i32, i32
  }
  func.func @transform_14(%arg0: i32) -> (i32, i32) {
    %c0_i32 = arith.constant 0 : i32
    %c0_i32_0 = arith.constant 0 : i32
    %c0_i32_1 = arith.constant 0 : i32
    return %c0_i32, %c0_i32_0 : i32, i32
  }
  func.func @transform_15(%arg0: i32) -> (i32, i32) {
    %c0_i32 = arith.constant 0 : i32
    %c0_i32_0 = arith.constant 0 : i32
    %c0_i32_1 = arith.constant 0 : i32
    return %c0_i32, %c0_i32_0 : i32, i32
  }
  func.func @transform_16(%arg0: i32) -> (i32, i32) {
    %c0_i32 = arith.constant 0 : i32
    %c0_i32_0 = arith.constant 0 : i32
    %c0_i32_1 = arith.constant 0 : i32
    return %c0_i32, %c0_i32_0 : i32, i32
  }
  func.func @transform_17(%arg0: i32) -> (i32, i32) {
    %c0_i32 = arith.constant 0 : i32
    %c0_i32_0 = arith.constant 0 : i32
    %c0_i32_1 = arith.constant 0 : i32
    return %c0_i32, %c0_i32_0 : i32, i32
  }
  func.func @transform_18(%arg0: i32) -> (i32, i32) {
    %c0_i32 = arith.constant 0 : i32
    %c0_i32_0 = arith.constant 0 : i32
    %c0_i32_1 = arith.constant 0 : i32
    return %c0_i32, %c0_i32_0 : i32, i32
  }
  func.func @transform_19(%arg0: i32) -> (i32, i32) {
    %c0_i32 = arith.constant 0 : i32
    %c0_i32_0 = arith.constant 0 : i32
    %c0_i32_1 = arith.constant 0 : i32
    return %c0_i32, %c0_i32_0 : i32, i32
  }
  func.func @transform_20(%arg0: i32) -> (i32, i32) {
    %c0_i32 = arith.constant 0 : i32
    %c0_i32_0 = arith.constant 0 : i32
    %c0_i32_1 = arith.constant 0 : i32
    return %c0_i32, %c0_i32_0 : i32, i32
  }
  func.func @transform_21(%arg0: i32) -> (i32, i32) {
    %c0_i32 = arith.constant 0 : i32
    %c0_i32_0 = arith.constant 0 : i32
    return %arg0, %c0_i32 : i32, i32
  }
}

module attributes {stable_mosaic.version = 11 : i64} {
  func.func @_pool_head_kernel(%arg0: i32, %arg1: memref<8x2x128xf32, #tpu.memory_space<vmem>>, %arg2: memref<128x128xf32, #tpu.memory_space<vmem>>, %arg3: memref<1x128xf32, #tpu.memory_space<vmem>>, %arg4: memref<128x640xf32, #tpu.memory_space<vmem>>, %arg5: memref<1x640xf32, #tpu.memory_space<vmem>>, %arg6: memref<2x640xf32, #tpu.memory_space<vmem>>, %arg7: memref<2x128xf32, #tpu.memory_space<vmem>>) attributes {dimension_semantics = [#tpu.dimension_semantics<arbitrary>], iteration_bounds = array<i64: 2>, scalar_prefetch = 0 : i64, scratch_operands = 1 : i64, tpu.core_type = #tpu.core_type<tc>, window_params = [{transform_indices = @transform_0, window_bounds = array<i64: 8, 2, 128>}, {pipeline_mode = #tpu.pipeline_mode<synchronous>, transform_indices = @transform_1, window_bounds = array<i64: 128, 128>}, {pipeline_mode = #tpu.pipeline_mode<synchronous>, transform_indices = @transform_2, window_bounds = array<i64: 1, 128>}, {pipeline_mode = #tpu.pipeline_mode<synchronous>, transform_indices = @transform_3, window_bounds = array<i64: 128, 640>}, {pipeline_mode = #tpu.pipeline_mode<synchronous>, transform_indices = @transform_4, window_bounds = array<i64: 1, 640>}, {pipeline_mode = #tpu.pipeline_mode<synchronous>, transform_indices = @transform_5, window_bounds = array<i64: 2, 640>}]} {
    %c0_i32 = arith.constant 0 : i32
    %0 = arith.cmpi eq, %arg0, %c0_i32 : i32
    %1 = arith.extui %0 : i1 to i32
    %c0_i32_0 = arith.constant 0 : i32
    %2 = arith.cmpi ne, %1, %c0_i32_0 : i32
    scf.if %2 {
      %cst_8 = arith.constant 0.000000e+00 : f32
      %11 = vector.broadcast %cst_8 : f32 to vector<2x128xf32>
      %c0_9 = arith.constant 0 : index
      %c0_10 = arith.constant 0 : index
      %12 = vector.load %arg7[%c0_9, %c0_10] : memref<2x128xf32, #tpu.memory_space<vmem>>, vector<2x128xf32>
      tpu.vector_store %arg7[%c0_9, %c0_10], %11 {strides = array<i32>} : memref<2x128xf32, #tpu.memory_space<vmem>>, vector<2x128xf32>,
    } else {
    }
    %c0 = arith.constant 0 : index
    %c0_1 = arith.constant 0 : index
    %3 = vector.load %arg7[%c0, %c0_1] : memref<2x128xf32, #tpu.memory_space<vmem>>, vector<2x128xf32>
    %c0_2 = arith.constant 0 : index
    %c0_3 = arith.constant 0 : index
    %c0_4 = arith.constant 0 : index
    %4 = vector.load %arg1[%c0_2, %c0_3, %c0_4] : memref<8x2x128xf32, #tpu.memory_space<vmem>>, vector<8x2x128xf32>
    %cst = arith.constant dense<0.000000e+00> : vector<2x128xf32>
    %5 = vector.multi_reduction <add>, %4, %cst [0] : vector<8x2x128xf32> to vector<2x128xf32>
    %6 = arith.addf %3, %5 : vector<2x128xf32>
    %c0_5 = arith.constant 0 : index
    %c0_6 = arith.constant 0 : index
    %7 = vector.load %arg7[%c0_5, %c0_6] : memref<2x128xf32, #tpu.memory_space<vmem>>, vector<2x128xf32>
    tpu.vector_store %arg7[%c0_5, %c0_6], %6 {strides = array<i32>} : memref<2x128xf32, #tpu.memory_space<vmem>>, vector<2x128xf32>,
    %c1_i32 = arith.constant 1 : i32
    %8 = arith.cmpi eq, %arg0, %c1_i32 : i32
    %9 = arith.extui %8 : i1 to i32
    %c0_i32_7 = arith.constant 0 : i32
    %10 = arith.cmpi ne, %9, %c0_i32_7 : i32
    scf.if %10 {
      %c0_8 = arith.constant 0 : index
      %c0_9 = arith.constant 0 : index
      %11 = vector.load %arg7[%c0_8, %c0_9] : memref<2x128xf32, #tpu.memory_space<vmem>>, vector<2x128xf32>
      %cst_10 = arith.constant 6.250000e-02 : f32
      %12 = vector.broadcast %cst_10 : f32 to vector<2x128xf32>
      %13 = arith.mulf %11, %12 : vector<2x128xf32>
      %c0_11 = arith.constant 0 : index
      %c0_12 = arith.constant 0 : index
      %14 = vector.load %arg2[%c0_11, %c0_12] : memref<128x128xf32, #tpu.memory_space<vmem>>, vector<128x128xf32>
      %cst_13 = arith.constant dense<0.000000e+00> : vector<2x128xf32>
      %15 = tpu.matmul %13, %14, %cst_13 {dimension_numbers = #tpu.dot_dimension_numbers<[1], [0], [0], [1], [0, 0, 1, 1], [], []>} : vector<2x128xf32>, vector<128x128xf32>, vector<2x128xf32> -> vector<2x128xf32>
      %c0_14 = arith.constant 0 : index
      %c0_15 = arith.constant 0 : index
      %16 = vector.load %arg3[%c0_14, %c0_15] : memref<1x128xf32, #tpu.memory_space<vmem>>, vector<1x128xf32>
      %17 = vector.broadcast %16 : vector<1x128xf32> to vector<2x128xf32>
      %18 = arith.addf %15, %17 : vector<2x128xf32>
      %cst_16 = arith.constant 0.000000e+00 : f32
      %19 = vector.broadcast %cst_16 : f32 to vector<2x128xf32>
      %20 = arith.maximumf %18, %19 : vector<2x128xf32>
      %c0_17 = arith.constant 0 : index
      %c0_18 = arith.constant 0 : index
      %21 = vector.load %arg4[%c0_17, %c0_18] : memref<128x640xf32, #tpu.memory_space<vmem>>, vector<128x640xf32>
      %cst_19 = arith.constant dense<0.000000e+00> : vector<2x640xf32>
      %22 = tpu.matmul %20, %21, %cst_19 {dimension_numbers = #tpu.dot_dimension_numbers<[1], [0], [0], [1], [0, 0, 1, 1], [], []>} : vector<2x128xf32>, vector<128x640xf32>, vector<2x640xf32> -> vector<2x640xf32>
      %c0_20 = arith.constant 0 : index
      %c0_21 = arith.constant 0 : index
      %23 = vector.load %arg5[%c0_20, %c0_21] : memref<1x640xf32, #tpu.memory_space<vmem>>, vector<1x640xf32>
      %24 = vector.broadcast %23 : vector<1x640xf32> to vector<2x640xf32>
      %25 = arith.addf %22, %24 : vector<2x640xf32>
      %c0_22 = arith.constant 0 : index
      %c0_23 = arith.constant 0 : index
      %26 = vector.load %arg6[%c0_22, %c0_23] : memref<2x640xf32, #tpu.memory_space<vmem>>, vector<2x640xf32>
      tpu.vector_store %arg6[%c0_22, %c0_23], %25 {strides = array<i32>} : memref<2x640xf32, #tpu.memory_space<vmem>>, vector<2x640xf32>,
    } else {
    }
    return
  }
  func.func @transform_0(%arg0: i32) -> (i32, i32, i32) {
    %c0_i32 = arith.constant 0 : i32
    %c0_i32_0 = arith.constant 0 : i32
    %c0_i32_1 = arith.constant 0 : i32
    return %arg0, %c0_i32, %c0_i32_0 : i32, i32, i32
  }
  func.func @transform_1(%arg0: i32) -> (i32, i32) {
    %c0_i32 = arith.constant 0 : i32
    %c0_i32_0 = arith.constant 0 : i32
    %c0_i32_1 = arith.constant 0 : i32
    return %c0_i32, %c0_i32_0 : i32, i32
  }
  func.func @transform_2(%arg0: i32) -> (i32, i32) {
    %c0_i32 = arith.constant 0 : i32
    %c0_i32_0 = arith.constant 0 : i32
    %c0_i32_1 = arith.constant 0 : i32
    return %c0_i32, %c0_i32_0 : i32, i32
  }
  func.func @transform_3(%arg0: i32) -> (i32, i32) {
    %c0_i32 = arith.constant 0 : i32
    %c0_i32_0 = arith.constant 0 : i32
    %c0_i32_1 = arith.constant 0 : i32
    return %c0_i32, %c0_i32_0 : i32, i32
  }
  func.func @transform_4(%arg0: i32) -> (i32, i32) {
    %c0_i32 = arith.constant 0 : i32
    %c0_i32_0 = arith.constant 0 : i32
    %c0_i32_1 = arith.constant 0 : i32
    return %c0_i32, %c0_i32_0 : i32, i32
  }
  func.func @transform_5(%arg0: i32) -> (i32, i32) {
    %c0_i32 = arith.constant 0 : i32
    %c0_i32_0 = arith.constant 0 : i32
    %c0_i32_1 = arith.constant 0 : i32
    return %c0_i32, %c0_i32_0 : i32, i32
  }
}

</mosaic_0001>

<bundles_post_ra>
// kernel: tile.0
= control target key start
LH: loop header
LB: loop body
LE: loop exit
PB: predicated region body
PF: predicated region fallthrough
CT: control target
= control target key end

     0   :  { %vm3_vm0 = vcmask 7168   ;;  %s58_s0 = inlined_call_operand.vmem [shape: s32[16,2], index: 0, kind: input, shape index: {}]   ;;  %s59_s1 = inlined_call_operand.vmem [shape: s32[32,1], index: 1, kind: output, shape index: {}]  }
   0x1   :  { %v10_v0 = vld [vmem:[%s58_s0] sm:$0xff]   ;;  %v23_v1 = vld [vmem:[%s58_s0 + $0x8] sm:$0xff]   ;;  %s29_s0 = smov 127  }
   0x2   :  { %11 = vrot.lane.b32.xlu0 %v10_v0, %s29_s0  ;;  %4 = vst.msk [vmem:[%s59_s1] ss:$2 sm:$0xff] %vm3_vm0, %v10_v0   ;;  %24 = vst.msk [vmem:[%s59_s1 + $0x10] ss:$2 sm:$0xff] %vm3_vm0, %v23_v1  }
   0x6   :  { %18 = vrot.lane.b32.xlu0 %v23_v1, %s29_s0 }
  0x74   :  { %v12_v2 = vpop.permute.xlu0 %11  }
  0x75   :  { %25 = vst.msk [vmem:[%s59_s1 + $0x1] ss:$2 sm:$0xff] %vm3_vm0, %v12_v2  }
  0x78   :  { %v19_v3 = vpop.permute.xlu0 %18  }
  0x79   :  { %27 = vst.msk [vmem:[%s59_s1 + $0x11] ss:$2 sm:$0xff] %vm3_vm0, %v19_v3  }

// kernel: strong_classifier_forward.14
= control target key start
LH: loop header
LB: loop body
LE: loop exit
PB: predicated region body
PF: predicated region fallthrough
CT: control target
= control target key end

     0   :  { %s406_s12 = smov 0   ;;  %s441_s0 = inlined_call_operand.vmem [shape: f32[32,40], index: 0, kind: input, shape index: {}]   ;;  %s442_s1 = inlined_call_operand.vmem [shape: f32[40,128], index: 1, kind: input, shape index: {}]   ;;  %s443_s2 = inlined_call_operand.vmem [shape: f32[1,128], index: 2, kind: input, shape index: {}]   ;;  %s444_s3 = inlined_call_operand.vmem [shape: f32[32,128], index: 3, kind: output, shape index: {}]  }
   0x1 LB: > { %s328_s13 = sadd.s32 4294967295, %s384_s12   ;;  %p332_p0 = scmp.ge.s32.totalorder %s384_s12, 1  ;;  %s384_s12 = sphi %s406_s12, %s13_s12  }
   0x2   : > { %p138_p1 = scmp.lt.s32.totalorder %s384_s12, 3 }
   0x4   : > { %p139_p2 = pnand %p332_p0, %p138_p1 }
   0x5   : > { %v176_v0 = vld [vmem:[%s442_s1] sm:$0xff] (!%p139_p2)  ;;  %v177_v1 = vld [vmem:[%s442_s1 + $0x8] sm:$0xff] (!%p139_p2)  ;;  %v178_v2 = vld [vmem:[%s442_s1 + $0x10] sm:$0xff] (!%p139_p2)  ;;  %s333_s20 = sshll.u32 (!%p139_p2), %s328_s13, 1  ;;  %vm188_vm0 = vcmask (!%p139_p2), 326656  }
   0x6   : > { %142 = sbr.rel (%p139_p2) target bundleno = 234 (0xea), region = 32  ;;  %v362_v3 = vpack.c.bf16 (!%p139_p2), %v177_v1, %v176_v0  ;;  %v179_v4 = vld [vmem:[%s442_s1 + $0x18] sm:$0xff] (!%p139_p2)  ;;  %p163_p3 = scmp.lt.s32.totalorder (!%p139_p2), %s333_s20, 3  ;;  %v180_v6 = vld [vmem:[%s442_s1 + $0x20] sm:$0xff] (!%p139_p2) }
   0x7   : > { %v366_v5 = vpack.c.bf16 (!%p139_p2), %v179_v4, %v178_v2  ;;  %v337_v9 = vld [vmem:[%s443_s2] ss:$0 sm:$0xff] (!%p139_p2) }
   0x8   : > { %363 = vmatprep.subr.bf16.mxu0 (!%p139_p2), %v362_v3 }
   0x9   : > { %365 = vmatpush3.bf16.msra.mxu0 (!%p139_p2), %v362_v3 }
   0xa   : > { %367 = vmatprep.subr.bf16.mxu0 (!%p139_p2), %v366_v5 }
   0xd   : > { %s446_s20 = smov (!%p163_p3, %s333_s20), 3  ;;  %369 = vmatpush3.bf16.msra.mxu0 %v366_v5 }
   0xe   : > { %s334_s23 = sshll.u32 %s446_s20, 3  ;;  %357 = vmatprep.subr.mxu0 %v180_v6 }
   0xf   : > { %s166_s28 = scalar_lea.vmem %s441_s0, %s334_s23  ;;  %s172_s6 = scalar_lea.vmem %s444_s3, %s334_s23 }
  0x10   : > { %v174_v7 = vld [vmem:[%s166_s28] sm:$0xff]  ;;  %v175_v8 = vld [vmem:[%s166_s28 + $0x8] sm:$0xff] }
  0x11   : > { %359 = vmatprep.mubr.msk.f32.mxu0 %vm188_vm0, %v174_v7  ;;  %358 = vmatpush3.msra.mxu0 %v180_v6 }
  0x12   : > { %360 = vmatmul.mubr.msk.f32.vlgmr.msra.gmra.mrb[0].mxu0 %vm188_vm0, %v175_v8 }
  0xe5   : > { %v361_v10 = vpop.f32.mrb[0].mxu0 }
  0xe6   : > { %v261_v11 = vpop.f32.mrb[1].mxu0  ;;  %v267_v13 = vadd.f32 %v361_v10, %v337_v9 }
  0xe7   : > { %v262_v12 = vadd.f32 %v337_v9, %v261_v11 }
  0xe8   : > { %271 = vst [vmem:[%s172_s6 + $0x8] sm:$0xff] %v267_v13 }
  0xe9   : > { %270 = vst [vmem:[%s172_s6] sm:$0xff] %v262_v12 }
  0xea PF: > { %s13_s12 = sadd.s32 1, %s384_s12  }
  0xeb   : > { %p10_p4 = scmp.ge.s32.totalorder %s13_s12, 4  }
  0xed   :  { %12 = sbr.rel (!%p10_p4) target bundleno = 1 (0x1), region = 62 }

// kernel: strong_classifier_forward.15
= control target key start
LH: loop header
LB: loop body
LE: loop exit
PB: predicated region body
PF: predicated region fallthrough
CT: control target
= control target key end

     0   :  { %s2156_s0 = inlined_call_operand.vmem [shape: f32[32,128], index: 0, kind: input, shape index: {}]   ;;  %s2157_s1 = inlined_call_operand.vmem [shape: f32[1,128], index: 1, kind: input, shape index: {}]   ;;  %s2158_s2 = inlined_call_operand.vmem [shape: f32[1,128], index: 2, kind: input, shape index: {}]   ;;  %s2159_s3 = inlined_call_operand.hbm [shape: bf16[128,256], index: 3, kind: input, shape index: {}]   ;;  %s2160_s4 = inlined_call_operand.vmem [shape: f32[1,256], index: 4, kind: input, shape index: {}]   ;;  %s2161_s5 = inlined_call_operand.hbm [shape: bf16[256,128], index: 5, kind: input, shape index: {}]   ;;  %s2162_s6 = inlined_call_operand.vmem [shape: f32[1,128], index: 6, kind: input, shape index: {}]   ;;  %s2163_s7 = inlined_call_operand.hbm [shape: f32[1,128], index: 7, kind: input, shape index: {}]   ;;  %s2164_s8 = inlined_call_operand.hbm [shape: f32[1,128], index: 8, kind: input, shape index: {}]   ;;  %s2165_s9 = inlined_call_operand.vmem [shape: bf16[128,384], index: 9, kind: input, shape index: {}]   ;;  %s2166_s10 = inlined_call_operand.vmem [shape: f32[1,384], index: 10, kind: input, shape index: {}]   ;;  %s2167_s11 = inlined_call_operand.vmem [shape: f32[32,128], index: 11, kind: output, shape index: {0}]   ;;  %s2168_s12 = inlined_call_operand.vmem [shape: bf16[32,384], index: 12, kind: output, shape index: {1}]  }
   0x1   :  { %2173 = sst [smem:[#allocation12_spill]] %s2161_s5 }
   0x2   :  { %2174 = sst [smem:[#allocation13_spill]] %s2168_s12 }
   0x3   :  { %18 = vsyncpa [#allocation3], 0 }
   0x4   :  { %19 = vsyncpa [#allocation5], 0 }
   0x5   :  { %20 = vsyncpa [#allocation8], 0  ;;  %s1867_s21 = smov 0  }
   0x6 LB: > { %s1791_s22 = smov [#allocation4]   ;;  %s2169_s24 = sadd.s32 4294967295, %s1789_s21   ;;  %s1789_s21 = sphi %s1867_s21, %s26_s21  }
   0x7   : > { %s353_s23 = sshll.u32 %s1791_s22, 4  ;;  %p1363_p0 = scmp.ge.s32.totalorder %s1789_s21, 1  ;;  %s1881_s23 = int_to_ptr.vmem [resolvable:$true] %s353_s23 }
   0x8   : > { %p319_p1 = scmp.lt.s32.totalorder %s1789_s21, 3  ;;  %p1877_p2 = scmp.eq.s32.totalorder %s2169_s24, 0 }
   0x9   : > { %s1792_s27 = smov [#allocation2]   ;;  %s1793_s30 = smov [#allocation6]  }
   0xa   : > { %s2175_s25 = scalar_select %p1877_p2, 1, 0 }
   0xb   : > { %p1883_p3 = pnand %p1363_p0, %p319_p1  ;;  %s337_s28 = sshll.u32 %s1792_s27, 4  ;;  %s1889_s28 = int_to_ptr.vmem [resolvable:$true] %s337_s28 }
   0xc   : > { %s1897_s13 = sshll.u32 %s1793_s30, 4  ;;  %s2178_s5 = sld [smem:[#allocation12_spill]]  ;;  %s371_s13 = int_to_ptr.vmem [resolvable:$true] %s1897_s13 }
   0xd   : > { %s2176_s26 = scalar_select %p1883_p3, 1, 0 }
   0xe   : > { %p1523_p4 = pneg %p1883_p3 }
  0x10   : > { %p1893_p5 = pnand %p1877_p2, %p1523_p4 }
  0x12   : > { %s1659_s16 = scalar_lea.hbm %s2178_s5, 2048  ;;  %p1907_p7 = pneg %p1893_p5 }
  0x13   : > { %p1660_p6 = scmp.ne.s32.totalorder %s2178_s5, %s1659_s16  ;;  %p1666_p10 = scmp.lt.u32.totalorder %s1659_s16, %s2178_s5 }
  0x15   : > { %p1662_p8 = pnand %p1907_p7, %p1660_p6 }
  0x17   : > { %p1663_p9 = pneg %p1662_p8 }
  0x19   : > { %p1668_p11 = pnand %p1666_p10, %p1663_p9 }
  0x1b   : > { %1671 = shalt.err (!%p1668_p11)
}
  0x1c   : > { %s1672_s27 = scalar_lea.vmem %s1881_s23, 2048  ;;  %p1680_p1 = scmp.lt.s32.totalorder %s1881_s23, %s1881_s23 }
  0x1d   : > { %p1673_p12 = scmp.ne.s32.totalorder %s1881_s23, %s1672_s27  ;;  %p1681_p4 = scmp.lt.s32.totalorder %s1672_s27, %s1672_s27 }
  0x1f   : > { %p1675_p13 = pnand %p1673_p12, %p1907_p7  ;;  %p1682_p6 = por %p1681_p4, %p1680_p1 }
  0x21   : > { %p1676_p0 = pneg %p1675_p13 }
  0x23   : > { %p1683_p8 = pnand %p1682_p6, %p1676_p0 }
  0x25   : > { %1686 = shalt.err (!%p1683_p8)
}
  0x26   : > { %s1794_s30 = smov 64   ;;  %s1795_s14 = smov 4  }
  0x27   : > { %1529 = dma.hbm_to_vmem [thread:$0]  (!%p1893_p5), %s2178_s5, 2048, %s1881_s23, [#allocation5], %s1794_s30, %s1794_s30, %s1795_s14  }
  0x28   : > { %s1687_s20 = scalar_lea.hbm %s2159_s3, 2048 }
  0x29   : > { %p1688_p9 = scmp.ne.s32.totalorder %s2159_s3, %s1687_s20  ;;  %p1694_p12 = scmp.lt.u32.totalorder %s1687_s20, %s2159_s3 }
  0x2b   : > { %p1690_p10 = pnand %p1688_p9, %p1907_p7 }
  0x2d   : > { %p1691_p11 = pneg %p1690_p10 }
  0x2f   : > { %p1696_p13 = pnand %p1694_p12, %p1691_p11 }
  0x31   : > { %1699 = shalt.err (!%p1696_p13)
}
  0x32   : > { %s1700_s23 = scalar_lea.vmem %s1889_s28, 2048  ;;  %p1708_p6 = scmp.lt.s32.totalorder %s1889_s28, %s1889_s28 }
  0x33   : > { %p1701_p0 = scmp.ne.s32.totalorder %s1889_s28, %s1700_s23  ;;  %p1709_p8 = scmp.lt.s32.totalorder %s1700_s23, %s1700_s23 }
  0x35   : > { %p1703_p1 = pnand %p1701_p0, %p1907_p7  ;;  %p1710_p9 = por %p1709_p8, %p1708_p6 }
  0x37   : > { %p1704_p4 = pneg %p1703_p1 }
  0x39   : > { %p1711_p10 = pnand %p1710_p9, %p1704_p4 }
  0x3b   : > { %1714 = shalt.err (!%p1711_p10)
}
  0x3c   : > { %s1796_s24 = smov 128   ;;  %s1797_s12 = smov 8  }
  0x3d   : > { %1526 = dma.hbm_to_vmem [thread:$0]  (!%p1893_p5), %s2159_s3, 2048, %s1889_s28, [#allocation3], %s1796_s24, %s1796_s24, %s1797_s12  }
  0x3e   : > { %s1798_s15 = smov [#allocation7]   ;;  %s1715_s20 = scalar_lea.hbm %s2163_s7, 16 }
  0x3f   : > { %s381_s16 = sshll.u32 %s1798_s15, 4  ;;  %p1716_p11 = scmp.ne.s32.totalorder %s2163_s7, %s1715_s20  ;;  %s382_s16 = int_to_ptr.vmem [resolvable:$true] %s381_s16 }
  0x40   : > { %p1722_p0 = scmp.lt.u32.totalorder %s1715_s20, %s2163_s7 }
  0x41   : > { %p1718_p12 = pnand %p1716_p11, %p1907_p7 }
  0x43   : > { %p1719_p13 = pneg %p1718_p12 }
  0x45   : > { %p1724_p1 = pnand %p1722_p0, %p1719_p13 }
  0x47   : > { %1727 = shalt.err (!%p1724_p1)
}
  0x48   : > { %s1728_s28 = scalar_lea.vmem %s371_s13, 16  ;;  %s1735_s24 = scalar_lea.vmem %s371_s13, 32 }
  0x49   : > { %p1729_p4 = scmp.ne.s32.totalorder %s371_s13, %s1728_s28  ;;  %p1736_p9 = scmp.lt.s32.totalorder %s371_s13, %s371_s13 }
  0x4a   : > { %p1737_p10 = scmp.lt.s32.totalorder %s1735_s24, %s1728_s28 }
  0x4b   : > { %p1731_p6 = pnand %p1729_p4, %p1907_p7 }
  0x4c   : > { %p1738_p2 = por %p1737_p10, %p1736_p9 }
  0x4d   : > { %p1732_p8 = pneg %p1731_p6 }
  0x4f   : > { %p1739_p3 = pnand %p1738_p2, %p1732_p8 }
  0x51   : > { %1742 = shalt.err (!%p1739_p3)
}
  0x52   : > { %1532 = dma.hbm_to_vmem [thread:$0]  (!%p1893_p5), %s2163_s7, 16, %s371_s13, [#allocation5]  }
  0x53   : > { %s1743_s15 = scalar_lea.hbm %s2164_s8, 16 }
  0x54   : > { %p1744_p11 = scmp.ne.s32.totalorder %s2164_s8, %s1743_s15  ;;  %p1750_p3 = scmp.lt.u32.totalorder %s1743_s15, %s2164_s8 }
  0x56   : > { %p1746_p12 = pnand %p1744_p11, %p1907_p7 }
  0x58   : > { %p1747_p2 = pneg %p1746_p12 }
  0x5a   : > { %p1752_p13 = pnand %p1750_p3, %p1747_p2 }
  0x5c   : > { %1755 = shalt.err (!%p1752_p13)
}
  0x5d   : > { %s1756_s27 = scalar_lea.vmem %s382_s16, 16  ;;  %s1763_s13 = scalar_lea.vmem %s382_s16, 32 }
  0x5e   : > { %p1757_p0 = scmp.ne.s32.totalorder %s382_s16, %s1756_s27  ;;  %p1764_p6 = scmp.lt.s32.totalorder %s382_s16, %s382_s16 }
  0x5f   : > { %p1765_p8 = scmp.lt.s32.totalorder %s1763_s13, %s1756_s27 }
  0x60   : > { %p1759_p1 = pnand %p1757_p0, %p1907_p7 }
  0x61   : > { %p1766_p9 = por %p1765_p8, %p1764_p6 }
  0x62   : > { %p1760_p4 = pneg %p1759_p1 }
  0x64   : > { %p1767_p10 = pnand %p1766_p9, %p1760_p4 }
  0x66   : > { %1770 = shalt.err (!%p1767_p10)
}
  0x67   : > { %1535 = dma.hbm_to_vmem [thread:$0]  (!%p1893_p5), %s2164_s8, 16, %s382_s16, [#allocation8]  }
  0x68   : > { %p2180_p11 = scmp.ne.s32.totalorder %s2176_s26, 0 }
  0x69   : > { %p2181_p12 = scmp.ne.s32.totalorder (!%p2180_p11), %s2175_s25, 0 }
  0x6a   : > { %409 = sbr.rel (%p2180_p11) target bundleno = 1449 (0x5a9), region = 64 }
  0x71   : > { %1776 = dma.done.wait (%p2181_p12), [#allocation3], 2048  }
  0x72   : > { %1778 = vsyncadd (%p2181_p12), [#allocation3], 4294965248 }
  0x73   : > { %1780 = dma.done.wait (%p2181_p12), [#allocation5], 2064  }
  0x74   : > { %1782 = vsyncadd (%p2181_p12), [#allocation5], 4294965232 }
  0x75   : > { %1784 = dma.done.wait (%p2181_p12), [#allocation8], 16  }
  0x76   : > { %1786 = vsyncadd (%p2181_p12), [#allocation8], 4294967280  ;;  %s2182_s26 = sadd.s32 4294967295, %s1789_s21   ;;  %v1563_v2 = vld [vmem:[#allocation2 + $0x4] ss:$8 sps:$4 sm:$0xff]   ;;  %v499_v5 = vlaneseq  ;;  %v1799_v25 = vmov 0  }
  0x77   : > { %s1374_s29 = sshll.u32 %s2182_s26, 1  ;;  %v1565_v3 = vld [vmem:[#allocation2] ss:$8 sps:$4 sm:$0xff]   ;;  %v1566_v4 = vld [vmem:[#allocation2 + $0x14] ss:$8 sps:$4 sm:$0xff]   ;;  %645 = vmatprep.subr.bf16.mxu0 %v1563_v2  ;;  %677 = vmatprep.mubr.bf16.mxu0 %v1799_v25  ;;  %vm1801_vm1 = vmmov 0  }
  0x78   : > { %p470_p5 = scmp.lt.s32.totalorder %s1374_s29, 3  ;;  %646 = vmatpush1.bf16.msra.mxu0 %v1565_v3  ;;  %v2019_v6 = vand.u32 127, %v499_v5  ;;  %v1568_v17 = vld [vmem:[#allocation2 + $0x10] ss:$8 sps:$4 sm:$0xff]   ;;  %v1569_v18 = vld [vmem:[#allocation2 + $0x24] ss:$8 sps:$4 sm:$0xff]  }
  0x79   : > { %647 = vmatprep.subr.bf16.mxu0 %v1566_v4  ;;  %v1571_v19 = vld [vmem:[#allocation2 + $0x20] ss:$8 sps:$4 sm:$0xff]   ;;  %v1572_v20 = vld [vmem:[#allocation2 + $0x34] ss:$8 sps:$4 sm:$0xff]   ;;  %v1574_v21 = vld [vmem:[#allocation2 + $0x30] ss:$8 sps:$4 sm:$0xff]  }
  0x7a   : > { %s2185_s29 = smov (!%p470_p5, %s1374_s29), 3  ;;  %vm501_vm0 = vcmp.lt.s32.totalorder %v2019_v6, 80  ;;  %v1575_v22 = vld [vmem:[#allocation2 + $0x44] ss:$8 sps:$4 sm:$0xff]   ;;  %v1577_v23 = vld [vmem:[#allocation2 + $0x40] ss:$8 sps:$4 sm:$0xff]  }
  0x7b   : > { %s1375_s19 = sshll.u32 %s2185_s29, 3  ;;  %v1578_v24 = vld [vmem:[#allocation2 + $0x54] ss:$8 sps:$4 sm:$0xff]   ;;  %v1580_v26 = vld [vmem:[#allocation2 + $0x50] ss:$8 sps:$4 sm:$0xff]   ;;  %v1587_v48 = vld [vmem:[#allocation4 + $0x40] sm:$0xff]  }
  0x7c   : > { %s473_s12 = scalar_lea.vmem %s2156_s0, %s1375_s19  ;;  %648 = vmatpush1.bf16.msra.mxu0 %v1568_v17  ;;  %v1581_v27 = vld [vmem:[#allocation2 + $0x64] ss:$8 sps:$4 sm:$0xff]   ;;  %v1583_v28 = vld [vmem:[#allocation2 + $0x60] ss:$8 sps:$4 sm:$0xff]   ;;  %v1584_v29 = vld [vmem:[#allocation2 + $0x74] ss:$8 sps:$4 sm:$0xff]   ;;  %1455 = vmatprep.subr.bf16.mxu1 %v1587_v48  ;;  %s479_s13 = scalar_lea.vmem %s2167_s11, %s1375_s19 }
  0x7d   : > { %v2012_v0 = vld [vmem:[%s473_s12] sm:$0xff]  ;;  %v2014_v1 = vld [vmem:[%s473_s12 + $0x8] sm:$0xff]  ;;  %649 = vmatprep.subr.bf16.mxu0 %v1569_v18  ;;  %v1586_v30 = vld [vmem:[#allocation2 + $0x70] ss:$8 sps:$4 sm:$0xff]   ;;  %v2035_v2 = vshrl.u32 %v499_v5, 7  ;;  %s1506_s20 = smul.u32 12, %s2185_s29 }
  0x7e   : > { %493 = vadd.xlane.f32.xlu0 %v2012_v0  ;;  %v1380_v39 = vld [vmem:[%s2157_s1] ss:$0 sm:$0xff]  ;;  %v1589_v50 = vld [vmem:[#allocation4 + $0x48] sm:$0xff]   ;;  %v1591_v52 = vld [vmem:[#allocation4 + $0x50] sm:$0xff]  }
  0x7f   : > { %v1381_v43 = vld [vmem:[%s2158_s2] ss:$0 sm:$0xff]  ;;  %v1590_v51 = vld [vmem:[#allocation4 + $0x8] sm:$0xff]   ;;  %v1592_v53 = vld [vmem:[#allocation4 + $0x10] sm:$0xff]   ;;  %v557_v3 = vsub.s32 0, %v2035_v2 }
  0x80   : > { %650 = vmatpush1.bf16.msra.mxu0 %v1571_v19  ;;  %v1588_v49 = vld [vmem:[#allocation4] sm:$0xff]   ;;  %v1593_v54 = vld [vmem:[#allocation4 + $0x58] sm:$0xff]   ;;  %v1597_v58 = vld [vmem:[#allocation4 + $0x68] sm:$0xff]  }
  0x81   : > { %651 = vmatprep.subr.bf16.mxu0 %v1572_v20  ;;  %1456 = vmatpush3.bf16.msra.mxu1 %v1588_v49  ;;  %v1594_v55 = vld [vmem:[#allocation4 + $0x18] sm:$0xff]   ;;  %v1595_v56 = vld [vmem:[#allocation4 + $0x60] sm:$0xff]   ;;  %v1598_v59 = vld [vmem:[#allocation4 + $0x28] sm:$0xff]  }
  0x82   : > { %495 = vadd.xlane.f32.xlu0 %v2014_v1  ;;  %1457 = vmatprep.subr.bf16.mxu1 %v1589_v50  ;;  %v1596_v57 = vld [vmem:[#allocation4 + $0x20] sm:$0xff]   ;;  %v1599_v60 = vld [vmem:[#allocation4 + $0x70] sm:$0xff]   ;;  %v1601_v62 = vld [vmem:[#allocation4 + $0x78] sm:$0xff]  }
  0x83   : > { %v1600_v61 = vld [vmem:[#allocation4 + $0x30] sm:$0xff]   ;;  %v1602_v63 = vld [vmem:[#allocation4 + $0x38] sm:$0xff]   ;;  %v553_v4 = vld [vmem:[%s2160_s4] sm:$0x3] }
  0x84   : > { %652 = vmatpush1.bf16.msra.mxu0 %v1574_v21  ;;  %v1617_v6 = vld [vmem:[%s2165_s9 + $0x4c] ss:$12 sps:$4 sm:$0xff]  }
  0x85   : > { %653 = vmatprep.subr.bf16.mxu0 %v1575_v22  ;;  %1458 = vmatpush3.bf16.msra.mxu1 %v1590_v51 }
  0x86   : > { %1459 = vmatprep.subr.bf16.mxu1 %v1591_v52  ;;  %v1603_v52 = vld [vmem:[%s2165_s9] ss:$12 sps:$4 sm:$0xff]  }
  0x88   : > { %654 = vmatpush1.bf16.msra.mxu0 %v1577_v23 }
  0x89   : > { %655 = vmatprep.subr.bf16.mxu0 %v1578_v24  ;;  %1460 = vmatpush3.bf16.msra.mxu1 %v1592_v53  ;;  %v1605_v53 = vld [vmem:[%s2165_s9 + $0x4] ss:$12 sps:$4 sm:$0xff]  }
  0x8a   : > { %1461 = vmatprep.subr.bf16.mxu1 %v1593_v54  ;;  %v1800_v54 = vmov 0.0  }
  0x8c   : > { %656 = vmatpush1.bf16.msra.mxu0 %v1580_v26 }
  0x8d   : > { %657 = vmatprep.subr.bf16.mxu0 %v1581_v27  ;;  %1462 = vmatpush3.bf16.msra.mxu1 %v1594_v55  ;;  %v1607_v55 = vld [vmem:[%s2165_s9 + $0x18] ss:$12 sps:$4 sm:$0xff]  }
  0x8e   : > { %1463 = vmatprep.subr.bf16.mxu1 %v1595_v56  ;;  %v1610_v56 = vld [vmem:[%s2165_s9 + $0x20] ss:$12 sps:$4 sm:$0xff]  }
  0x90   : > { %658 = vmatpush1.bf16.msra.mxu0 %v1583_v28 }
  0x91   : > { %659 = vmatprep.subr.bf16.mxu0 %v1584_v29  ;;  %1464 = vmatpush3.bf16.msra.mxu1 %v1596_v57 }
  0x92   : > { %1465 = vmatprep.subr.bf16.mxu1 %v1597_v58 }
  0x94   : > { %660 = vmatpush1.bf16.msra.mxu0 %v1586_v30 }
  0x95   : > { %1466 = vmatpush3.bf16.msra.mxu1 %v1598_v59  ;;  %1120 = vmatprep.subr.bf16.mxu0 %v1605_v53 }
  0x96   : > { %1467 = vmatprep.subr.bf16.mxu1 %v1599_v60 }
  0x99   : > { %1468 = vmatpush3.bf16.msra.mxu1 %v1600_v61 }
  0x9a   : > { %1469 = vmatprep.subr.bf16.mxu1 %v1601_v62 }
  0x9d   : > { %1470 = vmatpush3.bf16.msra.mxu1 %v1602_v63 }
  0x9e   : > { %1486 = vmatprep.subr.bf16.mxu1 %v1800_v54 }
 0x10b   : > { %v494_v7 = vpop.xlane.xlu0 %493 }
 0x10c   : > { %v497_v8 = vmul.f32 0.0125, %v494_v7  ;;  %v561_v7 = vsub.s32 1, %v2035_v2 }
 0x10e   : > { %v502_v9 = vsub.f32 %v2012_v0, %v497_v8  ;;  %v558_v8 = vrot.slane %v553_v4, %v557_v3 }
 0x10f   : > { %v496_v10 = vpop.xlane.xlu0 %495 }
 0x110   : > { %v498_v11 = vmul.f32 0.0125, %v496_v10  ;;  %v504_v12 = vsel %vm501_vm0, %v502_v9, 0.0  ;;  %v562_v9 = vrot.slane %v553_v4, %v561_v7 }
 0x111   : > { %v506_v13 = vmul.f32 %v504_v12, %v504_v12 }
 0x112   : > { %v503_v14 = vsub.f32 %v2014_v1, %v498_v11 }
 0x113   : > { %508 = vadd.xlane.f32.xlu1 %v506_v13 }
 0x114   : > { %v505_v15 = vsel %vm501_vm0, %v503_v14, 0.0 }
 0x115   : > { %v507_v16 = vmul.f32 %v505_v15, %v505_v15 }
 0x117   : > { %510 = vadd.xlane.f32.xlu1 %v507_v16 }
 0x1a0   : > { %v509_v31 = vpop.xlane.xlu1 %508 }
 0x1a1   : > { %v512_v32 = vmul.f32 0.0125, %v509_v31 }
 0x1a3   : > { %v514_v33 = vadd.f32 1e-05, %v512_v32 }
 0x1a4   : > { %v511_v34 = vpop.xlane.xlu1 %510 }
 0x1a5   : > { %1635 = vrsqrt.f32 %v514_v33  ;;  %v513_v35 = vmul.f32 0.0125, %v511_v34 }
 0x1a7   : > { %v515_v36 = vadd.f32 1e-05, %v513_v35 }
 0x1a9   : > { %1637 = vrsqrt.f32 %v515_v36 }
 0x1af   : > { %v1636_v37 = vpop.eup %1635 }
 0x1b0   : > { %v518_v38 = vmul.f32 %v1636_v37, %v504_v12 }
 0x1b2   : > { %v526_v42 = vmul.f32 %v1380_v39, %v518_v38 }
 0x1b3   : > { %v1638_v40 = vpop.eup %1637 }
 0x1b4   : > { %v519_v41 = vmul.f32 %v1638_v40, %v505_v15  ;;  %v534_v45 = vadd.f32 %v1381_v43, %v526_v42  ;;  %v1402_v40 = vld [vmem:[%s2162_s6] ss:$0 sm:$0xff] }
 0x1b6   : > { %v527_v44 = vmul.f32 %v1380_v39, %v519_v41 }
 0x1b8   : > { %v535_v46 = vadd.f32 %v1381_v43, %v527_v44 }
 0x1ba   : > { %v536_v47 = vpack.c.bf16 %v535_v46, %v534_v45 }
 0x1bc   : > { %678 = vmatmul.mubr.bf16.vlgmr.msra.gmra.mrb[0].mxu0 %v536_v47 }
 0x1bd   : > { %1152 = vmatprep.mubr.bf16.mxu0 %v1799_v25  ;;  %1121 = vmatpush1.bf16.msra.mxu0 %v1603_v52 }
 0x28f   : > { %v679_v10 = vpop.f32.mrb[0].mxu0 }
 0x290   : > { %v680_v11 = vadd.f32 %v679_v10, %v558_v8  ;;  %v681_v12 = vpop.f32.mrb[1].mxu0  ;;  %v1613_v10 = vld [vmem:[%s2165_s9 + $0x34] ss:$12 sps:$4 sm:$0xff]  }
 0x291   : > { %v682_v13 = vadd.f32 %v681_v12, %v562_v9  ;;  %v683_v5 = vpop.f32.mrb[2].mxu0  ;;  %v1614_v12 = vld [vmem:[%s2165_s9 + $0x38] ss:$12 sps:$4 sm:$0xff]  }
 0x292   : > { %v1398_v14 = vmul.f32 -1.442695, %v680_v11  ;;  %v684_v15 = vadd.f32 %v683_v5, %v558_v8  ;;  %v685_v16 = vpop.f32.mrb[3].mxu0  ;;  %v1618_v5 = vld [vmem:[%s2165_s9 + $0x50] ss:$12 sps:$4 sm:$0xff]  }
 0x293   : > { %v1399_v17 = vmul.f32 -1.442695, %v682_v13  ;;  %v686_v18 = vadd.f32 %v685_v16, %v562_v9  ;;  %v1622_v16 = vld [vmem:[%s2165_s9 + $0x68] ss:$12 sps:$4 sm:$0xff]  }
 0x294   : > { %1639 = vpow2.f32 %v1398_v14  ;;  %v1400_v19 = vmul.f32 -1.442695, %v684_v15  ;;  %v1621_v14 = vld [vmem:[%s2165_s9 + $0x64] ss:$12 sps:$4 sm:$0xff]  }
 0x295   : > { %1641 = vpow2.f32 %v1399_v17  ;;  %v1401_v20 = vmul.f32 -1.442695, %v686_v18  ;;  %v1625_v17 = vld [vmem:[%s2165_s9 + $0x7c] ss:$12 sps:$4 sm:$0xff]  }
 0x296   : > { %1643 = vpow2.f32 %v1400_v19  ;;  %v1626_v19 = vld [vmem:[%s2165_s9 + $0x80] ss:$12 sps:$4 sm:$0xff]  }
 0x297   : > { %1645 = vpow2.f32 %v1401_v20  ;;  %v1629_v20 = vld [vmem:[%s2165_s9 + $0x94] ss:$12 sps:$4 sm:$0xff]  }
 0x29e   : > { %v1640_v21 = vpop.eup %1639 }
 0x29f   : > { %v1642_v22 = vpop.eup %1641  ;;  %v700_v23 = vadd.f32 1.0, %v1640_v21  ;;  %v1627_v21 = vld [vmem:[%s2165_s9 + $0x90] ss:$12 sps:$4 sm:$0xff]  }
 0x2a0   : > { %v1644_v24 = vpop.eup %1643  ;;  %v701_v25 = vadd.f32 1.0, %v1642_v22  ;;  %v1630_v22 = vld [vmem:[%s2165_s9 + $0x98] ss:$12 sps:$4 sm:$0xff]  }
 0x2a1   : > { %v1646_v26 = vpop.eup %1645  ;;  %1647 = vrcp.f32 %v700_v23  ;;  %v702_v27 = vadd.f32 1.0, %v1644_v24  ;;  %v1633_v23 = vld [vmem:[%s2165_s9 + $0xac] ss:$12 sps:$4 sm:$0xff]   ;;  %v1631_v24 = vld [vmem:[%s2165_s9 + $0xa8] ss:$12 sps:$4 sm:$0xff]  }
 0x2a2   : > { %1649 = vrcp.f32 %v701_v25  ;;  %v703_v28 = vadd.f32 1.0, %v1646_v26  ;;  %v1634_v25 = vld [vmem:[%s2165_s9 + $0xb0] ss:$12 sps:$4 sm:$0xff]  }
 0x2a3   : > { %1651 = vrcp.f32 %v702_v27 }
 0x2a4   : > { %1653 = vrcp.f32 %v703_v28 }
 0x2ab   : > { %v1648_v29 = vpop.eup %1647 }
 0x2ac   : > { %v1650_v30 = vpop.eup %1649  ;;  %v712_v33 = vmul.f32 %v1648_v29, %v680_v11  ;;  %v1611_v11 = vld [vmem:[%s2165_s9 + $0x30] ss:$12 sps:$4 sm:$0xff]  }
 0x2ad   : > { %v1652_v31 = vpop.eup %1651  ;;  %v713_v35 = vmul.f32 %v1650_v30, %v682_v13  ;;  %v1615_v13 = vld [vmem:[%s2165_s9 + $0x48] ss:$12 sps:$4 sm:$0xff]  }
 0x2ae   : > { %v1654_v32 = vpop.eup %1653  ;;  %v714_v34 = vmul.f32 %v1652_v31, %v684_v15  ;;  %v1619_v15 = vld [vmem:[%s2165_s9 + $0x60] ss:$12 sps:$4 sm:$0xff]  }
 0x2af   : > { %v715_v36 = vmul.f32 %v1654_v32, %v686_v18  ;;  %v1623_v18 = vld [vmem:[%s2165_s9 + $0x78] ss:$12 sps:$4 sm:$0xff]  }
 0x2b0   : > { %v716_v37 = vpack.c.bf16 %v714_v34, %v712_v33  ;;  %v1419_v33 = vld [vmem:[#allocation6] ss:$0 sm:$0xff] }
 0x2b1   : > { %v717_v38 = vpack.c.bf16 %v715_v36, %v713_v35 }
 0x2b3   : > { %885 = vmatprep.mubr.bf16.mxu1 %v717_v38  ;;  %v1420_v38 = vld [vmem:[#allocation7] ss:$0 sm:$0xff] }
 0x2b4   : > { %886 = vmatmul.mubr.bf16.vlgmr.msra.gmra.mrb[0].mxu1 %v716_v37 }
 0x2b5   : > { %1502 = vmatprep.mubr.msk.bf16.mxu1 %vm1801_vm1, %v1800_v54 }
 0x387   : > { %v1471_v39 = vpop.f32.mrb[0].mxu1 }
 0x388   : > { %v1472_v41 = vpop.f32.mrb[1].mxu1 }
 0x389   : > { %v1473_v42 = vadd.f32 %v1472_v41, %v1471_v39  ;;  %v1474_v43 = vpop.f32.mrb[2].mxu1 }
 0x38a   : > { %v1475_v44 = vpop.f32.mrb[3].mxu1 }
 0x38b   : > { %v888_v45 = vadd.f32 %v1473_v42, %v1402_v40  ;;  %v1476_v46 = vadd.f32 %v1475_v44, %v1474_v43  ;;  %v987_v43 = vsub.s32 2, %v2035_v2  ;;  %v975_v44 = vld [vmem:[%s2166_s10] sm:$0x7] }
 0x38d   : > { %v894_v47 = vmul.f32 0.5, %v888_v45  ;;  %v891_v48 = vadd.f32 %v1476_v46, %v1402_v40  ;;  %v980_v45 = vrot.slane %v975_v44, %v557_v3  ;;  %v988_v46 = vrot.slane %v975_v44, %v987_v43 }
 0x38f   : > { %v895_v49 = vmul.f32 0.5, %v891_v48  ;;  %v896_v50 = vadd.f32 %v894_v47, %v2012_v0  ;;  %v1606_v0 = vld [vmem:[%s2165_s9 + $0x8] ss:$12 sps:$4 sm:$0xff]   ;;  %v984_v47 = vrot.slane %v975_v44, %v561_v7 }
 0x390   : > { %1487 = vmatpush3.bf16.msra.mxu1 %v1606_v0 }
 0x391   : > { %902 = vadd.xlane.f32.xlu0 %v896_v50  ;;  %898 = vst [vmem:[%s479_s13] sm:$0xff] %v896_v50  ;;  %v897_v51 = vadd.f32 %v895_v49, %v2014_v1  ;;  %v1609_v1 = vld [vmem:[%s2165_s9 + $0x1c] ss:$12 sps:$4 sm:$0xff]   ;;  %1488 = vmatprep.subr.bf16.mxu1 %v1800_v54 }
 0x392   : > { %1122 = vmatprep.subr.bf16.mxu0 %v1609_v1 }
 0x393   : > { %904 = vadd.xlane.f32.xlu1 %v897_v51  ;;  %899 = vst [vmem:[%s479_s13 + $0x8] sm:$0xff] %v897_v51  ;;  %1123 = vmatpush1.bf16.msra.mxu0 %v1607_v55  ;;  %s2183_s13 = sld [smem:[#allocation13_spill]] }
 0x394   : > { %1489 = vmatpush3.bf16.msra.mxu1 %v1610_v56  ;;  %1124 = vmatprep.subr.bf16.mxu0 %v1613_v10 }
 0x395   : > { %1490 = vmatprep.subr.bf16.mxu1 %v1800_v54 }
 0x397   : > { %1125 = vmatpush1.bf16.msra.mxu0 %v1611_v11 }
 0x398   : > { %1491 = vmatpush3.bf16.msra.mxu1 %v1614_v12  ;;  %1126 = vmatprep.subr.bf16.mxu0 %v1617_v6 }
 0x399   : > { %1492 = vmatprep.subr.bf16.mxu1 %v1800_v54  ;;  %s486_s23 = scalar_lea.vmem %s2183_s13, %s1506_s20 }
 0x39b   : > { %1127 = vmatpush1.bf16.msra.mxu0 %v1615_v13 }
 0x39c   : > { %1493 = vmatpush3.bf16.msra.mxu1 %v1618_v5  ;;  %1128 = vmatprep.subr.bf16.mxu0 %v1621_v14 }
 0x39d   : > { %1494 = vmatprep.subr.bf16.mxu1 %v1800_v54 }
 0x39f   : > { %1129 = vmatpush1.bf16.msra.mxu0 %v1619_v15 }
 0x3a0   : > { %1495 = vmatpush3.bf16.msra.mxu1 %v1622_v16  ;;  %1130 = vmatprep.subr.bf16.mxu0 %v1625_v17 }
 0x3a1   : > { %1496 = vmatprep.subr.bf16.mxu1 %v1800_v54 }
 0x3a3   : > { %1131 = vmatpush1.bf16.msra.mxu0 %v1623_v18 }
 0x3a4   : > { %1497 = vmatpush3.bf16.msra.mxu1 %v1626_v19  ;;  %1132 = vmatprep.subr.bf16.mxu0 %v1629_v20 }
 0x3a5   : > { %1498 = vmatprep.subr.bf16.mxu1 %v1800_v54 }
 0x3a7   : > { %1133 = vmatpush1.bf16.msra.mxu0 %v1627_v21 }
 0x3a8   : > { %1499 = vmatpush3.bf16.msra.mxu1 %v1630_v22  ;;  %1134 = vmatprep.subr.bf16.mxu0 %v1633_v23 }
 0x3a9   : > { %1500 = vmatprep.subr.bf16.mxu1 %v1800_v54 }
 0x3ab   : > { %1135 = vmatpush1.bf16.msra.mxu0 %v1631_v24 }
 0x3ac   : > { %1501 = vmatpush3.bf16.msra.mxu1 %v1634_v25 }
 0x41e   : > { %v903_v57 = vpop.xlane.xlu0 %902 }
 0x41f   : > { %v906_v58 = vmul.f32 0.0125, %v903_v57 }
 0x420   : > { %v905_v59 = vpop.xlane.xlu1 %904 }
 0x421   : > { %v908_v60 = vsub.f32 %v896_v50, %v906_v58  ;;  %v907_v61 = vmul.f32 0.0125, %v905_v59 }
 0x423   : > { %v909_v62 = vsub.f32 %v897_v51, %v907_v61  ;;  %v910_v63 = vsel %vm501_vm0, %v908_v60, 0.0 }
 0x424   : > { %v912_v4 = vmul.f32 %v910_v63, %v910_v63 }
 0x425   : > { %v911_v8 = vsel %vm501_vm0, %v909_v62, 0.0 }
 0x426   : > { %914 = vadd.xlane.f32.xlu0 %v912_v4  ;;  %v913_v9 = vmul.f32 %v911_v8, %v911_v8 }
 0x428   : > { %916 = vadd.xlane.f32.xlu1 %v913_v9 }
 0x4b3   : > { %v915_v26 = vpop.xlane.xlu0 %914 }
 0x4b4   : > { %v918_v27 = vmul.f32 0.0125, %v915_v26 }
 0x4b5   : > { %v917_v28 = vpop.xlane.xlu1 %916 }
 0x4b6   : > { %v920_v29 = vadd.f32 1e-05, %v918_v27  ;;  %v919_v30 = vmul.f32 0.0125, %v917_v28 }
 0x4b8   : > { %1655 = vrsqrt.f32 %v920_v29  ;;  %v921_v31 = vadd.f32 1e-05, %v919_v30 }
 0x4ba   : > { %1657 = vrsqrt.f32 %v921_v31 }
 0x4c2   : > { %v1656_v32 = vpop.eup %1655 }
 0x4c3   : > { %v924_v34 = vmul.f32 %v1656_v32, %v910_v63 }
 0x4c4   : > { %v1658_v35 = vpop.eup %1657 }
 0x4c5   : > { %v925_v36 = vmul.f32 %v1658_v35, %v911_v8  ;;  %v932_v37 = vmul.f32 %v1419_v33, %v924_v34 }
 0x4c7   : > { %v933_v39 = vmul.f32 %v1419_v33, %v925_v36  ;;  %v940_v40 = vadd.f32 %v1420_v38, %v932_v37 }
 0x4c9   : > { %v941_v41 = vadd.f32 %v1420_v38, %v933_v39 }
 0x4cb   : > { %v942_v42 = vpack.c.bf16 %v941_v41, %v940_v40 }
 0x4cd   : > { %1153 = vmatmul.mubr.bf16.vlgmr.msra.gmra.mrb[4].mxu0 %v942_v42  ;;  %1503 = vmatmul.mubr.bf16.vlgmr.msra.gmra.mrb[4].mxu1 %v942_v42 }
 0x5a0   : > { %v1154_v48 = vpop.f32.mrb[4].mxu0  ;;  %v1197_v49 = vpop.f32.mrb[4].mxu1 }
 0x5a1   : > { %v1155_v50 = vadd.f32 %v1154_v48, %v980_v45  ;;  %v1198_v51 = vadd.f32 %v1197_v49, %v988_v46  ;;  %v1156_v52 = vpop.f32.mrb[5].mxu0  ;;  %v1504_v53 = vpop.f32.mrb[5].mxu1 }
 0x5a2   : > { %v1157_v54 = vadd.f32 %v1156_v52, %v984_v47  ;;  %v1158_v0 = vpop.f32.mrb[6].mxu0  ;;  %v1200_v1 = vpop.f32.mrb[6].mxu1 }
 0x5a3   : > { %v1452_v55 = vpack.c.bf16 %v1198_v51, %v1198_v51  ;;  %v1159_v3 = vadd.f32 %v1158_v0, %v980_v45  ;;  %v1201_v56 = vadd.f32 %v1200_v1, %v988_v46  ;;  %v1160_v57 = vpop.f32.mrb[7].mxu0  ;;  %v1505_v58 = vpop.f32.mrb[7].mxu1 }
 0x5a4   : > { %v1451_v2 = vpack.c.bf16 %v1157_v54, %v1155_v50  ;;  %v1161_v7 = vadd.f32 %v1160_v57, %v984_v47 }
 0x5a5   : > { %1225 = vst [vmem:[%s486_s23 + $0x8] sm:$0xf] %v1452_v55  ;;  %v1454_v59 = vpack.c.bf16 %v1201_v56, %v1201_v56 }
 0x5a6   : > { %1224 = vst [vmem:[%s486_s23] sm:$0xff] %v1451_v2  ;;  %v1453_v60 = vpack.c.bf16 %v1161_v7, %v1159_v3 }
 0x5a7   : > { %1227 = vst [vmem:[%s486_s23 + $0x14] sm:$0xf] %v1454_v59 }
 0x5a8   : > { %1226 = vst [vmem:[%s486_s23 + $0xc] sm:$0xff] %v1453_v60 }
 0x5a9 PF: > { %s26_s21 = sadd.s32 1, %s1789_s21  }
 0x5aa   : > { %p23_p7 = scmp.ge.s32.totalorder %s26_s21, 4  }
 0x5ac   :  { %25 = sbr.rel (!%p23_p7) target bundleno = 6 (0x6), region = 123 }
 0x5b3   :  { %1269 = vsyncpa [#allocation3], 1 }
 0x5b4   :  { %1271 = vsyncpa [#allocation3 + $0x1], 1 }
 0x5b5   :  { %1272 = vsyncpa [#allocation5], 1 }
 0x5b6   :  { %1273 = vsyncpa [#allocation8], 1 }

// kernel: strong_classifier_forward.18
= control target key start
LH: loop header
LB: loop body
LE: loop exit
PB: predicated region body
PF: predicated region fallthrough
CT: control target
= control target key end

     0   :  { %s1586_s21 = smov 0   ;;  %s1848_s0 = inlined_call_operand.vmem [shape: f32[32,128], index: 0, kind: input, shape index: {}]   ;;  %s1849_s1 = inlined_call_operand.vmem [shape: f32[1,128], index: 1, kind: input, shape index: {}]   ;;  %s1850_s2 = inlined_call_operand.vmem [shape: f32[1,128], index: 2, kind: input, shape index: {}]   ;;  %s1851_s3 = inlined_call_operand.vmem [shape: bf16[128,256], index: 3, kind: input, shape index: {}]   ;;  %s1852_s4 = inlined_call_operand.vmem [shape: f32[1,256], index: 4, kind: input, shape index: {}]   ;;  %s1853_s5 = inlined_call_operand.vmem [shape: bf16[256,128], index: 5, kind: input, shape index: {}]   ;;  %s1854_s6 = inlined_call_operand.vmem [shape: f32[1,128], index: 6, kind: input, shape index: {}]   ;;  %s1855_s7 = inlined_call_operand.vmem [shape: f32[1,128], index: 7, kind: input, shape index: {}]   ;;  %s1856_s8 = inlined_call_operand.vmem [shape: f32[1,128], index: 8, kind: input, shape index: {}]   ;;  %s1857_s9 = inlined_call_operand.vmem [shape: bf16[128,384], index: 9, kind: input, shape index: {}]   ;;  %s1858_s10 = inlined_call_operand.vmem [shape: f32[1,384], index: 10, kind: input, shape index: {}]   ;;  %s1859_s11 = inlined_call_operand.vmem [shape: f32[32,128], index: 11, kind: output, shape index: {0}]   ;;  %s1860_s12 = inlined_call_operand.vmem [shape: bf16[32,384], index: 12, kind: output, shape index: {1}]  }
   0x1 LB: > { %s1265_s22 = sadd.s32 4294967295, %s1516_s21   ;;  %p1269_p0 = scmp.ge.s32.totalorder %s1516_s21, 1  ;;  %s1516_s21 = sphi %s1586_s21, %s23_s21  }
   0x2   : > { %p366_p1 = scmp.lt.s32.totalorder %s1516_s21, 3 }
   0x4   : > { %p367_p2 = pnand %p1269_p0, %p366_p1 }
   0x5   : > { %s1270_s23 = sshll.u32 (!%p367_p2), %s1265_s22, 1  ;;  %v1414_v2 = vld [vmem:[%s1851_s3 + $0x4] ss:$8 sps:$4 sm:$0xff] (!%p367_p2)   ;;  %v1416_v3 = vld [vmem:[%s1851_s3] ss:$8 sps:$4 sm:$0xff] (!%p367_p2)   ;;  %v444_v5 = vlaneseq (!%p367_p2)  ;;  %v1518_v25 = vmov (!%p367_p2), 0  }
   0x6   : > { %370 = sbr.rel (%p367_p2) target bundleno = 1340 (0x53c), region = 64  ;;  %p415_p3 = scmp.lt.s32.totalorder (!%p367_p2), %s1270_s23, 3  ;;  %v1417_v4 = vld [vmem:[%s1851_s3 + $0x14] ss:$8 sps:$4 sm:$0xff] (!%p367_p2)   ;;  %590 = vmatprep.subr.bf16.mxu0 (!%p367_p2), %v1414_v2  ;;  %v1419_v17 = vld [vmem:[%s1851_s3 + $0x10] ss:$8 sps:$4 sm:$0xff] (!%p367_p2)   ;;  %622 = vmatprep.mubr.bf16.mxu0 (!%p367_p2), %v1518_v25 }
   0x7   : > { %591 = vmatpush1.bf16.msra.mxu0 (!%p367_p2), %v1416_v3  ;;  %v1618_v6 = vand.u32 (!%p367_p2), 127, %v444_v5  ;;  %v1420_v18 = vld [vmem:[%s1851_s3 + $0x24] ss:$8 sps:$4 sm:$0xff] (!%p367_p2)   ;;  %v1422_v19 = vld [vmem:[%s1851_s3 + $0x20] ss:$8 sps:$4 sm:$0xff] (!%p367_p2)   ;;  %v1442_v52 = vld [vmem:[%s1853_s5 + $0x50] sm:$0xff] (!%p367_p2)  }
   0x8   : > { %592 = vmatprep.subr.bf16.mxu0 (!%p367_p2), %v1417_v4  ;;  %v1423_v20 = vld [vmem:[%s1851_s3 + $0x34] ss:$8 sps:$4 sm:$0xff] (!%p367_p2)   ;;  %v1425_v21 = vld [vmem:[%s1851_s3 + $0x30] ss:$8 sps:$4 sm:$0xff] (!%p367_p2)   ;;  %v1426_v22 = vld [vmem:[%s1851_s3 + $0x44] ss:$8 sps:$4 sm:$0xff] (!%p367_p2)  }
   0x9   : > { %vm446_vm0 = vcmp.lt.s32.totalorder (!%p367_p2), %v1618_v6, 80  ;;  %v1428_v23 = vld [vmem:[%s1851_s3 + $0x40] ss:$8 sps:$4 sm:$0xff] (!%p367_p2)   ;;  %v1429_v24 = vld [vmem:[%s1851_s3 + $0x54] ss:$8 sps:$4 sm:$0xff] (!%p367_p2)   ;;  %v1721_v2 = vshrl.u32 (!%p367_p2), %v444_v5, 7 }
   0xa   : > { %v1431_v26 = vld [vmem:[%s1851_s3 + $0x50] ss:$8 sps:$4 sm:$0xff] (!%p367_p2)   ;;  %v1432_v27 = vld [vmem:[%s1851_s3 + $0x64] ss:$8 sps:$4 sm:$0xff] (!%p367_p2)   ;;  %v1434_v28 = vld [vmem:[%s1851_s3 + $0x60] ss:$8 sps:$4 sm:$0xff] (!%p367_p2)  }
   0xb   : > { %593 = vmatpush1.bf16.msra.mxu0 (!%p367_p2), %v1419_v17  ;;  %v1435_v29 = vld [vmem:[%s1851_s3 + $0x74] ss:$8 sps:$4 sm:$0xff] (!%p367_p2)   ;;  %v1437_v30 = vld [vmem:[%s1851_s3 + $0x70] ss:$8 sps:$4 sm:$0xff] (!%p367_p2)   ;;  %v1276_v39 = vld [vmem:[%s1849_s1] ss:$0 sm:$0xff] (!%p367_p2) }
   0xc   : > { %594 = vmatprep.subr.bf16.mxu0 (!%p367_p2), %v1420_v18  ;;  %v1277_v43 = vld [vmem:[%s1850_s2] ss:$0 sm:$0xff] (!%p367_p2)  ;;  %v1440_v50 = vld [vmem:[%s1853_s5 + $0x48] sm:$0xff] (!%p367_p2)   ;;  %v1443_v53 = vld [vmem:[%s1853_s5 + $0x10] sm:$0xff] (!%p367_p2)   ;;  %v502_v3 = vsub.s32 (!%p367_p2), 0, %v1721_v2  ;;  %vm1520_vm1 = vmmov (!%p367_p2), 0  }
   0xd   : > { %s1862_s23 = smov (!%p415_p3, %s1270_s23), 3  ;;  %v1438_v48 = vld [vmem:[%s1853_s5 + $0x40] sm:$0xff]   ;;  %v1441_v51 = vld [vmem:[%s1853_s5 + $0x8] sm:$0xff]   ;;  %v1444_v54 = vld [vmem:[%s1853_s5 + $0x58] sm:$0xff]  }
   0xe   : > { %s1271_s24 = sshll.u32 %s1862_s23, 3  ;;  %v1439_v49 = vld [vmem:[%s1853_s5] sm:$0xff]   ;;  %1351 = vmatprep.subr.bf16.mxu1 %v1438_v48  ;;  %v1445_v55 = vld [vmem:[%s1853_s5 + $0x18] sm:$0xff]   ;;  %v1448_v58 = vld [vmem:[%s1853_s5 + $0x68] sm:$0xff]   ;;  %s1402_s15 = smul.u32 12, %s1862_s23 }
   0xf   : > { %s418_s27 = scalar_lea.vmem %s1848_s0, %s1271_s24  ;;  %595 = vmatpush1.bf16.msra.mxu0 %v1422_v19  ;;  %1352 = vmatpush3.bf16.msra.mxu1 %v1439_v49  ;;  %v1446_v56 = vld [vmem:[%s1853_s5 + $0x60] sm:$0xff]   ;;  %v1449_v59 = vld [vmem:[%s1853_s5 + $0x28] sm:$0xff]   ;;  %v1450_v60 = vld [vmem:[%s1853_s5 + $0x70] sm:$0xff]  }
  0x10   : > { %v1602_v0 = vld [vmem:[%s418_s27] sm:$0xff]  ;;  %v1604_v1 = vld [vmem:[%s418_s27 + $0x8] sm:$0xff]  ;;  %596 = vmatprep.subr.bf16.mxu0 %v1423_v20  ;;  %1353 = vmatprep.subr.bf16.mxu1 %v1440_v50  ;;  %v1451_v61 = vld [vmem:[%s1853_s5 + $0x30] sm:$0xff]   ;;  %s424_s27 = scalar_lea.vmem %s1859_s11, %s1271_s24  ;;  %s431_s18 = scalar_lea.vmem %s1860_s12, %s1402_s15 }
  0x11   : > { %438 = vadd.xlane.f32.xlu0 %v1602_v0  ;;  %v1447_v57 = vld [vmem:[%s1853_s5 + $0x20] sm:$0xff]   ;;  %v1452_v62 = vld [vmem:[%s1853_s5 + $0x78] sm:$0xff]  }
  0x12   : > { %v1453_v63 = vld [vmem:[%s1853_s5 + $0x38] sm:$0xff]   ;;  %v498_v4 = vld [vmem:[%s1852_s4] sm:$0x3] }
  0x13   : > { %597 = vmatpush1.bf16.msra.mxu0 %v1425_v21  ;;  %1354 = vmatpush3.bf16.msra.mxu1 %v1441_v51  ;;  %v1468_v6 = vld [vmem:[%s1857_s9 + $0x4c] ss:$12 sps:$4 sm:$0xff]  }
  0x14   : > { %598 = vmatprep.subr.bf16.mxu0 %v1426_v22  ;;  %1355 = vmatprep.subr.bf16.mxu1 %v1442_v52  ;;  %v1454_v52 = vld [vmem:[%s1857_s9] ss:$12 sps:$4 sm:$0xff]  }
  0x15   : > { %440 = vadd.xlane.f32.xlu0 %v1604_v1 }
  0x17   : > { %599 = vmatpush1.bf16.msra.mxu0 %v1428_v23  ;;  %1356 = vmatpush3.bf16.msra.mxu1 %v1443_v53  ;;  %v1456_v53 = vld [vmem:[%s1857_s9 + $0x4] ss:$12 sps:$4 sm:$0xff]  }
  0x18   : > { %600 = vmatprep.subr.bf16.mxu0 %v1429_v24  ;;  %1357 = vmatprep.subr.bf16.mxu1 %v1444_v54  ;;  %v1519_v54 = vmov 0.0  }
  0x1b   : > { %601 = vmatpush1.bf16.msra.mxu0 %v1431_v26  ;;  %1358 = vmatpush3.bf16.msra.mxu1 %v1445_v55  ;;  %v1458_v55 = vld [vmem:[%s1857_s9 + $0x18] ss:$12 sps:$4 sm:$0xff]  }
  0x1c   : > { %602 = vmatprep.subr.bf16.mxu0 %v1432_v27  ;;  %1359 = vmatprep.subr.bf16.mxu1 %v1446_v56  ;;  %v1461_v56 = vld [vmem:[%s1857_s9 + $0x20] ss:$12 sps:$4 sm:$0xff]  }
  0x1f   : > { %603 = vmatpush1.bf16.msra.mxu0 %v1434_v28  ;;  %1360 = vmatpush3.bf16.msra.mxu1 %v1447_v57 }
  0x20   : > { %604 = vmatprep.subr.bf16.mxu0 %v1435_v29  ;;  %1361 = vmatprep.subr.bf16.mxu1 %v1448_v58 }
  0x23   : > { %605 = vmatpush1.bf16.msra.mxu0 %v1437_v30  ;;  %1362 = vmatpush3.bf16.msra.mxu1 %v1449_v59 }
  0x24   : > { %1363 = vmatprep.subr.bf16.mxu1 %v1450_v60  ;;  %1065 = vmatprep.subr.bf16.mxu0 %v1456_v53 }
  0x27   : > { %1364 = vmatpush3.bf16.msra.mxu1 %v1451_v61 }
  0x28   : > { %1365 = vmatprep.subr.bf16.mxu1 %v1452_v62 }
  0x2b   : > { %1366 = vmatpush3.bf16.msra.mxu1 %v1453_v63 }
  0x2c   : > { %1382 = vmatprep.subr.bf16.mxu1 %v1519_v54 }
  0x9e   : > { %v439_v7 = vpop.xlane.xlu0 %438 }
  0x9f   : > { %v442_v8 = vmul.f32 0.0125, %v439_v7  ;;  %v506_v7 = vsub.s32 1, %v1721_v2 }
  0xa1   : > { %v447_v9 = vsub.f32 %v1602_v0, %v442_v8  ;;  %v503_v8 = vrot.slane %v498_v4, %v502_v3 }
  0xa2   : > { %v441_v10 = vpop.xlane.xlu0 %440 }
  0xa3   : > { %v443_v11 = vmul.f32 0.0125, %v441_v10  ;;  %v449_v12 = vsel %vm446_vm0, %v447_v9, 0.0  ;;  %v507_v9 = vrot.slane %v498_v4, %v506_v7 }
  0xa4   : > { %v451_v13 = vmul.f32 %v449_v12, %v449_v12 }
  0xa5   : > { %v448_v14 = vsub.f32 %v1604_v1, %v443_v11 }
  0xa6   : > { %453 = vadd.xlane.f32.xlu1 %v451_v13 }
  0xa7   : > { %v450_v15 = vsel %vm446_vm0, %v448_v14, 0.0 }
  0xa8   : > { %v452_v16 = vmul.f32 %v450_v15, %v450_v15 }
  0xaa   : > { %455 = vadd.xlane.f32.xlu1 %v452_v16 }
 0x133   : > { %v454_v31 = vpop.xlane.xlu1 %453 }
 0x134   : > { %v457_v32 = vmul.f32 0.0125, %v454_v31 }
 0x136   : > { %v459_v33 = vadd.f32 1e-05, %v457_v32 }
 0x137   : > { %v456_v34 = vpop.xlane.xlu1 %455 }
 0x138   : > { %1486 = vrsqrt.f32 %v459_v33  ;;  %v458_v35 = vmul.f32 0.0125, %v456_v34 }
 0x13a   : > { %v460_v36 = vadd.f32 1e-05, %v458_v35 }
 0x13c   : > { %1488 = vrsqrt.f32 %v460_v36 }
 0x142   : > { %v1487_v37 = vpop.eup %1486 }
 0x143   : > { %v463_v38 = vmul.f32 %v1487_v37, %v449_v12 }
 0x145   : > { %v471_v42 = vmul.f32 %v1276_v39, %v463_v38 }
 0x146   : > { %v1489_v40 = vpop.eup %1488 }
 0x147   : > { %v464_v41 = vmul.f32 %v1489_v40, %v450_v15  ;;  %v479_v45 = vadd.f32 %v1277_v43, %v471_v42  ;;  %v1298_v40 = vld [vmem:[%s1854_s6] ss:$0 sm:$0xff] }
 0x149   : > { %v472_v44 = vmul.f32 %v1276_v39, %v464_v41 }
 0x14b   : > { %v480_v46 = vadd.f32 %v1277_v43, %v472_v44 }
 0x14d   : > { %v481_v47 = vpack.c.bf16 %v480_v46, %v479_v45 }
 0x14f   : > { %623 = vmatmul.mubr.bf16.vlgmr.msra.gmra.mrb[0].mxu0 %v481_v47 }
 0x150   : > { %1097 = vmatprep.mubr.bf16.mxu0 %v1518_v25  ;;  %1066 = vmatpush1.bf16.msra.mxu0 %v1454_v52 }
 0x222   : > { %v624_v10 = vpop.f32.mrb[0].mxu0 }
 0x223   : > { %v625_v11 = vadd.f32 %v624_v10, %v503_v8  ;;  %v626_v12 = vpop.f32.mrb[1].mxu0  ;;  %v1464_v10 = vld [vmem:[%s1857_s9 + $0x34] ss:$12 sps:$4 sm:$0xff]  }
 0x224   : > { %v627_v13 = vadd.f32 %v626_v12, %v507_v9  ;;  %v628_v5 = vpop.f32.mrb[2].mxu0  ;;  %v1465_v12 = vld [vmem:[%s1857_s9 + $0x38] ss:$12 sps:$4 sm:$0xff]  }
 0x225   : > { %v1294_v14 = vmul.f32 -1.442695, %v625_v11  ;;  %v629_v15 = vadd.f32 %v628_v5, %v503_v8  ;;  %v630_v16 = vpop.f32.mrb[3].mxu0  ;;  %v1469_v5 = vld [vmem:[%s1857_s9 + $0x50] ss:$12 sps:$4 sm:$0xff]  }
 0x226   : > { %v1295_v17 = vmul.f32 -1.442695, %v627_v13  ;;  %v631_v18 = vadd.f32 %v630_v16, %v507_v9  ;;  %v1473_v16 = vld [vmem:[%s1857_s9 + $0x68] ss:$12 sps:$4 sm:$0xff]  }
 0x227   : > { %1490 = vpow2.f32 %v1294_v14  ;;  %v1296_v19 = vmul.f32 -1.442695, %v629_v15  ;;  %v1472_v14 = vld [vmem:[%s1857_s9 + $0x64] ss:$12 sps:$4 sm:$0xff]  }
 0x228   : > { %1492 = vpow2.f32 %v1295_v17  ;;  %v1297_v20 = vmul.f32 -1.442695, %v631_v18  ;;  %v1476_v17 = vld [vmem:[%s1857_s9 + $0x7c] ss:$12 sps:$4 sm:$0xff]  }
 0x229   : > { %1494 = vpow2.f32 %v1296_v19  ;;  %v1477_v19 = vld [vmem:[%s1857_s9 + $0x80] ss:$12 sps:$4 sm:$0xff]  }
 0x22a   : > { %1496 = vpow2.f32 %v1297_v20  ;;  %v1480_v20 = vld [vmem:[%s1857_s9 + $0x94] ss:$12 sps:$4 sm:$0xff]  }
 0x231   : > { %v1491_v21 = vpop.eup %1490 }
 0x232   : > { %v1493_v22 = vpop.eup %1492  ;;  %v645_v23 = vadd.f32 1.0, %v1491_v21  ;;  %v1478_v21 = vld [vmem:[%s1857_s9 + $0x90] ss:$12 sps:$4 sm:$0xff]  }
 0x233   : > { %v1495_v24 = vpop.eup %1494  ;;  %v646_v25 = vadd.f32 1.0, %v1493_v22  ;;  %v1481_v22 = vld [vmem:[%s1857_s9 + $0x98] ss:$12 sps:$4 sm:$0xff]  }
 0x234   : > { %v1497_v26 = vpop.eup %1496  ;;  %1498 = vrcp.f32 %v645_v23  ;;  %v647_v27 = vadd.f32 1.0, %v1495_v24  ;;  %v1484_v23 = vld [vmem:[%s1857_s9 + $0xac] ss:$12 sps:$4 sm:$0xff]   ;;  %v1482_v24 = vld [vmem:[%s1857_s9 + $0xa8] ss:$12 sps:$4 sm:$0xff]  }
 0x235   : > { %1500 = vrcp.f32 %v646_v25  ;;  %v648_v28 = vadd.f32 1.0, %v1497_v26  ;;  %v1485_v25 = vld [vmem:[%s1857_s9 + $0xb0] ss:$12 sps:$4 sm:$0xff]  }
 0x236   : > { %1502 = vrcp.f32 %v647_v27 }
 0x237   : > { %1504 = vrcp.f32 %v648_v28 }
 0x23e   : > { %v1499_v29 = vpop.eup %1498 }
 0x23f   : > { %v1501_v30 = vpop.eup %1500  ;;  %v657_v33 = vmul.f32 %v1499_v29, %v625_v11  ;;  %v1462_v11 = vld [vmem:[%s1857_s9 + $0x30] ss:$12 sps:$4 sm:$0xff]  }
 0x240   : > { %v1503_v31 = vpop.eup %1502  ;;  %v658_v35 = vmul.f32 %v1501_v30, %v627_v13  ;;  %v1466_v13 = vld [vmem:[%s1857_s9 + $0x48] ss:$12 sps:$4 sm:$0xff]  }
 0x241   : > { %v1505_v32 = vpop.eup %1504  ;;  %v659_v34 = vmul.f32 %v1503_v31, %v629_v15  ;;  %v1470_v15 = vld [vmem:[%s1857_s9 + $0x60] ss:$12 sps:$4 sm:$0xff]  }
 0x242   : > { %v660_v36 = vmul.f32 %v1505_v32, %v631_v18  ;;  %v1474_v18 = vld [vmem:[%s1857_s9 + $0x78] ss:$12 sps:$4 sm:$0xff]  }
 0x243   : > { %v661_v37 = vpack.c.bf16 %v659_v34, %v657_v33  ;;  %v1315_v33 = vld [vmem:[%s1855_s7] ss:$0 sm:$0xff] }
 0x244   : > { %v662_v38 = vpack.c.bf16 %v660_v36, %v658_v35 }
 0x246   : > { %830 = vmatprep.mubr.bf16.mxu1 %v662_v38  ;;  %v1316_v38 = vld [vmem:[%s1856_s8] ss:$0 sm:$0xff] }
 0x247   : > { %831 = vmatmul.mubr.bf16.vlgmr.msra.gmra.mrb[0].mxu1 %v661_v37 }
 0x248   : > { %1398 = vmatprep.mubr.msk.bf16.mxu1 %vm1520_vm1, %v1519_v54 }
 0x31a   : > { %v1367_v39 = vpop.f32.mrb[0].mxu1 }
 0x31b   : > { %v1368_v41 = vpop.f32.mrb[1].mxu1 }
 0x31c   : > { %v1369_v42 = vadd.f32 %v1368_v41, %v1367_v39  ;;  %v1370_v43 = vpop.f32.mrb[2].mxu1 }
 0x31d   : > { %v1371_v44 = vpop.f32.mrb[3].mxu1 }
 0x31e   : > { %v833_v45 = vadd.f32 %v1369_v42, %v1298_v40  ;;  %v1372_v46 = vadd.f32 %v1371_v44, %v1370_v43  ;;  %v932_v43 = vsub.s32 2, %v1721_v2  ;;  %v920_v44 = vld [vmem:[%s1858_s10] sm:$0x7] }
 0x320   : > { %v839_v47 = vmul.f32 0.5, %v833_v45  ;;  %v836_v48 = vadd.f32 %v1372_v46, %v1298_v40  ;;  %v925_v45 = vrot.slane %v920_v44, %v502_v3  ;;  %v933_v46 = vrot.slane %v920_v44, %v932_v43 }
 0x322   : > { %v840_v49 = vmul.f32 0.5, %v836_v48  ;;  %v841_v50 = vadd.f32 %v839_v47, %v1602_v0  ;;  %v1457_v0 = vld [vmem:[%s1857_s9 + $0x8] ss:$12 sps:$4 sm:$0xff]   ;;  %v929_v47 = vrot.slane %v920_v44, %v506_v7 }
 0x323   : > { %1383 = vmatpush3.bf16.msra.mxu1 %v1457_v0 }
 0x324   : > { %847 = vadd.xlane.f32.xlu0 %v841_v50  ;;  %843 = vst [vmem:[%s424_s27] sm:$0xff] %v841_v50  ;;  %v842_v51 = vadd.f32 %v840_v49, %v1604_v1  ;;  %v1460_v1 = vld [vmem:[%s1857_s9 + $0x1c] ss:$12 sps:$4 sm:$0xff]   ;;  %1384 = vmatprep.subr.bf16.mxu1 %v1519_v54 }
 0x325   : > { %1067 = vmatprep.subr.bf16.mxu0 %v1460_v1 }
 0x326   : > { %849 = vadd.xlane.f32.xlu1 %v842_v51  ;;  %844 = vst [vmem:[%s424_s27 + $0x8] sm:$0xff] %v842_v51  ;;  %1068 = vmatpush1.bf16.msra.mxu0 %v1458_v55 }
 0x327   : > { %1385 = vmatpush3.bf16.msra.mxu1 %v1461_v56  ;;  %1069 = vmatprep.subr.bf16.mxu0 %v1464_v10 }
 0x328   : > { %1386 = vmatprep.subr.bf16.mxu1 %v1519_v54 }
 0x32a   : > { %1070 = vmatpush1.bf16.msra.mxu0 %v1462_v11 }
 0x32b   : > { %1387 = vmatpush3.bf16.msra.mxu1 %v1465_v12  ;;  %1071 = vmatprep.subr.bf16.mxu0 %v1468_v6 }
 0x32c   : > { %1388 = vmatprep.subr.bf16.mxu1 %v1519_v54 }
 0x32e   : > { %1072 = vmatpush1.bf16.msra.mxu0 %v1466_v13 }
 0x32f   : > { %1389 = vmatpush3.bf16.msra.mxu1 %v1469_v5  ;;  %1073 = vmatprep.subr.bf16.mxu0 %v1472_v14 }
 0x330   : > { %1390 = vmatprep.subr.bf16.mxu1 %v1519_v54 }
 0x332   : > { %1074 = vmatpush1.bf16.msra.mxu0 %v1470_v15 }
 0x333   : > { %1391 = vmatpush3.bf16.msra.mxu1 %v1473_v16  ;;  %1075 = vmatprep.subr.bf16.mxu0 %v1476_v17 }
 0x334   : > { %1392 = vmatprep.subr.bf16.mxu1 %v1519_v54 }
 0x336   : > { %1076 = vmatpush1.bf16.msra.mxu0 %v1474_v18 }
 0x337   : > { %1393 = vmatpush3.bf16.msra.mxu1 %v1477_v19  ;;  %1077 = vmatprep.subr.bf16.mxu0 %v1480_v20 }
 0x338   : > { %1394 = vmatprep.subr.bf16.mxu1 %v1519_v54 }
 0x33a   : > { %1078 = vmatpush1.bf16.msra.mxu0 %v1478_v21 }
 0x33b   : > { %1395 = vmatpush3.bf16.msra.mxu1 %v1481_v22  ;;  %1079 = vmatprep.subr.bf16.mxu0 %v1484_v23 }
 0x33c   : > { %1396 = vmatprep.subr.bf16.mxu1 %v1519_v54 }
 0x33e   : > { %1080 = vmatpush1.bf16.msra.mxu0 %v1482_v24 }
 0x33f   : > { %1397 = vmatpush3.bf16.msra.mxu1 %v1485_v25 }
 0x3b1   : > { %v848_v57 = vpop.xlane.xlu0 %847 }
 0x3b2   : > { %v851_v58 = vmul.f32 0.0125, %v848_v57 }
 0x3b3   : > { %v850_v59 = vpop.xlane.xlu1 %849 }
 0x3b4   : > { %v853_v60 = vsub.f32 %v841_v50, %v851_v58  ;;  %v852_v61 = vmul.f32 0.0125, %v850_v59 }
 0x3b6   : > { %v854_v62 = vsub.f32 %v842_v51, %v852_v61  ;;  %v855_v63 = vsel %vm446_vm0, %v853_v60, 0.0 }
 0x3b7   : > { %v857_v4 = vmul.f32 %v855_v63, %v855_v63 }
 0x3b8   : > { %v856_v8 = vsel %vm446_vm0, %v854_v62, 0.0 }
 0x3b9   : > { %859 = vadd.xlane.f32.xlu0 %v857_v4  ;;  %v858_v9 = vmul.f32 %v856_v8, %v856_v8 }
 0x3bb   : > { %861 = vadd.xlane.f32.xlu1 %v858_v9 }
 0x446   : > { %v860_v26 = vpop.xlane.xlu0 %859 }
 0x447   : > { %v863_v27 = vmul.f32 0.0125, %v860_v26 }
 0x448   : > { %v862_v28 = vpop.xlane.xlu1 %861 }
 0x449   : > { %v865_v29 = vadd.f32 1e-05, %v863_v27  ;;  %v864_v30 = vmul.f32 0.0125, %v862_v28 }
 0x44b   : > { %1506 = vrsqrt.f32 %v865_v29  ;;  %v866_v31 = vadd.f32 1e-05, %v864_v30 }
 0x44d   : > { %1508 = vrsqrt.f32 %v866_v31 }
 0x455   : > { %v1507_v32 = vpop.eup %1506 }
 0x456   : > { %v869_v34 = vmul.f32 %v1507_v32, %v855_v63 }
 0x457   : > { %v1509_v35 = vpop.eup %1508 }
 0x458   : > { %v870_v36 = vmul.f32 %v1509_v35, %v856_v8  ;;  %v877_v37 = vmul.f32 %v1315_v33, %v869_v34 }
 0x45a   : > { %v878_v39 = vmul.f32 %v1315_v33, %v870_v36  ;;  %v885_v40 = vadd.f32 %v1316_v38, %v877_v37 }
 0x45c   : > { %v886_v41 = vadd.f32 %v1316_v38, %v878_v39 }
 0x45e   : > { %v887_v42 = vpack.c.bf16 %v886_v41, %v885_v40 }
 0x460   : > { %1098 = vmatmul.mubr.bf16.vlgmr.msra.gmra.mrb[4].mxu0 %v887_v42  ;;  %1399 = vmatmul.mubr.bf16.vlgmr.msra.gmra.mrb[4].mxu1 %v887_v42 }
 0x533   : > { %v1099_v48 = vpop.f32.mrb[4].mxu0  ;;  %v1142_v49 = vpop.f32.mrb[4].mxu1 }
 0x534   : > { %v1100_v50 = vadd.f32 %v1099_v48, %v925_v45  ;;  %v1143_v51 = vadd.f32 %v1142_v49, %v933_v46  ;;  %v1101_v52 = vpop.f32.mrb[5].mxu0  ;;  %v1400_v53 = vpop.f32.mrb[5].mxu1 }
 0x535   : > { %v1102_v54 = vadd.f32 %v1101_v52, %v929_v47  ;;  %v1103_v0 = vpop.f32.mrb[6].mxu0  ;;  %v1145_v1 = vpop.f32.mrb[6].mxu1 }
 0x536   : > { %v1348_v55 = vpack.c.bf16 %v1143_v51, %v1143_v51  ;;  %v1104_v3 = vadd.f32 %v1103_v0, %v925_v45  ;;  %v1146_v56 = vadd.f32 %v1145_v1, %v933_v46  ;;  %v1105_v57 = vpop.f32.mrb[7].mxu0  ;;  %v1401_v58 = vpop.f32.mrb[7].mxu1 }
 0x537   : > { %v1347_v2 = vpack.c.bf16 %v1102_v54, %v1100_v50  ;;  %v1106_v7 = vadd.f32 %v1105_v57, %v929_v47 }
 0x538   : > { %1170 = vst [vmem:[%s431_s18 + $0x8] sm:$0xf] %v1348_v55  ;;  %v1350_v59 = vpack.c.bf16 %v1146_v56, %v1146_v56 }
 0x539   : > { %1169 = vst [vmem:[%s431_s18] sm:$0xff] %v1347_v2  ;;  %v1349_v60 = vpack.c.bf16 %v1106_v7, %v1104_v3 }
 0x53a   : > { %1172 = vst [vmem:[%s431_s18 + $0x14] sm:$0xf] %v1350_v59 }
 0x53b   : > { %1171 = vst [vmem:[%s431_s18 + $0xc] sm:$0xff] %v1349_v60 }
 0x53c PF: > { %s23_s21 = sadd.s32 1, %s1516_s21  }
 0x53d   : > { %p20_p4 = scmp.ge.s32.totalorder %s23_s21, 4  }
 0x53f   :  { %22 = sbr.rel (!%p20_p4) target bundleno = 1 (0x1), region = 106 }

// kernel: strong_classifier_forward.17
= control target key start
LH: loop header
LB: loop body
LE: loop exit
PB: predicated region body
PF: predicated region fallthrough
CT: control target
= control target key end

     0   :  { %s2603_s0 = inlined_call_operand.vmem [shape: f32[32,128], index: 0, kind: input, shape index: {}]   ;;  %s2604_s1 = inlined_call_operand.vmem [shape: bf16[32,128], index: 1, kind: input, shape index: {}]   ;;  %s2605_s2 = inlined_call_operand.vmem [shape: s32[32,1], index: 2, kind: input, shape index: {}]   ;;  %s2606_s3 = inlined_call_operand.vmem [shape: bf16[128,128], index: 3, kind: input, shape index: {}]   ;;  %s2607_s4 = inlined_call_operand.vmem [shape: f32[1,128], index: 4, kind: input, shape index: {}]   ;;  %s2608_s5 = inlined_call_operand.vmem [shape: f32[1,128], index: 5, kind: input, shape index: {}]   ;;  %s2609_s6 = inlined_call_operand.vmem [shape: f32[1,128], index: 6, kind: input, shape index: {}]   ;;  %s2610_s7 = inlined_call_operand.vmem [shape: bf16[128,256], index: 7, kind: input, shape index: {}]   ;;  %s2611_s8 = inlined_call_operand.vmem [shape: f32[1,256], index: 8, kind: input, shape index: {}]   ;;  %s2612_s9 = inlined_call_operand.vmem [shape: f32[31,128], index: 9, kind: input, shape index: {}]   ;;  %s2613_s10 = inlined_call_operand.vmem [shape: f32[1,128], index: 10, kind: input, shape index: {}]   ;;  %s2614_s11 = inlined_call_operand.vmem [shape: bf16[128,128], index: 11, kind: input, shape index: {}]   ;;  %s2615_s12 = inlined_call_operand.vmem [shape: f32[1,128], index: 12, kind: input, shape index: {}]   ;;  %s2616_s13 = inlined_call_operand.vmem [shape: f32[1,128], index: 13, kind: input, shape index: {}]   ;;  %s2617_s14 = inlined_call_operand.vmem [shape: f32[1,128], index: 14, kind: input, shape index: {}]   ;;  %s2618_s15 = inlined_call_operand.vmem [shape: bf16[128,256], index: 15, kind: input, shape index: {}]   ;;  %s2619_s16 = inlined_call_operand.vmem [shape: f32[1,256], index: 16, kind: input, shape index: {}]   ;;  %s2620_s17 = inlined_call_operand.vmem [shape: bf16[256,128], index: 17, kind: input, shape index: {}]   ;;  %s2621_s18 = inlined_call_operand.vmem [shape: f32[1,128], index: 18, kind: input, shape index: {}]   ;;  %s2622_s19 = inlined_call_operand.vmem [shape: f32[1,128], index: 19, kind: input, shape index: {}]   ;;  %s2623_s20 = inlined_call_operand.vmem [shape: f32[1,128], index: 20, kind: input, shape index: {}]   ;;  %s2624_s21 = inlined_call_operand.vmem [shape: f32[32,128], index: 21, kind: output, shape index: {}]  }
   0x1   :  { %2626 = sst [smem:[#allocation3_spill]] %s2603_s0 }
   0x2   :  { %2627 = sst [smem:[#allocation4_spill]] %s2604_s1 }
   0x3   :  { %2628 = sst [smem:[#allocation5_spill]] %s2605_s2  ;;  %s2247_s2 = smov 0  }
   0x4   :  { %2629 = sst [smem:[#allocation6_spill]] %s2606_s3 }
   0x5   :  { %2630 = sst [smem:[#allocation7_spill]] %s2607_s4 }
   0x6   :  { %2631 = sst [smem:[#allocation8_spill]] %s2608_s5 }
   0x7 LB: > { %s1810_s25 = sadd.s32 4294967295, %s2132_s2   ;;  %p1814_p0 = scmp.ge.s32.totalorder %s2132_s2, 1  ;;  %s2132_s2 = sphi %s2247_s2, %s31_s2  }
   0x8   : > { %p610_p1 = scmp.lt.s32.totalorder %s2132_s2, 3 }
   0xa   : > { %p611_p2 = pnand %p1814_p0, %p610_p1 }
   0xb   : > { %s2632_s3 = sld [smem:[#allocation6_spill]] (!%p611_p2)  ;;  %v2134_v1 = vmov (!%p611_p2), 0.0   ;;  %vm2135_vm0 = vmmov (!%p611_p2), 0   ;;  %s1815_s0 = sshll.u32 (!%p611_p2), %s1810_s25, 1  ;;  %v2010_v21 = vld [vmem:[%s2610_s7 + $0x4] ss:$8 sps:$4 sm:$0xff] (!%p611_p2)   ;;  %v839_v24 = vlaneseq (!%p611_p2) }
   0xc   : > { %614 = sbr.rel (%p611_p2) target bundleno = 2195 (0x893), region = 104  ;;  %1948 = vmatprep.subr.bf16.mxu0 (!%p611_p2), %v2134_v1  ;;  %1043 = vst [vmem:[#allocation2 + $0x8] sm:$0xff] (!%p611_p2), %v2134_v1  ;;  %1044 = vst [vmem:[#allocation2 + $0x20] sm:$0xff] (!%p611_p2), %v2134_v1  ;;  %1964 = vmatprep.mubr.msk.bf16.mxu0 (!%p611_p2), %vm2135_vm0, %v2134_v1  ;;  %p681_p3 = scmp.lt.s32.totalorder (!%p611_p2), %s1815_s0, 3  ;;  %v2012_v22 = vld [vmem:[%s2610_s7] ss:$8 sps:$4 sm:$0xff] (!%p611_p2)  }
   0xd   : > { %s2633_s1 = sld [smem:[#allocation4_spill]] (!%p611_p2)  ;;  %s2634_s25 = sld [smem:[#allocation3_spill]] (!%p611_p2)  ;;  %v2013_v23 = vld [vmem:[%s2610_s7 + $0x14] ss:$8 sps:$4 sm:$0xff] (!%p611_p2)   ;;  %985 = vmatprep.subr.bf16.mxu1 (!%p611_p2), %v2010_v21  ;;  %v2322_v25 = vand.u32 (!%p611_p2), 127, %v839_v24  ;;  %v2136_v44 = vmov (!%p611_p2), 0  }
   0xe   : > { %s2635_s30 = sld [smem:[#allocation7_spill]] (!%p611_p2)  ;;  %986 = vmatpush1.bf16.msra.mxu1 (!%p611_p2), %v2012_v22  ;;  %v2015_v36 = vld [vmem:[%s2610_s7 + $0x10] ss:$8 sps:$4 sm:$0xff] (!%p611_p2)   ;;  %v2016_v37 = vld [vmem:[%s2610_s7 + $0x24] ss:$8 sps:$4 sm:$0xff] (!%p611_p2)   ;;  %1017 = vmatprep.mubr.bf16.mxu1 (!%p611_p2), %v2136_v44  ;;  %s2636_s4 = sld [smem:[#allocation5_spill]] (!%p611_p2) }
   0xf   : > { %987 = vmatprep.subr.bf16.mxu1 (!%p611_p2), %v2013_v23  ;;  %vm841_vm1 = vcmp.lt.s32.totalorder (!%p611_p2), %v2322_v25, 80  ;;  %v2018_v38 = vld [vmem:[%s2610_s7 + $0x20] ss:$8 sps:$4 sm:$0xff] (!%p611_p2)   ;;  %v2019_v39 = vld [vmem:[%s2610_s7 + $0x34] ss:$8 sps:$4 sm:$0xff] (!%p611_p2)   ;;  %2000 = vset.pattern.permute.xlu1 (!%p611_p2), %v2136_v44 }
  0x10   : > { %v2021_v40 = vld [vmem:[%s2610_s7 + $0x30] ss:$8 sps:$4 sm:$0xff] (!%p611_p2)   ;;  %v2022_v41 = vld [vmem:[%s2610_s7 + $0x44] ss:$8 sps:$4 sm:$0xff] (!%p611_p2)   ;;  %v2024_v42 = vld [vmem:[%s2610_s7 + $0x40] ss:$8 sps:$4 sm:$0xff] (!%p611_p2)   ;;  %1999 = vset.pattern.permute.xlu0 (!%p611_p2), %v2136_v44 }
  0x11   : > { %v2001_v0 = vld [vmem:[%s2632_s3] sm:$0xff] (!%p611_p2)   ;;  %v2002_v2 = vld [vmem:[%s2632_s3 + $0x8] sm:$0xff] (!%p611_p2)   ;;  %v2003_v3 = vld [vmem:[%s2632_s3 + $0x10] sm:$0xff] (!%p611_p2)  }
  0x12   : > { %1949 = vmatpush3.bf16.msra.mxu0 (!%p611_p2), %v2001_v0  ;;  %v2004_v4 = vld [vmem:[%s2632_s3 + $0x18] sm:$0xff] (!%p611_p2)   ;;  %v2005_v5 = vld [vmem:[%s2632_s3 + $0x20] sm:$0xff] (!%p611_p2)   ;;  %v2006_v6 = vld [vmem:[%s2632_s3 + $0x28] sm:$0xff] (!%p611_p2)   ;;  %988 = vmatpush1.bf16.msra.mxu1 (!%p611_p2), %v2015_v36 }
  0x13   : > { %1950 = vmatprep.subr.bf16.mxu0 %v2134_v1  ;;  %s2639_s0 = smov (!%p681_p3, %s1815_s0), 3  ;;  %v2007_v7 = vld [vmem:[%s2632_s3 + $0x30] sm:$0xff]   ;;  %v2008_v8 = vld [vmem:[%s2632_s3 + $0x38] sm:$0xff]   ;;  %989 = vmatprep.subr.bf16.mxu1 %v2016_v37  ;;  %v2028_v46 = vld [vmem:[%s2610_s7 + $0x64] ss:$8 sps:$4 sm:$0xff]  }
  0x14   : > { %s1818_s5 = sshll.u32 %s2639_s0, 2  ;;  %v1832_v12 = vld [vmem:[%s2635_s30] ss:$0 sm:$0xff]  ;;  %v2025_v43 = vld [vmem:[%s2610_s7 + $0x54] ss:$8 sps:$4 sm:$0xff]   ;;  %v2039_v23 = vld [vmem:[%s2614_s11 + $0x28] sm:$0xff]  }
  0x15   : > { %s690_s24 = scalar_lea.vmem %s2633_s1, %s1818_s5  ;;  %s2297_s1 = sshll.u32 %s2639_s0, 3  ;;  %v2027_v45 = vld [vmem:[%s2610_s7 + $0x50] ss:$8 sps:$4 sm:$0xff]   ;;  %v2030_v47 = vld [vmem:[%s2610_s7 + $0x60] ss:$8 sps:$4 sm:$0xff]  }
  0x16   : > { %1951 = vmatpush3.bf16.msra.mxu0 %v2002_v2  ;;  %v2009_v9 = vld [vmem:[%s690_s24] sm:$0xff]   ;;  %s684_s28 = scalar_lea.vmem %s2634_s25, %s2297_s1  ;;  %990 = vmatpush1.bf16.msra.mxu1 %v2018_v38  ;;  %v2031_v48 = vld [vmem:[%s2610_s7 + $0x74] ss:$8 sps:$4 sm:$0xff]   ;;  %v2033_v49 = vld [vmem:[%s2610_s7 + $0x70] ss:$8 sps:$4 sm:$0xff]   ;;  %s696_s30 = scalar_lea.vmem %s2636_s4, %s2297_s1 }
  0x17   : > { %1952 = vmatprep.subr.bf16.mxu0 %v2134_v1  ;;  %v705_v10 = vld [vmem:[%s684_s28] sm:$0xff]  ;;  %v706_v13 = vld [vmem:[%s684_s28 + $0x8] sm:$0xff]  ;;  %991 = vmatprep.subr.bf16.mxu1 %v2019_v39  ;;  %s2637_s5 = sld [smem:[#allocation8_spill]]  ;;  %v2037_v21 = vld [vmem:[%s2614_s11 + $0x18] sm:$0xff]   ;;  %s702_s24 = scalar_lea.vmem %s2624_s21, %s2297_s1 }
  0x18   : > { %v1049_v50 = vld [vmem:[%s696_s30 + $0x8] sm:$0xff]  ;;  %v1048_v52 = vld [vmem:[%s696_s30] sm:$0xff] }
  0x19   : > { %v1055_v51 = vadd.s32 4294967295, %v1049_v50  ;;  %vm1084_vm2 = vcmp.ge.s32.totalorder %v1048_v52, 0  ;;  %vm1086_vm3 = vcmp.lt.s32.totalorder %v1048_v52, 2  ;;  %v1054_v53 = vadd.s32 4294967295, %v1048_v52  ;;  %v2038_v22 = vld [vmem:[%s2614_s11 + $0x20] sm:$0xff]  }
  0x1a   : > { %1953 = vmatpush3.bf16.msra.mxu0 %v2003_v3  ;;  %992 = vmatpush1.bf16.msra.mxu1 %v2021_v40  ;;  %vm1088_vm6 = vmand %vm1084_vm2, %vm1086_vm3  ;;  %vm1085_vm8 = vcmp.ge.s32.totalorder %v1049_v50, 0  ;;  %vm1087_vm9 = vcmp.lt.s32.totalorder %v1049_v50, 2  ;;  %v1112_v55 = vadd.s32 1, %v1048_v52  ;;  %v1113_v58 = vadd.s32 1, %v1049_v50 }
  0x1b   : > { %1954 = vmatprep.subr.bf16.mxu0 %v2134_v1  ;;  %993 = vmatprep.subr.bf16.mxu1 %v2022_v41  ;;  %vm1057_vm4 = vcmp.ge.s32.totalorder %v1055_v51, 0  ;;  %vm1059_vm5 = vcmp.lt.s32.totalorder %v1055_v51, 2  ;;  %vm1056_vm10 = vcmp.ge.s32.totalorder %v1054_v53, 0  ;;  %vm1058_vm11 = vcmp.lt.s32.totalorder %v1054_v53, 2  ;;  %vm1089_vm13 = vmand %vm1085_vm8, %vm1087_vm9 }
  0x1c   : > { %vm1061_vm7 = vmand %vm1057_vm4, %vm1059_vm5  ;;  %v1090_v56 = vsel %vm1088_vm6, 1, %v2136_v44  ;;  %vm1114_vm14 = vcmp.ge.s32.totalorder %v1112_v55, 0  ;;  %vm1116_vm15 = vcmp.lt.s32.totalorder %v1112_v55, 2  ;;  %v1091_v59 = vsel %vm1089_vm13, 1, %v2136_v44 }
  0x1d   : > { %v1063_v54 = vsel %vm1061_vm7, 1, %v2136_v44  ;;  %vm1060_vm12 = vmand %vm1056_vm10, %vm1058_vm11  ;;  %vm1115_vm2 = vcmp.ge.s32.totalorder %v1113_v58, 0  ;;  %vm1117_vm3 = vcmp.lt.s32.totalorder %v1113_v58, 2  ;;  %v1051_v58 = vld [vmem:[%s2612_s9 + $0x10] sm:$0xff] }
  0x1e   : > { %1955 = vmatpush3.bf16.msra.mxu0 %v2004_v4  ;;  %994 = vmatpush1.bf16.msra.mxu1 %v2024_v42  ;;  %v1062_v57 = vsel %vm1060_vm12, 1, %v2136_v44  ;;  %vm1119_vm4 = vmand %vm1115_vm2, %vm1117_vm3 }
  0x1f   : > { %1956 = vmatprep.subr.bf16.mxu0 %v2134_v1  ;;  %995 = vmatprep.subr.bf16.mxu1 %v2025_v43  ;;  %v1121_v61 = vsel %vm1119_vm4, 1, %v2136_v44 }
  0x22   : > { %1957 = vmatpush3.bf16.msra.mxu0 %v2005_v5  ;;  %996 = vmatpush1.bf16.msra.mxu1 %v2027_v45 }
  0x23   : > { %1958 = vmatprep.subr.bf16.mxu0 %v2134_v1  ;;  %997 = vmatprep.subr.bf16.mxu1 %v2028_v46 }
  0x26   : > { %1959 = vmatpush3.bf16.msra.mxu0 %v2006_v6  ;;  %998 = vmatpush1.bf16.msra.mxu1 %v2030_v47 }
  0x27   : > { %1960 = vmatprep.subr.bf16.mxu0 %v2134_v1  ;;  %999 = vmatprep.subr.bf16.mxu1 %v2031_v48 }
  0x2a   : > { %1961 = vmatpush3.bf16.msra.mxu0 %v2007_v7  ;;  %1000 = vmatpush1.bf16.msra.mxu1 %v2033_v49  ;;  %v1833_v7 = vld [vmem:[%s2637_s5] ss:$0 sm:$0xff] }
  0x2b   : > { %1962 = vmatprep.subr.bf16.mxu0 %v2134_v1 }
  0x2e   : > { %1963 = vmatpush3.bf16.msra.mxu0 %v2008_v8 }
  0x2f   : > { %1968 = vmatprep.subr.bf16.mxu0 %v2134_v1 }
  0x31   : > { %1965 = vmatmul.mubr.bf16.vlgmr.msra.gmra.mrb[0].mxu0 %v2009_v9 }
  0x32   : > { %1984 = vmatprep.mubr.msk.bf16.mxu0 %vm2135_vm0, %v2134_v1  ;;  %vm1118_vm0 = vmand %vm1114_vm14, %vm1116_vm15 }
  0x33   : > { %v1120_v60 = vsel %vm1118_vm0, 1, %v2136_v44 }
 0x104   : > { %v813_v11 = vpop.f32.mrb[0].mxu0 }
 0x105   : > { %v820_v14 = vadd.f32 %v813_v11, %v705_v10  ;;  %v1966_v15 = vpop.f32.mrb[1].mxu0  ;;  %v1834_v11 = vld [vmem:[%s2609_s6] ss:$0 sm:$0xff] }
 0x106   : > { %v816_v16 = vpop.f32.mrb[2].mxu0 }
 0x107   : > { %v2306_v17 = vadd.f32 %v1832_v12, %v820_v14  ;;  %v821_v18 = vadd.f32 %v816_v16, %v706_v13  ;;  %v1967_v19 = vpop.f32.mrb[3].mxu0  ;;  %v2034_v16 = vld [vmem:[%s2614_s11] sm:$0xff]  }
 0x108   : > { %1969 = vmatpush3.bf16.msra.mxu0 %v2034_v16  ;;  %v2036_v19 = vld [vmem:[%s2614_s11 + $0x10] sm:$0xff]   ;;  %v1853_v16 = vld [vmem:[%s2613_s10] ss:$0 sm:$0xff] }
 0x109   : > { %833 = vadd.xlane.f32.xlu0 %v2306_v17  ;;  %v2309_v20 = vadd.f32 %v1832_v12, %v821_v18  ;;  %1970 = vmatprep.subr.bf16.mxu0 %v2134_v1  ;;  %v2035_v18 = vld [vmem:[%s2614_s11 + $0x8] sm:$0xff]  }
 0x10c   : > { %1971 = vmatpush3.bf16.msra.mxu0 %v2035_v18 }
 0x10d   : > { %835 = vadd.xlane.f32.xlu0 %v2309_v20  ;;  %1972 = vmatprep.subr.bf16.mxu0 %v2134_v1 }
 0x110   : > { %1973 = vmatpush3.bf16.msra.mxu0 %v2036_v19 }
 0x111   : > { %1974 = vmatprep.subr.bf16.mxu0 %v2134_v1 }
 0x114   : > { %1975 = vmatpush3.bf16.msra.mxu0 %v2037_v21 }
 0x115   : > { %1976 = vmatprep.subr.bf16.mxu0 %v2134_v1 }
 0x118   : > { %1977 = vmatpush3.bf16.msra.mxu0 %v2038_v22 }
 0x119   : > { %1978 = vmatprep.subr.bf16.mxu0 %v2134_v1 }
 0x11c   : > { %1979 = vmatpush3.bf16.msra.mxu0 %v2039_v23 }
 0x11d   : > { %1980 = vmatprep.subr.bf16.mxu0 %v2134_v1 }
 0x123   : > { %1065 = vperm.xlu0 %1999, %v1062_v57  }
 0x196   : > { %v834_v26 = vpop.xlane.xlu0 %833 }
 0x197   : > { %v837_v27 = vmul.f32 0.0125, %v834_v26  ;;  %v2040_v26 = vld [vmem:[%s2614_s11 + $0x30] sm:$0xff]  }
 0x198   : > { %1981 = vmatpush3.bf16.msra.mxu0 %v2040_v26 }
 0x199   : > { %v842_v28 = vsub.f32 %v2306_v17, %v837_v27  ;;  %v2041_v27 = vld [vmem:[%s2614_s11 + $0x38] sm:$0xff]   ;;  %1982 = vmatprep.subr.bf16.mxu0 %v2134_v1 }
 0x19a   : > { %v836_v29 = vpop.xlane.xlu0 %835 }
 0x19b   : > { %v838_v30 = vmul.f32 0.0125, %v836_v29  ;;  %v2328_v31 = vsel %vm841_vm1, %v842_v28, 0.0  ;;  %v2432_v28 = vshrl.u32 %v839_v24, 7 }
 0x19c   : > { %v846_v32 = vmul.f32 %v2328_v31, %v2328_v31  ;;  %1983 = vmatpush3.bf16.msra.mxu0 %v2041_v27 }
 0x19d   : > { %v843_v33 = vsub.f32 %v2309_v20, %v838_v30  ;;  %v901_v29 = vsub.s32 1, %v2432_v28  ;;  %v893_v30 = vld [vmem:[%s2611_s8] sm:$0x3]  ;;  %v2441_v43 = vsub.s32 0, %v2432_v28  ;;  %v1104_v55 = vsub.s32 7, %v2432_v28 }
 0x19e   : > { %848 = vadd.xlane.f32.xlu1 %v846_v32 }
 0x19f   : > { %v2335_v34 = vsel %vm841_vm1, %v843_v33, 0.0  ;;  %v898_v45 = vrot.slane %v893_v30, %v2441_v43 }
 0x1a0   : > { %v847_v35 = vmul.f32 %v2335_v34, %v2335_v34 }
 0x1a2   : > { %850 = vadd.xlane.f32.xlu1 %v847_v35  ;;  %v1066_v57 = vpop.permute.xlu0 %1065 }
 0x1a3   : > { %vm1070_vm6 = vcmp.eq.s32.totalorder %v1066_v57, 1 }
 0x1b3   : > { %1068 = vperm.xlu1 %2000, %v1063_v54   ;;  %v1076_v54 = vsub.s32 6, %v2432_v28 }
 0x1b7   : > { %1093 = vperm.xlu1 %2000, %v1090_v56   ;;  %v1050_v56 = vld [vmem:[%s2612_s9 + $0x8] sm:$0xff] }
 0x1bb   : > { %1096 = vperm.xlu1 %2000, %v1091_v59   ;;  %v1077_v59 = vrot.slane %v1050_v56, %v1076_v54 }
 0x1bf   : > { %1123 = vperm.xlu1 %2000, %v1120_v60   ;;  %v1105_v60 = vrot.slane %v1050_v56, %v1104_v55 }
 0x1c3   : > { %1126 = vperm.xlu1 %2000, %v1121_v61  }
 0x22b   : > { %v849_v62 = vpop.xlane.xlu1 %848 }
 0x22c   : > { %v852_v63 = vmul.f32 0.0125, %v849_v62 }
 0x22e   : > { %v854_v0 = vadd.f32 1e-05, %v852_v63  ;;  %v1135_v63 = vrot.slane %v1051_v58, %v2441_v43 }
 0x22f   : > { %v851_v2 = vpop.xlane.xlu1 %850 }
 0x230   : > { %2082 = vrsqrt.f32 %v854_v0  ;;  %v853_v3 = vmul.f32 0.0125, %v851_v2 }
 0x232   : > { %v855_v4 = vadd.f32 1e-05, %v853_v3 }
 0x233   : > { %v1069_v24 = vpop.permute.xlu1 %1068 }
 0x234   : > { %2084 = vrsqrt.f32 %v855_v4  ;;  %vm1071_vm8 = vcmp.eq.s32.totalorder %v1069_v24, 1 }
 0x23a   : > { %v2083_v5 = vpop.eup %2082 }
 0x23b   : > { %v858_v6 = vmul.f32 %v2083_v5, %v2328_v31  ;;  %v902_v31 = vrot.slane %v893_v30, %v901_v29 }
 0x23d   : > { %v866_v10 = vmul.f32 %v1833_v7, %v858_v6 }
 0x23e   : > { %v2085_v8 = vpop.eup %2084 }
 0x23f   : > { %v859_v9 = vmul.f32 %v2085_v8, %v2335_v34  ;;  %v874_v13 = vadd.f32 %v1834_v11, %v866_v10 }
 0x241   : > { %v867_v12 = vmul.f32 %v1833_v7, %v859_v9 }
 0x243   : > { %v875_v14 = vadd.f32 %v1834_v11, %v867_v12 }
 0x245   : > { %v876_v15 = vpack.c.bf16 %v875_v14, %v874_v13 }
 0x247   : > { %1018 = vmatmul.mubr.bf16.vlgmr.msra.gmra.mrb[0].mxu1 %v876_v15 }
 0x248   : > { %1465 = vmatprep.mubr.bf16.mxu1 %v2136_v44  ;;  %v1094_v44 = vpop.permute.xlu1 %1093 }
 0x249   : > { %vm1098_vm5 = vcmp.eq.s32.totalorder %v1094_v44, 1  ;;  %v1864_v44 = vld [vmem:[%s2615_s12] ss:$0 sm:$0xff] }
 0x24c   : > { %v1097_v46 = vpop.permute.xlu1 %1096 }
 0x24d   : > { %vm1099_vm7 = vcmp.eq.s32.totalorder %v1097_v46, 1 }
 0x250   : > { %v1124_v53 = vpop.permute.xlu1 %1123 }
 0x251   : > { %vm1128_vm9 = vcmp.eq.s32.totalorder %v1124_v53, 1  ;;  %v2047_v53 = vld [vmem:[%s2618_s15 + $0x14] ss:$8 sps:$4 sm:$0xff]  }
 0x254   : > { %v1127_v62 = vpop.permute.xlu1 %1126 }
 0x255   : > { %vm1129_vm10 = vcmp.eq.s32.totalorder %v1127_v62, 1 }
 0x31a   : > { %v1019_v32 = vpop.f32.mrb[0].mxu1 }
 0x31b   : > { %v1021_v33 = vpop.f32.mrb[1].mxu1  ;;  %v1020_v47 = vadd.f32 %v1019_v32, %v898_v45 }
 0x31c   : > { %v1022_v34 = vadd.f32 %v1021_v33, %v902_v31  ;;  %v1023_v35 = vpop.f32.mrb[2].mxu1 }
 0x31d   : > { %v1025_v36 = vpop.f32.mrb[3].mxu1  ;;  %v1024_v50 = vadd.f32 %v1023_v35, %v898_v45 }
 0x31e   : > { %v1851_v37 = vmul.f32 -1.442695, %v1022_v34  ;;  %v1026_v1 = vadd.f32 %v1025_v36, %v902_v31 }
 0x320   : > { %2086 = vpow2.f32 %v1851_v37  ;;  %v1852_v38 = vmul.f32 -1.442695, %v1026_v1 }
 0x322   : > { %2088 = vpow2.f32 %v1852_v38 }
 0x32a   : > { %v2087_v39 = vpop.eup %2086 }
 0x32b   : > { %v1034_v40 = vadd.f32 1.0, %v2087_v39 }
 0x32c   : > { %v2089_v41 = vpop.eup %2088 }
 0x32d   : > { %2090 = vrcp.f32 %v1034_v40  ;;  %v1035_v42 = vadd.f32 1.0, %v2089_v41 }
 0x32f   : > { %2092 = vrcp.f32 %v1035_v42 }
 0x337   : > { %v2091_v48 = vpop.eup %2090 }
 0x338   : > { %v1040_v49 = vmul.f32 %v2091_v48, %v1020_v47 }
 0x339   : > { %v2093_v51 = vpop.eup %2092 }
 0x33a   : > { %1046 = vst [vmem:[#allocation2 + $0x10] sm:$0xff] %v1040_v49  ;;  %v1041_v52 = vmul.f32 %v2093_v51, %v1024_v50  ;;  %v1100_v61 = vsel %vm1098_vm5, %v1040_v49, 0.0 }
 0x33b   : > { %v1106_v5 = vmul.f32 %v1105_v60, %v1100_v61 }
 0x33c   : > { %1047 = vst [vmem:[#allocation2 + $0x18] sm:$0xff] %v1041_v52  ;;  %v1101_v2 = vsel %vm1099_vm7, %v1041_v52, 0.0  ;;  %v2042_v52 = vld [vmem:[%s2618_s15] ss:$8 sps:$4 sm:$0xff]  }
 0x33d   : > { %v1107_v13 = vmul.f32 %v1105_v60, %v1101_v2  ;;  %v2048_v2 = vld [vmem:[%s2618_s15 + $0x20] ss:$8 sps:$4 sm:$0xff]  }
 0x341   : > { %v1052_v0 = vld [vmem:[#allocation2 + $0xf] sm:$0xff] }
 0x342   : > { %v1072_v3 = vsel %vm1070_vm6, %v1052_v0, 0.0  ;;  %v2050_v0 = vld [vmem:[%s2618_s15 + $0x24] ss:$8 sps:$4 sm:$0xff]  }
 0x343   : > { %v1053_v4 = vld [vmem:[#allocation2 + $0x17] sm:$0xff]  ;;  %v1078_v8 = vmul.f32 %v1077_v59, %v1072_v3 }
 0x344   : > { %v1110_v6 = vld [vmem:[#allocation2 + $0x11] sm:$0xff]  ;;  %v1111_v7 = vld [vmem:[#allocation2 + $0x19] sm:$0xff]  ;;  %v1073_v9 = vsel %vm1071_vm8, %v1053_v4, 0.0 }
 0x345   : > { %v1130_v10 = vsel %vm1128_vm9, %v1110_v6, 0.0  ;;  %v1131_v11 = vsel %vm1129_vm10, %v1111_v7, 0.0  ;;  %v1079_v12 = vmul.f32 %v1077_v59, %v1073_v9  ;;  %v1108_v15 = vadd.f32 %v1106_v5, %v1078_v8  ;;  %v2053_v3 = vld [vmem:[%s2618_s15 + $0x34] ss:$8 sps:$4 sm:$0xff]   ;;  %v2051_v4 = vld [vmem:[%s2618_s15 + $0x30] ss:$8 sps:$4 sm:$0xff]  }
 0x346   : > { %v1136_v14 = vmul.f32 %v1135_v63, %v1130_v10  ;;  %v1137_v19 = vmul.f32 %v1135_v63, %v1131_v11  ;;  %v2056_v5 = vld [vmem:[%s2618_s15 + $0x44] ss:$8 sps:$4 sm:$0xff]   ;;  %v2054_v6 = vld [vmem:[%s2618_s15 + $0x40] ss:$8 sps:$4 sm:$0xff]   ;;  %v2059_v7 = vld [vmem:[%s2618_s15 + $0x54] ss:$8 sps:$4 sm:$0xff]  }
 0x347   : > { %v1109_v18 = vadd.f32 %v1107_v13, %v1079_v12  ;;  %v2057_v8 = vld [vmem:[%s2618_s15 + $0x50] ss:$8 sps:$4 sm:$0xff]   ;;  %v2062_v9 = vld [vmem:[%s2618_s15 + $0x64] ss:$8 sps:$4 sm:$0xff]   ;;  %v2060_v10 = vld [vmem:[%s2618_s15 + $0x60] ss:$8 sps:$4 sm:$0xff]  }
 0x348   : > { %v1138_v21 = vadd.f32 %v1136_v14, %v1108_v15  ;;  %v2065_v11 = vld [vmem:[%s2618_s15 + $0x74] ss:$8 sps:$4 sm:$0xff]   ;;  %v2063_v12 = vld [vmem:[%s2618_s15 + $0x70] ss:$8 sps:$4 sm:$0xff]  }
 0x349   : > { %v1139_v22 = vadd.f32 %v1137_v19, %v1109_v18 }
 0x34a   : > { %v1147_v23 = vadd.f32 %v1853_v16, %v1138_v21 }
 0x34b   : > { %v1148_v26 = vadd.f32 %v1853_v16, %v1139_v22 }
 0x34c   : > { %v1854_v27 = vmul.f32 -0.999995, %v1147_v23  ;;  %v1149_v38 = vmul.f32 0.999995, %v1147_v23  ;;  %v1865_v23 = vld [vmem:[%s2616_s13] ss:$0 sm:$0xff] }
 0x34d   : > { %v1855_v30 = vmul.f32 -0.999995, %v1148_v26  ;;  %v1150_v1 = vmul.f32 0.999995, %v1148_v26 }
 0x34e   : > { %v1153_v31 = vmul.f32 1.442695, %v1854_v27 }
 0x34f   : > { %v1155_v32 = vmul.f32 1.442695, %v1855_v30 }
 0x350   : > { %2094 = vpow2.f32 %v1153_v31  ;;  %v1866_v31 = vld [vmem:[%s2617_s14] ss:$0 sm:$0xff] }
 0x351   : > { %2096 = vpow2.f32 %v1155_v32 }
 0x35a   : > { %v2095_v33 = vpop.eup %2094 }
 0x35b   : > { %v1157_v34 = vadd.f32 1.0, %v2095_v33  ;;  %v2097_v35 = vpop.eup %2096 }
 0x35c   : > { %v1158_v36 = vadd.f32 1.0, %v2097_v35 }
 0x35d   : > { %2098 = vrcp.f32 %v1157_v34 }
 0x35e   : > { %2100 = vrcp.f32 %v1158_v36  ;;  %v2066_v36 = vld [vmem:[%s2620_s17 + $0x40] sm:$0xff]  }
 0x35f   : > { %1926 = vmatprep.subr.bf16.mxu0 %v2066_v36 }
 0x367   : > { %v2099_v37 = vpop.eup %2098 }
 0x368   : > { %v2101_v24 = vpop.eup %2100  ;;  %v1163_v39 = vmul.f32 %v2099_v37, %v1149_v38  ;;  %v2067_v37 = vld [vmem:[%s2620_s17] sm:$0xff]   ;;  %v2069_v38 = vld [vmem:[%s2620_s17 + $0x8] sm:$0xff]  }
 0x369   : > { %v1164_v40 = vmul.f32 %v2101_v24, %v1150_v1  ;;  %v2068_v1 = vld [vmem:[%s2620_s17 + $0x48] sm:$0xff]   ;;  %v2070_v24 = vld [vmem:[%s2620_s17 + $0x50] sm:$0xff]  }
 0x36b   : > { %v1165_v41 = vpack.c.bf16 %v1164_v40, %v1163_v39  ;;  %v2071_v39 = vld [vmem:[%s2620_s17 + $0x10] sm:$0xff]   ;;  %v2072_v40 = vld [vmem:[%s2620_s17 + $0x58] sm:$0xff]  }
 0x36d   : > { %1985 = vmatmul.mubr.bf16.vlgmr.msra.gmra.mrb[4].mxu0 %v1165_v41  ;;  %v2073_v41 = vld [vmem:[%s2620_s17 + $0x18] sm:$0xff]  }
 0x36e   : > { %1927 = vmatpush3.bf16.msra.mxu0 %v2067_v37 }
 0x36f   : > { %1928 = vmatprep.subr.bf16.mxu0 %v2068_v1 }
 0x372   : > { %1929 = vmatpush3.bf16.msra.mxu0 %v2069_v38 }
 0x373   : > { %1930 = vmatprep.subr.bf16.mxu0 %v2070_v24 }
 0x376   : > { %1931 = vmatpush3.bf16.msra.mxu0 %v2071_v39 }
 0x377   : > { %1932 = vmatprep.subr.bf16.mxu0 %v2072_v40 }
 0x37a   : > { %1933 = vmatpush3.bf16.msra.mxu0 %v2073_v41 }
 0x440   : > { %v1264_v42 = vpop.f32.mrb[4].mxu0 }
 0x441   : > { %v1271_v45 = vadd.f32 %v1264_v42, %v2306_v17  ;;  %v1986_v46 = vpop.f32.mrb[5].mxu0  ;;  %v2044_v17 = vld [vmem:[%s2618_s15 + $0x4] ss:$8 sps:$4 sm:$0xff]  }
 0x442   : > { %v1267_v47 = vpop.f32.mrb[6].mxu0  ;;  %1433 = vmatprep.subr.bf16.mxu1 %v2044_v17  ;;  %v2074_v42 = vld [vmem:[%s2620_s17 + $0x60] sm:$0xff]   ;;  %v2077_v46 = vld [vmem:[%s2620_s17 + $0x28] sm:$0xff]  }
 0x443   : > { %v2460_v48 = vadd.f32 %v1864_v44, %v1271_v45  ;;  %v1272_v49 = vadd.f32 %v1267_v47, %v2309_v20  ;;  %v1987_v50 = vpop.f32.mrb[7].mxu0  ;;  %1434 = vmatpush1.bf16.msra.mxu1 %v2042_v52  ;;  %v2045_v20 = vld [vmem:[%s2618_s15 + $0x10] ss:$8 sps:$4 sm:$0xff]   ;;  %1934 = vmatprep.subr.bf16.mxu0 %v2074_v42  ;;  %v2076_v45 = vld [vmem:[%s2620_s17 + $0x68] sm:$0xff]   ;;  %v1341_v17 = vld [vmem:[%s2619_s16] sm:$0x3] }
 0x444   : > { %1435 = vmatprep.subr.bf16.mxu1 %v2047_v53  ;;  %v2078_v47 = vld [vmem:[%s2620_s17 + $0x70] sm:$0xff]   ;;  %v2080_v50 = vld [vmem:[%s2620_s17 + $0x78] sm:$0xff]   ;;  %v1346_v53 = vrot.slane %v1341_v17, %v2441_v43 }
 0x445   : > { %v2463_v51 = vadd.f32 %v1864_v44, %v1272_v49  ;;  %1284 = vadd.xlane.f32.xlu1 %v2460_v48  ;;  %v2075_v44 = vld [vmem:[%s2620_s17 + $0x20] sm:$0xff]   ;;  %v2079_v49 = vld [vmem:[%s2620_s17 + $0x30] sm:$0xff]   ;;  %v2081_v52 = vld [vmem:[%s2620_s17 + $0x38] sm:$0xff]  }
 0x446   : > { %1935 = vmatpush3.bf16.msra.mxu0 %v2075_v44 }
 0x447   : > { %1286 = vadd.xlane.f32.xlu0 %v2463_v51  ;;  %1436 = vmatpush1.bf16.msra.mxu1 %v2045_v20  ;;  %v1350_v20 = vrot.slane %v1341_v17, %v901_v29  ;;  %v1904_v17 = vld [vmem:[%s2622_s19] ss:$0 sm:$0xff] }
 0x448   : > { %1437 = vmatprep.subr.bf16.mxu1 %v2050_v0  ;;  %1936 = vmatprep.subr.bf16.mxu0 %v2076_v45 }
 0x44a   : > { %1937 = vmatpush3.bf16.msra.mxu0 %v2077_v46 }
 0x44b   : > { %1438 = vmatpush1.bf16.msra.mxu1 %v2048_v2  ;;  %1938 = vmatprep.subr.bf16.mxu0 %v2078_v47 }
 0x44c   : > { %1439 = vmatprep.subr.bf16.mxu1 %v2053_v3 }
 0x44e   : > { %1939 = vmatpush3.bf16.msra.mxu0 %v2079_v49 }
 0x44f   : > { %1440 = vmatpush1.bf16.msra.mxu1 %v2051_v4  ;;  %1940 = vmatprep.subr.bf16.mxu0 %v2080_v50 }
 0x450   : > { %1441 = vmatprep.subr.bf16.mxu1 %v2056_v5 }
 0x452   : > { %1941 = vmatpush3.bf16.msra.mxu0 %v2081_v52 }
 0x453   : > { %1442 = vmatpush1.bf16.msra.mxu1 %v2054_v6 }
 0x454   : > { %1443 = vmatprep.subr.bf16.mxu1 %v2059_v7 }
 0x457   : > { %1444 = vmatpush1.bf16.msra.mxu1 %v2057_v8 }
 0x458   : > { %1445 = vmatprep.subr.bf16.mxu1 %v2062_v9 }
 0x45b   : > { %1446 = vmatpush1.bf16.msra.mxu1 %v2060_v10 }
 0x45c   : > { %1447 = vmatprep.subr.bf16.mxu1 %v2065_v11 }
 0x45f   : > { %1448 = vmatpush1.bf16.msra.mxu1 %v2063_v12 }
 0x4d2   : > { %v1285_v54 = vpop.xlane.xlu1 %1284 }
 0x4d3   : > { %v1288_v55 = vmul.f32 0.0125, %v1285_v54 }
 0x4d4   : > { %v1287_v56 = vpop.xlane.xlu0 %1286 }
 0x4d5   : > { %v1290_v57 = vsub.f32 %v2460_v48, %v1288_v55  ;;  %v1289_v58 = vmul.f32 0.0125, %v1287_v56 }
 0x4d7   : > { %v1291_v59 = vsub.f32 %v2463_v51, %v1289_v58  ;;  %v1292_v60 = vsel %vm841_vm1, %v1290_v57, 0.0 }
 0x4d8   : > { %v1294_v61 = vmul.f32 %v1292_v60, %v1292_v60 }
 0x4d9   : > { %v1293_v62 = vsel %vm841_vm1, %v1291_v59, 0.0 }
 0x4da   : > { %1296 = vadd.xlane.f32.xlu1 %v1294_v61  ;;  %v1295_v63 = vmul.f32 %v1293_v62, %v1293_v62 }
 0x4de   : > { %1298 = vadd.xlane.f32.xlu1 %v1295_v63 }
 0x567   : > { %v1297_v13 = vpop.xlane.xlu1 %1296 }
 0x568   : > { %v1300_v14 = vmul.f32 0.0125, %v1297_v13 }
 0x56a   : > { %v1302_v15 = vadd.f32 1e-05, %v1300_v14 }
 0x56b   : > { %v1299_v16 = vpop.xlane.xlu1 %1298 }
 0x56c   : > { %2102 = vrsqrt.f32 %v1302_v15  ;;  %v1301_v18 = vmul.f32 0.0125, %v1299_v16 }
 0x56e   : > { %v1303_v19 = vadd.f32 1e-05, %v1301_v18 }
 0x570   : > { %2104 = vrsqrt.f32 %v1303_v19 }
 0x576   : > { %v2103_v21 = vpop.eup %2102 }
 0x577   : > { %v1306_v22 = vmul.f32 %v2103_v21, %v1292_v60  ;;  %v1887_v21 = vld [vmem:[%s2621_s18] ss:$0 sm:$0xff] }
 0x579   : > { %v1314_v30 = vmul.f32 %v1865_v23, %v1306_v22 }
 0x57a   : > { %v2105_v26 = vpop.eup %2104 }
 0x57b   : > { %v1307_v27 = vmul.f32 %v2105_v26, %v1293_v62  ;;  %v1322_v33 = vadd.f32 %v1866_v31, %v1314_v30 }
 0x57d   : > { %v1315_v32 = vmul.f32 %v1865_v23, %v1307_v27 }
 0x57f   : > { %v1323_v34 = vadd.f32 %v1866_v31, %v1315_v32 }
 0x581   : > { %v1324_v35 = vpack.c.bf16 %v1323_v34, %v1322_v33 }
 0x583   : > { %1466 = vmatmul.mubr.bf16.vlgmr.msra.gmra.mrb[4].mxu1 %v1324_v35 }
 0x656   : > { %v1467_v54 = vpop.f32.mrb[4].mxu1 }
 0x657   : > { %v1468_v55 = vadd.f32 %v1467_v54, %v1346_v53  ;;  %v1469_v56 = vpop.f32.mrb[5].mxu1 }
 0x658   : > { %v1470_v57 = vadd.f32 %v1469_v56, %v1350_v20  ;;  %v1471_v58 = vpop.f32.mrb[6].mxu1 }
 0x659   : > { %v1883_v59 = vmul.f32 -1.442695, %v1468_v55  ;;  %v1472_v60 = vadd.f32 %v1471_v58, %v1346_v53  ;;  %v1473_v61 = vpop.f32.mrb[7].mxu1 }
 0x65a   : > { %v1884_v62 = vmul.f32 -1.442695, %v1470_v57  ;;  %v1474_v63 = vadd.f32 %v1473_v61, %v1350_v20  ;;  %v1905_v20 = vld [vmem:[%s2623_s20] ss:$0 sm:$0xff] }
 0x65b   : > { %2106 = vpow2.f32 %v1883_v59  ;;  %v1885_v0 = vmul.f32 -1.442695, %v1472_v60 }
 0x65c   : > { %2108 = vpow2.f32 %v1884_v62  ;;  %v1886_v2 = vmul.f32 -1.442695, %v1474_v63 }
 0x65d   : > { %2110 = vpow2.f32 %v1885_v0 }
 0x65e   : > { %2112 = vpow2.f32 %v1886_v2 }
 0x665   : > { %v2107_v43 = vpop.eup %2106 }
 0x666   : > { %v2109_v3 = vpop.eup %2108  ;;  %v1488_v28 = vadd.f32 1.0, %v2107_v43 }
 0x667   : > { %v2111_v29 = vpop.eup %2110  ;;  %v1489_v4 = vadd.f32 1.0, %v2109_v3 }
 0x668   : > { %v2113_v5 = vpop.eup %2112  ;;  %2114 = vrcp.f32 %v1488_v28  ;;  %v1490_v6 = vadd.f32 1.0, %v2111_v29 }
 0x669   : > { %2116 = vrcp.f32 %v1489_v4  ;;  %v1491_v7 = vadd.f32 1.0, %v2113_v5 }
 0x66a   : > { %2118 = vrcp.f32 %v1490_v6 }
 0x66b   : > { %2120 = vrcp.f32 %v1491_v7 }
 0x672   : > { %v2115_v8 = vpop.eup %2114 }
 0x673   : > { %v2117_v9 = vpop.eup %2116  ;;  %v1500_v12 = vmul.f32 %v2115_v8, %v1468_v55 }
 0x674   : > { %v2119_v10 = vpop.eup %2118  ;;  %v1501_v14 = vmul.f32 %v2117_v9, %v1470_v57 }
 0x675   : > { %v2121_v11 = vpop.eup %2120  ;;  %v1502_v13 = vmul.f32 %v2119_v10, %v1472_v60 }
 0x676   : > { %v1503_v15 = vmul.f32 %v2121_v11, %v1474_v63 }
 0x677   : > { %v1504_v16 = vpack.c.bf16 %v1502_v13, %v1500_v12 }
 0x678   : > { %v1505_v18 = vpack.c.bf16 %v1503_v15, %v1501_v14 }
 0x67a   : > { %1673 = vmatprep.mubr.bf16.mxu0 %v1505_v18 }
 0x67b   : > { %1674 = vmatmul.mubr.bf16.vlgmr.msra.gmra.mrb[8].mxu0 %v1504_v16 }
 0x74e   : > { %v1942_v19 = vpop.f32.mrb[8].mxu0 }
 0x74f   : > { %v1943_v22 = vpop.f32.mrb[9].mxu0 }
 0x750   : > { %v1944_v23 = vadd.f32 %v1943_v22, %v1942_v19  ;;  %v1945_v26 = vpop.f32.mrb[10].mxu0 }
 0x751   : > { %v1946_v27 = vpop.f32.mrb[11].mxu0 }
 0x752   : > { %v1676_v30 = vadd.f32 %v1944_v23, %v1887_v21  ;;  %v1947_v31 = vadd.f32 %v1946_v27, %v1945_v26 }
 0x754   : > { %v1682_v32 = vmul.f32 0.5, %v1676_v30  ;;  %v1679_v33 = vadd.f32 %v1947_v31, %v1887_v21 }
 0x756   : > { %v1683_v34 = vmul.f32 0.5, %v1679_v33  ;;  %v1684_v35 = vadd.f32 %v1682_v32, %v2460_v48 }
 0x758   : > { %1688 = vadd.xlane.f32.xlu0 %v1684_v35  ;;  %v1685_v36 = vadd.f32 %v1683_v34, %v2463_v51 }
 0x75a   : > { %1690 = vadd.xlane.f32.xlu1 %v1685_v36 }
 0x7e5   : > { %v1689_v37 = vpop.xlane.xlu0 %1688 }
 0x7e6   : > { %v1692_v1 = vmul.f32 0.0125, %v1689_v37 }
 0x7e7   : > { %v1691_v38 = vpop.xlane.xlu1 %1690 }
 0x7e8   : > { %v1694_v24 = vsub.f32 %v1684_v35, %v1692_v1  ;;  %v1693_v39 = vmul.f32 0.0125, %v1691_v38 }
 0x7ea   : > { %v1695_v40 = vsub.f32 %v1685_v36, %v1693_v39  ;;  %v1696_v41 = vsel %vm841_vm1, %v1694_v24, 0.0 }
 0x7eb   : > { %v1698_v42 = vmul.f32 %v1696_v41, %v1696_v41 }
 0x7ec   : > { %v1697_v44 = vsel %vm841_vm1, %v1695_v40, 0.0 }
 0x7ed   : > { %1700 = vadd.xlane.f32.xlu0 %v1698_v42  ;;  %v1699_v45 = vmul.f32 %v1697_v44, %v1697_v44 }
 0x7ef   : > { %1702 = vadd.xlane.f32.xlu1 %v1699_v45 }
 0x87a   : > { %v1701_v48 = vpop.xlane.xlu0 %1700 }
 0x87b   : > { %v1704_v51 = vmul.f32 0.0125, %v1701_v48 }
 0x87c   : > { %v1703_v46 = vpop.xlane.xlu1 %1702 }
 0x87d   : > { %v1706_v47 = vadd.f32 1e-05, %v1704_v51  ;;  %v1705_v49 = vmul.f32 0.0125, %v1703_v46 }
 0x87f   : > { %2122 = vrsqrt.f32 %v1706_v47  ;;  %v1707_v50 = vadd.f32 1e-05, %v1705_v49 }
 0x881   : > { %2124 = vrsqrt.f32 %v1707_v50 }
 0x889   : > { %v2123_v52 = vpop.eup %2122 }
 0x88a   : > { %v1710_v53 = vmul.f32 %v2123_v52, %v1696_v41 }
 0x88b   : > { %v2125_v25 = vpop.eup %2124 }
 0x88c   : > { %v1718_v54 = vmul.f32 %v1904_v17, %v1710_v53  ;;  %v1711_v55 = vmul.f32 %v2125_v25, %v1697_v44 }
 0x88e   : > { %v1726_v56 = vadd.f32 %v1905_v20, %v1718_v54  ;;  %v1719_v57 = vmul.f32 %v1904_v17, %v1711_v55 }
 0x890   : > { %1728 = vst [vmem:[%s702_s24] sm:$0xff] %v1726_v56  ;;  %v1727_v58 = vadd.f32 %v1905_v20, %v1719_v57 }
 0x892   : > { %1729 = vst [vmem:[%s702_s24 + $0x8] sm:$0xff] %v1727_v58 }
 0x893 PF: > { %s31_s2 = sadd.s32 1, %s2132_s2  }
 0x894   : > { %p28_p4 = scmp.ge.s32.totalorder %s31_s2, 4  }
 0x896   :  { %30 = sbr.rel (!%p28_p4) target bundleno = 7 (0x7), region = 140 }

// kernel: strong_classifier_forward.16
= control target key start
LH: loop header
LB: loop body
LE: loop exit
PB: predicated region body
PF: predicated region fallthrough
CT: control target
= control target key end

     0   :  { %s4297_s6 = smov 0   ;;  %s5161_s0 = inlined_call_operand.vmem [shape: bf16[16,2,384], index: 0, kind: input, shape index: {}]   ;;  %s5162_s1 = inlined_call_operand.vmem [shape: bf16[16,2,128], index: 1, kind: output, shape index: {}]  }
   0x1 LB: > { %s3479_s7 = sadd.s32 4294967295, %s4282_s6   ;;  %p3483_p0 = scmp.ge.s32.totalorder %s4282_s6, 1  ;;  %s4282_s6 = sphi %s4297_s6, %s11_s6  }
   0x2   : > { %p88_p1 = scmp.lt.s32.totalorder %s4282_s6, 3 }
   0x4   : > { %p89_p2 = pnand %p3483_p0, %p88_p1 }
   0x5   : > { %s3484_s8 = sshll.u32 (!%p89_p2), %s3479_s7, 3  ;;  %v128_v0 = vlaneseq (!%p89_p2)  ;;  %v4284_v1 = vmov (!%p89_p2), 0.0   ;;  %vm4285_vm0 = vmmov (!%p89_p2), 0   ;;  %v4286_v3 = vmov (!%p89_p2), 0  }
   0x6   : > { %92 = sbr.rel (%p89_p2) target bundleno = 1985 (0x7c1), region = 24  ;;  %3648 = vmatprep.subr.bf16.mxu0 (!%p89_p2), %v4284_v1  ;;  %3654 = vmatprep.subr.bf16.mxu1 (!%p89_p2), %v4284_v1  ;;  %p108_p3 = scmp.lt.s32.totalorder (!%p89_p2), %s3484_s8, 15  ;;  %vm488_vm7 = vcmask (!%p89_p2), 9216   ;;  %vm1051_vm8 = vcmask (!%p89_p2), 1040384   ;;  %vm1047_vm9 = vcmask (!%p89_p2), 15360  }
   0x7   : > { %v4307_v2 = vand.u32 (!%p89_p2), 127, %v128_v0  ;;  %3650 = vmatprep.mubr.msk.bf16.mxu0 (!%p89_p2), %vm4285_vm0, %v4284_v1  ;;  %3656 = vmatprep.mubr.msk.bf16.mxu1 (!%p89_p2), %vm4285_vm0, %v4284_v1 }
   0x9   : > { %vm131_vm1 = vcmp.lt.s32.totalorder (!%p89_p2), %v4307_v2, 32  ;;  %vm609_vm3 = vcmp.ge.s32.totalorder (!%p89_p2), %v4307_v2, 32  ;;  %vm610_vm4 = vcmp.lt.s32.totalorder (!%p89_p2), %v4307_v2, 64  ;;  %vm1785_vm10 = vcmp.ge.s32.totalorder (!%p89_p2), %v4307_v2, 64 }
   0xa   : > { %v133_v4 = vsel (!%p89_p2), %vm131_vm1, 1, %v4286_v3  ;;  %vm611_vm5 = vmand (!%p89_p2), %vm609_vm3, %vm610_vm4  ;;  %vm1786_vm11 = vcmp.lt.s32.totalorder (!%p89_p2), %v4307_v2, 96  ;;  %vm2599_vm14 = vcmp.ge.s32.totalorder (!%p89_p2), %v4307_v2, 96 }
   0xb   : > { %v134_v5 = vpack.c.b16 (!%p89_p2), %v133_v4, %v133_v4  ;;  %v612_v29 = vsel (!%p89_p2), %vm611_vm5, 1, %v4286_v3  ;;  %vm1787_vm12 = vmand (!%p89_p2), %vm1785_vm10, %vm1786_vm11 }
   0xc   : > { %v613_v32 = vpack.c.b16 (!%p89_p2), %v612_v29, %v612_v29 }
   0xd   : > { %s5172_s8 = smov (!%p108_p3, %s3484_s8), 15  ;;  %vm4326_vm2 = vcmp.ne.s16.totalorder %v134_v5, 0 }
   0xe   : > { %s4128_s9 = smul.u32 3, %s5172_s8  ;;  %vm4428_vm6 = vcmp.ne.s16.totalorder %v613_v32, 0  ;;  %s5148_s15 = scalar_lea.vmem %s5162_s1, %s5172_s8 }
  0x10   : > { %s4321_s12 = scalar_lea.vmem %s5161_s0, %s4128_s9 }
  0x11   : > { %v4324_v6 = vld [vmem:[%s4321_s12] sm:$0x7]  ;;  %v4331_v8 = vld [vmem:[%s4321_s12 + $0x3] sm:$0x7]  ;;  %v4340_v11 = vld [vmem:[%s4321_s12 + $0x6] sm:$0x7] }
  0x12   : > { %v4334_v9 = vrot.slane %v4324_v6, 1  ;;  %v4337_v10 = vrot.slane %v4331_v8, 1  ;;  %v4343_v12 = vld [vmem:[%s4321_s12 + $0x9] sm:$0x7]  ;;  %v4354_v15 = vrot.slane %v4340_v11, 1 }
  0x13   : > { %v4357_v16 = vrot.slane %v4343_v12, 1  ;;  %v4366_v19 = vld [vmem:[%s4321_s12 + $0xc] sm:$0x7]  ;;  %v4369_v20 = vld [vmem:[%s4321_s12 + $0xf] sm:$0x7] }
  0x14   : > { %v160_v13 = vsel %vm4326_vm2, %v4334_v9, 0  ;;  %v161_v14 = vsel %vm4326_vm2, %v4337_v10, 0  ;;  %v162_v17 = vsel %vm4326_vm2, %v4354_v15, 0  ;;  %v4378_v21 = vrot.slane %v4366_v19, 1  ;;  %v4394_v25 = vld [vmem:[%s4321_s12 + $0x12] sm:$0x7] }
  0x15   : > { %3649 = vmatpush3.bf16.xpose.msra.mxu0 %v160_v13  ;;  %3655 = vmatpush3.bf16.xpose.msra.mxu1 %v161_v14  ;;  %v163_v18 = vsel %vm4326_vm2, %v4357_v16, 0  ;;  %v4381_v22 = vrot.slane %v4369_v20, 1  ;;  %v4397_v26 = vld [vmem:[%s4321_s12 + $0x15] sm:$0x7]  ;;  %v4406_v27 = vrot.slane %v4394_v25, 1  ;;  %v615_v34 = vsel %vm4428_vm6, %v4334_v9, 0 }
  0x16   : > { %3660 = vmatprep.subr.bf16.mxu0 %v4284_v1  ;;  %3666 = vmatprep.subr.bf16.mxu1 %v4284_v1  ;;  %v164_v23 = vsel %vm4326_vm2, %v4378_v21, 0  ;;  %v4409_v28 = vrot.slane %v4397_v26, 1  ;;  %v616_v35 = vsel %vm4428_vm6, %v4337_v10, 0  ;;  %v617_v36 = vsel %vm4428_vm6, %v4354_v15, 0 }
  0x17   : > { %v165_v24 = vsel %vm4326_vm2, %v4381_v22, 0  ;;  %v166_v30 = vsel %vm4326_vm2, %v4406_v27, 0  ;;  %v618_v37 = vsel %vm4428_vm6, %v4357_v16, 0  ;;  %v619_v38 = vsel %vm4428_vm6, %v4378_v21, 0 }
  0x18   : > { %v167_v31 = vsel %vm4326_vm2, %v4409_v28, 0  ;;  %v620_v39 = vsel %vm4428_vm6, %v4381_v22, 0  ;;  %v621_v40 = vsel %vm4428_vm6, %v4406_v27, 0  ;;  %v622_v41 = vsel %vm4428_vm6, %v4409_v28, 0 }
  0x1c   : > { %3651 = vmatmul.mubr.bf16.vlgmr.msra.gmra.mrb[0].mxu0 %v4324_v6  ;;  %3657 = vmatmul.mubr.bf16.vlgmr.msra.gmra.mrb[0].mxu1 %v4331_v8 }
  0x1d   : > { %3661 = vmatpush3.bf16.xpose.msra.mxu0 %v162_v17  ;;  %3667 = vmatpush3.bf16.xpose.msra.mxu1 %v163_v18 }
  0x1e   : > { %3662 = vmatprep.mubr.msk.bf16.mxu0 %vm4285_vm0, %v4284_v1  ;;  %3668 = vmatprep.mubr.msk.bf16.mxu1 %vm4285_vm0, %v4284_v1 }
  0x1f   : > { %3672 = vmatprep.subr.bf16.mxu0 %v4284_v1  ;;  %3678 = vmatprep.subr.bf16.mxu1 %v4284_v1 }
  0x24   : > { %3663 = vmatmul.mubr.bf16.vlgmr.msra.gmra.mrb[4].mxu0 %v4340_v11  ;;  %3669 = vmatmul.mubr.bf16.vlgmr.msra.gmra.mrb[4].mxu1 %v4343_v12 }
  0x25   : > { %3673 = vmatpush3.bf16.xpose.msra.mxu0 %v164_v23  ;;  %3679 = vmatpush3.bf16.xpose.msra.mxu1 %v165_v24 }
  0x26   : > { %3674 = vmatprep.mubr.msk.bf16.mxu0 %vm4285_vm0, %v4284_v1  ;;  %3680 = vmatprep.mubr.msk.bf16.mxu1 %vm4285_vm0, %v4284_v1 }
  0x27   : > { %3684 = vmatprep.subr.bf16.mxu0 %v4284_v1  ;;  %3690 = vmatprep.subr.bf16.mxu1 %v4284_v1 }
  0x2c   : > { %3675 = vmatmul.mubr.bf16.vlgmr.msra.gmra.mrb[8].mxu0 %v4366_v19  ;;  %3681 = vmatmul.mubr.bf16.vlgmr.msra.gmra.mrb[8].mxu1 %v4369_v20 }
  0x2d   : > { %3685 = vmatpush3.bf16.xpose.msra.mxu0 %v166_v30  ;;  %3691 = vmatpush3.bf16.xpose.msra.mxu1 %v167_v31 }
  0x2e   : > { %3686 = vmatprep.mubr.msk.bf16.mxu0 %vm4285_vm0, %v4284_v1  ;;  %3692 = vmatprep.mubr.msk.bf16.mxu1 %vm4285_vm0, %v4284_v1 }
  0x2f   : > { %3696 = vmatprep.subr.bf16.mxu0 %v4284_v1  ;;  %3702 = vmatprep.subr.bf16.mxu1 %v4284_v1 }
  0x34   : > { %3687 = vmatmul.mubr.bf16.vlgmr.msra.gmra.mrb[12].mxu0 %v4394_v25  ;;  %3693 = vmatmul.mubr.bf16.vlgmr.msra.gmra.mrb[12].mxu1 %v4397_v26 }
  0x35   : > { %3697 = vmatpush3.bf16.xpose.msra.mxu0 %v615_v34  ;;  %3703 = vmatpush3.bf16.xpose.msra.mxu1 %v616_v35 }
  0x36   : > { %3698 = vmatprep.mubr.msk.bf16.mxu0 %vm4285_vm0, %v4284_v1  ;;  %3704 = vmatprep.mubr.msk.bf16.mxu1 %vm4285_vm0, %v4284_v1 }
  0x37   : > { %3708 = vmatprep.subr.bf16.mxu0 %v4284_v1  ;;  %3714 = vmatprep.subr.bf16.mxu1 %v4284_v1 }
  0x3c   : > { %3699 = vmatmul.mubr.bf16.vlgmr.msra.gmra.mrb[16].mxu0 %v4324_v6  ;;  %3705 = vmatmul.mubr.bf16.vlgmr.msra.gmra.mrb[16].mxu1 %v4331_v8 }
  0x3d   : > { %3709 = vmatpush3.bf16.xpose.msra.mxu0 %v617_v36  ;;  %3715 = vmatpush3.bf16.xpose.msra.mxu1 %v618_v37 }
  0x3e   : > { %3710 = vmatprep.mubr.msk.bf16.mxu0 %vm4285_vm0, %v4284_v1  ;;  %3716 = vmatprep.mubr.msk.bf16.mxu1 %vm4285_vm0, %v4284_v1 }
  0x3f   : > { %3720 = vmatprep.subr.bf16.mxu0 %v4284_v1  ;;  %3726 = vmatprep.subr.bf16.mxu1 %v4284_v1 }
  0x44   : > { %3711 = vmatmul.mubr.bf16.vlgmr.msra.gmra.mrb[20].mxu0 %v4340_v11  ;;  %3717 = vmatmul.mubr.bf16.vlgmr.msra.gmra.mrb[20].mxu1 %v4343_v12 }
  0x45   : > { %3721 = vmatpush3.bf16.xpose.msra.mxu0 %v619_v38  ;;  %3727 = vmatpush3.bf16.xpose.msra.mxu1 %v620_v39 }
  0x46   : > { %3722 = vmatprep.mubr.msk.bf16.mxu0 %vm4285_vm0, %v4284_v1  ;;  %3728 = vmatprep.mubr.msk.bf16.mxu1 %vm4285_vm0, %v4284_v1 }
  0x47   : > { %3732 = vmatprep.subr.bf16.mxu0 %v4284_v1  ;;  %3738 = vmatprep.subr.bf16.mxu1 %v4284_v1 }
  0x4c   : > { %3723 = vmatmul.mubr.bf16.vlgmr.msra.gmra.mrb[24].mxu0 %v4366_v19  ;;  %3729 = vmatmul.mubr.bf16.vlgmr.msra.gmra.mrb[24].mxu1 %v4369_v20 }
  0x4d   : > { %3733 = vmatpush3.bf16.xpose.msra.mxu0 %v621_v40  ;;  %3739 = vmatpush3.bf16.xpose.msra.mxu1 %v622_v41 }
  0x4e   : > { %3734 = vmatprep.mubr.msk.bf16.mxu0 %vm4285_vm0, %v4284_v1  ;;  %3740 = vmatprep.mubr.msk.bf16.mxu1 %vm4285_vm0, %v4284_v1 }
  0x4f   : > { %3744 = vmatprep.subr.bf16.mxu0 %v4284_v1  ;;  %3750 = vmatprep.subr.bf16.mxu1 %v4284_v1 }
  0x54   : > { %3735 = vmatmul.mubr.bf16.vlgmr.msra.gmra.mrb[28].mxu0 %v4394_v25  ;;  %3741 = vmatmul.mubr.bf16.vlgmr.msra.gmra.mrb[28].mxu1 %v4397_v26 }
  0x55   : > { %3746 = vmatprep.mubr.msk.bf16.mxu0 %vm4285_vm0, %v4284_v1  ;;  %3752 = vmatprep.mubr.msk.bf16.mxu1 %vm4285_vm0, %v4284_v1 }
  0xef   : > { %v4494_v42 = vpop.f32.mrb[0].mxu0  ;;  %v4496_v43 = vpop.f32.mrb[0].mxu1 }
  0xf0   : > { %v3652_v44 = vpop.f32.mrb[1].mxu0  ;;  %v3658_v45 = vpop.f32.mrb[1].mxu1 }
  0xf1   : > { %v205_v46 = vpop.f32.mrb[2].mxu0  ;;  %v245_v47 = vpop.f32.mrb[2].mxu1 }
  0xf2   : > { %v3653_v48 = vpop.f32.mrb[3].mxu0  ;;  %v3659_v49 = vpop.f32.mrb[3].mxu1 }
  0xf7   : > { %v4498_v50 = vpop.f32.mrb[4].mxu0  ;;  %v4500_v51 = vpop.f32.mrb[4].mxu1 }
  0xf8   : > { %v3664_v52 = vpop.f32.mrb[5].mxu0  ;;  %v3670_v53 = vpop.f32.mrb[5].mxu1 }
  0xf9   : > { %v285_v54 = vpop.f32.mrb[6].mxu0  ;;  %v325_v55 = vpop.f32.mrb[6].mxu1 }
  0xfa   : > { %v3665_v56 = vpop.f32.mrb[7].mxu0  ;;  %v3671_v57 = vpop.f32.mrb[7].mxu1 }
  0xff   : > { %v4502_v58 = vpop.f32.mrb[8].mxu0  ;;  %v4504_v59 = vpop.f32.mrb[8].mxu1 }
 0x100   : > { %v3676_v60 = vpop.f32.mrb[9].mxu0  ;;  %v3682_v61 = vpop.f32.mrb[9].mxu1 }
 0x101   : > { %v365_v62 = vpop.f32.mrb[10].mxu0  ;;  %v405_v63 = vpop.f32.mrb[10].mxu1 }
 0x102   : > { %v3677_v0 = vpop.f32.mrb[11].mxu0  ;;  %v3683_v4 = vpop.f32.mrb[11].mxu1 }
 0x107   : > { %v4506_v5 = vpop.f32.mrb[12].mxu0  ;;  %v4508_v13 = vpop.f32.mrb[12].mxu1 }
 0x108   : > { %v3688_v14 = vpop.f32.mrb[13].mxu0  ;;  %v3694_v17 = vpop.f32.mrb[13].mxu1 }
 0x109   : > { %v445_v18 = vpop.f32.mrb[14].mxu0  ;;  %v485_v23 = vpop.f32.mrb[14].mxu1 }
 0x10a   : > { %v3689_v24 = vpop.f32.mrb[15].mxu0  ;;  %v3695_v29 = vpop.f32.mrb[15].mxu1 }
 0x10f   : > { %v4510_v30 = vpop.f32.mrb[16].mxu0  ;;  %v4512_v31 = vpop.f32.mrb[16].mxu1 }
 0x110   : > { %v3700_v32 = vpop.f32.mrb[17].mxu0  ;;  %v3706_v34 = vpop.f32.mrb[17].mxu1  ;;  %v943_v35 = vsel %vm488_vm7, %v4510_v30, -inf  ;;  %v946_v40 = vsel %vm488_vm7, %v4512_v31, -inf }
 0x111   : > { %944 = vmax.xlane.f32.xlu0 %v943_v35  ;;  %v660_v36 = vpop.f32.mrb[18].mxu0  ;;  %v700_v37 = vpop.f32.mrb[18].mxu1 }
 0x112   : > { %v3701_v38 = vpop.f32.mrb[19].mxu0  ;;  %v3707_v39 = vpop.f32.mrb[19].mxu1 }
 0x113   : > { %v492_v38 = vsel %vm488_vm7, %v4496_v43, -inf  ;;  %v489_v39 = vsel %vm488_vm7, %v4494_v42, -inf }
 0x115   : > { %947 = vmax.xlane.f32.xlu0 %v946_v40  ;;  %v498_v40 = vsel %vm488_vm7, %v4500_v51, -inf }
 0x117   : > { %v737_v41 = vpop.f32.mrb[20].mxu0  ;;  %v4518_v44 = vpop.f32.mrb[20].mxu1 }
 0x118   : > { %v3712_v45 = vpop.f32.mrb[21].mxu0  ;;  %v3718_v46 = vpop.f32.mrb[21].mxu1  ;;  %v949_v47 = vsel %vm488_vm7, %v737_v41, -inf  ;;  %v952_v54 = vsel %vm488_vm7, %v4518_v44, -inf }
 0x119   : > { %950 = vmax.xlane.f32.xlu1 %v949_v47  ;;  %v740_v48 = vpop.f32.mrb[22].mxu0  ;;  %v780_v49 = vpop.f32.mrb[22].mxu1  ;;  %v495_v45 = vsel %vm488_vm7, %v4498_v50, -inf  ;;  %v504_v46 = vsel %vm488_vm7, %v4504_v59, -inf  ;;  %v501_v47 = vsel %vm488_vm7, %v4502_v58, -inf }
 0x11a   : > { %v3713_v52 = vpop.f32.mrb[23].mxu0  ;;  %v3719_v53 = vpop.f32.mrb[23].mxu1  ;;  %v510_v48 = vsel %vm488_vm7, %v4508_v13, -inf  ;;  %v507_v49 = vsel %vm488_vm7, %v4506_v5, -inf }
 0x11d   : > { %953 = vmax.xlane.f32.xlu1 %v952_v54 }
 0x11f   : > { %v4523_v55 = vpop.f32.mrb[24].mxu0  ;;  %v4525_v56 = vpop.f32.mrb[24].mxu1 }
 0x120   : > { %v3730_v57 = vpop.f32.mrb[25].mxu1  ;;  %v958_v60 = vsel %vm488_vm7, %v4525_v56, -inf  ;;  %v955_v61 = vsel %vm488_vm7, %v4523_v55, -inf  ;;  %v3724_v62 = vpop.f32.mrb[25].mxu0 }
 0x121   : > { %959 = vmax.xlane.f32.xlu1 %v958_v60  ;;  %956 = vmax.xlane.f32.xlu0 %v955_v61  ;;  %v820_v63 = vpop.f32.mrb[26].mxu0  ;;  %v860_v0 = vpop.f32.mrb[26].mxu1 }
 0x122   : > { %v3725_v4 = vpop.f32.mrb[27].mxu0  ;;  %v3731_v14 = vpop.f32.mrb[27].mxu1 }
 0x127   : > { %v4531_v17 = vpop.f32.mrb[28].mxu0  ;;  %v4533_v18 = vpop.f32.mrb[28].mxu1 }
 0x128   : > { %v3742_v23 = vpop.f32.mrb[29].mxu1  ;;  %v964_v24 = vsel %vm488_vm7, %v4533_v18, -inf  ;;  %v961_v29 = vsel %vm488_vm7, %v4531_v17, -inf  ;;  %v3736_v32 = vpop.f32.mrb[29].mxu0 }
 0x129   : > { %965 = vmax.xlane.f32.xlu1 %v964_v24  ;;  %962 = vmax.xlane.f32.xlu0 %v961_v29  ;;  %v900_v34 = vpop.f32.mrb[30].mxu0  ;;  %v940_v35 = vpop.f32.mrb[30].mxu1 }
 0x12a   : > { %v3737_v36 = vpop.f32.mrb[31].mxu0  ;;  %v3743_v37 = vpop.f32.mrb[31].mxu1 }
 0x12d   : > { %493 = vmax.xlane.f32.xlu1 %v492_v38  ;;  %490 = vmax.xlane.f32.xlu0 %v489_v39 }
 0x131   : > { %499 = vmax.xlane.f32.xlu1 %v498_v40  ;;  %496 = vmax.xlane.f32.xlu0 %v495_v45 }
 0x135   : > { %505 = vmax.xlane.f32.xlu1 %v504_v46  ;;  %502 = vmax.xlane.f32.xlu0 %v501_v47 }
 0x139   : > { %511 = vmax.xlane.f32.xlu1 %v510_v48  ;;  %508 = vmax.xlane.f32.xlu0 %v507_v49 }
 0x19e   : > { %v945_v52 = vpop.xlane.xlu0 %944 }
 0x19f   : > { %v967_v53 = vsub.f32 %v4510_v30, %v945_v52 }
 0x1a1   : > { %v975_v54 = vmul.f32 1.442695, %v967_v53 }
 0x1a2   : > { %v948_v57 = vpop.xlane.xlu0 %947 }
 0x1a3   : > { %4140 = vpow2.f32 %v975_v54  ;;  %v968_v60 = vsub.f32 %v4512_v31, %v948_v57 }
 0x1a5   : > { %v977_v61 = vmul.f32 1.442695, %v968_v60 }
 0x1a6   : > { %v951_v62 = vpop.xlane.xlu1 %950 }
 0x1a7   : > { %4142 = vpow2.f32 %v977_v61  ;;  %v969_v63 = vsub.f32 %v737_v41, %v951_v62 }
 0x1a9   : > { %v979_v0 = vmul.f32 1.442695, %v969_v63 }
 0x1aa   : > { %v954_v4 = vpop.xlane.xlu1 %953 }
 0x1ab   : > { %4144 = vpow2.f32 %v979_v0  ;;  %v970_v14 = vsub.f32 %v4518_v44, %v954_v4 }
 0x1ad   : > { %v4558_v23 = vpop.eup %4140  ;;  %v981_v24 = vmul.f32 1.442695, %v970_v14 }
 0x1ae   : > { %v960_v29 = vpop.xlane.xlu1 %959  ;;  %v957_v32 = vpop.xlane.xlu0 %956  ;;  %v991_v30 = vsel %vm488_vm7, %v4558_v23, 0.0 }
 0x1af   : > { %4146 = vpow2.f32 %v981_v24  ;;  %v972_v31 = vsub.f32 %v4525_v56, %v960_v29  ;;  %v971_v34 = vsub.f32 %v4523_v55, %v957_v32  ;;  %992 = vadd.xlane.f32.xlu0 %v991_v30 }
 0x1b1   : > { %v4564_v41 = vpop.eup %4142  ;;  %v985_v35 = vmul.f32 1.442695, %v972_v31  ;;  %v983_v36 = vmul.f32 1.442695, %v971_v34 }
 0x1b2   : > { %v994_v44 = vsel %vm488_vm7, %v4564_v41, 0.0 }
 0x1b3   : > { %4148 = vpow2.f32 %v985_v35  ;;  %995 = vadd.xlane.f32.xlu1 %v994_v44 }
 0x1b4   : > { %4150 = vpow2.f32 %v983_v36 }
 0x1b5   : > { %v4568_v37 = vpop.eup %4144 }
 0x1b6   : > { %v966_v38 = vpop.xlane.xlu1 %965  ;;  %v963_v39 = vpop.xlane.xlu0 %962  ;;  %v997_v56 = vsel %vm488_vm7, %v4568_v37, 0.0 }
 0x1b7   : > { %v974_v55 = vsub.f32 %v4533_v18, %v966_v38  ;;  %v973_v40 = vsub.f32 %v4531_v17, %v963_v39  ;;  %998 = vadd.xlane.f32.xlu0 %v997_v56  ;;  %v4599_v38 = vrot.slane %v4324_v6, 2 }
 0x1b9   : > { %v4574_v45 = vpop.eup %4146  ;;  %v989_v46 = vmul.f32 1.442695, %v974_v55  ;;  %v987_v47 = vmul.f32 1.442695, %v973_v40  ;;  %v1031_v56 = vsel %vm4428_vm6, %v4599_v38, 0  ;;  %v593_v33 = vsel %vm4326_vm2, %v4599_v38, 0 }
 0x1ba   : > { %v494_v48 = vpop.xlane.xlu1 %493  ;;  %v491_v49 = vpop.xlane.xlu0 %490  ;;  %v1000_v52 = vsel %vm488_vm7, %v4574_v45, 0.0 }
 0x1bb   : > { %4152 = vpow2.f32 %v989_v46  ;;  %v514_v53 = vsub.f32 %v4496_v43, %v494_v48  ;;  %v513_v54 = vsub.f32 %v4494_v42, %v491_v49  ;;  %1001 = vadd.xlane.f32.xlu1 %v1000_v52  ;;  %v4616_v48 = vrot.slane %v4331_v8, 2 }
 0x1bc   : > { %4154 = vpow2.f32 %v987_v47  ;;  %v1053_v47 = vsel %vm1051_vm8, %v1031_v56, 0  ;;  %v4665_v56 = vrot.slane %v4366_v19, 2 }
 0x1bd   : > { %v4580_v18 = vpop.eup %4148  ;;  %v523_v17 = vmul.f32 1.442695, %v514_v53  ;;  %v521_v57 = vmul.f32 1.442695, %v513_v54  ;;  %3745 = vmatpush3.bf16.msra.mxu0 %v1053_v47  ;;  %v1032_v52 = vsel %vm4428_vm6, %v4616_v48, 0 }
 0x1be   : > { %v4582_v60 = vpop.eup %4150  ;;  %v500_v61 = vpop.xlane.xlu1 %499  ;;  %v1006_v63 = vsel %vm488_vm7, %v4580_v18, 0.0  ;;  %3756 = vmatprep.subr.bf16.mxu0 %v4284_v1  ;;  %v1099_v54 = vsel %vm1051_vm8, %v1032_v52, 0  ;;  %v1035_v19 = vsel %vm4428_vm6, %v4665_v56, 0 }
 0x1bf   : > { %v497_v62 = vpop.xlane.xlu0 %496  ;;  %4156 = vpow2.f32 %v523_v17  ;;  %v516_v0 = vsub.f32 %v4500_v51, %v500_v61  ;;  %1007 = vadd.xlane.f32.xlu1 %v1006_v63  ;;  %v1003_v42 = vsel %vm488_vm7, %v4582_v60, 0.0  ;;  %3751 = vmatpush3.bf16.msra.mxu1 %v1099_v54  ;;  %v1237_v54 = vsel %vm1051_vm8, %v1035_v19, 0 }
 0x1c0   : > { %v515_v43 = vsub.f32 %v4498_v50, %v497_v62  ;;  %4158 = vpow2.f32 %v521_v57  ;;  %1004 = vadd.xlane.f32.xlu0 %v1003_v42  ;;  %3762 = vmatprep.subr.bf16.mxu1 %v4284_v1  ;;  %v1421_v19 = vsel %vm1051_vm8, %v593_v33, 0 }
 0x1c1   : > { %v527_v4 = vmul.f32 1.442695, %v516_v0 }
 0x1c2   : > { %v525_v14 = vmul.f32 1.442695, %v515_v43  ;;  %v506_v24 = vpop.xlane.xlu1 %505 }
 0x1c3   : > { %v503_v29 = vpop.xlane.xlu0 %502  ;;  %4160 = vpow2.f32 %v527_v4  ;;  %v518_v32 = vsub.f32 %v4504_v59, %v506_v24 }
 0x1c4   : > { %v517_v30 = vsub.f32 %v4502_v58, %v503_v29  ;;  %4162 = vpow2.f32 %v525_v14 }
 0x1c5   : > { %v4592_v31 = vpop.eup %4152  ;;  %v531_v51 = vmul.f32 1.442695, %v518_v32  ;;  %v4651_v32 = vrot.slane %v4340_v11, 2 }
 0x1c6   : > { %v529_v50 = vmul.f32 1.442695, %v517_v30  ;;  %v4594_v34 = vpop.eup %4154  ;;  %v512_v35 = vpop.xlane.xlu1 %511  ;;  %v1012_v44 = vsel %vm488_vm7, %v4592_v31, 0.0 }
 0x1c7   : > { %v509_v36 = vpop.xlane.xlu0 %508  ;;  %4164 = vpow2.f32 %v531_v51  ;;  %v520_v59 = vsub.f32 %v4508_v13, %v512_v35  ;;  %1013 = vadd.xlane.f32.xlu1 %v1012_v44  ;;  %v1009_v39 = vsel %vm488_vm7, %v4594_v34, 0.0  ;;  %v4657_v35 = vrot.slane %v4343_v12, 2 }
 0x1c8   : > { %v519_v58 = vsub.f32 %v4506_v5, %v509_v36  ;;  %4166 = vpow2.f32 %v529_v50  ;;  %1010 = vadd.xlane.f32.xlu0 %v1009_v39  ;;  %v1033_v50 = vsel %vm4428_vm6, %v4651_v32, 0 }
 0x1c9   : > { %v4608_v55 = vpop.eup %4156  ;;  %v535_v40 = vmul.f32 1.442695, %v520_v59  ;;  %v1034_v39 = vsel %vm4428_vm6, %v4657_v35, 0 }
 0x1ca   : > { %v533_v46 = vmul.f32 1.442695, %v519_v58  ;;  %v4611_v13 = vpop.eup %4158  ;;  %v540_v5 = vsel %vm488_vm7, %v4608_v55, 0.0  ;;  %v1145_v58 = vsel %vm1051_vm8, %v1033_v50, 0  ;;  %v1191_v47 = vsel %vm1051_vm8, %v1034_v39, 0 }
 0x1cb   : > { %4168 = vpow2.f32 %v535_v40  ;;  %541 = vadd.xlane.f32.xlu1 %v540_v5  ;;  %v537_v49 = vsel %vm488_vm7, %v4611_v13, 0.0 }
 0x1cc   : > { %4170 = vpow2.f32 %v533_v46  ;;  %538 = vadd.xlane.f32.xlu0 %v537_v49 }
 0x1cd   : > { %v4624_v53 = vpop.eup %4160 }
 0x1ce   : > { %v4627_v17 = vpop.eup %4162  ;;  %v546_v8 = vsel %vm488_vm7, %v4624_v53, 0.0 }
 0x1cf   : > { %547 = vadd.xlane.f32.xlu1 %v546_v8  ;;  %v543_v57 = vsel %vm488_vm7, %v4627_v17, 0.0 }
 0x1d0   : > { %544 = vadd.xlane.f32.xlu0 %v543_v57 }
 0x1d1   : > { %v4634_v61 = vpop.eup %4164 }
 0x1d2   : > { %v4636_v62 = vpop.eup %4166  ;;  %v552_v63 = vsel %vm488_vm7, %v4634_v61, 0.0 }
 0x1d3   : > { %553 = vadd.xlane.f32.xlu1 %v552_v63  ;;  %v549_v0 = vsel %vm488_vm7, %v4636_v62, 0.0 }
 0x1d4   : > { %550 = vadd.xlane.f32.xlu0 %v549_v0 }
 0x1d5   : > { %v4642_v43 = vpop.eup %4168 }
 0x1d6   : > { %v4644_v42 = vpop.eup %4170  ;;  %v558_v4 = vsel %vm488_vm7, %v4642_v43, 0.0 }
 0x1d7   : > { %559 = vadd.xlane.f32.xlu1 %v558_v4  ;;  %v555_v14 = vsel %vm488_vm7, %v4644_v42, 0.0 }
 0x1d8   : > { %556 = vadd.xlane.f32.xlu0 %v555_v14 }
 0x23c   : > { %v993_v24 = vpop.xlane.xlu0 %992 }
 0x23d   : > { %4172 = vrcp.f32 %v993_v24 }
 0x240   : > { %v996_v29 = vpop.xlane.xlu1 %995 }
 0x241   : > { %4174 = vrcp.f32 %v996_v29 }
 0x244   : > { %v999_v30 = vpop.xlane.xlu0 %998 }
 0x245   : > { %4176 = vrcp.f32 %v999_v30 }
 0x247   : > { %v4173_v51 = vpop.eup %4172 }
 0x248   : > { %v1016_v36 = vmul.f32 %v4173_v51, %v4558_v23  ;;  %v1002_v44 = vpop.xlane.xlu1 %1001 }
 0x249   : > { %4178 = vrcp.f32 %v1002_v44 }
 0x24a   : > { %v1039_v59 = vpack.c.bf16 %v1016_v36, %v1016_v36 }
 0x24b   : > { %v4175_v11 = vpop.eup %4174 }
 0x24c   : > { %v1018_v40 = vmul.f32 %v4175_v11, %v4564_v41  ;;  %v1008_v12 = vpop.xlane.xlu1 %1007  ;;  %3747 = vmatmul.mubr.msk.bf16.vlgmr.msra.gmra.mrb[32].mxu0 %vm1047_vm9, %v1039_v59  ;;  %v4677_v41 = vrot.slane %v4369_v20, 2 }
 0x24d   : > { %4180 = vrcp.f32 %v1008_v12  ;;  %v1005_v23 = vpop.xlane.xlu0 %1004  ;;  %3757 = vmatpush3.bf16.msra.mxu0 %v1145_v58  ;;  %3758 = vmatprep.mubr.msk.bf16.mxu0 %vm4285_vm0, %v4284_v1 }
 0x24e   : > { %4182 = vrcp.f32 %v1005_v23  ;;  %v1040_v46 = vpack.c.bf16 %v1018_v40, %v1018_v40  ;;  %3768 = vmatprep.subr.bf16.mxu0 %v4284_v1  ;;  %v1036_v57 = vsel %vm4428_vm6, %v4677_v41, 0 }
 0x24f   : > { %v4177_v5 = vpop.eup %4176  ;;  %v1283_v14 = vsel %vm1051_vm8, %v1036_v57, 0 }
 0x250   : > { %v1020_v49 = vmul.f32 %v4177_v5, %v4568_v37  ;;  %3753 = vmatmul.mubr.msk.bf16.vlgmr.msra.gmra.mrb[32].mxu1 %vm1047_vm9, %v1040_v46  ;;  %v4691_v37 = vrot.slane %v4394_v25, 2 }
 0x251   : > { %3763 = vmatpush3.bf16.msra.mxu1 %v1191_v47  ;;  %3764 = vmatprep.mubr.msk.bf16.mxu1 %vm4285_vm0, %v4284_v1 }
 0x252   : > { %v1041_v52 = vpack.c.bf16 %v1020_v49, %v1020_v49  ;;  %3774 = vmatprep.subr.bf16.mxu1 %v4284_v1  ;;  %v1037_v30 = vsel %vm4428_vm6, %v4691_v37, 0  ;;  %v594_v49 = vsel %vm4326_vm2, %v4616_v48, 0 }
 0x253   : > { %v4179_v8 = vpop.eup %4178  ;;  %v1329_v58 = vsel %vm1051_vm8, %v1037_v30, 0 }
 0x254   : > { %v1022_v20 = vmul.f32 %v4179_v8, %v4574_v45  ;;  %v1014_v63 = vpop.xlane.xlu1 %1013  ;;  %3759 = vmatmul.mubr.msk.bf16.vlgmr.msra.gmra.mrb[36].mxu0 %vm1047_vm9, %v1041_v52  ;;  %v4698_v45 = vrot.slane %v4397_v26, 2 }
 0x255   : > { %4184 = vrcp.f32 %v1014_v63  ;;  %v1011_v0 = vpop.xlane.xlu0 %1010  ;;  %3769 = vmatpush3.bf16.msra.mxu0 %v1237_v54  ;;  %3770 = vmatprep.mubr.msk.bf16.mxu0 %vm4285_vm0, %v4284_v1  ;;  %v1467_v54 = vsel %vm1051_vm8, %v594_v49, 0 }
 0x256   : > { %4186 = vrcp.f32 %v1011_v0  ;;  %v1042_v4 = vpack.c.bf16 %v1022_v20, %v1022_v20  ;;  %3780 = vmatprep.subr.bf16.mxu0 %v4284_v1  ;;  %v1038_v11 = vsel %vm4428_vm6, %v4698_v45, 0  ;;  %v595_v20 = vsel %vm4326_vm2, %v4651_v32, 0 }
 0x257   : > { %v4181_v24 = vpop.eup %4180  ;;  %v1375_v39 = vsel %vm1051_vm8, %v1038_v11, 0  ;;  %v598_v11 = vsel %vm4326_vm2, %v4677_v41, 0 }
 0x258   : > { %v4183_v29 = vpop.eup %4182  ;;  %3765 = vmatmul.mubr.msk.bf16.vlgmr.msra.gmra.mrb[36].mxu1 %vm1047_vm9, %v1042_v4  ;;  %v1026_v36 = vmul.f32 %v4181_v24, %v4580_v18  ;;  %v542_v44 = vpop.xlane.xlu1 %541  ;;  %v1513_v4 = vsel %vm1051_vm8, %v595_v20, 0 }
 0x259   : > { %v1024_v51 = vmul.f32 %v4183_v29, %v4582_v60  ;;  %v539_v50 = vpop.xlane.xlu0 %538  ;;  %3775 = vmatpush3.bf16.msra.mxu1 %v1283_v14  ;;  %3776 = vmatprep.mubr.msk.bf16.mxu1 %vm4285_vm0, %v4284_v1  ;;  %v596_v14 = vsel %vm4326_vm2, %v4657_v35, 0 }
 0x25a   : > { %4188 = vrcp.f32 %v539_v50  ;;  %3786 = vmatprep.subr.bf16.mxu1 %v4284_v1  ;;  %v1044_v60 = vpack.c.bf16 %v1026_v36, %v1026_v36  ;;  %v1559_v30 = vsel %vm1051_vm8, %v596_v14, 0  ;;  %v597_v36 = vsel %vm4326_vm2, %v4665_v56, 0 }
 0x25b   : > { %v1043_v59 = vpack.c.bf16 %v1024_v51, %v1024_v51  ;;  %4190 = vrcp.f32 %v542_v44 }
 0x25c   : > { %v548_v47 = vpop.xlane.xlu1 %547 }
 0x25d   : > { %3771 = vmatmul.mubr.msk.bf16.vlgmr.msra.gmra.mrb[40].mxu0 %vm1047_vm9, %v1043_v59  ;;  %v545_v40 = vpop.xlane.xlu0 %544 }
 0x25e   : > { %3781 = vmatpush3.bf16.msra.mxu0 %v1329_v58  ;;  %3782 = vmatprep.mubr.msk.bf16.mxu0 %vm4285_vm0, %v4284_v1  ;;  %4192 = vrcp.f32 %v545_v40  ;;  %v1605_v58 = vsel %vm1051_vm8, %v597_v36, 0 }
 0x25f   : > { %v4185_v18 = vpop.eup %4184  ;;  %3792 = vmatprep.subr.bf16.mxu0 %v4284_v1  ;;  %4194 = vrcp.f32 %v548_v47  ;;  %v600_v47 = vsel %vm4326_vm2, %v4698_v45, 0 }
 0x260   : > { %v4187_v12 = vpop.eup %4186  ;;  %3777 = vmatmul.mubr.msk.bf16.vlgmr.msra.gmra.mrb[40].mxu1 %vm1047_vm9, %v1044_v60  ;;  %v1030_v46 = vmul.f32 %v4185_v18, %v4592_v31  ;;  %v554_v0 = vpop.xlane.xlu1 %553 }
 0x261   : > { %v1028_v23 = vmul.f32 %v4187_v12, %v4594_v34  ;;  %3787 = vmatpush3.bf16.msra.mxu1 %v1375_v39  ;;  %3788 = vmatprep.mubr.msk.bf16.mxu1 %vm4285_vm0, %v4284_v1  ;;  %v551_v57 = vpop.xlane.xlu0 %550  ;;  %v1651_v39 = vsel %vm1051_vm8, %v598_v11, 0  ;;  %v599_v12 = vsel %vm4326_vm2, %v4691_v37, 0 }
 0x262   : > { %3798 = vmatprep.subr.bf16.mxu1 %v4284_v1  ;;  %v1046_v34 = vpack.c.bf16 %v1030_v46, %v1030_v46  ;;  %4196 = vrcp.f32 %v551_v57  ;;  %v1697_v46 = vsel %vm1051_vm8, %v599_v12, 0 }
 0x263   : > { %v1045_v5 = vpack.c.bf16 %v1028_v23, %v1028_v23  ;;  %4198 = vrcp.f32 %v554_v0  ;;  %v1788_v23 = vsel %vm1787_vm12, 1, %v4286_v3  ;;  %v4838_v0 = vld [vmem:[%s4321_s12 + $0x6] sm:$0x7] }
 0x264   : > { %v4189_v52 = vpop.eup %4188  ;;  %v560_v59 = vpop.xlane.xlu1 %559 }
 0x265   : > { %3783 = vmatmul.mubr.msk.bf16.vlgmr.msra.gmra.mrb[44].mxu0 %vm1047_vm9, %v1045_v5  ;;  %v4191_v31 = vpop.eup %4190  ;;  %v562_v8 = vmul.f32 %v4189_v52, %v4611_v13  ;;  %v557_v50 = vpop.xlane.xlu0 %556  ;;  %v1743_v52 = vsel %vm1051_vm8, %v600_v47, 0 }
 0x266   : > { %3793 = vmatpush3.bf16.msra.mxu0 %v1421_v19  ;;  %3794 = vmatprep.mubr.msk.bf16.mxu0 %vm4285_vm0, %v4284_v1  ;;  %v564_v63 = vmul.f32 %v4191_v31, %v4608_v55  ;;  %4200 = vrcp.f32 %v557_v50  ;;  %v1789_v19 = vpack.c.b16 %v1788_v23, %v1788_v23 }
 0x267   : > { %3804 = vmatprep.subr.bf16.mxu0 %v4284_v1  ;;  %v601_v13 = vpack.c.bf16 %v562_v8, %v562_v8  ;;  %4202 = vrcp.f32 %v560_v59 }
 0x268   : > { %3789 = vmatmul.mubr.msk.bf16.vlgmr.msra.gmra.mrb[44].mxu1 %vm1047_vm9, %v1046_v34  ;;  %v4193_v24 = vpop.eup %4192  ;;  %v602_v29 = vpack.c.bf16 %v564_v63, %v564_v63  ;;  %vm4795_vm13 = vcmp.ne.s16.totalorder %v1789_v19, 0  ;;  %v4828_v63 = vld [vmem:[%s4321_s12 + $0x3] sm:$0x7] }
 0x269   : > { %3799 = vmatpush3.bf16.msra.mxu1 %v1467_v54  ;;  %3800 = vmatprep.mubr.msk.bf16.mxu1 %vm4285_vm0, %v4284_v1  ;;  %v4195_v55 = vpop.eup %4194  ;;  %v566_v51 = vmul.f32 %v4193_v24, %v4627_v17  ;;  %v1792_v57 = vsel %vm4795_vm13, %v4337_v10, 0  ;;  %v1794_v20 = vsel %vm4795_vm13, %v4357_v16, 0  ;;  %v1797_v14 = vsel %vm4795_vm13, %v4406_v27, 0  ;;  %v4858_v24 = vld [vmem:[%s4321_s12 + $0xc] sm:$0x7] }
 0x26a   : > { %3810 = vmatprep.subr.bf16.mxu1 %v4284_v1  ;;  %v568_v44 = vmul.f32 %v4195_v55, %v4624_v53 }
 0x26b   : > { %v603_v17 = vpack.c.bf16 %v566_v51, %v566_v51 }
 0x26c   : > { %v4197_v60 = vpop.eup %4196  ;;  %v604_v53 = vpack.c.bf16 %v568_v44, %v568_v44 }
 0x26d   : > { %3795 = vmatmul.mubr.msk.bf16.vlgmr.msra.gmra.mrb[32].mxu0 %vm1047_vm9, %v601_v13  ;;  %v4199_v18 = vpop.eup %4198  ;;  %v570_v40 = vmul.f32 %v4197_v60, %v4636_v62  ;;  %v1796_v13 = vsel %vm4795_vm13, %v4381_v22, 0 }
 0x26e   : > { %3805 = vmatpush3.bf16.msra.mxu0 %v1513_v4  ;;  %3806 = vmatprep.mubr.msk.bf16.mxu0 %vm4285_vm0, %v4284_v1  ;;  %v572_v33 = vmul.f32 %v4199_v18, %v4634_v61  ;;  %v4848_v4 = vld [vmem:[%s4321_s12 + $0x9] sm:$0x7] }
 0x26f   : > { %3816 = vmatprep.subr.bf16.mxu0 %v4284_v1  ;;  %v605_v62 = vpack.c.bf16 %v570_v40, %v570_v40 }
 0x270   : > { %3801 = vmatmul.mubr.msk.bf16.vlgmr.msra.gmra.mrb[32].mxu1 %vm1047_vm9, %v602_v29  ;;  %v4201_v5 = vpop.eup %4200  ;;  %v606_v49 = vpack.c.bf16 %v572_v33, %v572_v33  ;;  %v1798_v29 = vsel %vm4795_vm13, %v4409_v28, 0 }
 0x271   : > { %3811 = vmatpush3.bf16.msra.mxu1 %v1559_v30  ;;  %3812 = vmatprep.mubr.msk.bf16.mxu1 %vm4285_vm0, %v4284_v1  ;;  %v4203_v61 = vpop.eup %4202  ;;  %v574_v34 = vmul.f32 %v4201_v5, %v4644_v42  ;;  %v1791_v42 = vsel %vm4795_vm13, %v4334_v9, 0  ;;  %v4868_v30 = vld [vmem:[%s4321_s12 + $0xf] sm:$0x7] }
 0x272   : > { %3822 = vmatprep.subr.bf16.mxu1 %v4284_v1  ;;  %v576_v54 = vmul.f32 %v4203_v61, %v4642_v43  ;;  %v1793_v43 = vsel %vm4795_vm13, %v4354_v15, 0 }
 0x273   : > { %v607_v31 = vpack.c.bf16 %v574_v34, %v574_v34 }
 0x274   : > { %v608_v8 = vpack.c.bf16 %v576_v54, %v576_v54 }
 0x275   : > { %3807 = vmatmul.mubr.msk.bf16.vlgmr.msra.gmra.mrb[36].mxu0 %vm1047_vm9, %v603_v17 }
 0x276   : > { %3817 = vmatpush3.bf16.msra.mxu0 %v1605_v58  ;;  %3818 = vmatprep.mubr.msk.bf16.mxu0 %vm4285_vm0, %v4284_v1 }
 0x277   : > { %3828 = vmatprep.subr.bf16.mxu0 %v4284_v1 }
 0x278   : > { %3813 = vmatmul.mubr.msk.bf16.vlgmr.msra.gmra.mrb[36].mxu1 %vm1047_vm9, %v604_v53 }
 0x279   : > { %3823 = vmatpush3.bf16.msra.mxu1 %v1651_v39  ;;  %3824 = vmatprep.mubr.msk.bf16.mxu1 %vm4285_vm0, %v4284_v1 }
 0x27a   : > { %3834 = vmatprep.subr.bf16.mxu1 %v4284_v1 }
 0x27d   : > { %3819 = vmatmul.mubr.msk.bf16.vlgmr.msra.gmra.mrb[40].mxu0 %vm1047_vm9, %v605_v62 }
 0x27e   : > { %3829 = vmatpush3.bf16.msra.mxu0 %v1697_v46  ;;  %3830 = vmatprep.mubr.msk.bf16.mxu0 %vm4285_vm0, %v4284_v1 }
 0x27f   : > { %3840 = vmatprep.subr.bf16.mxu0 %v4284_v1 }
 0x280   : > { %3825 = vmatmul.mubr.msk.bf16.vlgmr.msra.gmra.mrb[40].mxu1 %vm1047_vm9, %v606_v49 }
 0x281   : > { %3835 = vmatpush3.bf16.msra.mxu1 %v1743_v52  ;;  %3836 = vmatprep.mubr.msk.bf16.mxu1 %vm4285_vm0, %v4284_v1 }
 0x282   : > { %3846 = vmatprep.subr.bf16.mxu1 %v4284_v1 }
 0x285   : > { %3831 = vmatmul.mubr.msk.bf16.vlgmr.msra.gmra.mrb[44].mxu0 %vm1047_vm9, %v607_v31 }
 0x286   : > { %3842 = vmatprep.mubr.msk.bf16.mxu0 %vm4285_vm0, %v4284_v1 }
 0x287   : > { %3841 = vmatpush3.bf16.xpose.msra.mxu0 %v1791_v42 }
 0x288   : > { %3837 = vmatmul.mubr.msk.bf16.vlgmr.msra.gmra.mrb[44].mxu1 %vm1047_vm9, %v608_v8  ;;  %3852 = vmatprep.subr.bf16.mxu0 %v4284_v1 }
 0x289   : > { %3848 = vmatprep.mubr.msk.bf16.mxu1 %vm4285_vm0, %v4284_v1 }
 0x28a   : > { %3847 = vmatpush3.bf16.xpose.msra.mxu1 %v1792_v57 }
 0x28b   : > { %3858 = vmatprep.subr.bf16.mxu1 %v4284_v1 }
 0x28e   : > { %3843 = vmatmul.mubr.bf16.vlgmr.msra.gmra.mrb[48].mxu0 %v4324_v6  ;;  %v1795_v6 = vsel %vm4795_vm13, %v4378_v21, 0 }
 0x28f   : > { %3853 = vmatpush3.bf16.xpose.msra.mxu0 %v1793_v43  ;;  %3854 = vmatprep.mubr.msk.bf16.mxu0 %vm4285_vm0, %v4284_v1 }
 0x290   : > { %3864 = vmatprep.subr.bf16.mxu0 %v4284_v1 }
 0x291   : > { %3849 = vmatmul.mubr.bf16.vlgmr.msra.gmra.mrb[48].mxu1 %v4828_v63 }
 0x292   : > { %3859 = vmatpush3.bf16.xpose.msra.mxu1 %v1794_v20  ;;  %3860 = vmatprep.mubr.msk.bf16.mxu1 %vm4285_vm0, %v4284_v1 }
 0x293   : > { %3870 = vmatprep.subr.bf16.mxu1 %v4284_v1 }
 0x296   : > { %3855 = vmatmul.mubr.bf16.vlgmr.msra.gmra.mrb[52].mxu0 %v4838_v0 }
 0x297   : > { %3865 = vmatpush3.bf16.xpose.msra.mxu0 %v1795_v6  ;;  %3866 = vmatprep.mubr.msk.bf16.mxu0 %vm4285_vm0, %v4284_v1 }
 0x298   : > { %3876 = vmatprep.subr.bf16.mxu0 %v4284_v1 }
 0x299   : > { %3861 = vmatmul.mubr.bf16.vlgmr.msra.gmra.mrb[52].mxu1 %v4848_v4 }
 0x29a   : > { %3871 = vmatpush3.bf16.xpose.msra.mxu1 %v1796_v13  ;;  %3872 = vmatprep.mubr.msk.bf16.mxu1 %vm4285_vm0, %v4284_v1 }
 0x29b   : > { %3882 = vmatprep.subr.bf16.mxu1 %v4284_v1 }
 0x29e   : > { %3867 = vmatmul.mubr.bf16.vlgmr.msra.gmra.mrb[56].mxu0 %v4858_v24 }
 0x29f   : > { %3877 = vmatpush3.bf16.xpose.msra.mxu0 %v1797_v14  ;;  %3878 = vmatprep.mubr.msk.bf16.mxu0 %vm4285_vm0, %v4284_v1 }
 0x2a0   : > { %3888 = vmatprep.subr.bf16.mxu0 %v4284_v1 }
 0x2a1   : > { %3873 = vmatmul.mubr.bf16.vlgmr.msra.gmra.mrb[56].mxu1 %v4868_v30 }
 0x2a2   : > { %3883 = vmatpush3.bf16.xpose.msra.mxu1 %v1798_v29  ;;  %3884 = vmatprep.mubr.msk.bf16.mxu1 %vm4285_vm0, %v4284_v1 }
 0x2a3   : > { %3894 = vmatprep.subr.bf16.mxu1 %v4284_v1 }
 0x2a6   : > { %3879 = vmatmul.mubr.bf16.vlgmr.msra.gmra.mrb[60].mxu0 %v4394_v25 }
 0x2a7   : > { %3890 = vmatprep.mubr.msk.bf16.mxu0 %vm4285_vm0, %v4284_v1 }
 0x2a9   : > { %3885 = vmatmul.mubr.bf16.vlgmr.msra.gmra.mrb[60].mxu1 %v4397_v26 }
 0x2aa   : > { %3896 = vmatprep.mubr.msk.bf16.mxu1 %vm4285_vm0, %v4284_v1 }
 0x361   : > { %v1833_v55 = vpop.f32.mrb[48].mxu0 }
 0x362   : > { %v2119_v51 = vsel %vm488_vm7, %v1833_v55, -inf  ;;  %v3844_v50 = vpop.f32.mrb[49].mxu0 }
 0x363   : > { %2120 = vmax.xlane.f32.xlu0 %v2119_v51  ;;  %v1836_v36 = vpop.f32.mrb[50].mxu0 }
 0x364   : > { %v3845_v44 = vpop.f32.mrb[51].mxu0  ;;  %v1873_v59 = vpop.f32.mrb[48].mxu1 }
 0x365   : > { %v3850_v17 = vpop.f32.mrb[49].mxu1  ;;  %v2122_v58 = vsel %vm488_vm7, %v1873_v59, -inf }
 0x366   : > { %2123 = vmax.xlane.f32.xlu1 %v2122_v58  ;;  %v1876_v25 = vpop.f32.mrb[50].mxu1 }
 0x367   : > { %v3851_v11 = vpop.f32.mrb[51].mxu1 }
 0x369   : > { %v1913_v60 = vpop.f32.mrb[52].mxu0 }
 0x36a   : > { %v2125_v26 = vsel %vm488_vm7, %v1913_v60, -inf  ;;  %v3856_v53 = vpop.f32.mrb[53].mxu0 }
 0x36b   : > { %2126 = vmax.xlane.f32.xlu0 %v2125_v26  ;;  %v1916_v39 = vpop.f32.mrb[54].mxu0 }
 0x36c   : > { %v3857_v18 = vpop.f32.mrb[55].mxu0  ;;  %v1953_v40 = vpop.f32.mrb[52].mxu1 }
 0x36d   : > { %v3862_v12 = vpop.f32.mrb[53].mxu1  ;;  %v2128_v33 = vsel %vm488_vm7, %v1953_v40, -inf }
 0x36e   : > { %2129 = vmax.xlane.f32.xlu1 %v2128_v33  ;;  %v1956_v23 = vpop.f32.mrb[54].mxu1 }
 0x36f   : > { %v3863_v62 = vpop.f32.mrb[55].mxu1 }
 0x371   : > { %v1993_v46 = vpop.f32.mrb[56].mxu0 }
 0x372   : > { %v2131_v47 = vsel %vm488_vm7, %v1993_v46, -inf  ;;  %v3868_v5 = vpop.f32.mrb[57].mxu0 }
 0x373   : > { %2132 = vmax.xlane.f32.xlu0 %v2131_v47  ;;  %v1996_v19 = vpop.f32.mrb[58].mxu0 }
 0x374   : > { %v3869_v49 = vpop.f32.mrb[59].mxu0  ;;  %v2033_v52 = vpop.f32.mrb[56].mxu1 }
 0x375   : > { %v3874_v61 = vpop.f32.mrb[57].mxu1  ;;  %v2134_v34 = vsel %vm488_vm7, %v2033_v52, -inf }
 0x376   : > { %2135 = vmax.xlane.f32.xlu1 %v2134_v34  ;;  %v2036_v54 = vpop.f32.mrb[58].mxu1 }
 0x377   : > { %v3875_v31 = vpop.f32.mrb[59].mxu1 }
 0x379   : > { %v2073_v42 = vpop.f32.mrb[60].mxu0 }
 0x37a   : > { %v2137_v8 = vsel %vm488_vm7, %v2073_v42, -inf  ;;  %v3880_v57 = vpop.f32.mrb[61].mxu0 }
 0x37b   : > { %2138 = vmax.xlane.f32.xlu0 %v2137_v8  ;;  %v2076_v43 = vpop.f32.mrb[62].mxu0 }
 0x37c   : > { %v2113_v20 = vpop.f32.mrb[60].mxu1  ;;  %v3881_v6 = vpop.f32.mrb[63].mxu0 }
 0x37d   : > { %v3886_v13 = vpop.f32.mrb[61].mxu1  ;;  %v2140_v14 = vsel %vm488_vm7, %v2113_v20, -inf }
 0x37e   : > { %2141 = vmax.xlane.f32.xlu1 %v2140_v14  ;;  %v2116_v29 = vpop.f32.mrb[62].mxu1 }
 0x37f   : > { %v3887_v51 = vpop.f32.mrb[63].mxu1 }
 0x380   : > { %v2207_v51 = vsel %vm4795_vm13, %v4599_v38, 0 }
 0x3f0   : > { %v2121_v50 = vpop.xlane.xlu0 %2120 }
 0x3f1   : > { %v2143_v36 = vsub.f32 %v1833_v55, %v2121_v50 }
 0x3f3   : > { %v2151_v44 = vmul.f32 1.442695, %v2143_v36  ;;  %v2124_v17 = vpop.xlane.xlu1 %2123  ;;  %v2227_v36 = vsel %vm1051_vm8, %v2207_v51, 0 }
 0x3f4   : > { %v2144_v58 = vsub.f32 %v1873_v59, %v2124_v17  ;;  %3889 = vmatpush3.bf16.msra.mxu0 %v2227_v36  ;;  %v2208_v17 = vsel %vm4795_vm13, %v4616_v48, 0  ;;  %v2602_v36 = vsel %vm2599_vm14, 1, %v4286_v3 }
 0x3f5   : > { %4204 = vpow2.f32 %v2151_v44  ;;  %3900 = vmatprep.subr.bf16.mxu0 %v4284_v1 }
 0x3f6   : > { %v2153_v25 = vmul.f32 1.442695, %v2144_v58  ;;  %v2273_v58 = vsel %vm1051_vm8, %v2208_v17, 0 }
 0x3f7   : > { %3895 = vmatpush3.bf16.msra.mxu1 %v2273_v58  ;;  %v2214_v58 = vsel %vm4795_vm13, %v4698_v45, 0 }
 0x3f8   : > { %4206 = vpow2.f32 %v2153_v25  ;;  %v2127_v11 = vpop.xlane.xlu0 %2126  ;;  %3906 = vmatprep.subr.bf16.mxu1 %v4284_v1 }
 0x3f9   : > { %v2145_v26 = vsub.f32 %v1913_v60, %v2127_v11 }
 0x3fb   : > { %v2155_v53 = vmul.f32 1.442695, %v2145_v26  ;;  %v2130_v39 = vpop.xlane.xlu1 %2129 }
 0x3fc   : > { %v2146_v18 = vsub.f32 %v1953_v40, %v2130_v39 }
 0x3fd   : > { %4208 = vpow2.f32 %v2155_v53 }
 0x3fe   : > { %v2157_v12 = vmul.f32 1.442695, %v2146_v18  ;;  %v2209_v18 = vsel %vm4795_vm13, %v4651_v32, 0 }
 0x3ff   : > { %v4205_v33 = vpop.eup %4204 }
 0x400   : > { %4210 = vpow2.f32 %v2157_v12  ;;  %v2133_v23 = vpop.xlane.xlu0 %2132  ;;  %v2167_v62 = vsel %vm488_vm7, %v4205_v33, 0.0 }
 0x401   : > { %v2147_v47 = vsub.f32 %v1993_v46, %v2133_v23  ;;  %2168 = vadd.xlane.f32.xlu0 %v2167_v62 }
 0x402   : > { %v4207_v55 = vpop.eup %4206 }
 0x403   : > { %v2159_v5 = vmul.f32 1.442695, %v2147_v47  ;;  %v2136_v59 = vpop.xlane.xlu1 %2135  ;;  %v2170_v19 = vsel %vm488_vm7, %v4207_v55, 0.0  ;;  %v2319_v47 = vsel %vm1051_vm8, %v2209_v18, 0 }
 0x404   : > { %v2148_v49 = vsub.f32 %v2033_v52, %v2136_v59  ;;  %2171 = vadd.xlane.f32.xlu1 %v2170_v19 }
 0x405   : > { %4212 = vpow2.f32 %v2159_v5  ;;  %v2210_v5 = vsel %vm4795_vm13, %v4657_v35, 0 }
 0x406   : > { %v2161_v60 = vmul.f32 1.442695, %v2148_v49 }
 0x407   : > { %v4890_v61 = vpop.eup %4208 }
 0x408   : > { %4214 = vpow2.f32 %v2161_v60  ;;  %v2139_v40 = vpop.xlane.xlu0 %2138  ;;  %v2173_v34 = vsel %vm488_vm7, %v4890_v61, 0.0  ;;  %v2365_v60 = vsel %vm1051_vm8, %v2210_v5, 0 }
 0x409   : > { %v2149_v54 = vsub.f32 %v2073_v42, %v2139_v40  ;;  %2174 = vadd.xlane.f32.xlu0 %v2173_v34 }
 0x40a   : > { %v4894_v46 = vpop.eup %4210 }
 0x40b   : > { %v2163_v31 = vmul.f32 1.442695, %v2149_v54  ;;  %v2142_v8 = vpop.xlane.xlu1 %2141  ;;  %v2176_v57 = vsel %vm488_vm7, %v4894_v46, 0.0 }
 0x40c   : > { %v2150_v52 = vsub.f32 %v2113_v20, %v2142_v8  ;;  %2177 = vadd.xlane.f32.xlu1 %v2176_v57  ;;  %v2212_v57 = vsel %vm4795_vm13, %v4677_v41, 0 }
 0x40d   : > { %4216 = vpow2.f32 %v2163_v31 }
 0x40e   : > { %v2165_v43 = vmul.f32 1.442695, %v2150_v52 }
 0x40f   : > { %v4898_v6 = vpop.eup %4212 }
 0x410   : > { %4218 = vpow2.f32 %v2165_v43  ;;  %v2179_v13 = vsel %vm488_vm7, %v4898_v6, 0.0 }
 0x411   : > { %2180 = vadd.xlane.f32.xlu0 %v2179_v13  ;;  %v2457_v13 = vsel %vm1051_vm8, %v2212_v57, 0 }
 0x412   : > { %v4902_v42 = vpop.eup %4214 }
 0x413   : > { %v2182_v14 = vsel %vm488_vm7, %v4902_v42, 0.0 }
 0x414   : > { %2183 = vadd.xlane.f32.xlu1 %v2182_v14 }
 0x417   : > { %v4906_v29 = vpop.eup %4216 }
 0x418   : > { %v2185_v20 = vsel %vm488_vm7, %v4906_v29, 0.0 }
 0x419   : > { %2186 = vadd.xlane.f32.xlu0 %v2185_v20 }
 0x41a   : > { %v4913_v50 = vpop.eup %4218 }
 0x41b   : > { %v2188_v44 = vsel %vm488_vm7, %v4913_v50, 0.0 }
 0x41c   : > { %2189 = vadd.xlane.f32.xlu1 %v2188_v44 }
 0x48e   : > { %v2169_v25 = vpop.xlane.xlu0 %2168 }
 0x48f   : > { %4220 = vrcp.f32 %v2169_v25 }
 0x491   : > { %v2172_v11 = vpop.xlane.xlu1 %2171 }
 0x492   : > { %4222 = vrcp.f32 %v2172_v11 }
 0x496   : > { %v2175_v26 = vpop.xlane.xlu0 %2174 }
 0x497   : > { %4224 = vrcp.f32 %v2175_v26  ;;  %v2549_v26 = vsel %vm1051_vm8, %v2214_v58, 0 }
 0x499   : > { %v4221_v53 = vpop.eup %4220  ;;  %v2178_v39 = vpop.xlane.xlu1 %2177 }
 0x49a   : > { %v2192_v12 = vmul.f32 %v4221_v53, %v4205_v33  ;;  %4226 = vrcp.f32 %v2178_v39 }
 0x49c   : > { %v4223_v23 = vpop.eup %4222  ;;  %v2215_v62 = vpack.c.bf16 %v2192_v12, %v2192_v12 }
 0x49d   : > { %v2194_v59 = vmul.f32 %v4223_v23, %v4207_v55  ;;  %v2211_v55 = vsel %vm4795_vm13, %v4665_v56, 0 }
 0x49e   : > { %3891 = vmatmul.mubr.msk.bf16.vlgmr.msra.gmra.mrb[32].mxu0 %vm1047_vm9, %v2215_v62  ;;  %v2181_v19 = vpop.xlane.xlu0 %2180  ;;  %v2411_v8 = vsel %vm1051_vm8, %v2211_v55, 0 }
 0x49f   : > { %4228 = vrcp.f32 %v2181_v19  ;;  %v2216_v49 = vpack.c.bf16 %v2194_v59, %v2194_v59  ;;  %3901 = vmatpush3.bf16.msra.mxu0 %v2319_v47  ;;  %3902 = vmatprep.mubr.msk.bf16.mxu0 %vm4285_vm0, %v4284_v1 }
 0x4a0   : > { %3912 = vmatprep.subr.bf16.mxu0 %v4284_v1 }
 0x4a1   : > { %v4225_v33 = vpop.eup %4224  ;;  %3897 = vmatmul.mubr.msk.bf16.vlgmr.msra.gmra.mrb[32].mxu1 %vm1047_vm9, %v2216_v49  ;;  %v2184_v40 = vpop.xlane.xlu1 %2183 }
 0x4a2   : > { %v2196_v34 = vmul.f32 %v4225_v33, %v4890_v61  ;;  %4230 = vrcp.f32 %v2184_v40  ;;  %3907 = vmatpush3.bf16.msra.mxu1 %v2365_v60  ;;  %3908 = vmatprep.mubr.msk.bf16.mxu1 %vm4285_vm0, %v4284_v1 }
 0x4a3   : > { %3918 = vmatprep.subr.bf16.mxu1 %v4284_v1 }
 0x4a4   : > { %v4227_v54 = vpop.eup %4226  ;;  %v2217_v31 = vpack.c.bf16 %v2196_v34, %v2196_v34 }
 0x4a5   : > { %v2198_v52 = vmul.f32 %v4227_v54, %v4894_v46  ;;  %v2213_v46 = vsel %vm4795_vm13, %v4691_v37, 0 }
 0x4a6   : > { %3903 = vmatmul.mubr.msk.bf16.vlgmr.msra.gmra.mrb[36].mxu0 %vm1047_vm9, %v2217_v31  ;;  %v2187_v61 = vpop.xlane.xlu0 %2186  ;;  %v2503_v17 = vsel %vm1051_vm8, %v2213_v46, 0 }
 0x4a7   : > { %4232 = vrcp.f32 %v2187_v61  ;;  %v2218_v43 = vpack.c.bf16 %v2198_v52, %v2198_v52  ;;  %3913 = vmatpush3.bf16.msra.mxu0 %v2411_v8  ;;  %3914 = vmatprep.mubr.msk.bf16.mxu0 %vm4285_vm0, %v4284_v1 }
 0x4a8   : > { %3924 = vmatprep.subr.bf16.mxu0 %v4284_v1 }
 0x4a9   : > { %v4229_v14 = vpop.eup %4228  ;;  %3909 = vmatmul.mubr.msk.bf16.vlgmr.msra.gmra.mrb[36].mxu1 %vm1047_vm9, %v2218_v43  ;;  %v2190_v20 = vpop.xlane.xlu1 %2189 }
 0x4aa   : > { %v2200_v51 = vmul.f32 %v4229_v14, %v4898_v6  ;;  %4234 = vrcp.f32 %v2190_v20  ;;  %3919 = vmatpush3.bf16.msra.mxu1 %v2457_v13  ;;  %3920 = vmatprep.mubr.msk.bf16.mxu1 %vm4285_vm0, %v4284_v1  ;;  %v2603_v6 = vpack.c.b16 %v2602_v36, %v2602_v36 }
 0x4ab   : > { %3930 = vmatprep.subr.bf16.mxu1 %v4284_v1 }
 0x4ac   : > { %v4231_v2 = vpop.eup %4230  ;;  %v2219_v44 = vpack.c.bf16 %v2200_v51, %v2200_v51  ;;  %vm4976_vm15 = vcmp.ne.s16.totalorder %v2603_v6, 0 }
 0x4ad   : > { %v2202_v25 = vmul.f32 %v4231_v2, %v4902_v42  ;;  %v2605_v12 = vsel %vm4976_vm15, %v4334_v9, 0  ;;  %v2606_v23 = vsel %vm4976_vm15, %v4337_v10, 0  ;;  %v2607_v9 = vsel %vm4976_vm15, %v4354_v15, 0 }
 0x4ae   : > { %3915 = vmatmul.mubr.msk.bf16.vlgmr.msra.gmra.mrb[40].mxu0 %vm1047_vm9, %v2219_v44  ;;  %v2608_v10 = vsel %vm4976_vm15, %v4357_v16, 0  ;;  %v2609_v15 = vsel %vm4976_vm15, %v4378_v21, 0  ;;  %v2610_v16 = vsel %vm4976_vm15, %v4381_v22, 0  ;;  %v2611_v21 = vsel %vm4976_vm15, %v4406_v27, 0  ;;  %v4274_v27 = vld [vmem:[%s4321_s12 + $0x12] sm:$0x7] }
 0x4af   : > { %3925 = vmatpush3.bf16.msra.mxu0 %v2503_v17  ;;  %v2220_v11 = vpack.c.bf16 %v2202_v25, %v2202_v25  ;;  %3926 = vmatprep.mubr.msk.bf16.mxu0 %vm4285_vm0, %v4284_v1  ;;  %v2612_v22 = vsel %vm4976_vm15, %v4409_v28, 0 }
 0x4b0   : > { %3936 = vmatprep.subr.bf16.mxu0 %v4284_v1 }
 0x4b1   : > { %v4233_v3 = vpop.eup %4232  ;;  %3921 = vmatmul.mubr.msk.bf16.vlgmr.msra.gmra.mrb[40].mxu1 %vm1047_vm9, %v2220_v11 }
 0x4b2   : > { %v2204_v7 = vmul.f32 %v4233_v3, %v4906_v29  ;;  %3931 = vmatpush3.bf16.msra.mxu1 %v2549_v26  ;;  %3932 = vmatprep.mubr.msk.bf16.mxu1 %vm4285_vm0, %v4284_v1 }
 0x4b3   : > { %3942 = vmatprep.subr.bf16.mxu1 %v4284_v1 }
 0x4b4   : > { %v4235_v53 = vpop.eup %4234  ;;  %v2221_v39 = vpack.c.bf16 %v2204_v7, %v2204_v7 }
 0x4b5   : > { %v2206_v18 = vmul.f32 %v4235_v53, %v4913_v50  ;;  %v4273_v50 = vld [vmem:[%s4321_s12] sm:$0x7] }
 0x4b6   : > { %3927 = vmatmul.mubr.msk.bf16.vlgmr.msra.gmra.mrb[44].mxu0 %vm1047_vm9, %v2221_v39 }
 0x4b7   : > { %v2222_v29 = vpack.c.bf16 %v2206_v18, %v2206_v18  ;;  %3938 = vmatprep.mubr.msk.bf16.mxu0 %vm4285_vm0, %v4284_v1 }
 0x4b8   : > { %3937 = vmatpush3.bf16.xpose.msra.mxu0 %v2605_v12 }
 0x4b9   : > { %3933 = vmatmul.mubr.msk.bf16.vlgmr.msra.gmra.mrb[44].mxu1 %vm1047_vm9, %v2222_v29  ;;  %3948 = vmatprep.subr.bf16.mxu0 %v4284_v1 }
 0x4ba   : > { %3944 = vmatprep.mubr.msk.bf16.mxu1 %vm4285_vm0, %v4284_v1 }
 0x4bb   : > { %3943 = vmatpush3.bf16.xpose.msra.mxu1 %v2606_v23 }
 0x4bc   : > { %3954 = vmatprep.subr.bf16.mxu1 %v4284_v1 }
 0x4bf   : > { %3939 = vmatmul.mubr.bf16.vlgmr.msra.gmra.mrb[64].mxu0 %v4273_v50 }
 0x4c0   : > { %3949 = vmatpush3.bf16.xpose.msra.mxu0 %v2607_v9  ;;  %3950 = vmatprep.mubr.msk.bf16.mxu0 %vm4285_vm0, %v4284_v1 }
 0x4c1   : > { %3960 = vmatprep.subr.bf16.mxu0 %v4284_v1 }
 0x4c2   : > { %3945 = vmatmul.mubr.bf16.vlgmr.msra.gmra.mrb[64].mxu1 %v4828_v63  ;;  %v4275_v63 = vld [vmem:[%s4321_s12 + $0x15] sm:$0x7] }
 0x4c3   : > { %3955 = vmatpush3.bf16.xpose.msra.mxu1 %v2608_v10  ;;  %3956 = vmatprep.mubr.msk.bf16.mxu1 %vm4285_vm0, %v4284_v1 }
 0x4c4   : > { %3966 = vmatprep.subr.bf16.mxu1 %v4284_v1 }
 0x4c7   : > { %3951 = vmatmul.mubr.bf16.vlgmr.msra.gmra.mrb[68].mxu0 %v4838_v0 }
 0x4c8   : > { %3961 = vmatpush3.bf16.xpose.msra.mxu0 %v2609_v15  ;;  %3962 = vmatprep.mubr.msk.bf16.mxu0 %vm4285_vm0, %v4284_v1 }
 0x4c9   : > { %3972 = vmatprep.subr.bf16.mxu0 %v4284_v1 }
 0x4ca   : > { %3957 = vmatmul.mubr.bf16.vlgmr.msra.gmra.mrb[68].mxu1 %v4848_v4 }
 0x4cb   : > { %3967 = vmatpush3.bf16.xpose.msra.mxu1 %v2610_v16  ;;  %3968 = vmatprep.mubr.msk.bf16.mxu1 %vm4285_vm0, %v4284_v1 }
 0x4cc   : > { %3978 = vmatprep.subr.bf16.mxu1 %v4284_v1 }
 0x4cf   : > { %3963 = vmatmul.mubr.bf16.vlgmr.msra.gmra.mrb[72].mxu0 %v4858_v24 }
 0x4d0   : > { %3973 = vmatpush3.bf16.xpose.msra.mxu0 %v2611_v21  ;;  %3974 = vmatprep.mubr.msk.bf16.mxu0 %vm4285_vm0, %v4284_v1 }
 0x4d1   : > { %3984 = vmatprep.subr.bf16.mxu0 %v4284_v1 }
 0x4d2   : > { %3969 = vmatmul.mubr.bf16.vlgmr.msra.gmra.mrb[72].mxu1 %v4868_v30 }
 0x4d3   : > { %3979 = vmatpush3.bf16.xpose.msra.mxu1 %v2612_v22  ;;  %3980 = vmatprep.mubr.msk.bf16.mxu1 %vm4285_vm0, %v4284_v1 }
 0x4d4   : > { %3990 = vmatprep.subr.bf16.mxu1 %v4284_v1 }
 0x4d7   : > { %3975 = vmatmul.mubr.bf16.vlgmr.msra.gmra.mrb[76].mxu0 %v4274_v27 }
 0x4d8   : > { %3986 = vmatprep.mubr.msk.bf16.mxu0 %vm4285_vm0, %v4284_v1 }
 0x4da   : > { %3981 = vmatmul.mubr.bf16.vlgmr.msra.gmra.mrb[76].mxu1 %v4275_v63 }
 0x4db   : > { %3992 = vmatprep.mubr.msk.bf16.mxu1 %vm4285_vm0, %v4284_v1 }
 0x592   : > { %v2647_v28 = vpop.f32.mrb[64].mxu0 }
 0x593   : > { %v2933_v0 = vsel %vm488_vm7, %v2647_v28, -inf  ;;  %v3940_v4 = vpop.f32.mrb[65].mxu0 }
 0x594   : > { %2934 = vmax.xlane.f32.xlu0 %v2933_v0  ;;  %v2650_v24 = vpop.f32.mrb[66].mxu0 }
 0x595   : > { %v2687_v30 = vpop.f32.mrb[64].mxu1  ;;  %v3941_v62 = vpop.f32.mrb[67].mxu0 }
 0x596   : > { %v3946_v47 = vpop.f32.mrb[65].mxu1  ;;  %v2936_v5 = vsel %vm488_vm7, %v2687_v30, -inf }
 0x597   : > { %2937 = vmax.xlane.f32.xlu1 %v2936_v5  ;;  %v2690_v59 = vpop.f32.mrb[66].mxu1 }
 0x598   : > { %v3947_v19 = vpop.f32.mrb[67].mxu1 }
 0x59a   : > { %v2727_v49 = vpop.f32.mrb[68].mxu0 }
 0x59b   : > { %v2939_v60 = vsel %vm488_vm7, %v2727_v49, -inf  ;;  %v3952_v33 = vpop.f32.mrb[69].mxu0 }
 0x59c   : > { %2940 = vmax.xlane.f32.xlu0 %v2939_v60  ;;  %v2730_v40 = vpop.f32.mrb[70].mxu0 }
 0x59d   : > { %v2767_v55 = vpop.f32.mrb[68].mxu1  ;;  %v3953_v34 = vpop.f32.mrb[71].mxu0 }
 0x59e   : > { %v3958_v54 = vpop.f32.mrb[69].mxu1  ;;  %v2942_v31 = vsel %vm488_vm7, %v2767_v55, -inf }
 0x59f   : > { %2943 = vmax.xlane.f32.xlu1 %v2942_v31  ;;  %v2770_v8 = vpop.f32.mrb[70].mxu1 }
 0x5a0   : > { %v3959_v57 = vpop.f32.mrb[71].mxu1 }
 0x5a2   : > { %v2807_v52 = vpop.f32.mrb[72].mxu0 }
 0x5a3   : > { %v2945_v61 = vsel %vm488_vm7, %v2807_v52, -inf  ;;  %v3964_v43 = vpop.f32.mrb[73].mxu0 }
 0x5a4   : > { %2946 = vmax.xlane.f32.xlu0 %v2945_v61  ;;  %v2810_v13 = vpop.f32.mrb[74].mxu0 }
 0x5a5   : > { %v2847_v14 = vpop.f32.mrb[72].mxu1  ;;  %v3965_v20 = vpop.f32.mrb[75].mxu0 }
 0x5a6   : > { %v3970_v46 = vpop.f32.mrb[73].mxu1  ;;  %v2948_v51 = vsel %vm488_vm7, %v2847_v14, -inf }
 0x5a7   : > { %2949 = vmax.xlane.f32.xlu1 %v2948_v51  ;;  %v2850_v36 = vpop.f32.mrb[74].mxu1 }
 0x5a8   : > { %v3971_v2 = vpop.f32.mrb[75].mxu1  ;;  %v3022_v36 = vsel %vm4976_vm15, %v4616_v48, 0 }
 0x5a9   : > { %v3087_v2 = vsel %vm1051_vm8, %v3022_v36, 0 }
 0x5aa   : > { %v2887_v44 = vpop.f32.mrb[76].mxu0  ;;  %3991 = vmatpush3.bf16.msra.mxu1 %v3087_v2 }
 0x5ab   : > { %v2951_v17 = vsel %vm488_vm7, %v2887_v44, -inf  ;;  %v3976_v58 = vpop.f32.mrb[77].mxu0  ;;  %4002 = vmatprep.subr.bf16.mxu1 %v4284_v1 }
 0x5ac   : > { %2952 = vmax.xlane.f32.xlu0 %v2951_v17  ;;  %v2890_v25 = vpop.f32.mrb[78].mxu0 }
 0x5ad   : > { %v2927_v6 = vpop.f32.mrb[76].mxu1  ;;  %v3977_v11 = vpop.f32.mrb[79].mxu0 }
 0x5ae   : > { %v3982_v26 = vpop.f32.mrb[77].mxu1  ;;  %v2954_v3 = vsel %vm488_vm7, %v2927_v6, -inf }
 0x5af   : > { %2955 = vmax.xlane.f32.xlu1 %v2954_v3  ;;  %v2930_v7 = vpop.f32.mrb[78].mxu1 }
 0x5b0   : > { %v3983_v53 = vpop.f32.mrb[79].mxu1  ;;  %v3024_v7 = vsel %vm4976_vm15, %v4657_v35, 0  ;;  %v3025_v35 = vsel %vm4976_vm15, %v4665_v56, 0 }
 0x621   : > { %v2935_v39 = vpop.xlane.xlu0 %2934 }
 0x622   : > { %v2957_v18 = vsub.f32 %v2647_v28, %v2935_v39 }
 0x624   : > { %v2965_v12 = vmul.f32 1.442695, %v2957_v18  ;;  %v2938_v29 = vpop.xlane.xlu1 %2937 }
 0x625   : > { %v2958_v23 = vsub.f32 %v2687_v30, %v2938_v29 }
 0x626   : > { %4236 = vpow2.f32 %v2965_v12  ;;  %v3179_v12 = vsel %vm1051_vm8, %v3024_v7, 0 }
 0x627   : > { %v2967_v9 = vmul.f32 1.442695, %v2958_v23 }
 0x629   : > { %4238 = vpow2.f32 %v2967_v9  ;;  %v2941_v50 = vpop.xlane.xlu0 %2940 }
 0x62a   : > { %v2959_v10 = vsub.f32 %v2727_v49, %v2941_v50 }
 0x62c   : > { %v2969_v15 = vmul.f32 1.442695, %v2959_v10  ;;  %v2944_v16 = vpop.xlane.xlu1 %2943  ;;  %v3225_v10 = vsel %vm1051_vm8, %v3025_v35, 0 }
 0x62d   : > { %v2960_v21 = vsub.f32 %v2767_v55, %v2944_v16 }
 0x62e   : > { %4240 = vpow2.f32 %v2969_v15  ;;  %v3026_v15 = vsel %vm4976_vm15, %v4677_v41, 0  ;;  %v3027_v41 = vsel %vm4976_vm15, %v4691_v37, 0 }
 0x62f   : > { %v2971_v22 = vmul.f32 1.442695, %v2960_v21 }
 0x630   : > { %v4237_v27 = vpop.eup %4236 }
 0x631   : > { %4242 = vpow2.f32 %v2971_v22  ;;  %v2947_v63 = vpop.xlane.xlu0 %2946  ;;  %v2981_v0 = vsel %vm488_vm7, %v4237_v27, 0.0  ;;  %v3271_v22 = vsel %vm1051_vm8, %v3026_v15, 0 }
 0x632   : > { %v2961_v4 = vsub.f32 %v2807_v52, %v2947_v63  ;;  %2982 = vadd.xlane.f32.xlu0 %v2981_v0 }
 0x633   : > { %v4239_v28 = vpop.eup %4238 }
 0x634   : > { %v2973_v24 = vmul.f32 1.442695, %v2961_v4  ;;  %v2950_v30 = vpop.xlane.xlu1 %2949  ;;  %v2984_v62 = vsel %vm488_vm7, %v4239_v28, 0.0 }
 0x635   : > { %v2962_v47 = vsub.f32 %v2847_v14, %v2950_v30  ;;  %2985 = vadd.xlane.f32.xlu1 %v2984_v62  ;;  %v3021_v14 = vsel %vm4976_vm15, %v4599_v38, 0  ;;  %v3028_v30 = vsel %vm4976_vm15, %v4698_v45, 0 }
 0x636   : > { %4244 = vpow2.f32 %v2973_v24  ;;  %v3041_v46 = vsel %vm1051_vm8, %v3021_v14, 0  ;;  %v3317_v24 = vsel %vm1051_vm8, %v3027_v41, 0 }
 0x637   : > { %v2975_v5 = vmul.f32 1.442695, %v2962_v47  ;;  %3985 = vmatpush3.bf16.msra.mxu0 %v3041_v46  ;;  %v3363_v47 = vsel %vm1051_vm8, %v3028_v30, 0 }
 0x638   : > { %v5056_v59 = vpop.eup %4240  ;;  %3996 = vmatprep.subr.bf16.mxu0 %v4284_v1 }
 0x639   : > { %4246 = vpow2.f32 %v2975_v5  ;;  %v2953_v19 = vpop.xlane.xlu0 %2952  ;;  %v2987_v49 = vsel %vm488_vm7, %v5056_v59, 0.0 }
 0x63a   : > { %v2963_v60 = vsub.f32 %v2887_v44, %v2953_v19  ;;  %2988 = vadd.xlane.f32.xlu0 %v2987_v49 }
 0x63b   : > { %v5060_v33 = vpop.eup %4242 }
 0x63c   : > { %v2977_v40 = vmul.f32 1.442695, %v2963_v60  ;;  %v2956_v55 = vpop.xlane.xlu1 %2955  ;;  %v2990_v34 = vsel %vm488_vm7, %v5060_v33, 0.0 }
 0x63d   : > { %v2964_v54 = vsub.f32 %v2927_v6, %v2956_v55  ;;  %2991 = vadd.xlane.f32.xlu1 %v2990_v34  ;;  %v3023_v6 = vsel %vm4976_vm15, %v4651_v32, 0 }
 0x63e   : > { %4248 = vpow2.f32 %v2977_v40  ;;  %v3133_v3 = vsel %vm1051_vm8, %v3023_v6, 0 }
 0x63f   : > { %v2979_v31 = vmul.f32 1.442695, %v2964_v54 }
 0x640   : > { %v5064_v8 = vpop.eup %4244 }
 0x641   : > { %4250 = vpow2.f32 %v2979_v31  ;;  %v2993_v57 = vsel %vm488_vm7, %v5064_v8, 0.0 }
 0x642   : > { %2994 = vadd.xlane.f32.xlu0 %v2993_v57 }
 0x643   : > { %v5068_v52 = vpop.eup %4246 }
 0x644   : > { %v2996_v61 = vsel %vm488_vm7, %v5068_v52, 0.0 }
 0x645   : > { %2997 = vadd.xlane.f32.xlu1 %v2996_v61 }
 0x648   : > { %v5072_v43 = vpop.eup %4248 }
 0x649   : > { %v2999_v13 = vsel %vm488_vm7, %v5072_v43, 0.0 }
 0x64a   : > { %3000 = vadd.xlane.f32.xlu0 %v2999_v13 }
 0x64b   : > { %v5079_v20 = vpop.eup %4250 }
 0x64c   : > { %v3002_v51 = vsel %vm488_vm7, %v5079_v20, 0.0 }
 0x64d   : > { %3003 = vadd.xlane.f32.xlu1 %v3002_v51 }
 0x6bf   : > { %v2983_v38 = vpop.xlane.xlu0 %2982 }
 0x6c0   : > { %4252 = vrcp.f32 %v2983_v38 }
 0x6c2   : > { %v2986_v44 = vpop.xlane.xlu1 %2985 }
 0x6c3   : > { %4254 = vrcp.f32 %v2986_v44 }
 0x6c7   : > { %v2989_v17 = vpop.xlane.xlu0 %2988 }
 0x6c8   : > { %4256 = vrcp.f32 %v2989_v17 }
 0x6ca   : > { %v4253_v58 = vpop.eup %4252  ;;  %v2992_v25 = vpop.xlane.xlu1 %2991 }
 0x6cb   : > { %v3006_v11 = vmul.f32 %v4253_v58, %v4237_v27  ;;  %4258 = vrcp.f32 %v2992_v25 }
 0x6cd   : > { %v4255_v48 = vpop.eup %4254  ;;  %v3029_v26 = vpack.c.bf16 %v3006_v11, %v3006_v11 }
 0x6ce   : > { %v3008_v53 = vmul.f32 %v4255_v48, %v4239_v28 }
 0x6cf   : > { %3987 = vmatmul.mubr.msk.bf16.vlgmr.msra.gmra.mrb[32].mxu0 %vm1047_vm9, %v3029_v26  ;;  %v2995_v39 = vpop.xlane.xlu0 %2994 }
 0x6d0   : > { %4260 = vrcp.f32 %v2995_v39  ;;  %v3030_v18 = vpack.c.bf16 %v3008_v53, %v3008_v53  ;;  %3997 = vmatpush3.bf16.msra.mxu0 %v3133_v3  ;;  %3998 = vmatprep.mubr.msk.bf16.mxu0 %vm4285_vm0, %v4284_v1 }
 0x6d1   : > { %4008 = vmatprep.subr.bf16.mxu0 %v4284_v1 }
 0x6d2   : > { %v4257_v32 = vpop.eup %4256  ;;  %3993 = vmatmul.mubr.msk.bf16.vlgmr.msra.gmra.mrb[32].mxu1 %vm1047_vm9, %v3030_v18  ;;  %v2998_v29 = vpop.xlane.xlu1 %2997 }
 0x6d3   : > { %v3010_v23 = vmul.f32 %v4257_v32, %v5056_v59  ;;  %4262 = vrcp.f32 %v2998_v29  ;;  %4003 = vmatpush3.bf16.msra.mxu1 %v3179_v12  ;;  %4004 = vmatprep.mubr.msk.bf16.mxu1 %vm4285_vm0, %v4284_v1 }
 0x6d4   : > { %4014 = vmatprep.subr.bf16.mxu1 %v4284_v1 }
 0x6d5   : > { %v4259_v9 = vpop.eup %4258  ;;  %v3031_v50 = vpack.c.bf16 %v3010_v23, %v3010_v23 }
 0x6d6   : > { %v3012_v16 = vmul.f32 %v4259_v9, %v5060_v33 }
 0x6d7   : > { %3999 = vmatmul.mubr.msk.bf16.vlgmr.msra.gmra.mrb[36].mxu0 %vm1047_vm9, %v3031_v50  ;;  %v3001_v56 = vpop.xlane.xlu0 %3000 }
 0x6d8   : > { %4264 = vrcp.f32 %v3001_v56  ;;  %v3032_v21 = vpack.c.bf16 %v3012_v16, %v3012_v16  ;;  %4009 = vmatpush3.bf16.msra.mxu0 %v3225_v10  ;;  %4010 = vmatprep.mubr.msk.bf16.mxu0 %vm4285_vm0, %v4284_v1 }
 0x6d9   : > { %4020 = vmatprep.subr.bf16.mxu0 %v4284_v1 }
 0x6da   : > { %v4261_v27 = vpop.eup %4260  ;;  %4005 = vmatmul.mubr.msk.bf16.vlgmr.msra.gmra.mrb[36].mxu1 %vm1047_vm9, %v3032_v21  ;;  %v3004_v63 = vpop.xlane.xlu1 %3003 }
 0x6db   : > { %v3014_v0 = vmul.f32 %v4261_v27, %v5064_v8  ;;  %4266 = vrcp.f32 %v3004_v63  ;;  %4015 = vmatpush3.bf16.msra.mxu1 %v3271_v22  ;;  %4016 = vmatprep.mubr.msk.bf16.mxu1 %vm4285_vm0, %v4284_v1 }
 0x6dc   : > { %4026 = vmatprep.subr.bf16.mxu1 %v4284_v1 }
 0x6dd   : > { %v4263_v4 = vpop.eup %4262  ;;  %v3033_v28 = vpack.c.bf16 %v3014_v0, %v3014_v0 }
 0x6de   : > { %v3016_v62 = vmul.f32 %v4263_v4, %v5068_v52 }
 0x6df   : > { %4011 = vmatmul.mubr.msk.bf16.vlgmr.msra.gmra.mrb[40].mxu0 %vm1047_vm9, %v3033_v28 }
 0x6e0   : > { %v3034_v37 = vpack.c.bf16 %v3016_v62, %v3016_v62  ;;  %4021 = vmatpush3.bf16.msra.mxu0 %v3317_v24  ;;  %4022 = vmatprep.mubr.msk.bf16.mxu0 %vm4285_vm0, %v4284_v1 }
 0x6e2   : > { %v4265_v5 = vpop.eup %4264  ;;  %4017 = vmatmul.mubr.msk.bf16.vlgmr.msra.gmra.mrb[40].mxu1 %vm1047_vm9, %v3034_v37 }
 0x6e3   : > { %v3018_v59 = vmul.f32 %v4265_v5, %v5072_v43  ;;  %4027 = vmatpush3.bf16.msra.mxu1 %v3363_v47  ;;  %4028 = vmatprep.mubr.msk.bf16.mxu1 %vm4285_vm0, %v4284_v1 }
 0x6e5   : > { %v4267_v45 = vpop.eup %4266  ;;  %v3035_v42 = vpack.c.bf16 %v3018_v59, %v3018_v59 }
 0x6e6   : > { %v3020_v19 = vmul.f32 %v4267_v45, %v5079_v20 }
 0x6e7   : > { %4023 = vmatmul.mubr.msk.bf16.vlgmr.msra.gmra.mrb[44].mxu0 %vm1047_vm9, %v3035_v42 }
 0x6e8   : > { %v3036_v49 = vpack.c.bf16 %v3020_v19, %v3020_v19 }
 0x6ea   : > { %4029 = vmatmul.mubr.msk.bf16.vlgmr.msra.gmra.mrb[44].mxu1 %vm1047_vm9, %v3036_v49 }
 0x7a2   : > { %v3077_v60 = vpop.f32.mrb[32].mxu0 }
 0x7a3   : > { %v3413_v33 = vpack.c.bf16 %v3077_v60, %v3077_v60  ;;  %v3988_v1 = vpop.f32.mrb[33].mxu0 }
 0x7a4   : > { %v3080_v40 = vpop.f32.mrb[34].mxu0 }
 0x7a5   : > { %3421 = vst [vmem:[%s5148_s15] sm:$0x1] %v3413_v33  ;;  %v3989_v55 = vpop.f32.mrb[35].mxu0  ;;  %v3123_v34 = vpop.f32.mrb[32].mxu1 }
 0x7a6   : > { %v3414_v54 = vpack.c.bf16 %v3123_v34, %v3123_v34  ;;  %v3994_v31 = vpop.f32.mrb[33].mxu1 }
 0x7a7   : > { %v3126_v8 = vpop.f32.mrb[34].mxu1 }
 0x7a8   : > { %3422 = vst [vmem:[%s5148_s15 + $0x1] sm:$0x1] %v3414_v54  ;;  %v3995_v57 = vpop.f32.mrb[35].mxu1 }
 0x7aa   : > { %v3169_v52 = vpop.f32.mrb[36].mxu0 }
 0x7ab   : > { %v3415_v61 = vpack.c.bf16 %v3169_v52, %v3169_v52  ;;  %v4000_v43 = vpop.f32.mrb[37].mxu0 }
 0x7ac   : > { %v3172_v13 = vpop.f32.mrb[38].mxu0 }
 0x7ad   : > { %3423 = vst [vmem:[%s5148_s15 + $0x2] sm:$0x1] %v3415_v61  ;;  %v4001_v14 = vpop.f32.mrb[39].mxu0  ;;  %v3215_v20 = vpop.f32.mrb[36].mxu1 }
 0x7ae   : > { %v3416_v46 = vpack.c.bf16 %v3215_v20, %v3215_v20  ;;  %v4006_v51 = vpop.f32.mrb[37].mxu1 }
 0x7af   : > { %v3218_v36 = vpop.f32.mrb[38].mxu1 }
 0x7b0   : > { %3424 = vst [vmem:[%s5148_s15 + $0x3] sm:$0x1] %v3416_v46  ;;  %v4007_v2 = vpop.f32.mrb[39].mxu1 }
 0x7b2   : > { %v3261_v38 = vpop.f32.mrb[40].mxu0 }
 0x7b3   : > { %v3417_v44 = vpack.c.bf16 %v3261_v38, %v3261_v38  ;;  %v4012_v17 = vpop.f32.mrb[41].mxu0 }
 0x7b4   : > { %v3264_v58 = vpop.f32.mrb[42].mxu0 }
 0x7b5   : > { %3425 = vst [vmem:[%s5148_s15 + $0x4] sm:$0x1] %v3417_v44  ;;  %v4013_v25 = vpop.f32.mrb[43].mxu0  ;;  %v3307_v6 = vpop.f32.mrb[40].mxu1 }
 0x7b6   : > { %v3418_v11 = vpack.c.bf16 %v3307_v6, %v3307_v6  ;;  %v4018_v48 = vpop.f32.mrb[41].mxu1 }
 0x7b7   : > { %v3310_v26 = vpop.f32.mrb[42].mxu1 }
 0x7b8   : > { %3426 = vst [vmem:[%s5148_s15 + $0x5] sm:$0x1] %v3418_v11  ;;  %v4019_v3 = vpop.f32.mrb[43].mxu1 }
 0x7ba   : > { %v3353_v7 = vpop.f32.mrb[44].mxu0 }
 0x7bb   : > { %v3419_v53 = vpack.c.bf16 %v3353_v7, %v3353_v7  ;;  %v4024_v39 = vpop.f32.mrb[45].mxu0 }
 0x7bc   : > { %v3356_v18 = vpop.f32.mrb[46].mxu0 }
 0x7bd   : > { %3427 = vst [vmem:[%s5148_s15 + $0x6] sm:$0x1] %v3419_v53  ;;  %v4025_v12 = vpop.f32.mrb[47].mxu0  ;;  %v3399_v32 = vpop.f32.mrb[44].mxu1 }
 0x7be   : > { %v3420_v29 = vpack.c.bf16 %v3399_v32, %v3399_v32  ;;  %v4030_v35 = vpop.f32.mrb[45].mxu1 }
 0x7bf   : > { %v3402_v23 = vpop.f32.mrb[46].mxu1 }
 0x7c0   : > { %3428 = vst [vmem:[%s5148_s15 + $0x7] sm:$0x1] %v3420_v29  ;;  %v4031_v9 = vpop.f32.mrb[47].mxu1 }
 0x7c1 PF: > { %s11_s6 = sadd.s32 1, %s4282_s6  }
 0x7c2   : > { %p8_p4 = scmp.ge.s32.totalorder %s11_s6, 4  }
 0x7c4   :  { %10 = sbr.rel (!%p8_p4) target bundleno = 1 (0x1), region = 54 }

// kernel: strong_classifier_forward.24
= control target key start
LH: loop header
LB: loop body
LE: loop exit
PB: predicated region body
PF: predicated region fallthrough
CT: control target
= control target key end

     0   :  { %18 = vsyncpa [#allocation3], 0  ;;  %s2326_s0 = inlined_call_operand.vmem [shape: f32[32,128], index: 0, kind: input, shape index: {}]   ;;  %s2327_s1 = inlined_call_operand.hbm [shape: f32[1,128], index: 1, kind: input, shape index: {}]   ;;  %s2328_s2 = inlined_call_operand.hbm [shape: f32[1,128], index: 2, kind: input, shape index: {}]   ;;  %s2329_s3 = inlined_call_operand.vmem [shape: bf16[128,256], index: 3, kind: input, shape index: {}]   ;;  %s2330_s4 = inlined_call_operand.vmem [shape: f32[1,256], index: 4, kind: input, shape index: {}]   ;;  %s2331_s5 = inlined_call_operand.vmem [shape: bf16[256,128], index: 5, kind: input, shape index: {}]   ;;  %s2332_s6 = inlined_call_operand.hbm [shape: f32[1,128], index: 6, kind: input, shape index: {}]   ;;  %s2333_s7 = inlined_call_operand.hbm [shape: f32[1,128], index: 7, kind: input, shape index: {}]   ;;  %s2334_s8 = inlined_call_operand.hbm [shape: f32[1,128], index: 8, kind: input, shape index: {}]   ;;  %s2335_s9 = inlined_call_operand.vmem [shape: bf16[128,384], index: 9, kind: input, shape index: {}]   ;;  %s2336_s10 = inlined_call_operand.vmem [shape: f32[1,384], index: 10, kind: input, shape index: {}]   ;;  %s2337_s11 = inlined_call_operand.vmem [shape: f32[32,128], index: 11, kind: output, shape index: {0}]   ;;  %s2338_s12 = inlined_call_operand.vmem [shape: bf16[32,384], index: 12, kind: output, shape index: {1}]  }
   0x1   :  { %19 = vsyncpa [#allocation5], 0 }
   0x2   :  { %20 = vsyncpa [#allocation8], 0  ;;  %s1917_s21 = smov 0  }
   0x3 LB: > { %s1844_s22 = smov [#allocation4]   ;;  %s2339_s24 = sadd.s32 4294967295, %s1842_s21   ;;  %s1842_s21 = sphi %s1917_s21, %s26_s21  }
   0x4   : > { %s343_s23 = sshll.u32 %s1844_s22, 4  ;;  %p1380_p0 = scmp.ge.s32.totalorder %s1842_s21, 1  ;;  %s1931_s23 = int_to_ptr.vmem [resolvable:$true] %s343_s23 }
   0x5   : > { %p319_p1 = scmp.lt.s32.totalorder %s1842_s21, 3  ;;  %p1927_p2 = scmp.eq.s32.totalorder %s2339_s24, 0 }
   0x6   : > { %s1845_s27 = smov [#allocation7]   ;;  %s1846_s29 = smov [#allocation2]  }
   0x7   : > { %s2343_s25 = scalar_select %p1927_p2, 1, 0 }
   0x8   : > { %p1933_p3 = pnand %p1380_p0, %p319_p1  ;;  %s374_s28 = sshll.u32 %s1845_s27, 4  ;;  %s1939_s28 = int_to_ptr.vmem [resolvable:$true] %s374_s28 }
   0x9   : > { %s332_s30 = sshll.u32 %s1846_s29, 4  ;;  %s1847_s14 = smov [#allocation6]   ;;  %s1947_s30 = int_to_ptr.vmem [resolvable:$true] %s332_s30 }
   0xa   : > { %s2344_s26 = scalar_select %p1933_p3, 1, 0 }
   0xb   : > { %p1546_p4 = pneg %p1933_p3  ;;  %s363_s15 = sshll.u32 %s1847_s14, 4  ;;  %s1949_s15 = int_to_ptr.vmem [resolvable:$true] %s363_s15 }
   0xc   : > { %s1684_s18 = scalar_lea.hbm %s2328_s2, 16 }
   0xd   : > { %p1943_p5 = pnand %p1927_p2, %p1546_p4  ;;  %p1685_p6 = scmp.ne.s32.totalorder %s2328_s2, %s1684_s18 }
   0xe   : > { %p1691_p10 = scmp.lt.u32.totalorder %s1684_s18, %s2328_s2 }
   0xf   : > { %p1959_p7 = pneg %p1943_p5 }
  0x11   : > { %p1687_p8 = pnand %p1959_p7, %p1685_p6 }
  0x13   : > { %p1688_p9 = pneg %p1687_p8 }
  0x15   : > { %p1693_p11 = pnand %p1691_p10, %p1688_p9 }
  0x17   : > { %1696 = shalt.err (!%p1693_p11)
}
  0x18   : > { %s1697_s14 = scalar_lea.vmem %s1931_s23, 16  ;;  %s1704_s16 = scalar_lea.vmem %s1931_s23, 32 }
  0x19   : > { %p1698_p12 = scmp.ne.s32.totalorder %s1931_s23, %s1697_s14  ;;  %p1705_p1 = scmp.lt.s32.totalorder %s1931_s23, %s1931_s23 }
  0x1a   : > { %p1706_p4 = scmp.lt.s32.totalorder %s1704_s16, %s1697_s14 }
  0x1b   : > { %p1700_p13 = pnand %p1698_p12, %p1959_p7 }
  0x1c   : > { %p1707_p6 = por %p1706_p4, %p1705_p1 }
  0x1d   : > { %p1701_p0 = pneg %p1700_p13 }
  0x1f   : > { %p1708_p8 = pnand %p1707_p6, %p1701_p0 }
  0x21   : > { %1711 = shalt.err (!%p1708_p8)
}
  0x22   : > { %1552 = dma.hbm_to_vmem [thread:$0]  (!%p1943_p5), %s2328_s2, 16, %s1931_s23, [#allocation5]  }
  0x23   : > { %s1712_s27 = scalar_lea.hbm %s2333_s7, 16 }
  0x24   : > { %p1713_p9 = scmp.ne.s32.totalorder %s2333_s7, %s1712_s27  ;;  %p1719_p12 = scmp.lt.u32.totalorder %s1712_s27, %s2333_s7 }
  0x26   : > { %p1715_p10 = pnand %p1713_p9, %p1959_p7 }
  0x28   : > { %p1716_p11 = pneg %p1715_p10 }
  0x2a   : > { %p1721_p13 = pnand %p1719_p12, %p1716_p11 }
  0x2c   : > { %1724 = shalt.err (!%p1721_p13)
}
  0x2d   : > { %s1725_s23 = scalar_lea.vmem %s1939_s28, 16  ;;  %s1732_s24 = scalar_lea.vmem %s1939_s28, 32 }
  0x2e   : > { %p1726_p0 = scmp.ne.s32.totalorder %s1939_s28, %s1725_s23  ;;  %p1733_p6 = scmp.lt.s32.totalorder %s1939_s28, %s1939_s28 }
  0x2f   : > { %p1734_p8 = scmp.lt.s32.totalorder %s1732_s24, %s1725_s23 }
  0x30   : > { %p1728_p1 = pnand %p1726_p0, %p1959_p7 }
  0x31   : > { %p1735_p9 = por %p1734_p8, %p1733_p6 }
  0x32   : > { %p1729_p4 = pneg %p1728_p1 }
  0x34   : > { %p1736_p10 = pnand %p1735_p9, %p1729_p4 }
  0x36   : > { %1739 = shalt.err (!%p1736_p10)
}
  0x37   : > { %1558 = dma.hbm_to_vmem [thread:$0]  (!%p1943_p5), %s2333_s7, 16, %s1939_s28, [#allocation8]  }
  0x38   : > { %s1740_s27 = scalar_lea.hbm %s2327_s1, 16 }
  0x39   : > { %p1741_p11 = scmp.ne.s32.totalorder %s2327_s1, %s1740_s27  ;;  %p1747_p0 = scmp.lt.u32.totalorder %s1740_s27, %s2327_s1 }
  0x3b   : > { %p1743_p12 = pnand %p1741_p11, %p1959_p7 }
  0x3d   : > { %p1744_p13 = pneg %p1743_p12 }
  0x3f   : > { %p1749_p1 = pnand %p1747_p0, %p1744_p13 }
  0x41   : > { %1752 = shalt.err (!%p1749_p1)
}
  0x42   : > { %s1753_s28 = scalar_lea.vmem %s1947_s30, 16  ;;  %s1760_s24 = scalar_lea.vmem %s1947_s30, 32 }
  0x43   : > { %p1754_p4 = scmp.ne.s32.totalorder %s1947_s30, %s1753_s28  ;;  %p1761_p9 = scmp.lt.s32.totalorder %s1947_s30, %s1947_s30 }
  0x44   : > { %p1762_p10 = scmp.lt.s32.totalorder %s1760_s24, %s1753_s28 }
  0x45   : > { %p1756_p6 = pnand %p1754_p4, %p1959_p7 }
  0x46   : > { %p1763_p11 = por %p1762_p10, %p1761_p9 }
  0x47   : > { %p1757_p8 = pneg %p1756_p6 }
  0x49   : > { %p1764_p12 = pnand %p1763_p11, %p1757_p8 }
  0x4b   : > { %1767 = shalt.err (!%p1764_p12)
}
  0x4c   : > { %1549 = dma.hbm_to_vmem [thread:$0]  (!%p1943_p5), %s2327_s1, 16, %s1947_s30, [#allocation3]  }
  0x4d   : > { %s1768_s27 = scalar_lea.hbm %s2332_s6, 16 }
  0x4e   : > { %p1769_p13 = scmp.ne.s32.totalorder %s2332_s6, %s1768_s27  ;;  %p1775_p4 = scmp.lt.u32.totalorder %s1768_s27, %s2332_s6 }
  0x50   : > { %p1771_p0 = pnand %p1769_p13, %p1959_p7 }
  0x52   : > { %p1772_p1 = pneg %p1771_p0 }
  0x54   : > { %p1777_p6 = pnand %p1775_p4, %p1772_p1 }
  0x56   : > { %1780 = shalt.err (!%p1777_p6)
}
  0x57   : > { %s1781_s30 = scalar_lea.vmem %s1949_s15, 16  ;;  %s1788_s28 = scalar_lea.vmem %s1949_s15, 32 }
  0x58   : > { %p1782_p8 = scmp.ne.s32.totalorder %s1949_s15, %s1781_s30  ;;  %p1789_p11 = scmp.lt.s32.totalorder %s1949_s15, %s1949_s15 }
  0x59   : > { %p1790_p12 = scmp.lt.s32.totalorder %s1788_s28, %s1781_s30 }
  0x5a   : > { %p1784_p9 = pnand %p1782_p8, %p1959_p7 }
  0x5b   : > { %p1791_p13 = por %p1790_p12, %p1789_p11 }
  0x5c   : > { %p1785_p10 = pneg %p1784_p9 }
  0x5e   : > { %p1792_p0 = pnand %p1791_p13, %p1785_p10 }
  0x60   : > { %1795 = shalt.err (!%p1792_p0)
}
  0x61   : > { %1555 = dma.hbm_to_vmem [thread:$0]  (!%p1943_p5), %s2332_s6, 16, %s1949_s15, [#allocation5]  }
  0x62   : > { %s1848_s18 = smov [#allocation9]   ;;  %s1796_s29 = scalar_lea.hbm %s2334_s8, 16 }
  0x63   : > { %s385_s19 = sshll.u32 %s1848_s18, 4  ;;  %p1797_p1 = scmp.ne.s32.totalorder %s2334_s8, %s1796_s29  ;;  %s386_s19 = int_to_ptr.vmem [resolvable:$true] %s385_s19 }
  0x64   : > { %p1803_p8 = scmp.lt.u32.totalorder %s1796_s29, %s2334_s8 }
  0x65   : > { %p1799_p4 = pnand %p1797_p1, %p1959_p7 }
  0x67   : > { %p1800_p6 = pneg %p1799_p4 }
  0x69   : > { %p1805_p9 = pnand %p1803_p8, %p1800_p6 }
  0x6b   : > { %1808 = shalt.err (!%p1805_p9)
}
  0x6c   : > { %s1809_s15 = scalar_lea.vmem %s386_s19, 16  ;;  %s1816_s28 = scalar_lea.vmem %s386_s19, 32 }
  0x6d   : > { %p1810_p10 = scmp.ne.s32.totalorder %s386_s19, %s1809_s15  ;;  %p1817_p13 = scmp.lt.s32.totalorder %s386_s19, %s386_s19 }
  0x6e   : > { %p1818_p0 = scmp.lt.s32.totalorder %s1816_s28, %s1809_s15 }
  0x6f   : > { %p1812_p11 = pnand %p1810_p10, %p1959_p7 }
  0x70   : > { %p1819_p2 = por %p1818_p0, %p1817_p13 }
  0x71   : > { %p1813_p12 = pneg %p1812_p11 }
  0x73   : > { %p1820_p3 = pnand %p1819_p2, %p1813_p12 }
  0x75   : > { %1823 = shalt.err (!%p1820_p3)
}
  0x76   : > { %1561 = dma.hbm_to_vmem [thread:$0]  (!%p1943_p5), %s2334_s8, 16, %s386_s19, [#allocation8]  }
  0x77   : > { %p2347_p1 = scmp.ne.s32.totalorder %s2344_s26, 0 }
  0x78   : > { %p2348_p4 = scmp.ne.s32.totalorder (!%p2347_p1), %s2343_s25, 0 }
  0x79   : > { %413 = sbr.rel (%p2347_p1) target bundleno = 1464 (0x5b8), region = 64 }
  0x80   : > { %1829 = dma.done.wait (%p2348_p4), [#allocation3], 16  }
  0x81   : > { %1831 = vsyncadd (%p2348_p4), [#allocation3], 4294967280 }
  0x82   : > { %1833 = dma.done.wait (%p2348_p4), [#allocation5], 32  }
  0x83   : > { %1835 = vsyncadd (%p2348_p4), [#allocation5], 4294967264 }
  0x84   : > { %1837 = dma.done.wait (%p2348_p4), [#allocation8], 32  }
  0x85   : > { %1839 = vsyncadd (%p2348_p4), [#allocation8], 4294967264  ;;  %s2349_s26 = sadd.s32 4294967295, %s1842_s21   ;;  %v1588_v2 = vld [vmem:[%s2329_s3 + $0x4] ss:$8 sps:$4 sm:$0xff]   ;;  %v507_v5 = vlaneseq  ;;  %v1849_v25 = vmov 0  }
  0x86   : > { %s1393_s13 = sshll.u32 %s2349_s26, 1  ;;  %v1590_v3 = vld [vmem:[%s2329_s3] ss:$8 sps:$4 sm:$0xff]   ;;  %v1591_v4 = vld [vmem:[%s2329_s3 + $0x14] ss:$8 sps:$4 sm:$0xff]   ;;  %653 = vmatprep.subr.bf16.mxu0 %v1588_v2  ;;  %685 = vmatprep.mubr.bf16.mxu0 %v1849_v25  ;;  %vm1851_vm1 = vmmov 0  }
  0x87   : > { %p478_p2 = scmp.lt.s32.totalorder %s1393_s13, 3  ;;  %654 = vmatpush1.bf16.msra.mxu0 %v1590_v3  ;;  %v2111_v6 = vand.u32 127, %v507_v5  ;;  %v1593_v17 = vld [vmem:[%s2329_s3 + $0x10] ss:$8 sps:$4 sm:$0xff]   ;;  %v1594_v18 = vld [vmem:[%s2329_s3 + $0x24] ss:$8 sps:$4 sm:$0xff]  }
  0x88   : > { %655 = vmatprep.subr.bf16.mxu0 %v1591_v4  ;;  %v1596_v19 = vld [vmem:[%s2329_s3 + $0x20] ss:$8 sps:$4 sm:$0xff]   ;;  %v1597_v20 = vld [vmem:[%s2329_s3 + $0x34] ss:$8 sps:$4 sm:$0xff]   ;;  %v1599_v21 = vld [vmem:[%s2329_s3 + $0x30] ss:$8 sps:$4 sm:$0xff]  }
  0x89   : > { %s2351_s13 = smov (!%p478_p2, %s1393_s13), 3  ;;  %vm509_vm0 = vcmp.lt.s32.totalorder %v2111_v6, 80  ;;  %v1600_v22 = vld [vmem:[%s2329_s3 + $0x44] ss:$8 sps:$4 sm:$0xff]   ;;  %v1602_v23 = vld [vmem:[%s2329_s3 + $0x40] ss:$8 sps:$4 sm:$0xff]  }
  0x8a   : > { %s1394_s22 = sshll.u32 %s2351_s13, 3  ;;  %v1603_v24 = vld [vmem:[%s2329_s3 + $0x54] ss:$8 sps:$4 sm:$0xff]   ;;  %v1605_v26 = vld [vmem:[%s2329_s3 + $0x50] ss:$8 sps:$4 sm:$0xff]   ;;  %v1612_v48 = vld [vmem:[%s2331_s5 + $0x40] sm:$0xff]  }
  0x8b   : > { %s481_s20 = scalar_lea.vmem %s2326_s0, %s1394_s22  ;;  %656 = vmatpush1.bf16.msra.mxu0 %v1593_v17  ;;  %v1606_v27 = vld [vmem:[%s2329_s3 + $0x64] ss:$8 sps:$4 sm:$0xff]   ;;  %v1608_v28 = vld [vmem:[%s2329_s3 + $0x60] ss:$8 sps:$4 sm:$0xff]   ;;  %v1609_v29 = vld [vmem:[%s2329_s3 + $0x74] ss:$8 sps:$4 sm:$0xff]   ;;  %1474 = vmatprep.subr.bf16.mxu1 %v1612_v48  ;;  %s487_s28 = scalar_lea.vmem %s2337_s11, %s1394_s22 }
  0x8c   : > { %v2095_v0 = vld [vmem:[%s481_s20] sm:$0xff]  ;;  %v2097_v1 = vld [vmem:[%s481_s20 + $0x8] sm:$0xff]  ;;  %657 = vmatprep.subr.bf16.mxu0 %v1594_v18  ;;  %v1611_v30 = vld [vmem:[%s2329_s3 + $0x70] ss:$8 sps:$4 sm:$0xff]   ;;  %v2208_v2 = vshrl.u32 %v507_v5, 7  ;;  %s1525_s26 = smul.u32 12, %s2351_s13 }
  0x8d   : > { %501 = vadd.xlane.f32.xlu0 %v2095_v0  ;;  %v1399_v39 = vld [vmem:[#allocation2] ss:$0 sm:$0xff]  ;;  %v1400_v43 = vld [vmem:[#allocation4] ss:$0 sm:$0xff]  ;;  %v1614_v50 = vld [vmem:[%s2331_s5 + $0x48] sm:$0xff]  }
  0x8e   : > { %v1613_v49 = vld [vmem:[%s2331_s5] sm:$0xff]   ;;  %v1615_v51 = vld [vmem:[%s2331_s5 + $0x8] sm:$0xff]   ;;  %v1616_v52 = vld [vmem:[%s2331_s5 + $0x50] sm:$0xff]   ;;  %v565_v3 = vsub.s32 0, %v2208_v2  ;;  %s494_s19 = scalar_lea.vmem %s2338_s12, %s1525_s26 }
  0x8f   : > { %658 = vmatpush1.bf16.msra.mxu0 %v1596_v19  ;;  %1475 = vmatpush3.bf16.msra.mxu1 %v1613_v49  ;;  %v1617_v53 = vld [vmem:[%s2331_s5 + $0x10] sm:$0xff]   ;;  %v1618_v54 = vld [vmem:[%s2331_s5 + $0x58] sm:$0xff]   ;;  %v1620_v56 = vld [vmem:[%s2331_s5 + $0x60] sm:$0xff]  }
  0x90   : > { %659 = vmatprep.subr.bf16.mxu0 %v1597_v20  ;;  %1476 = vmatprep.subr.bf16.mxu1 %v1614_v50  ;;  %v1619_v55 = vld [vmem:[%s2331_s5 + $0x18] sm:$0xff]   ;;  %v1621_v57 = vld [vmem:[%s2331_s5 + $0x20] sm:$0xff]   ;;  %v1622_v58 = vld [vmem:[%s2331_s5 + $0x68] sm:$0xff]  }
  0x91   : > { %503 = vadd.xlane.f32.xlu0 %v2097_v1  ;;  %v1623_v59 = vld [vmem:[%s2331_s5 + $0x28] sm:$0xff]   ;;  %v1624_v60 = vld [vmem:[%s2331_s5 + $0x70] sm:$0xff]   ;;  %v1626_v62 = vld [vmem:[%s2331_s5 + $0x78] sm:$0xff]  }
  0x92   : > { %v1625_v61 = vld [vmem:[%s2331_s5 + $0x30] sm:$0xff]   ;;  %v1627_v63 = vld [vmem:[%s2331_s5 + $0x38] sm:$0xff]   ;;  %v561_v4 = vld [vmem:[%s2330_s4] sm:$0x3] }
  0x93   : > { %660 = vmatpush1.bf16.msra.mxu0 %v1599_v21  ;;  %1477 = vmatpush3.bf16.msra.mxu1 %v1615_v51  ;;  %v1642_v6 = vld [vmem:[%s2335_s9 + $0x4c] ss:$12 sps:$4 sm:$0xff]  }
  0x94   : > { %661 = vmatprep.subr.bf16.mxu0 %v1600_v22  ;;  %1478 = vmatprep.subr.bf16.mxu1 %v1616_v52  ;;  %v1628_v52 = vld [vmem:[%s2335_s9] ss:$12 sps:$4 sm:$0xff]  }
  0x97   : > { %662 = vmatpush1.bf16.msra.mxu0 %v1602_v23  ;;  %1479 = vmatpush3.bf16.msra.mxu1 %v1617_v53  ;;  %v1630_v53 = vld [vmem:[%s2335_s9 + $0x4] ss:$12 sps:$4 sm:$0xff]  }
  0x98   : > { %663 = vmatprep.subr.bf16.mxu0 %v1603_v24  ;;  %1480 = vmatprep.subr.bf16.mxu1 %v1618_v54  ;;  %v1850_v54 = vmov 0.0  }
  0x9b   : > { %664 = vmatpush1.bf16.msra.mxu0 %v1605_v26  ;;  %1481 = vmatpush3.bf16.msra.mxu1 %v1619_v55  ;;  %v1632_v55 = vld [vmem:[%s2335_s9 + $0x18] ss:$12 sps:$4 sm:$0xff]  }
  0x9c   : > { %665 = vmatprep.subr.bf16.mxu0 %v1606_v27  ;;  %1482 = vmatprep.subr.bf16.mxu1 %v1620_v56  ;;  %v1635_v56 = vld [vmem:[%s2335_s9 + $0x20] ss:$12 sps:$4 sm:$0xff]  }
  0x9f   : > { %666 = vmatpush1.bf16.msra.mxu0 %v1608_v28  ;;  %1483 = vmatpush3.bf16.msra.mxu1 %v1621_v57 }
  0xa0   : > { %667 = vmatprep.subr.bf16.mxu0 %v1609_v29  ;;  %1484 = vmatprep.subr.bf16.mxu1 %v1622_v58 }
  0xa3   : > { %668 = vmatpush1.bf16.msra.mxu0 %v1611_v30  ;;  %1485 = vmatpush3.bf16.msra.mxu1 %v1623_v59 }
  0xa4   : > { %1486 = vmatprep.subr.bf16.mxu1 %v1624_v60  ;;  %1128 = vmatprep.subr.bf16.mxu0 %v1630_v53 }
  0xa7   : > { %1487 = vmatpush3.bf16.msra.mxu1 %v1625_v61 }
  0xa8   : > { %1488 = vmatprep.subr.bf16.mxu1 %v1626_v62 }
  0xab   : > { %1489 = vmatpush3.bf16.msra.mxu1 %v1627_v63 }
  0xac   : > { %1505 = vmatprep.subr.bf16.mxu1 %v1850_v54 }
 0x11a   : > { %v502_v7 = vpop.xlane.xlu0 %501 }
 0x11b   : > { %v505_v8 = vmul.f32 0.0125, %v502_v7  ;;  %v569_v7 = vsub.s32 1, %v2208_v2 }
 0x11d   : > { %v510_v9 = vsub.f32 %v2095_v0, %v505_v8  ;;  %v566_v8 = vrot.slane %v561_v4, %v565_v3 }
 0x11e   : > { %v504_v10 = vpop.xlane.xlu0 %503 }
 0x11f   : > { %v506_v11 = vmul.f32 0.0125, %v504_v10  ;;  %v512_v12 = vsel %vm509_vm0, %v510_v9, 0.0  ;;  %v570_v9 = vrot.slane %v561_v4, %v569_v7 }
 0x120   : > { %v514_v13 = vmul.f32 %v512_v12, %v512_v12 }
 0x121   : > { %v511_v14 = vsub.f32 %v2097_v1, %v506_v11 }
 0x122   : > { %516 = vadd.xlane.f32.xlu1 %v514_v13 }
 0x123   : > { %v513_v15 = vsel %vm509_vm0, %v511_v14, 0.0 }
 0x124   : > { %v515_v16 = vmul.f32 %v513_v15, %v513_v15 }
 0x126   : > { %518 = vadd.xlane.f32.xlu1 %v515_v16 }
 0x1af   : > { %v517_v31 = vpop.xlane.xlu1 %516 }
 0x1b0   : > { %v520_v32 = vmul.f32 0.0125, %v517_v31 }
 0x1b2   : > { %v522_v33 = vadd.f32 1e-05, %v520_v32 }
 0x1b3   : > { %v519_v34 = vpop.xlane.xlu1 %518 }
 0x1b4   : > { %1660 = vrsqrt.f32 %v522_v33  ;;  %v521_v35 = vmul.f32 0.0125, %v519_v34 }
 0x1b6   : > { %v523_v36 = vadd.f32 1e-05, %v521_v35 }
 0x1b8   : > { %1662 = vrsqrt.f32 %v523_v36 }
 0x1be   : > { %v1661_v37 = vpop.eup %1660 }
 0x1bf   : > { %v526_v38 = vmul.f32 %v1661_v37, %v512_v12 }
 0x1c1   : > { %v534_v42 = vmul.f32 %v1399_v39, %v526_v38 }
 0x1c2   : > { %v1663_v40 = vpop.eup %1662 }
 0x1c3   : > { %v527_v41 = vmul.f32 %v1663_v40, %v513_v15  ;;  %v542_v45 = vadd.f32 %v1400_v43, %v534_v42  ;;  %v1421_v40 = vld [vmem:[#allocation6] ss:$0 sm:$0xff] }
 0x1c5   : > { %v535_v44 = vmul.f32 %v1399_v39, %v527_v41 }
 0x1c7   : > { %v543_v46 = vadd.f32 %v1400_v43, %v535_v44 }
 0x1c9   : > { %v544_v47 = vpack.c.bf16 %v543_v46, %v542_v45 }
 0x1cb   : > { %686 = vmatmul.mubr.bf16.vlgmr.msra.gmra.mrb[0].mxu0 %v544_v47 }
 0x1cc   : > { %1160 = vmatprep.mubr.bf16.mxu0 %v1849_v25  ;;  %1129 = vmatpush1.bf16.msra.mxu0 %v1628_v52 }
 0x29e   : > { %v687_v10 = vpop.f32.mrb[0].mxu0 }
 0x29f   : > { %v688_v11 = vadd.f32 %v687_v10, %v566_v8  ;;  %v689_v12 = vpop.f32.mrb[1].mxu0  ;;  %v1638_v10 = vld [vmem:[%s2335_s9 + $0x34] ss:$12 sps:$4 sm:$0xff]  }
 0x2a0   : > { %v690_v13 = vadd.f32 %v689_v12, %v570_v9  ;;  %v691_v5 = vpop.f32.mrb[2].mxu0  ;;  %v1639_v12 = vld [vmem:[%s2335_s9 + $0x38] ss:$12 sps:$4 sm:$0xff]  }
 0x2a1   : > { %v1417_v14 = vmul.f32 -1.442695, %v688_v11  ;;  %v692_v15 = vadd.f32 %v691_v5, %v566_v8  ;;  %v693_v16 = vpop.f32.mrb[3].mxu0  ;;  %v1643_v5 = vld [vmem:[%s2335_s9 + $0x50] ss:$12 sps:$4 sm:$0xff]  }
 0x2a2   : > { %v1418_v17 = vmul.f32 -1.442695, %v690_v13  ;;  %v694_v18 = vadd.f32 %v693_v16, %v570_v9  ;;  %v1647_v16 = vld [vmem:[%s2335_s9 + $0x68] ss:$12 sps:$4 sm:$0xff]  }
 0x2a3   : > { %1664 = vpow2.f32 %v1417_v14  ;;  %v1419_v19 = vmul.f32 -1.442695, %v692_v15  ;;  %v1646_v14 = vld [vmem:[%s2335_s9 + $0x64] ss:$12 sps:$4 sm:$0xff]  }
 0x2a4   : > { %1666 = vpow2.f32 %v1418_v17  ;;  %v1420_v20 = vmul.f32 -1.442695, %v694_v18  ;;  %v1650_v17 = vld [vmem:[%s2335_s9 + $0x7c] ss:$12 sps:$4 sm:$0xff]  }
 0x2a5   : > { %1668 = vpow2.f32 %v1419_v19  ;;  %v1651_v19 = vld [vmem:[%s2335_s9 + $0x80] ss:$12 sps:$4 sm:$0xff]  }
 0x2a6   : > { %1670 = vpow2.f32 %v1420_v20  ;;  %v1654_v20 = vld [vmem:[%s2335_s9 + $0x94] ss:$12 sps:$4 sm:$0xff]  }
 0x2ad   : > { %v1665_v21 = vpop.eup %1664 }
 0x2ae   : > { %v1667_v22 = vpop.eup %1666  ;;  %v708_v23 = vadd.f32 1.0, %v1665_v21  ;;  %v1652_v21 = vld [vmem:[%s2335_s9 + $0x90] ss:$12 sps:$4 sm:$0xff]  }
 0x2af   : > { %v1669_v24 = vpop.eup %1668  ;;  %v709_v25 = vadd.f32 1.0, %v1667_v22  ;;  %v1655_v22 = vld [vmem:[%s2335_s9 + $0x98] ss:$12 sps:$4 sm:$0xff]  }
 0x2b0   : > { %v1671_v26 = vpop.eup %1670  ;;  %1672 = vrcp.f32 %v708_v23  ;;  %v710_v27 = vadd.f32 1.0, %v1669_v24  ;;  %v1658_v23 = vld [vmem:[%s2335_s9 + $0xac] ss:$12 sps:$4 sm:$0xff]   ;;  %v1656_v24 = vld [vmem:[%s2335_s9 + $0xa8] ss:$12 sps:$4 sm:$0xff]  }
 0x2b1   : > { %1674 = vrcp.f32 %v709_v25  ;;  %v711_v28 = vadd.f32 1.0, %v1671_v26  ;;  %v1659_v25 = vld [vmem:[%s2335_s9 + $0xb0] ss:$12 sps:$4 sm:$0xff]  }
 0x2b2   : > { %1676 = vrcp.f32 %v710_v27 }
 0x2b3   : > { %1678 = vrcp.f32 %v711_v28 }
 0x2ba   : > { %v1673_v29 = vpop.eup %1672 }
 0x2bb   : > { %v1675_v30 = vpop.eup %1674  ;;  %v720_v33 = vmul.f32 %v1673_v29, %v688_v11  ;;  %v1636_v11 = vld [vmem:[%s2335_s9 + $0x30] ss:$12 sps:$4 sm:$0xff]  }
 0x2bc   : > { %v1677_v31 = vpop.eup %1676  ;;  %v721_v35 = vmul.f32 %v1675_v30, %v690_v13  ;;  %v1640_v13 = vld [vmem:[%s2335_s9 + $0x48] ss:$12 sps:$4 sm:$0xff]  }
 0x2bd   : > { %v1679_v32 = vpop.eup %1678  ;;  %v722_v34 = vmul.f32 %v1677_v31, %v692_v15  ;;  %v1644_v15 = vld [vmem:[%s2335_s9 + $0x60] ss:$12 sps:$4 sm:$0xff]  }
 0x2be   : > { %v723_v36 = vmul.f32 %v1679_v32, %v694_v18  ;;  %v1648_v18 = vld [vmem:[%s2335_s9 + $0x78] ss:$12 sps:$4 sm:$0xff]  }
 0x2bf   : > { %v724_v37 = vpack.c.bf16 %v722_v34, %v720_v33  ;;  %v1438_v33 = vld [vmem:[#allocation7] ss:$0 sm:$0xff] }
 0x2c0   : > { %v725_v38 = vpack.c.bf16 %v723_v36, %v721_v35 }
 0x2c2   : > { %893 = vmatprep.mubr.bf16.mxu1 %v725_v38  ;;  %v1439_v38 = vld [vmem:[#allocation9] ss:$0 sm:$0xff] }
 0x2c3   : > { %894 = vmatmul.mubr.bf16.vlgmr.msra.gmra.mrb[0].mxu1 %v724_v37 }
 0x2c4   : > { %1521 = vmatprep.mubr.msk.bf16.mxu1 %vm1851_vm1, %v1850_v54 }
 0x396   : > { %v1490_v39 = vpop.f32.mrb[0].mxu1 }
 0x397   : > { %v1491_v41 = vpop.f32.mrb[1].mxu1 }
 0x398   : > { %v1492_v42 = vadd.f32 %v1491_v41, %v1490_v39  ;;  %v1493_v43 = vpop.f32.mrb[2].mxu1 }
 0x399   : > { %v1494_v44 = vpop.f32.mrb[3].mxu1 }
 0x39a   : > { %v896_v45 = vadd.f32 %v1492_v42, %v1421_v40  ;;  %v1495_v46 = vadd.f32 %v1494_v44, %v1493_v43  ;;  %v995_v43 = vsub.s32 2, %v2208_v2  ;;  %v983_v44 = vld [vmem:[%s2336_s10] sm:$0x7] }
 0x39c   : > { %v902_v47 = vmul.f32 0.5, %v896_v45  ;;  %v899_v48 = vadd.f32 %v1495_v46, %v1421_v40  ;;  %v988_v45 = vrot.slane %v983_v44, %v565_v3  ;;  %v996_v46 = vrot.slane %v983_v44, %v995_v43 }
 0x39e   : > { %v903_v49 = vmul.f32 0.5, %v899_v48  ;;  %v904_v50 = vadd.f32 %v902_v47, %v2095_v0  ;;  %v1631_v0 = vld [vmem:[%s2335_s9 + $0x8] ss:$12 sps:$4 sm:$0xff]   ;;  %v992_v47 = vrot.slane %v983_v44, %v569_v7 }
 0x39f   : > { %1506 = vmatpush3.bf16.msra.mxu1 %v1631_v0 }
 0x3a0   : > { %910 = vadd.xlane.f32.xlu0 %v904_v50  ;;  %906 = vst [vmem:[%s487_s28] sm:$0xff] %v904_v50  ;;  %v905_v51 = vadd.f32 %v903_v49, %v2097_v1  ;;  %v1634_v1 = vld [vmem:[%s2335_s9 + $0x1c] ss:$12 sps:$4 sm:$0xff]   ;;  %1507 = vmatprep.subr.bf16.mxu1 %v1850_v54 }
 0x3a1   : > { %1130 = vmatprep.subr.bf16.mxu0 %v1634_v1 }
 0x3a2   : > { %912 = vadd.xlane.f32.xlu1 %v905_v51  ;;  %907 = vst [vmem:[%s487_s28 + $0x8] sm:$0xff] %v905_v51  ;;  %1131 = vmatpush1.bf16.msra.mxu0 %v1632_v55 }
 0x3a3   : > { %1508 = vmatpush3.bf16.msra.mxu1 %v1635_v56  ;;  %1132 = vmatprep.subr.bf16.mxu0 %v1638_v10 }
 0x3a4   : > { %1509 = vmatprep.subr.bf16.mxu1 %v1850_v54 }
 0x3a6   : > { %1133 = vmatpush1.bf16.msra.mxu0 %v1636_v11 }
 0x3a7   : > { %1510 = vmatpush3.bf16.msra.mxu1 %v1639_v12  ;;  %1134 = vmatprep.subr.bf16.mxu0 %v1642_v6 }
 0x3a8   : > { %1511 = vmatprep.subr.bf16.mxu1 %v1850_v54 }
 0x3aa   : > { %1135 = vmatpush1.bf16.msra.mxu0 %v1640_v13 }
 0x3ab   : > { %1512 = vmatpush3.bf16.msra.mxu1 %v1643_v5  ;;  %1136 = vmatprep.subr.bf16.mxu0 %v1646_v14 }
 0x3ac   : > { %1513 = vmatprep.subr.bf16.mxu1 %v1850_v54 }
 0x3ae   : > { %1137 = vmatpush1.bf16.msra.mxu0 %v1644_v15 }
 0x3af   : > { %1514 = vmatpush3.bf16.msra.mxu1 %v1647_v16  ;;  %1138 = vmatprep.subr.bf16.mxu0 %v1650_v17 }
 0x3b0   : > { %1515 = vmatprep.subr.bf16.mxu1 %v1850_v54 }
 0x3b2   : > { %1139 = vmatpush1.bf16.msra.mxu0 %v1648_v18 }
 0x3b3   : > { %1516 = vmatpush3.bf16.msra.mxu1 %v1651_v19  ;;  %1140 = vmatprep.subr.bf16.mxu0 %v1654_v20 }
 0x3b4   : > { %1517 = vmatprep.subr.bf16.mxu1 %v1850_v54 }
 0x3b6   : > { %1141 = vmatpush1.bf16.msra.mxu0 %v1652_v21 }
 0x3b7   : > { %1518 = vmatpush3.bf16.msra.mxu1 %v1655_v22  ;;  %1142 = vmatprep.subr.bf16.mxu0 %v1658_v23 }
 0x3b8   : > { %1519 = vmatprep.subr.bf16.mxu1 %v1850_v54 }
 0x3ba   : > { %1143 = vmatpush1.bf16.msra.mxu0 %v1656_v24 }
 0x3bb   : > { %1520 = vmatpush3.bf16.msra.mxu1 %v1659_v25 }
 0x42d   : > { %v911_v57 = vpop.xlane.xlu0 %910 }
 0x42e   : > { %v914_v58 = vmul.f32 0.0125, %v911_v57 }
 0x42f   : > { %v913_v59 = vpop.xlane.xlu1 %912 }
 0x430   : > { %v916_v60 = vsub.f32 %v904_v50, %v914_v58  ;;  %v915_v61 = vmul.f32 0.0125, %v913_v59 }
 0x432   : > { %v917_v62 = vsub.f32 %v905_v51, %v915_v61  ;;  %v918_v63 = vsel %vm509_vm0, %v916_v60, 0.0 }
 0x433   : > { %v920_v4 = vmul.f32 %v918_v63, %v918_v63 }
 0x434   : > { %v919_v8 = vsel %vm509_vm0, %v917_v62, 0.0 }
 0x435   : > { %922 = vadd.xlane.f32.xlu0 %v920_v4  ;;  %v921_v9 = vmul.f32 %v919_v8, %v919_v8 }
 0x437   : > { %924 = vadd.xlane.f32.xlu1 %v921_v9 }
 0x4c2   : > { %v923_v26 = vpop.xlane.xlu0 %922 }
 0x4c3   : > { %v926_v27 = vmul.f32 0.0125, %v923_v26 }
 0x4c4   : > { %v925_v28 = vpop.xlane.xlu1 %924 }
 0x4c5   : > { %v928_v29 = vadd.f32 1e-05, %v926_v27  ;;  %v927_v30 = vmul.f32 0.0125, %v925_v28 }
 0x4c7   : > { %1680 = vrsqrt.f32 %v928_v29  ;;  %v929_v31 = vadd.f32 1e-05, %v927_v30 }
 0x4c9   : > { %1682 = vrsqrt.f32 %v929_v31 }
 0x4d1   : > { %v1681_v32 = vpop.eup %1680 }
 0x4d2   : > { %v932_v34 = vmul.f32 %v1681_v32, %v918_v63 }
 0x4d3   : > { %v1683_v35 = vpop.eup %1682 }
 0x4d4   : > { %v933_v36 = vmul.f32 %v1683_v35, %v919_v8  ;;  %v940_v37 = vmul.f32 %v1438_v33, %v932_v34 }
 0x4d6   : > { %v941_v39 = vmul.f32 %v1438_v33, %v933_v36  ;;  %v948_v40 = vadd.f32 %v1439_v38, %v940_v37 }
 0x4d8   : > { %v949_v41 = vadd.f32 %v1439_v38, %v941_v39 }
 0x4da   : > { %v950_v42 = vpack.c.bf16 %v949_v41, %v948_v40 }
 0x4dc   : > { %1161 = vmatmul.mubr.bf16.vlgmr.msra.gmra.mrb[4].mxu0 %v950_v42  ;;  %1522 = vmatmul.mubr.bf16.vlgmr.msra.gmra.mrb[4].mxu1 %v950_v42 }
 0x5af   : > { %v1162_v48 = vpop.f32.mrb[4].mxu0  ;;  %v1205_v49 = vpop.f32.mrb[4].mxu1 }
 0x5b0   : > { %v1163_v50 = vadd.f32 %v1162_v48, %v988_v45  ;;  %v1206_v51 = vadd.f32 %v1205_v49, %v996_v46  ;;  %v1164_v52 = vpop.f32.mrb[5].mxu0  ;;  %v1523_v53 = vpop.f32.mrb[5].mxu1 }
 0x5b1   : > { %v1165_v54 = vadd.f32 %v1164_v52, %v992_v47  ;;  %v1166_v0 = vpop.f32.mrb[6].mxu0  ;;  %v1208_v1 = vpop.f32.mrb[6].mxu1 }
 0x5b2   : > { %v1471_v55 = vpack.c.bf16 %v1206_v51, %v1206_v51  ;;  %v1167_v3 = vadd.f32 %v1166_v0, %v988_v45  ;;  %v1209_v56 = vadd.f32 %v1208_v1, %v996_v46  ;;  %v1168_v57 = vpop.f32.mrb[7].mxu0  ;;  %v1524_v58 = vpop.f32.mrb[7].mxu1 }
 0x5b3   : > { %v1470_v2 = vpack.c.bf16 %v1165_v54, %v1163_v50  ;;  %v1169_v7 = vadd.f32 %v1168_v57, %v992_v47 }
 0x5b4   : > { %1233 = vst [vmem:[%s494_s19 + $0x8] sm:$0xf] %v1471_v55  ;;  %v1473_v59 = vpack.c.bf16 %v1209_v56, %v1209_v56 }
 0x5b5   : > { %1232 = vst [vmem:[%s494_s19] sm:$0xff] %v1470_v2  ;;  %v1472_v60 = vpack.c.bf16 %v1169_v7, %v1167_v3 }
 0x5b6   : > { %1235 = vst [vmem:[%s494_s19 + $0x14] sm:$0xf] %v1473_v59 }
 0x5b7   : > { %1234 = vst [vmem:[%s494_s19 + $0xc] sm:$0xff] %v1472_v60 }
 0x5b8 PF: > { %s26_s21 = sadd.s32 1, %s1842_s21  }
 0x5b9   : > { %p23_p3 = scmp.ge.s32.totalorder %s26_s21, 4  }
 0x5bb   :  { %25 = sbr.rel (!%p23_p3) target bundleno = 3 (0x3), region = 127 }
 0x5c2   :  { %1277 = vsyncpa [#allocation3], 1 }
 0x5c3   :  { %1279 = vsyncpa [#allocation3 + $0x1], 1 }
 0x5c4   :  { %1280 = vsyncpa [#allocation5], 1 }
 0x5c5   :  { %1281 = vsyncpa [#allocation8], 1 }

// kernel: strong_classifier_forward.23
= control target key start
LH: loop header
LB: loop body
LE: loop exit
PB: predicated region body
PF: predicated region fallthrough
CT: control target
= control target key end

     0   :  { %s3332_s0 = inlined_call_operand.vmem [shape: f32[32,128], index: 0, kind: input, shape index: {}]   ;;  %s3333_s1 = inlined_call_operand.vmem [shape: bf16[32,128], index: 1, kind: input, shape index: {}]   ;;  %s3334_s2 = inlined_call_operand.vmem [shape: s32[32,1], index: 2, kind: input, shape index: {}]   ;;  %s3335_s3 = inlined_call_operand.vmem [shape: bf16[128,128], index: 3, kind: input, shape index: {}]   ;;  %s3336_s4 = inlined_call_operand.vmem [shape: f32[1,128], index: 4, kind: input, shape index: {}]   ;;  %s3337_s5 = inlined_call_operand.vmem [shape: f32[1,128], index: 5, kind: input, shape index: {}]   ;;  %s3338_s6 = inlined_call_operand.hbm [shape: f32[1,128], index: 6, kind: input, shape index: {}]   ;;  %s3339_s7 = inlined_call_operand.vmem [shape: bf16[128,256], index: 7, kind: input, shape index: {}]   ;;  %s3340_s8 = inlined_call_operand.vmem [shape: f32[1,256], index: 8, kind: input, shape index: {}]   ;;  %s3341_s9 = inlined_call_operand.vmem [shape: f32[31,128], index: 9, kind: input, shape index: {}]   ;;  %s3342_s10 = inlined_call_operand.hbm [shape: f32[1,128], index: 10, kind: input, shape index: {}]   ;;  %s3343_s11 = inlined_call_operand.vmem [shape: bf16[128,128], index: 11, kind: input, shape index: {}]   ;;  %s3344_s12 = inlined_call_operand.hbm [shape: f32[1,128], index: 12, kind: input, shape index: {}]   ;;  %s3345_s13 = inlined_call_operand.hbm [shape: f32[1,128], index: 13, kind: input, shape index: {}]   ;;  %s3346_s14 = inlined_call_operand.hbm [shape: f32[1,128], index: 14, kind: input, shape index: {}]   ;;  %s3347_s15 = inlined_call_operand.vmem [shape: bf16[128,256], index: 15, kind: input, shape index: {}]   ;;  %s3348_s16 = inlined_call_operand.vmem [shape: f32[1,256], index: 16, kind: input, shape index: {}]   ;;  %s3349_s17 = inlined_call_operand.vmem [shape: bf16[256,128], index: 17, kind: input, shape index: {}]   ;;  %s3350_s18 = inlined_call_operand.hbm [shape: f32[1,128], index: 18, kind: input, shape index: {}]   ;;  %s3351_s19 = inlined_call_operand.hbm [shape: f32[1,128], index: 19, kind: input, shape index: {}]   ;;  %s3352_s20 = inlined_call_operand.hbm [shape: f32[1,128], index: 20, kind: input, shape index: {}]   ;;  %s3353_s21 = inlined_call_operand.vmem [shape: f32[32,128], index: 21, kind: output, shape index: {}]  }
   0x1   :  { %3360 = sst [smem:[#allocation21_spill]] %s3332_s0 }
   0x2   :  { %3361 = sst [smem:[#allocation22_spill]] %s3333_s1 }
   0x3   :  { %3362 = sst [smem:[#allocation23_spill]] %s3334_s2 }
   0x4   :  { %3363 = sst [smem:[#allocation24_spill]] %s3335_s3 }
   0x5   :  { %3364 = sst [smem:[#allocation25_spill]] %s3336_s4 }
   0x6   :  { %3365 = sst [smem:[#allocation26_spill]] %s3337_s5 }
   0x7   :  { %3366 = sst [smem:[#allocation27_spill]] %s3348_s16 }
   0x8   :  { %3367 = sst [smem:[#allocation28_spill]] %s3349_s17 }
   0x9   :  { %3368 = sst [smem:[#allocation29_spill]] %s3353_s21 }
   0xa   :  { %26 = vsyncpa [#allocation4], 0 }
   0xb   :  { %27 = vsyncpa [#allocation6], 0 }
   0xc   :  { %28 = vsyncpa [#allocation9], 0 }
   0xd   :  { %29 = vsyncpa [#allocation12], 0 }
   0xe   :  { %30 = vsyncpa [#allocation15], 0  ;;  %s2776_s2 = smov 0  }
   0xf LB: > { %s2655_s25 = smov [#allocation5]   ;;  %s3355_s27 = sadd.s32 4294967295, %s2653_s2   ;;  %s2653_s2 = sphi %s2776_s2, %s36_s2  }
  0x10   : > { %s565_s26 = sshll.u32 %s2655_s25, 4  ;;  %p1992_p0 = scmp.ge.s32.totalorder %s2653_s2, 1  ;;  %s2790_s26 = int_to_ptr.vmem [resolvable:$true] %s565_s26 }
  0x11   : > { %p523_p1 = scmp.lt.s32.totalorder %s2653_s2, 3  ;;  %p2786_p2 = scmp.eq.s32.totalorder %s3355_s27, 0 }
  0x12   : > { %s2656_s29 = smov [#allocation8]   ;;  %s2657_s4 = smov [#allocation11]  }
  0x13   : > { %s3369_s3 = scalar_select %p2786_p2, 1, 0 }
  0x14   : > { %p2792_p3 = pnand %p1992_p0, %p523_p1  ;;  %s590_s0 = sshll.u32 %s2656_s29, 4  ;;  %s2798_s0 = int_to_ptr.vmem [resolvable:$true] %s590_s0 }
  0x15   : > { %s621_s30 = sshll.u32 %s2657_s4, 4  ;;  %s2658_s22 = smov [#allocation3]   ;;  %s2806_s30 = int_to_ptr.vmem [resolvable:$true] %s621_s30 }
  0x16   : > { %s3370_s28 = scalar_select %p2792_p3, 1, 0 }
  0x17   : > { %p2216_p4 = pneg %p2792_p3  ;;  %s545_s23 = sshll.u32 %s2658_s22, 4  ;;  %s2808_s23 = int_to_ptr.vmem [resolvable:$true] %s545_s23 }
  0x18   : > { %s2403_s25 = scalar_lea.hbm %s3342_s10, 16 }
  0x19   : > { %p2802_p5 = pnand %p2786_p2, %p2216_p4  ;;  %p2404_p6 = scmp.ne.s32.totalorder %s3342_s10, %s2403_s25 }
  0x1a   : > { %p2410_p10 = scmp.lt.u32.totalorder %s2403_s25, %s3342_s10 }
  0x1b   : > { %p2818_p7 = pneg %p2802_p5 }
  0x1d   : > { %p2406_p8 = pnand %p2818_p7, %p2404_p6 }
  0x1f   : > { %p2407_p9 = pneg %p2406_p8 }
  0x21   : > { %p2412_p11 = pnand %p2410_p10, %p2407_p9 }
  0x23   : > { %2415 = shalt.err (!%p2412_p11)
}
  0x24   : > { %s2416_s27 = scalar_lea.vmem %s2790_s26, 16  ;;  %s2423_s1 = scalar_lea.vmem %s2790_s26, 32 }
  0x25   : > { %p2417_p12 = scmp.ne.s32.totalorder %s2790_s26, %s2416_s27  ;;  %p2424_p1 = scmp.lt.s32.totalorder %s2790_s26, %s2790_s26 }
  0x26   : > { %p2425_p4 = scmp.lt.s32.totalorder %s2423_s1, %s2416_s27 }
  0x27   : > { %p2419_p13 = pnand %p2417_p12, %p2818_p7 }
  0x28   : > { %p2426_p6 = por %p2425_p4, %p2424_p1 }
  0x29   : > { %p2420_p0 = pneg %p2419_p13 }
  0x2b   : > { %p2427_p8 = pnand %p2426_p6, %p2420_p0 }
  0x2d   : > { %2430 = shalt.err (!%p2427_p8)
}
  0x2e   : > { %2222 = dma.hbm_to_vmem [thread:$0]  (!%p2802_p5), %s3342_s10, 16, %s2790_s26, [#allocation6]  }
  0x2f   : > { %s2431_s22 = scalar_lea.hbm %s3345_s13, 16 }
  0x30   : > { %p2432_p9 = scmp.ne.s32.totalorder %s3345_s13, %s2431_s22  ;;  %p2438_p12 = scmp.lt.u32.totalorder %s2431_s22, %s3345_s13 }
  0x32   : > { %p2434_p10 = pnand %p2432_p9, %p2818_p7 }
  0x34   : > { %p2435_p11 = pneg %p2434_p10 }
  0x36   : > { %p2440_p13 = pnand %p2438_p12, %p2435_p11 }
  0x38   : > { %2443 = shalt.err (!%p2440_p13)
}
  0x39   : > { %s2444_s26 = scalar_lea.vmem %s2798_s0, 16  ;;  %s2451_s16 = scalar_lea.vmem %s2798_s0, 32 }
  0x3a   : > { %p2445_p0 = scmp.ne.s32.totalorder %s2798_s0, %s2444_s26  ;;  %p2452_p6 = scmp.lt.s32.totalorder %s2798_s0, %s2798_s0 }
  0x3b   : > { %p2453_p8 = scmp.lt.s32.totalorder %s2451_s16, %s2444_s26 }
  0x3c   : > { %p2447_p1 = pnand %p2445_p0, %p2818_p7 }
  0x3d   : > { %p2454_p9 = por %p2453_p8, %p2452_p6 }
  0x3e   : > { %p2448_p4 = pneg %p2447_p1 }
  0x40   : > { %p2455_p10 = pnand %p2454_p9, %p2448_p4 }
  0x42   : > { %2458 = shalt.err (!%p2455_p10)
}
  0x43   : > { %2228 = dma.hbm_to_vmem [thread:$0]  (!%p2802_p5), %s3345_s13, 16, %s2798_s0, [#allocation9]  }
  0x44   : > { %s2459_s29 = scalar_lea.hbm %s3350_s18, 16 }
  0x45   : > { %p2460_p11 = scmp.ne.s32.totalorder %s3350_s18, %s2459_s29  ;;  %p2466_p0 = scmp.lt.u32.totalorder %s2459_s29, %s3350_s18 }
  0x47   : > { %p2462_p12 = pnand %p2460_p11, %p2818_p7 }
  0x49   : > { %p2463_p13 = pneg %p2462_p12 }
  0x4b   : > { %p2468_p1 = pnand %p2466_p0, %p2463_p13 }
  0x4d   : > { %2471 = shalt.err (!%p2468_p1)
}
  0x4e   : > { %s2472_s0 = scalar_lea.vmem %s2806_s30, 16  ;;  %s2479_s16 = scalar_lea.vmem %s2806_s30, 32 }
  0x4f   : > { %p2473_p4 = scmp.ne.s32.totalorder %s2806_s30, %s2472_s0  ;;  %p2480_p9 = scmp.lt.s32.totalorder %s2806_s30, %s2806_s30 }
  0x50   : > { %p2481_p10 = scmp.lt.s32.totalorder %s2479_s16, %s2472_s0 }
  0x51   : > { %p2475_p6 = pnand %p2473_p4, %p2818_p7 }
  0x52   : > { %p2482_p11 = por %p2481_p10, %p2480_p9 }
  0x53   : > { %p2476_p8 = pneg %p2475_p6 }
  0x55   : > { %p2483_p12 = pnand %p2482_p11, %p2476_p8 }
  0x57   : > { %2486 = shalt.err (!%p2483_p12)
}
  0x58   : > { %2234 = dma.hbm_to_vmem [thread:$0]  (!%p2802_p5), %s3350_s18, 16, %s2806_s30, [#allocation12]  }
  0x59   : > { %s2487_s29 = scalar_lea.hbm %s3338_s6, 16 }
  0x5a   : > { %p2488_p13 = scmp.ne.s32.totalorder %s3338_s6, %s2487_s29  ;;  %p2494_p4 = scmp.lt.u32.totalorder %s2487_s29, %s3338_s6 }
  0x5c   : > { %p2490_p0 = pnand %p2488_p13, %p2818_p7 }
  0x5e   : > { %p2491_p1 = pneg %p2490_p0 }
  0x60   : > { %p2496_p6 = pnand %p2494_p4, %p2491_p1 }
  0x62   : > { %2499 = shalt.err (!%p2496_p6)
}
  0x63   : > { %s2500_s30 = scalar_lea.vmem %s2808_s23, 16  ;;  %s2507_s0 = scalar_lea.vmem %s2808_s23, 32 }
  0x64   : > { %p2501_p8 = scmp.ne.s32.totalorder %s2808_s23, %s2500_s30  ;;  %p2508_p11 = scmp.lt.s32.totalorder %s2808_s23, %s2808_s23 }
  0x65   : > { %p2509_p12 = scmp.lt.s32.totalorder %s2507_s0, %s2500_s30 }
  0x66   : > { %p2503_p9 = pnand %p2501_p8, %p2818_p7 }
  0x67   : > { %p2510_p13 = por %p2509_p12, %p2508_p11 }
  0x68   : > { %p2504_p10 = pneg %p2503_p9 }
  0x6a   : > { %p2511_p0 = pnand %p2510_p13, %p2504_p10 }
  0x6c   : > { %2514 = shalt.err (!%p2511_p0)
}
  0x6d   : > { %2219 = dma.hbm_to_vmem [thread:$0]  (!%p2802_p5), %s3338_s6, 16, %s2808_s23, [#allocation4]  }
  0x6e   : > { %s2659_s21 = smov [#allocation7]   ;;  %s2660_s25 = smov [#allocation10]  }
  0x6f   : > { %s579_s24 = sshll.u32 %s2659_s21, 4  ;;  %s601_s29 = sshll.u32 %s2660_s25, 4  ;;  %s580_s24 = int_to_ptr.vmem [resolvable:$true] %s579_s24  ;;  %s602_s29 = int_to_ptr.vmem [resolvable:$true] %s601_s29 }
  0x70   : > { %s2515_s1 = scalar_lea.hbm %s3344_s12, 16 }
  0x71   : > { %p2516_p1 = scmp.ne.s32.totalorder %s3344_s12, %s2515_s1  ;;  %p2522_p8 = scmp.lt.u32.totalorder %s2515_s1, %s3344_s12 }
  0x73   : > { %p2518_p4 = pnand %p2516_p1, %p2818_p7 }
  0x75   : > { %p2519_p6 = pneg %p2518_p4 }
  0x77   : > { %p2524_p9 = pnand %p2522_p8, %p2519_p6 }
  0x79   : > { %2527 = shalt.err (!%p2524_p9)
}
  0x7a   : > { %s2528_s23 = scalar_lea.vmem %s580_s24, 16  ;;  %s2535_s17 = scalar_lea.vmem %s580_s24, 32 }
  0x7b   : > { %p2529_p10 = scmp.ne.s32.totalorder %s580_s24, %s2528_s23  ;;  %p2536_p13 = scmp.lt.s32.totalorder %s580_s24, %s580_s24 }
  0x7c   : > { %p2537_p0 = scmp.lt.s32.totalorder %s2535_s17, %s2528_s23 }
  0x7d   : > { %p2531_p11 = pnand %p2529_p10, %p2818_p7 }
  0x7e   : > { %p2538_p2 = por %p2537_p0, %p2536_p13 }
  0x7f   : > { %p2532_p12 = pneg %p2531_p11 }
  0x81   : > { %p2539_p3 = pnand %p2538_p2, %p2532_p12 }
  0x83   : > { %2542 = shalt.err (!%p2539_p3)
}
  0x84   : > { %2225 = dma.hbm_to_vmem [thread:$0]  (!%p2802_p5), %s3344_s12, 16, %s580_s24, [#allocation6]  }
  0x85   : > { %s2543_s1 = scalar_lea.hbm %s3346_s14, 16 }
  0x86   : > { %p2544_p1 = scmp.ne.s32.totalorder %s3346_s14, %s2543_s1  ;;  %p2550_p3 = scmp.lt.u32.totalorder %s2543_s1, %s3346_s14 }
  0x88   : > { %p2546_p4 = pnand %p2544_p1, %p2818_p7 }
  0x8a   : > { %p2547_p2 = pneg %p2546_p4 }
  0x8c   : > { %p2552_p6 = pnand %p2550_p3, %p2547_p2 }
  0x8e   : > { %2555 = shalt.err (!%p2552_p6)
}
  0x8f   : > { %s2556_s23 = scalar_lea.vmem %s602_s29, 16  ;;  %s2563_s24 = scalar_lea.vmem %s602_s29, 32 }
  0x90   : > { %p2557_p8 = scmp.ne.s32.totalorder %s602_s29, %s2556_s23  ;;  %p2564_p11 = scmp.lt.s32.totalorder %s602_s29, %s602_s29 }
  0x91   : > { %p2565_p12 = scmp.lt.s32.totalorder %s2563_s24, %s2556_s23 }
  0x92   : > { %p2559_p9 = pnand %p2557_p8, %p2818_p7 }
  0x93   : > { %p2566_p13 = por %p2565_p12, %p2564_p11 }
  0x94   : > { %p2560_p10 = pneg %p2559_p9 }
  0x96   : > { %p2567_p0 = pnand %p2566_p13, %p2560_p10 }
  0x98   : > { %2570 = shalt.err (!%p2567_p0)
}
  0x99   : > { %2231 = dma.hbm_to_vmem [thread:$0]  (!%p2802_p5), %s3346_s14, 16, %s602_s29, [#allocation9]  }
  0x9a   : > { %s2661_s25 = smov [#allocation13]   ;;  %s2662_s27 = smov [#allocation14]  }
  0x9b   : > { %s632_s22 = sshll.u32 %s2661_s25, 4  ;;  %s643_s1 = sshll.u32 %s2662_s27, 4  ;;  %s633_s22 = int_to_ptr.vmem [resolvable:$true] %s632_s22  ;;  %s644_s1 = int_to_ptr.vmem [resolvable:$true] %s643_s1 }
  0x9c   : > { %s2571_s0 = scalar_lea.hbm %s3351_s19, 16 }
  0x9d   : > { %p2572_p1 = scmp.ne.s32.totalorder %s3351_s19, %s2571_s0  ;;  %p2578_p3 = scmp.lt.u32.totalorder %s2571_s0, %s3351_s19 }
  0x9f   : > { %p2574_p4 = pnand %p2572_p1, %p2818_p7 }
  0xa1   : > { %p2575_p2 = pneg %p2574_p4 }
  0xa3   : > { %p2580_p6 = pnand %p2578_p3, %p2575_p2 }
  0xa5   : > { %2583 = shalt.err (!%p2580_p6)
}
  0xa6   : > { %s2584_s29 = scalar_lea.vmem %s633_s22, 16  ;;  %s2591_s21 = scalar_lea.vmem %s633_s22, 32 }
  0xa7   : > { %p2585_p8 = scmp.ne.s32.totalorder %s633_s22, %s2584_s29  ;;  %p2592_p11 = scmp.lt.s32.totalorder %s633_s22, %s633_s22 }
  0xa8   : > { %p2593_p12 = scmp.lt.s32.totalorder %s2591_s21, %s2584_s29 }
  0xa9   : > { %p2587_p9 = pnand %p2585_p8, %p2818_p7 }
  0xaa   : > { %p2594_p13 = por %p2593_p12, %p2592_p11 }
  0xab   : > { %p2588_p10 = pneg %p2587_p9 }
  0xad   : > { %p2595_p0 = pnand %p2594_p13, %p2588_p10 }
  0xaf   : > { %2598 = shalt.err (!%p2595_p0)
}
  0xb0   : > { %2237 = dma.hbm_to_vmem [thread:$0]  (!%p2802_p5), %s3351_s19, 16, %s633_s22, [#allocation12]  }
  0xb1   : > { %s2599_s0 = scalar_lea.hbm %s3352_s20, 16 }
  0xb2   : > { %p2600_p1 = scmp.ne.s32.totalorder %s3352_s20, %s2599_s0  ;;  %p2606_p3 = scmp.lt.u32.totalorder %s2599_s0, %s3352_s20 }
  0xb4   : > { %p2602_p4 = pnand %p2600_p1, %p2818_p7 }
  0xb6   : > { %p2603_p2 = pneg %p2602_p4 }
  0xb8   : > { %p2608_p6 = pnand %p2606_p3, %p2603_p2 }
  0xba   : > { %2611 = shalt.err (!%p2608_p6)
}
  0xbb   : > { %s2612_s29 = scalar_lea.vmem %s644_s1, 16  ;;  %s2619_s22 = scalar_lea.vmem %s644_s1, 32 }
  0xbc   : > { %p2613_p8 = scmp.ne.s32.totalorder %s644_s1, %s2612_s29  ;;  %p2620_p11 = scmp.lt.s32.totalorder %s644_s1, %s644_s1 }
  0xbd   : > { %p2621_p12 = scmp.lt.s32.totalorder %s2619_s22, %s2612_s29 }
  0xbe   : > { %p2615_p9 = pnand %p2613_p8, %p2818_p7 }
  0xbf   : > { %p2622_p13 = por %p2621_p12, %p2620_p11 }
  0xc0   : > { %p2616_p10 = pneg %p2615_p9 }
  0xc2   : > { %p2623_p0 = pnand %p2622_p13, %p2616_p10 }
  0xc4   : > { %2626 = shalt.err (!%p2623_p0)
}
  0xc5   : > { %2240 = dma.hbm_to_vmem [thread:$0]  (!%p2802_p5), %s3352_s20, 16, %s644_s1, [#allocation15]  }
  0xc6   : > { %p3373_p1 = scmp.ne.s32.totalorder %s3370_s28, 0 }
  0xc7   : > { %p3374_p4 = scmp.ne.s32.totalorder (!%p3373_p1), %s3369_s3, 0 }
  0xc8   : > { %683 = sbr.rel (%p3373_p1) target bundleno = 2400 (0x960), region = 104 }
  0xcf   : > { %2632 = dma.done.wait (%p3374_p4), [#allocation4], 16  }
  0xd0   : > { %2634 = vsyncadd (%p3374_p4), [#allocation4], 4294967280 }
  0xd1   : > { %2636 = dma.done.wait (%p3374_p4), [#allocation6], 32  }
  0xd2   : > { %2638 = vsyncadd (%p3374_p4), [#allocation6], 4294967264 }
  0xd3   : > { %2640 = dma.done.wait (%p3374_p4), [#allocation9], 32  }
  0xd4   : > { %2642 = vsyncadd (%p3374_p4), [#allocation9], 4294967264 }
  0xd5   : > { %2644 = dma.done.wait (%p3374_p4), [#allocation12], 32  }
  0xd6   : > { %2646 = vsyncadd (%p3374_p4), [#allocation12], 4294967264 }
  0xd7   : > { %2648 = dma.done.wait (%p3374_p4), [#allocation15], 16  }
  0xd8   : > { %2650 = vsyncadd (%p3374_p4), [#allocation15], 4294967280  ;;  %s3375_s28 = sadd.s32 4294967295, %s2653_s2   ;;  %v2663_v0 = vmov 0.0   ;;  %vm2664_vm0 = vmmov 0   ;;  %s3376_s27 = sld [smem:[#allocation24_spill]]  ;;  %v940_v24 = vlaneseq }
  0xd9   : > { %s2011_s5 = sshll.u32 %s3375_s28, 1  ;;  %2144 = vmatprep.subr.bf16.mxu0 %v2663_v0  ;;  %1144 = vst [vmem:[#allocation2 + $0x8] sm:$0xff] %v2663_v0  ;;  %1145 = vst [vmem:[#allocation2 + $0x20] sm:$0xff] %v2663_v0  ;;  %2160 = vmatprep.mubr.msk.bf16.mxu0 %vm2664_vm0, %v2663_v0  ;;  %s3377_s17 = sld [smem:[#allocation22_spill]]  ;;  %v2287_v21 = vld [vmem:[%s3339_s7 + $0x4] ss:$8 sps:$4 sm:$0xff]  }
  0xda   : > { %p782_p5 = scmp.lt.s32.totalorder %s2011_s5, 3  ;;  %s3379_s28 = sld [smem:[#allocation25_spill]]  ;;  %v2289_v22 = vld [vmem:[%s3339_s7] ss:$8 sps:$4 sm:$0xff]   ;;  %v2290_v23 = vld [vmem:[%s3339_s7 + $0x14] ss:$8 sps:$4 sm:$0xff]   ;;  %1086 = vmatprep.subr.bf16.mxu1 %v2287_v21 }
  0xdb   : > { %1087 = vmatpush1.bf16.msra.mxu1 %v2289_v22  ;;  %v3075_v25 = vand.u32 127, %v940_v24  ;;  %v2292_v36 = vld [vmem:[%s3339_s7 + $0x10] ss:$8 sps:$4 sm:$0xff]   ;;  %v2293_v37 = vld [vmem:[%s3339_s7 + $0x24] ss:$8 sps:$4 sm:$0xff]   ;;  %v2665_v44 = vmov 0  }
  0xdc   : > { %s3386_s5 = smov (!%p782_p5, %s2011_s5), 3  ;;  %1088 = vmatprep.subr.bf16.mxu1 %v2290_v23  ;;  %v2295_v38 = vld [vmem:[%s3339_s7 + $0x20] ss:$8 sps:$4 sm:$0xff]   ;;  %v2296_v39 = vld [vmem:[%s3339_s7 + $0x34] ss:$8 sps:$4 sm:$0xff]   ;;  %1118 = vmatprep.mubr.bf16.mxu1 %v2665_v44  ;;  %s3380_s3 = sld [smem:[#allocation23_spill]] }
  0xdd   : > { %s2014_s30 = sshll.u32 %s3386_s5, 2  ;;  %s3050_s16 = sshll.u32 %s3386_s5, 3  ;;  %vm942_vm1 = vcmp.lt.s32.totalorder %v3075_v25, 80  ;;  %v2298_v40 = vld [vmem:[%s3339_s7 + $0x30] ss:$8 sps:$4 sm:$0xff]   ;;  %2277 = vset.pattern.permute.xlu1 %v2665_v44  ;;  %2276 = vset.pattern.permute.xlu0 %v2665_v44  ;;  %v2315_v22 = vld [vmem:[%s3343_s11 + $0x20] sm:$0xff]  }
  0xde   : > { %v2278_v1 = vld [vmem:[%s3376_s27] sm:$0xff]   ;;  %v2279_v2 = vld [vmem:[%s3376_s27 + $0x8] sm:$0xff]   ;;  %v2280_v3 = vld [vmem:[%s3376_s27 + $0x10] sm:$0xff]   ;;  %s3381_s23 = sld [smem:[#allocation26_spill]]  ;;  %s3384_s25 = sld [smem:[#allocation29_spill]] }
  0xdf   : > { %2145 = vmatpush3.bf16.msra.mxu0 %v2278_v1  ;;  %s791_s29 = scalar_lea.vmem %s3377_s17, %s2014_s30  ;;  %v2281_v4 = vld [vmem:[%s3376_s27 + $0x18] sm:$0xff]   ;;  %v2282_v5 = vld [vmem:[%s3376_s27 + $0x20] sm:$0xff]   ;;  %v2283_v6 = vld [vmem:[%s3376_s27 + $0x28] sm:$0xff]   ;;  %s3378_s17 = sld [smem:[#allocation21_spill]]  ;;  %1089 = vmatpush1.bf16.msra.mxu1 %v2292_v36 }
  0xe0   : > { %2146 = vmatprep.subr.bf16.mxu0 %v2663_v0  ;;  %v2284_v7 = vld [vmem:[%s3376_s27 + $0x30] sm:$0xff]   ;;  %v2285_v8 = vld [vmem:[%s3376_s27 + $0x38] sm:$0xff]   ;;  %v2286_v9 = vld [vmem:[%s791_s29] sm:$0xff]   ;;  %1090 = vmatprep.subr.bf16.mxu1 %v2293_v37 }
  0xe1   : > { %v2028_v12 = vld [vmem:[%s3379_s28] ss:$0 sm:$0xff]  ;;  %v2299_v41 = vld [vmem:[%s3339_s7 + $0x44] ss:$8 sps:$4 sm:$0xff]   ;;  %v2302_v43 = vld [vmem:[%s3339_s7 + $0x54] ss:$8 sps:$4 sm:$0xff]  }
  0xe2   : > { %v2301_v42 = vld [vmem:[%s3339_s7 + $0x40] ss:$8 sps:$4 sm:$0xff]   ;;  %v2304_v45 = vld [vmem:[%s3339_s7 + $0x50] ss:$8 sps:$4 sm:$0xff]   ;;  %v2305_v46 = vld [vmem:[%s3339_s7 + $0x64] ss:$8 sps:$4 sm:$0xff]   ;;  %s797_s26 = scalar_lea.vmem %s3380_s3, %s3050_s16 }
  0xe3   : > { %2147 = vmatpush3.bf16.msra.mxu0 %v2279_v2  ;;  %1091 = vmatpush1.bf16.msra.mxu1 %v2295_v38  ;;  %v2307_v47 = vld [vmem:[%s3339_s7 + $0x60] ss:$8 sps:$4 sm:$0xff]   ;;  %v2308_v48 = vld [vmem:[%s3339_s7 + $0x74] ss:$8 sps:$4 sm:$0xff]   ;;  %v2310_v49 = vld [vmem:[%s3339_s7 + $0x70] ss:$8 sps:$4 sm:$0xff]  }
  0xe4   : > { %2148 = vmatprep.subr.bf16.mxu0 %v2663_v0  ;;  %1092 = vmatprep.subr.bf16.mxu1 %v2296_v39  ;;  %v1150_v50 = vld [vmem:[%s797_s26 + $0x8] sm:$0xff]  ;;  %v1149_v52 = vld [vmem:[%s797_s26] sm:$0xff]  ;;  %v2314_v21 = vld [vmem:[%s3343_s11 + $0x18] sm:$0xff]   ;;  %s3382_s26 = sld [smem:[#allocation28_spill]]  ;;  %s803_s28 = scalar_lea.vmem %s3384_s25, %s3050_s16 }
  0xe5   : > { %s785_s22 = scalar_lea.vmem %s3378_s17, %s3050_s16  ;;  %v1156_v51 = vadd.s32 4294967295, %v1150_v50  ;;  %vm1185_vm2 = vcmp.ge.s32.totalorder %v1149_v52, 0  ;;  %vm1187_vm3 = vcmp.lt.s32.totalorder %v1149_v52, 2  ;;  %v1155_v53 = vadd.s32 4294967295, %v1149_v52  ;;  %v2316_v23 = vld [vmem:[%s3343_s11 + $0x28] sm:$0xff]   ;;  %s3383_s17 = sld [smem:[#allocation27_spill]] }
  0xe6   : > { %v806_v10 = vld [vmem:[%s785_s22] sm:$0xff]  ;;  %v807_v13 = vld [vmem:[%s785_s22 + $0x8] sm:$0xff]  ;;  %vm1189_vm6 = vmand %vm1185_vm2, %vm1187_vm3  ;;  %vm1186_vm8 = vcmp.ge.s32.totalorder %v1150_v50, 0  ;;  %vm1188_vm9 = vcmp.lt.s32.totalorder %v1150_v50, 2  ;;  %v1213_v55 = vadd.s32 1, %v1149_v52  ;;  %v1214_v58 = vadd.s32 1, %v1150_v50 }
  0xe7   : > { %2149 = vmatpush3.bf16.msra.mxu0 %v2280_v3  ;;  %1093 = vmatpush1.bf16.msra.mxu1 %v2298_v40  ;;  %vm1158_vm4 = vcmp.ge.s32.totalorder %v1156_v51, 0  ;;  %vm1160_vm5 = vcmp.lt.s32.totalorder %v1156_v51, 2  ;;  %vm1157_vm10 = vcmp.ge.s32.totalorder %v1155_v53, 0  ;;  %vm1159_vm11 = vcmp.lt.s32.totalorder %v1155_v53, 2  ;;  %vm1190_vm13 = vmand %vm1186_vm8, %vm1188_vm9 }
  0xe8   : > { %2150 = vmatprep.subr.bf16.mxu0 %v2663_v0  ;;  %1094 = vmatprep.subr.bf16.mxu1 %v2299_v41  ;;  %vm1162_vm7 = vmand %vm1158_vm4, %vm1160_vm5  ;;  %v1191_v56 = vsel %vm1189_vm6, 1, %v2665_v44  ;;  %vm1215_vm14 = vcmp.ge.s32.totalorder %v1213_v55, 0  ;;  %vm1217_vm15 = vcmp.lt.s32.totalorder %v1213_v55, 2  ;;  %v1192_v59 = vsel %vm1190_vm13, 1, %v2665_v44 }
  0xe9   : > { %v1164_v54 = vsel %vm1162_vm7, 1, %v2665_v44  ;;  %vm1161_vm12 = vmand %vm1157_vm10, %vm1159_vm11  ;;  %vm1216_vm2 = vcmp.ge.s32.totalorder %v1214_v58, 0  ;;  %vm1218_vm3 = vcmp.lt.s32.totalorder %v1214_v58, 2  ;;  %v1152_v58 = vld [vmem:[%s3341_s9 + $0x10] sm:$0xff] }
  0xea   : > { %v1163_v57 = vsel %vm1161_vm12, 1, %v2665_v44  ;;  %vm1220_vm4 = vmand %vm1216_vm2, %vm1218_vm3 }
  0xeb   : > { %2151 = vmatpush3.bf16.msra.mxu0 %v2281_v4  ;;  %1095 = vmatpush1.bf16.msra.mxu1 %v2301_v42  ;;  %v1222_v61 = vsel %vm1220_vm4, 1, %v2665_v44 }
  0xec   : > { %2152 = vmatprep.subr.bf16.mxu0 %v2663_v0  ;;  %1096 = vmatprep.subr.bf16.mxu1 %v2302_v43 }
  0xef   : > { %2153 = vmatpush3.bf16.msra.mxu0 %v2282_v5  ;;  %1097 = vmatpush1.bf16.msra.mxu1 %v2304_v45 }
  0xf0   : > { %2154 = vmatprep.subr.bf16.mxu0 %v2663_v0  ;;  %1098 = vmatprep.subr.bf16.mxu1 %v2305_v46 }
  0xf3   : > { %2155 = vmatpush3.bf16.msra.mxu0 %v2283_v6  ;;  %1099 = vmatpush1.bf16.msra.mxu1 %v2307_v47 }
  0xf4   : > { %2156 = vmatprep.subr.bf16.mxu0 %v2663_v0  ;;  %1100 = vmatprep.subr.bf16.mxu1 %v2308_v48 }
  0xf7   : > { %2157 = vmatpush3.bf16.msra.mxu0 %v2284_v7  ;;  %1101 = vmatpush1.bf16.msra.mxu1 %v2310_v49  ;;  %v2029_v7 = vld [vmem:[%s3381_s23] ss:$0 sm:$0xff] }
  0xf8   : > { %2158 = vmatprep.subr.bf16.mxu0 %v2663_v0 }
  0xfb   : > { %2159 = vmatpush3.bf16.msra.mxu0 %v2285_v8 }
  0xfc   : > { %2164 = vmatprep.subr.bf16.mxu0 %v2663_v0 }
  0xfe   : > { %2161 = vmatmul.mubr.bf16.vlgmr.msra.gmra.mrb[0].mxu0 %v2286_v9 }
  0xff   : > { %2180 = vmatprep.mubr.msk.bf16.mxu0 %vm2664_vm0, %v2663_v0  ;;  %vm1219_vm0 = vmand %vm1215_vm14, %vm1217_vm15 }
 0x100   : > { %v1221_v60 = vsel %vm1219_vm0, 1, %v2665_v44 }
 0x1d1   : > { %v914_v11 = vpop.f32.mrb[0].mxu0 }
 0x1d2   : > { %v921_v14 = vadd.f32 %v914_v11, %v806_v10  ;;  %v2162_v15 = vpop.f32.mrb[1].mxu0  ;;  %v2030_v11 = vld [vmem:[#allocation3] ss:$0 sm:$0xff] }
 0x1d3   : > { %v917_v16 = vpop.f32.mrb[2].mxu0 }
 0x1d4   : > { %v3059_v17 = vadd.f32 %v2028_v12, %v921_v14  ;;  %v922_v18 = vadd.f32 %v917_v16, %v807_v13  ;;  %v2163_v19 = vpop.f32.mrb[3].mxu0  ;;  %v2311_v16 = vld [vmem:[%s3343_s11] sm:$0xff]  }
 0x1d5   : > { %2165 = vmatpush3.bf16.msra.mxu0 %v2311_v16  ;;  %v2313_v19 = vld [vmem:[%s3343_s11 + $0x10] sm:$0xff]  }
 0x1d6   : > { %934 = vadd.xlane.f32.xlu0 %v3059_v17  ;;  %v3062_v20 = vadd.f32 %v2028_v12, %v922_v18  ;;  %2166 = vmatprep.subr.bf16.mxu0 %v2663_v0  ;;  %v2312_v18 = vld [vmem:[%s3343_s11 + $0x8] sm:$0xff]   ;;  %v2049_v16 = vld [vmem:[#allocation5] ss:$0 sm:$0xff] }
 0x1d9   : > { %2167 = vmatpush3.bf16.msra.mxu0 %v2312_v18 }
 0x1da   : > { %936 = vadd.xlane.f32.xlu0 %v3062_v20  ;;  %2168 = vmatprep.subr.bf16.mxu0 %v2663_v0 }
 0x1dd   : > { %2169 = vmatpush3.bf16.msra.mxu0 %v2313_v19 }
 0x1de   : > { %2170 = vmatprep.subr.bf16.mxu0 %v2663_v0 }
 0x1e1   : > { %2171 = vmatpush3.bf16.msra.mxu0 %v2314_v21 }
 0x1e2   : > { %2172 = vmatprep.subr.bf16.mxu0 %v2663_v0 }
 0x1e5   : > { %2173 = vmatpush3.bf16.msra.mxu0 %v2315_v22 }
 0x1e6   : > { %2174 = vmatprep.subr.bf16.mxu0 %v2663_v0 }
 0x1e9   : > { %2175 = vmatpush3.bf16.msra.mxu0 %v2316_v23 }
 0x1ea   : > { %2176 = vmatprep.subr.bf16.mxu0 %v2663_v0 }
 0x1f0   : > { %1166 = vperm.xlu0 %2276, %v1163_v57  }
 0x263   : > { %v935_v26 = vpop.xlane.xlu0 %934 }
 0x264   : > { %v938_v27 = vmul.f32 0.0125, %v935_v26  ;;  %v2317_v26 = vld [vmem:[%s3343_s11 + $0x30] sm:$0xff]  }
 0x265   : > { %2177 = vmatpush3.bf16.msra.mxu0 %v2317_v26 }
 0x266   : > { %v943_v28 = vsub.f32 %v3059_v17, %v938_v27  ;;  %v2318_v27 = vld [vmem:[%s3343_s11 + $0x38] sm:$0xff]   ;;  %2178 = vmatprep.subr.bf16.mxu0 %v2663_v0 }
 0x267   : > { %v937_v29 = vpop.xlane.xlu0 %936 }
 0x268   : > { %v939_v30 = vmul.f32 0.0125, %v937_v29  ;;  %v3081_v31 = vsel %vm942_vm1, %v943_v28, 0.0  ;;  %v3182_v28 = vshrl.u32 %v940_v24, 7 }
 0x269   : > { %v947_v32 = vmul.f32 %v3081_v31, %v3081_v31  ;;  %2179 = vmatpush3.bf16.msra.mxu0 %v2318_v27 }
 0x26a   : > { %v944_v33 = vsub.f32 %v3062_v20, %v939_v30  ;;  %v1002_v29 = vsub.s32 1, %v3182_v28  ;;  %v994_v30 = vld [vmem:[%s3340_s8] sm:$0x3]  ;;  %v3191_v43 = vsub.s32 0, %v3182_v28  ;;  %v1205_v55 = vsub.s32 7, %v3182_v28 }
 0x26b   : > { %949 = vadd.xlane.f32.xlu1 %v947_v32 }
 0x26c   : > { %v3088_v34 = vsel %vm942_vm1, %v944_v33, 0.0  ;;  %v999_v45 = vrot.slane %v994_v30, %v3191_v43 }
 0x26d   : > { %v948_v35 = vmul.f32 %v3088_v34, %v3088_v34 }
 0x26f   : > { %951 = vadd.xlane.f32.xlu1 %v948_v35  ;;  %v1167_v57 = vpop.permute.xlu0 %1166 }
 0x270   : > { %vm1171_vm6 = vcmp.eq.s32.totalorder %v1167_v57, 1 }
 0x280   : > { %1169 = vperm.xlu1 %2277, %v1164_v54   ;;  %v1177_v54 = vsub.s32 6, %v3182_v28 }
 0x284   : > { %1194 = vperm.xlu1 %2277, %v1191_v56   ;;  %v1151_v56 = vld [vmem:[%s3341_s9 + $0x8] sm:$0xff] }
 0x288   : > { %1197 = vperm.xlu1 %2277, %v1192_v59   ;;  %v1178_v59 = vrot.slane %v1151_v56, %v1177_v54 }
 0x28c   : > { %1224 = vperm.xlu1 %2277, %v1221_v60   ;;  %v1206_v60 = vrot.slane %v1151_v56, %v1205_v55 }
 0x290   : > { %1227 = vperm.xlu1 %2277, %v1222_v61  }
 0x2f8   : > { %v950_v62 = vpop.xlane.xlu1 %949 }
 0x2f9   : > { %v953_v63 = vmul.f32 0.0125, %v950_v62 }
 0x2fb   : > { %v955_v1 = vadd.f32 1e-05, %v953_v63  ;;  %v1236_v63 = vrot.slane %v1152_v58, %v3191_v43 }
 0x2fc   : > { %v952_v2 = vpop.xlane.xlu1 %951 }
 0x2fd   : > { %2359 = vrsqrt.f32 %v955_v1  ;;  %v954_v3 = vmul.f32 0.0125, %v952_v2 }
 0x2ff   : > { %v956_v4 = vadd.f32 1e-05, %v954_v3 }
 0x300   : > { %v1170_v24 = vpop.permute.xlu1 %1169 }
 0x301   : > { %2361 = vrsqrt.f32 %v956_v4  ;;  %vm1172_vm8 = vcmp.eq.s32.totalorder %v1170_v24, 1 }
 0x307   : > { %v2360_v5 = vpop.eup %2359 }
 0x308   : > { %v959_v6 = vmul.f32 %v2360_v5, %v3081_v31  ;;  %v1003_v31 = vrot.slane %v994_v30, %v1002_v29 }
 0x30a   : > { %v967_v10 = vmul.f32 %v2029_v7, %v959_v6 }
 0x30b   : > { %v2362_v8 = vpop.eup %2361 }
 0x30c   : > { %v960_v9 = vmul.f32 %v2362_v8, %v3088_v34  ;;  %v975_v13 = vadd.f32 %v2030_v11, %v967_v10 }
 0x30e   : > { %v968_v12 = vmul.f32 %v2029_v7, %v960_v9 }
 0x310   : > { %v976_v14 = vadd.f32 %v2030_v11, %v968_v12 }
 0x312   : > { %v977_v15 = vpack.c.bf16 %v976_v14, %v975_v13 }
 0x314   : > { %1119 = vmatmul.mubr.bf16.vlgmr.msra.gmra.mrb[0].mxu1 %v977_v15 }
 0x315   : > { %1566 = vmatprep.mubr.bf16.mxu1 %v2665_v44  ;;  %v1195_v44 = vpop.permute.xlu1 %1194 }
 0x316   : > { %vm1199_vm5 = vcmp.eq.s32.totalorder %v1195_v44, 1  ;;  %v2060_v44 = vld [vmem:[#allocation7] ss:$0 sm:$0xff] }
 0x319   : > { %v1198_v46 = vpop.permute.xlu1 %1197 }
 0x31a   : > { %vm1200_vm7 = vcmp.eq.s32.totalorder %v1198_v46, 1 }
 0x31d   : > { %v1225_v53 = vpop.permute.xlu1 %1224 }
 0x31e   : > { %vm1229_vm9 = vcmp.eq.s32.totalorder %v1225_v53, 1  ;;  %v2324_v53 = vld [vmem:[%s3347_s15 + $0x14] ss:$8 sps:$4 sm:$0xff]  }
 0x321   : > { %v1228_v62 = vpop.permute.xlu1 %1227 }
 0x322   : > { %vm1230_vm10 = vcmp.eq.s32.totalorder %v1228_v62, 1 }
 0x3e7   : > { %v1120_v32 = vpop.f32.mrb[0].mxu1 }
 0x3e8   : > { %v1122_v33 = vpop.f32.mrb[1].mxu1  ;;  %v1121_v47 = vadd.f32 %v1120_v32, %v999_v45 }
 0x3e9   : > { %v1123_v34 = vadd.f32 %v1122_v33, %v1003_v31  ;;  %v1124_v35 = vpop.f32.mrb[2].mxu1 }
 0x3ea   : > { %v1126_v36 = vpop.f32.mrb[3].mxu1  ;;  %v1125_v50 = vadd.f32 %v1124_v35, %v999_v45 }
 0x3eb   : > { %v2047_v37 = vmul.f32 -1.442695, %v1123_v34  ;;  %v1127_v0 = vadd.f32 %v1126_v36, %v1003_v31 }
 0x3ed   : > { %2363 = vpow2.f32 %v2047_v37  ;;  %v2048_v38 = vmul.f32 -1.442695, %v1127_v0 }
 0x3ef   : > { %2365 = vpow2.f32 %v2048_v38 }
 0x3f7   : > { %v2364_v39 = vpop.eup %2363 }
 0x3f8   : > { %v1135_v40 = vadd.f32 1.0, %v2364_v39 }
 0x3f9   : > { %v2366_v41 = vpop.eup %2365 }
 0x3fa   : > { %2367 = vrcp.f32 %v1135_v40  ;;  %v1136_v42 = vadd.f32 1.0, %v2366_v41 }
 0x3fc   : > { %2369 = vrcp.f32 %v1136_v42 }
 0x404   : > { %v2368_v48 = vpop.eup %2367 }
 0x405   : > { %v1141_v49 = vmul.f32 %v2368_v48, %v1121_v47 }
 0x406   : > { %v2370_v51 = vpop.eup %2369 }
 0x407   : > { %1147 = vst [vmem:[#allocation2 + $0x10] sm:$0xff] %v1141_v49  ;;  %v1142_v52 = vmul.f32 %v2370_v51, %v1125_v50  ;;  %v1201_v61 = vsel %vm1199_vm5, %v1141_v49, 0.0 }
 0x408   : > { %v1207_v5 = vmul.f32 %v1206_v60, %v1201_v61 }
 0x409   : > { %1148 = vst [vmem:[#allocation2 + $0x18] sm:$0xff] %v1142_v52  ;;  %v1202_v2 = vsel %vm1200_vm7, %v1142_v52, 0.0  ;;  %v2319_v52 = vld [vmem:[%s3347_s15] ss:$8 sps:$4 sm:$0xff]  }
 0x40a   : > { %v1208_v13 = vmul.f32 %v1206_v60, %v1202_v2  ;;  %v2325_v2 = vld [vmem:[%s3347_s15 + $0x20] ss:$8 sps:$4 sm:$0xff]  }
 0x40e   : > { %v1153_v1 = vld [vmem:[#allocation2 + $0xf] sm:$0xff] }
 0x40f   : > { %v1173_v3 = vsel %vm1171_vm6, %v1153_v1, 0.0  ;;  %v2327_v1 = vld [vmem:[%s3347_s15 + $0x24] ss:$8 sps:$4 sm:$0xff]  }
 0x410   : > { %v1154_v4 = vld [vmem:[#allocation2 + $0x17] sm:$0xff]  ;;  %v1179_v8 = vmul.f32 %v1178_v59, %v1173_v3 }
 0x411   : > { %v1211_v6 = vld [vmem:[#allocation2 + $0x11] sm:$0xff]  ;;  %v1212_v7 = vld [vmem:[#allocation2 + $0x19] sm:$0xff]  ;;  %v1174_v9 = vsel %vm1172_vm8, %v1154_v4, 0.0 }
 0x412   : > { %v1231_v10 = vsel %vm1229_vm9, %v1211_v6, 0.0  ;;  %v1232_v11 = vsel %vm1230_vm10, %v1212_v7, 0.0  ;;  %v1180_v12 = vmul.f32 %v1178_v59, %v1174_v9  ;;  %v1209_v15 = vadd.f32 %v1207_v5, %v1179_v8  ;;  %v2330_v3 = vld [vmem:[%s3347_s15 + $0x34] ss:$8 sps:$4 sm:$0xff]   ;;  %v2328_v4 = vld [vmem:[%s3347_s15 + $0x30] ss:$8 sps:$4 sm:$0xff]  }
 0x413   : > { %v1237_v14 = vmul.f32 %v1236_v63, %v1231_v10  ;;  %v1238_v19 = vmul.f32 %v1236_v63, %v1232_v11  ;;  %v2333_v5 = vld [vmem:[%s3347_s15 + $0x44] ss:$8 sps:$4 sm:$0xff]   ;;  %v2331_v6 = vld [vmem:[%s3347_s15 + $0x40] ss:$8 sps:$4 sm:$0xff]   ;;  %v2336_v7 = vld [vmem:[%s3347_s15 + $0x54] ss:$8 sps:$4 sm:$0xff]  }
 0x414   : > { %v1210_v18 = vadd.f32 %v1208_v13, %v1180_v12  ;;  %v2334_v8 = vld [vmem:[%s3347_s15 + $0x50] ss:$8 sps:$4 sm:$0xff]   ;;  %v2339_v9 = vld [vmem:[%s3347_s15 + $0x64] ss:$8 sps:$4 sm:$0xff]   ;;  %v2337_v10 = vld [vmem:[%s3347_s15 + $0x60] ss:$8 sps:$4 sm:$0xff]  }
 0x415   : > { %v1239_v21 = vadd.f32 %v1237_v14, %v1209_v15  ;;  %v2342_v11 = vld [vmem:[%s3347_s15 + $0x74] ss:$8 sps:$4 sm:$0xff]   ;;  %v2340_v12 = vld [vmem:[%s3347_s15 + $0x70] ss:$8 sps:$4 sm:$0xff]  }
 0x416   : > { %v1240_v22 = vadd.f32 %v1238_v19, %v1210_v18 }
 0x417   : > { %v1248_v23 = vadd.f32 %v2049_v16, %v1239_v21 }
 0x418   : > { %v1249_v26 = vadd.f32 %v2049_v16, %v1240_v22 }
 0x419   : > { %v2050_v27 = vmul.f32 -0.999995, %v1248_v23  ;;  %v1250_v38 = vmul.f32 0.999995, %v1248_v23  ;;  %v2061_v23 = vld [vmem:[#allocation8] ss:$0 sm:$0xff] }
 0x41a   : > { %v2051_v30 = vmul.f32 -0.999995, %v1249_v26  ;;  %v1251_v0 = vmul.f32 0.999995, %v1249_v26 }
 0x41b   : > { %v1254_v31 = vmul.f32 1.442695, %v2050_v27 }
 0x41c   : > { %v1256_v32 = vmul.f32 1.442695, %v2051_v30 }
 0x41d   : > { %2371 = vpow2.f32 %v1254_v31  ;;  %v2062_v31 = vld [vmem:[#allocation10] ss:$0 sm:$0xff] }
 0x41e   : > { %2373 = vpow2.f32 %v1256_v32 }
 0x427   : > { %v2372_v33 = vpop.eup %2371 }
 0x428   : > { %v1258_v34 = vadd.f32 1.0, %v2372_v33  ;;  %v2374_v35 = vpop.eup %2373 }
 0x429   : > { %v1259_v36 = vadd.f32 1.0, %v2374_v35 }
 0x42a   : > { %2375 = vrcp.f32 %v1258_v34 }
 0x42b   : > { %2377 = vrcp.f32 %v1259_v36  ;;  %v2343_v36 = vld [vmem:[%s3382_s26 + $0x40] sm:$0xff]  }
 0x42c   : > { %2122 = vmatprep.subr.bf16.mxu0 %v2343_v36 }
 0x434   : > { %v2376_v37 = vpop.eup %2375 }
 0x435   : > { %v2378_v24 = vpop.eup %2377  ;;  %v1264_v39 = vmul.f32 %v2376_v37, %v1250_v38  ;;  %v2344_v37 = vld [vmem:[%s3382_s26] sm:$0xff]   ;;  %v2346_v38 = vld [vmem:[%s3382_s26 + $0x8] sm:$0xff]  }
 0x436   : > { %v1265_v40 = vmul.f32 %v2378_v24, %v1251_v0  ;;  %v2345_v0 = vld [vmem:[%s3382_s26 + $0x48] sm:$0xff]   ;;  %v2347_v24 = vld [vmem:[%s3382_s26 + $0x50] sm:$0xff]  }
 0x438   : > { %v1266_v41 = vpack.c.bf16 %v1265_v40, %v1264_v39  ;;  %v2348_v39 = vld [vmem:[%s3382_s26 + $0x10] sm:$0xff]   ;;  %v2349_v40 = vld [vmem:[%s3382_s26 + $0x58] sm:$0xff]  }
 0x43a   : > { %2181 = vmatmul.mubr.bf16.vlgmr.msra.gmra.mrb[4].mxu0 %v1266_v41  ;;  %v2350_v41 = vld [vmem:[%s3382_s26 + $0x18] sm:$0xff]  }
 0x43b   : > { %2123 = vmatpush3.bf16.msra.mxu0 %v2344_v37 }
 0x43c   : > { %2124 = vmatprep.subr.bf16.mxu0 %v2345_v0 }
 0x43f   : > { %2125 = vmatpush3.bf16.msra.mxu0 %v2346_v38 }
 0x440   : > { %2126 = vmatprep.subr.bf16.mxu0 %v2347_v24 }
 0x443   : > { %2127 = vmatpush3.bf16.msra.mxu0 %v2348_v39 }
 0x444   : > { %2128 = vmatprep.subr.bf16.mxu0 %v2349_v40 }
 0x447   : > { %2129 = vmatpush3.bf16.msra.mxu0 %v2350_v41 }
 0x50d   : > { %v1365_v42 = vpop.f32.mrb[4].mxu0 }
 0x50e   : > { %v1372_v45 = vadd.f32 %v1365_v42, %v3059_v17  ;;  %v2182_v46 = vpop.f32.mrb[5].mxu0  ;;  %v2321_v17 = vld [vmem:[%s3347_s15 + $0x4] ss:$8 sps:$4 sm:$0xff]  }
 0x50f   : > { %v1368_v47 = vpop.f32.mrb[6].mxu0  ;;  %1534 = vmatprep.subr.bf16.mxu1 %v2321_v17  ;;  %v2351_v42 = vld [vmem:[%s3382_s26 + $0x60] sm:$0xff]   ;;  %v2354_v46 = vld [vmem:[%s3382_s26 + $0x28] sm:$0xff]  }
 0x510   : > { %v3204_v48 = vadd.f32 %v2060_v44, %v1372_v45  ;;  %v1373_v49 = vadd.f32 %v1368_v47, %v3062_v20  ;;  %v2183_v50 = vpop.f32.mrb[7].mxu0  ;;  %1535 = vmatpush1.bf16.msra.mxu1 %v2319_v52  ;;  %v2322_v20 = vld [vmem:[%s3347_s15 + $0x10] ss:$8 sps:$4 sm:$0xff]   ;;  %2130 = vmatprep.subr.bf16.mxu0 %v2351_v42  ;;  %v2353_v45 = vld [vmem:[%s3382_s26 + $0x68] sm:$0xff]   ;;  %v1442_v17 = vld [vmem:[%s3383_s17] sm:$0x3] }
 0x511   : > { %1536 = vmatprep.subr.bf16.mxu1 %v2324_v53  ;;  %v2355_v47 = vld [vmem:[%s3382_s26 + $0x70] sm:$0xff]   ;;  %v2357_v50 = vld [vmem:[%s3382_s26 + $0x78] sm:$0xff]   ;;  %v1447_v53 = vrot.slane %v1442_v17, %v3191_v43 }
 0x512   : > { %v3207_v51 = vadd.f32 %v2060_v44, %v1373_v49  ;;  %1385 = vadd.xlane.f32.xlu1 %v3204_v48  ;;  %v2352_v44 = vld [vmem:[%s3382_s26 + $0x20] sm:$0xff]   ;;  %v2356_v49 = vld [vmem:[%s3382_s26 + $0x30] sm:$0xff]   ;;  %v2358_v52 = vld [vmem:[%s3382_s26 + $0x38] sm:$0xff]  }
 0x513   : > { %2131 = vmatpush3.bf16.msra.mxu0 %v2352_v44 }
 0x514   : > { %1387 = vadd.xlane.f32.xlu0 %v3207_v51  ;;  %1537 = vmatpush1.bf16.msra.mxu1 %v2322_v20  ;;  %v1451_v20 = vrot.slane %v1442_v17, %v1002_v29  ;;  %v2100_v17 = vld [vmem:[#allocation13] ss:$0 sm:$0xff] }
 0x515   : > { %1538 = vmatprep.subr.bf16.mxu1 %v2327_v1  ;;  %2132 = vmatprep.subr.bf16.mxu0 %v2353_v45 }
 0x517   : > { %2133 = vmatpush3.bf16.msra.mxu0 %v2354_v46 }
 0x518   : > { %1539 = vmatpush1.bf16.msra.mxu1 %v2325_v2  ;;  %2134 = vmatprep.subr.bf16.mxu0 %v2355_v47 }
 0x519   : > { %1540 = vmatprep.subr.bf16.mxu1 %v2330_v3 }
 0x51b   : > { %2135 = vmatpush3.bf16.msra.mxu0 %v2356_v49 }
 0x51c   : > { %1541 = vmatpush1.bf16.msra.mxu1 %v2328_v4  ;;  %2136 = vmatprep.subr.bf16.mxu0 %v2357_v50 }
 0x51d   : > { %1542 = vmatprep.subr.bf16.mxu1 %v2333_v5 }
 0x51f   : > { %2137 = vmatpush3.bf16.msra.mxu0 %v2358_v52 }
 0x520   : > { %1543 = vmatpush1.bf16.msra.mxu1 %v2331_v6 }
 0x521   : > { %1544 = vmatprep.subr.bf16.mxu1 %v2336_v7 }
 0x524   : > { %1545 = vmatpush1.bf16.msra.mxu1 %v2334_v8 }
 0x525   : > { %1546 = vmatprep.subr.bf16.mxu1 %v2339_v9 }
 0x528   : > { %1547 = vmatpush1.bf16.msra.mxu1 %v2337_v10 }
 0x529   : > { %1548 = vmatprep.subr.bf16.mxu1 %v2342_v11 }
 0x52c   : > { %1549 = vmatpush1.bf16.msra.mxu1 %v2340_v12 }
 0x59f   : > { %v1386_v54 = vpop.xlane.xlu1 %1385 }
 0x5a0   : > { %v1389_v55 = vmul.f32 0.0125, %v1386_v54 }
 0x5a1   : > { %v1388_v56 = vpop.xlane.xlu0 %1387 }
 0x5a2   : > { %v1391_v57 = vsub.f32 %v3204_v48, %v1389_v55  ;;  %v1390_v58 = vmul.f32 0.0125, %v1388_v56 }
 0x5a4   : > { %v1392_v59 = vsub.f32 %v3207_v51, %v1390_v58  ;;  %v1393_v60 = vsel %vm942_vm1, %v1391_v57, 0.0 }
 0x5a5   : > { %v1395_v61 = vmul.f32 %v1393_v60, %v1393_v60 }
 0x5a6   : > { %v1394_v62 = vsel %vm942_vm1, %v1392_v59, 0.0 }
 0x5a7   : > { %1397 = vadd.xlane.f32.xlu1 %v1395_v61  ;;  %v1396_v63 = vmul.f32 %v1394_v62, %v1394_v62 }
 0x5ab   : > { %1399 = vadd.xlane.f32.xlu1 %v1396_v63 }
 0x634   : > { %v1398_v13 = vpop.xlane.xlu1 %1397 }
 0x635   : > { %v1401_v14 = vmul.f32 0.0125, %v1398_v13 }
 0x637   : > { %v1403_v15 = vadd.f32 1e-05, %v1401_v14 }
 0x638   : > { %v1400_v16 = vpop.xlane.xlu1 %1399 }
 0x639   : > { %2379 = vrsqrt.f32 %v1403_v15  ;;  %v1402_v18 = vmul.f32 0.0125, %v1400_v16 }
 0x63b   : > { %v1404_v19 = vadd.f32 1e-05, %v1402_v18 }
 0x63d   : > { %2381 = vrsqrt.f32 %v1404_v19 }
 0x643   : > { %v2380_v21 = vpop.eup %2379 }
 0x644   : > { %v1407_v22 = vmul.f32 %v2380_v21, %v1393_v60  ;;  %v2083_v21 = vld [vmem:[#allocation11] ss:$0 sm:$0xff] }
 0x646   : > { %v1415_v30 = vmul.f32 %v2061_v23, %v1407_v22 }
 0x647   : > { %v2382_v26 = vpop.eup %2381 }
 0x648   : > { %v1408_v27 = vmul.f32 %v2382_v26, %v1394_v62  ;;  %v1423_v33 = vadd.f32 %v2062_v31, %v1415_v30 }
 0x64a   : > { %v1416_v32 = vmul.f32 %v2061_v23, %v1408_v27 }
 0x64c   : > { %v1424_v34 = vadd.f32 %v2062_v31, %v1416_v32 }
 0x64e   : > { %v1425_v35 = vpack.c.bf16 %v1424_v34, %v1423_v33 }
 0x650   : > { %1567 = vmatmul.mubr.bf16.vlgmr.msra.gmra.mrb[4].mxu1 %v1425_v35 }
 0x723   : > { %v1568_v54 = vpop.f32.mrb[4].mxu1 }
 0x724   : > { %v1569_v55 = vadd.f32 %v1568_v54, %v1447_v53  ;;  %v1570_v56 = vpop.f32.mrb[5].mxu1  ;;  %v2101_v54 = vld [vmem:[#allocation14] ss:$0 sm:$0xff] }
 0x725   : > { %v1571_v57 = vadd.f32 %v1570_v56, %v1451_v20  ;;  %v1572_v58 = vpop.f32.mrb[6].mxu1 }
 0x726   : > { %v2079_v59 = vmul.f32 -1.442695, %v1569_v55  ;;  %v1573_v60 = vadd.f32 %v1572_v58, %v1447_v53  ;;  %v1574_v61 = vpop.f32.mrb[7].mxu1 }
 0x727   : > { %v2080_v62 = vmul.f32 -1.442695, %v1571_v57  ;;  %v1575_v63 = vadd.f32 %v1574_v61, %v1451_v20 }
 0x728   : > { %2383 = vpow2.f32 %v2079_v59  ;;  %v2081_v1 = vmul.f32 -1.442695, %v1573_v60 }
 0x729   : > { %2385 = vpow2.f32 %v2080_v62  ;;  %v2082_v2 = vmul.f32 -1.442695, %v1575_v63 }
 0x72a   : > { %2387 = vpow2.f32 %v2081_v1 }
 0x72b   : > { %2389 = vpow2.f32 %v2082_v2 }
 0x732   : > { %v2384_v43 = vpop.eup %2383 }
 0x733   : > { %v2386_v3 = vpop.eup %2385  ;;  %v1589_v28 = vadd.f32 1.0, %v2384_v43 }
 0x734   : > { %v2388_v29 = vpop.eup %2387  ;;  %v1590_v4 = vadd.f32 1.0, %v2386_v3 }
 0x735   : > { %v2390_v5 = vpop.eup %2389  ;;  %2391 = vrcp.f32 %v1589_v28  ;;  %v1591_v6 = vadd.f32 1.0, %v2388_v29 }
 0x736   : > { %2393 = vrcp.f32 %v1590_v4  ;;  %v1592_v7 = vadd.f32 1.0, %v2390_v5 }
 0x737   : > { %2395 = vrcp.f32 %v1591_v6 }
 0x738   : > { %2397 = vrcp.f32 %v1592_v7 }
 0x73f   : > { %v2392_v8 = vpop.eup %2391 }
 0x740   : > { %v2394_v9 = vpop.eup %2393  ;;  %v1601_v12 = vmul.f32 %v2392_v8, %v1569_v55 }
 0x741   : > { %v2396_v10 = vpop.eup %2395  ;;  %v1602_v14 = vmul.f32 %v2394_v9, %v1571_v57 }
 0x742   : > { %v2398_v11 = vpop.eup %2397  ;;  %v1603_v13 = vmul.f32 %v2396_v10, %v1573_v60 }
 0x743   : > { %v1604_v15 = vmul.f32 %v2398_v11, %v1575_v63 }
 0x744   : > { %v1605_v16 = vpack.c.bf16 %v1603_v13, %v1601_v12 }
 0x745   : > { %v1606_v18 = vpack.c.bf16 %v1604_v15, %v1602_v14 }
 0x747   : > { %1774 = vmatprep.mubr.bf16.mxu0 %v1606_v18 }
 0x748   : > { %1775 = vmatmul.mubr.bf16.vlgmr.msra.gmra.mrb[8].mxu0 %v1605_v16 }
 0x81b   : > { %v2138_v19 = vpop.f32.mrb[8].mxu0 }
 0x81c   : > { %v2139_v22 = vpop.f32.mrb[9].mxu0 }
 0x81d   : > { %v2140_v23 = vadd.f32 %v2139_v22, %v2138_v19  ;;  %v2141_v26 = vpop.f32.mrb[10].mxu0 }
 0x81e   : > { %v2142_v27 = vpop.f32.mrb[11].mxu0 }
 0x81f   : > { %v1777_v30 = vadd.f32 %v2140_v23, %v2083_v21  ;;  %v2143_v31 = vadd.f32 %v2142_v27, %v2141_v26 }
 0x821   : > { %v1783_v32 = vmul.f32 0.5, %v1777_v30  ;;  %v1780_v33 = vadd.f32 %v2143_v31, %v2083_v21 }
 0x823   : > { %v1784_v34 = vmul.f32 0.5, %v1780_v33  ;;  %v1785_v35 = vadd.f32 %v1783_v32, %v3204_v48 }
 0x825   : > { %1789 = vadd.xlane.f32.xlu0 %v1785_v35  ;;  %v1786_v36 = vadd.f32 %v1784_v34, %v3207_v51 }
 0x827   : > { %1791 = vadd.xlane.f32.xlu1 %v1786_v36 }
 0x8b2   : > { %v1790_v37 = vpop.xlane.xlu0 %1789 }
 0x8b3   : > { %v1793_v0 = vmul.f32 0.0125, %v1790_v37 }
 0x8b4   : > { %v1792_v38 = vpop.xlane.xlu1 %1791 }
 0x8b5   : > { %v1795_v24 = vsub.f32 %v1785_v35, %v1793_v0  ;;  %v1794_v39 = vmul.f32 0.0125, %v1792_v38 }
 0x8b7   : > { %v1796_v40 = vsub.f32 %v1786_v36, %v1794_v39  ;;  %v1797_v41 = vsel %vm942_vm1, %v1795_v24, 0.0 }
 0x8b8   : > { %v1799_v42 = vmul.f32 %v1797_v41, %v1797_v41 }
 0x8b9   : > { %v1798_v44 = vsel %vm942_vm1, %v1796_v40, 0.0 }
 0x8ba   : > { %1801 = vadd.xlane.f32.xlu0 %v1799_v42  ;;  %v1800_v45 = vmul.f32 %v1798_v44, %v1798_v44 }
 0x8bc   : > { %1803 = vadd.xlane.f32.xlu1 %v1800_v45 }
 0x947   : > { %v1802_v48 = vpop.xlane.xlu0 %1801 }
 0x948   : > { %v1805_v51 = vmul.f32 0.0125, %v1802_v48 }
 0x949   : > { %v1804_v46 = vpop.xlane.xlu1 %1803 }
 0x94a   : > { %v1807_v47 = vadd.f32 1e-05, %v1805_v51  ;;  %v1806_v49 = vmul.f32 0.0125, %v1804_v46 }
 0x94c   : > { %2399 = vrsqrt.f32 %v1807_v47  ;;  %v1808_v50 = vadd.f32 1e-05, %v1806_v49 }
 0x94e   : > { %2401 = vrsqrt.f32 %v1808_v50 }
 0x956   : > { %v2400_v52 = vpop.eup %2399 }
 0x957   : > { %v1811_v53 = vmul.f32 %v2400_v52, %v1797_v41 }
 0x958   : > { %v2402_v20 = vpop.eup %2401 }
 0x959   : > { %v1819_v55 = vmul.f32 %v2100_v17, %v1811_v53  ;;  %v1812_v25 = vmul.f32 %v2402_v20, %v1798_v44 }
 0x95b   : > { %v1827_v56 = vadd.f32 %v2101_v54, %v1819_v55  ;;  %v1820_v57 = vmul.f32 %v2100_v17, %v1812_v25 }
 0x95d   : > { %1829 = vst [vmem:[%s803_s28] sm:$0xff] %v1827_v56  ;;  %v1828_v58 = vadd.f32 %v2101_v54, %v1820_v57 }
 0x95f   : > { %1830 = vst [vmem:[%s803_s28 + $0x8] sm:$0xff] %v1828_v58 }
 0x960 PF: > { %s36_s2 = sadd.s32 1, %s2653_s2  }
 0x961   : > { %p33_p7 = scmp.ge.s32.totalorder %s36_s2, 4  }
 0x963   :  { %35 = sbr.rel (!%p33_p7) target bundleno = 15 (0xf), region = 173 }
 0x96a   :  { %1853 = vsyncpa [#allocation4], 1 }
 0x96b   :  { %1855 = vsyncpa [#allocation4 + $0x1], 1 }
 0x96c   :  { %1856 = vsyncpa [#allocation6], 1 }
 0x96d   :  { %1857 = vsyncpa [#allocation9], 1 }
 0x96e   :  { %1858 = vsyncpa [#allocation12], 1 }
 0x96f   :  { %1859 = vsyncpa [#allocation15], 1 }

// kernel: strong_classifier_forward.27
= control target key start
LH: loop header
LB: loop body
LE: loop exit
PB: predicated region body
PF: predicated region fallthrough
CT: control target
= control target key end

     0   :  { %10 = vsyncpa [#allocation4], 0  ;;  %s1067_s18 = smov 0   ;;  %s1433_s0 = inlined_call_operand.vmem [shape: f32[16,2,128], index: 0, kind: input, shape index: {}]   ;;  %s1434_s1 = inlined_call_operand.vmem [shape: f32[128,128], index: 1, kind: input, shape index: {}]   ;;  %s1435_s2 = inlined_call_operand.vmem [shape: f32[1,128], index: 2, kind: input, shape index: {}]   ;;  %s1436_s3 = inlined_call_operand.vmem [shape: f32[128,640], index: 3, kind: input, shape index: {}]   ;;  %s1437_s4 = inlined_call_operand.vmem [shape: f32[1,640], index: 4, kind: input, shape index: {}]   ;;  %s1438_s5 = inlined_call_operand.hbm [shape: f32[2,640], index: 5, kind: output, shape index: {}]  }
   0x1 LB: > { %s1073_s19 = sadd.s32 4294967295, %s1029_s18   ;;  %p746_p0 = scmp.ge.s32.totalorder %s1029_s18, 1  ;;  %s1029_s18 = sphi %s1067_s18, %s16_s18  }
   0x2   : > { %p184_p1 = scmp.lt.s32.totalorder %s1029_s18, 3 }
   0x4   : > { %p185_p2 = pnand %p746_p0, %p184_p1 }
   0x5   : > { %s747_s20 = sshll.u32 (!%p185_p2), %s1073_s19, 3  ;;  %p749_p4 = scmp.ne.s32.totalorder (!%p185_p2), %s1073_s19, 0 }
   0x6   : > { %188 = sbr.rel (%p185_p2) target bundleno = 547 (0x223), region = 40  ;;  %p208_p3 = scmp.lt.s32.totalorder (!%p185_p2), %s747_s20, 15 }
   0xd   : > { %s1440_s20 = smov (!%p208_p3, %s747_s20), 15  ;;  %216 = sbr.rel (%p749_p4) target bundleno = 20 (0x14), region = 44 }
   0xe   : > { %s748_s21 = sshll.u32 %s1440_s20, 1  ;;  %v1031_v0 = vmov (!%p749_p4), 0.0  }
   0xf   : > { %s211_s24 = scalar_lea.vmem %s1433_s0, %s748_s21  ;;  %217 = vst [vmem:[#allocation2] sm:$0x3] (!%p749_p4), %v1031_v0 }
  0x14 PF: > { %v219_v1 = vld [vmem:[%s211_s24] sm:$0x3]  ;;  %v220_v2 = vld [vmem:[%s211_s24 + $0x2] sm:$0x3]  ;;  %v221_v3 = vld [vmem:[%s211_s24 + $0x4] sm:$0x3] }
  0x15   : > { %v222_v4 = vld [vmem:[%s211_s24 + $0x6] sm:$0x3]  ;;  %vm227_vm0 = vcmask 1041408   ;;  %v223_v8 = vld [vmem:[%s211_s24 + $0x8] sm:$0x3]  ;;  %p750_p5 = scmp.ne.s32.totalorder %s1073_s19, 1 }
  0x16   : > { %v228_v5 = vsel %vm227_vm0, %v219_v1, 0.0  ;;  %v229_v6 = vsel %vm227_vm0, %v220_v2, 0.0  ;;  %v231_v7 = vsel %vm227_vm0, %v221_v3, 0.0  ;;  %v233_v10 = vsel %vm227_vm0, %v222_v4, 0.0  ;;  %v224_v11 = vld [vmem:[%s211_s24 + $0xa] sm:$0x3] }
  0x17   : > { %v230_v9 = vadd.f32 %v229_v6, %v228_v5  ;;  %v235_v13 = vsel %vm227_vm0, %v223_v8, 0.0  ;;  %v225_v14 = vld [vmem:[%s211_s24 + $0xc] sm:$0x3]  ;;  %v237_v16 = vsel %vm227_vm0, %v224_v11, 0.0  ;;  %v226_v17 = vld [vmem:[%s211_s24 + $0xe] sm:$0x3] }
  0x18   : > { %v239_v19 = vsel %vm227_vm0, %v225_v14, 0.0  ;;  %v241_v21 = vsel %vm227_vm0, %v226_v17, 0.0  ;;  %v218_v23 = vld [vmem:[#allocation2] sm:$0x3]  ;;  %v252_v27 = vld [vmem:[%s1434_s1 + $0x8] sm:$0xff] (!%p750_p5)  ;;  %v253_v28 = vld [vmem:[%s1434_s1 + $0x10] sm:$0xff] (!%p750_p5) }
  0x19   : > { %v232_v12 = vadd.f32 %v231_v7, %v230_v9  ;;  %v251_v26 = vld [vmem:[%s1434_s1] sm:$0xff] (!%p750_p5)  ;;  %v1032_v29 = vmov (!%p750_p5), 0.0|0.0   ;;  %v254_v31 = vld [vmem:[%s1434_s1 + $0x18] sm:$0xff] (!%p750_p5)  ;;  %vm1033_vm1 = vmmov (!%p750_p5), 0   ;;  %v1034_v32 = vmov (!%p750_p5), 0.0   ;;  %v256_v35 = vld [vmem:[%s1434_s1 + $0x28] sm:$0xff] (!%p750_p5) }
  0x1a   : > { %861 = vmatprep.subr.bf16.mxu0 (!%p750_p5), %v1032_v29  ;;  %v862_v30 = vpack.c.bf16 (!%p750_p5), %v252_v27, %v251_v26  ;;  %823 = vmatprep.mubr.msk.f32.mxu0 (!%p750_p5), %vm1033_vm1, %v1034_v32  ;;  %v865_v33 = vpack.c.bf16 (!%p750_p5), %v254_v31, %v253_v28  ;;  %v255_v34 = vld [vmem:[%s1434_s1 + $0x20] sm:$0xff] (!%p750_p5)  ;;  %v346_v36 = vld [vmem:[%s1436_s3 + $0x8] sm:$0xff] (!%p750_p5)  ;;  %v351_v37 = vld [vmem:[%s1436_s3 + $0x30] sm:$0xff] (!%p750_p5) }
  0x1b   : > { %v234_v15 = vadd.f32 %v233_v10, %v232_v12  ;;  %516 = vmatprep.mubr.f32.mxu1 (!%p750_p5), %v1034_v32  ;;  %v345_v38 = vld [vmem:[%s1436_s3] sm:$0xff] (!%p750_p5)  ;;  %v350_v39 = vld [vmem:[%s1436_s3 + $0x28] sm:$0xff] (!%p750_p5)  ;;  %v868_v40 = vpack.c.bf16 (!%p750_p5), %v256_v35, %v255_v34  ;;  %v257_v41 = vld [vmem:[%s1434_s1 + $0x30] sm:$0xff] (!%p750_p5)  ;;  %v885_v42 = vpack.c.bf16 (!%p750_p5), %v351_v37, %v346_v36 }
  0x1c   : > { %863 = vmatpush3.bf16.msra.mxu0 (!%p750_p5), %v862_v30  ;;  %v887_v43 = vpack.c.bf16 (!%p750_p5), %v350_v39, %v345_v38  ;;  %v258_v44 = vld [vmem:[%s1434_s1 + $0x38] sm:$0xff] (!%p750_p5)  ;;  %v361_v46 = vld [vmem:[%s1436_s3 + $0x80] sm:$0xff] (!%p750_p5)  ;;  %v355_v48 = vld [vmem:[%s1436_s3 + $0x50] sm:$0xff] (!%p750_p5) }
  0x1d   : > { %v236_v18 = vadd.f32 %v235_v13, %v234_v15  ;;  %864 = vmatprep.subr.bf16.mxu0 (!%p750_p5), %v1032_v29  ;;  %v356_v45 = vld [vmem:[%s1436_s3 + $0x58] sm:$0xff] (!%p750_p5)  ;;  %886 = vmatprep.subr.bf16.mxu1 (!%p750_p5), %v885_v42  ;;  %v871_v51 = vpack.c.bf16 (!%p750_p5), %v258_v44, %v257_v41  ;;  %v366_v52 = vld [vmem:[%s1436_s3 + $0xa8] sm:$0xff] (!%p750_p5)  ;;  %v371_v53 = vld [vmem:[%s1436_s3 + $0xd0] sm:$0xff] (!%p750_p5) }
  0x1e   : > { %v889_v47 = vpack.c.bf16 (!%p750_p5), %v361_v46, %v356_v45  ;;  %v360_v49 = vld [vmem:[%s1436_s3 + $0x78] sm:$0xff] (!%p750_p5)  ;;  %888 = vmatpush1.bf16.msra.mxu1 (!%p750_p5), %v887_v43  ;;  %v365_v54 = vld [vmem:[%s1436_s3 + $0xa0] sm:$0xff] (!%p750_p5)  ;;  %v260_v56 = vld [vmem:[%s1434_s1 + $0x48] sm:$0xff] (!%p750_p5)  ;;  %v893_v57 = vpack.c.bf16 (!%p750_p5), %v371_v53, %v366_v52 }
  0x1f   : > { %v238_v20 = vadd.f32 %v237_v16, %v236_v18  ;;  %v891_v50 = vpack.c.bf16 (!%p750_p5), %v360_v49, %v355_v48  ;;  %v259_v55 = vld [vmem:[%s1434_s1 + $0x40] sm:$0xff] (!%p750_p5)  ;;  %v370_v58 = vld [vmem:[%s1436_s3 + $0xc8] sm:$0xff] (!%p750_p5)  ;;  %v376_v59 = vld [vmem:[%s1436_s3 + $0xf8] sm:$0xff] (!%p750_p5) }
  0x20   : > { %866 = vmatpush3.bf16.msra.mxu0 (!%p750_p5), %v865_v33  ;;  %890 = vmatprep.subr.bf16.mxu1 (!%p750_p5), %v889_v47  ;;  %v895_v60 = vpack.c.bf16 (!%p750_p5), %v370_v58, %v365_v54  ;;  %v381_v61 = vld [vmem:[%s1436_s3 + $0x120] sm:$0xff] (!%p750_p5)  ;;  %v874_v62 = vpack.c.bf16 (!%p750_p5), %v260_v56, %v259_v55  ;;  %v261_v63 = vld [vmem:[%s1434_s1 + $0x50] sm:$0xff] (!%p750_p5)  ;;  %v380_v2 = vld [vmem:[%s1436_s3 + $0x118] sm:$0xff] (!%p750_p5) }
  0x21   : > { %v240_v22 = vadd.f32 %v239_v19, %v238_v20  ;;  %248 = sbr.rel (%p750_p5) target bundleno = 522 (0x20a), region = 48  ;;  %867 = vmatprep.subr.bf16.mxu0 (!%p750_p5), %v1032_v29  ;;  %v897_v0 = vpack.c.bf16 (!%p750_p5), %v381_v61, %v376_v59  ;;  %v375_v1 = vld [vmem:[%s1436_s3 + $0xf0] sm:$0xff] (!%p750_p5)  ;;  %v262_v3 = vld [vmem:[%s1434_s1 + $0x58] sm:$0xff] (!%p750_p5)  ;;  %v386_v4 = vld [vmem:[%s1436_s3 + $0x148] sm:$0xff] (!%p750_p5) }
  0x22   : > { %892 = vmatpush1.bf16.msra.mxu1 (!%p750_p5), %v891_v50  ;;  %v391_v5 = vld [vmem:[%s1436_s3 + $0x170] sm:$0xff] (!%p750_p5)  ;;  %v899_v6 = vpack.c.bf16 (!%p750_p5), %v380_v2, %v375_v1  ;;  %v877_v7 = vpack.c.bf16 (!%p750_p5), %v262_v3, %v261_v63  ;;  %v263_v8 = vld [vmem:[%s1434_s1 + $0x60] sm:$0xff] (!%p750_p5)  ;;  %v390_v11 = vld [vmem:[%s1436_s3 + $0x168] sm:$0xff] (!%p750_p5) }
  0x23   : > { %v242_v24 = vadd.f32 %v241_v21, %v240_v22  ;;  %894 = vmatprep.subr.bf16.mxu1 (!%p750_p5), %v893_v57  ;;  %v901_v9 = vpack.c.bf16 (!%p750_p5), %v391_v5, %v386_v4  ;;  %v385_v10 = vld [vmem:[%s1436_s3 + $0x140] sm:$0xff] (!%p750_p5)  ;;  %v264_v12 = vld [vmem:[%s1434_s1 + $0x68] sm:$0xff] (!%p750_p5)  ;;  %v396_v13 = vld [vmem:[%s1436_s3 + $0x198] sm:$0xff] (!%p750_p5) }
  0x24   : > { %869 = vmatpush3.bf16.msra.mxu0 (!%p750_p5), %v868_v40  ;;  %v401_v14 = vld [vmem:[%s1436_s3 + $0x1c0] sm:$0xff] (!%p750_p5)  ;;  %v903_v15 = vpack.c.bf16 (!%p750_p5), %v390_v11, %v385_v10  ;;  %v880_v16 = vpack.c.bf16 (!%p750_p5), %v264_v12, %v263_v8  ;;  %v265_v17 = vld [vmem:[%s1434_s1 + $0x70] sm:$0xff] (!%p750_p5)  ;;  %v400_v20 = vld [vmem:[%s1436_s3 + $0x1b8] sm:$0xff] (!%p750_p5) }
  0x25   : > { %v243_v25 = vadd.f32 %v242_v24, %v218_v23  ;;  %870 = vmatprep.subr.bf16.mxu0 (!%p750_p5), %v1032_v29  ;;  %v905_v18 = vpack.c.bf16 (!%p750_p5), %v401_v14, %v396_v13  ;;  %v395_v19 = vld [vmem:[%s1436_s3 + $0x190] sm:$0xff] (!%p750_p5)  ;;  %v266_v21 = vld [vmem:[%s1434_s1 + $0x78] sm:$0xff] (!%p750_p5)  ;;  %v406_v22 = vld [vmem:[%s1436_s3 + $0x1e8] sm:$0xff] (!%p750_p5) }
  0x26   : > { %896 = vmatpush1.bf16.msra.mxu1 (!%p750_p5), %v895_v60  ;;  %v411_v23 = vld [vmem:[%s1436_s3 + $0x210] sm:$0xff] (!%p750_p5)  ;;  %v348_v24 = vld [vmem:[%s1436_s3 + $0x18] sm:$0xff] (!%p750_p5)  ;;  %v907_v26 = vpack.c.bf16 (!%p750_p5), %v400_v20, %v395_v19  ;;  %v883_v27 = vpack.c.bf16 (!%p750_p5), %v266_v21, %v265_v17  ;;  %v405_v31 = vld [vmem:[%s1436_s3 + $0x1e0] sm:$0xff] (!%p750_p5) }
  0x27   : > { %244 = vst [vmem:[#allocation2] sm:$0x3] %v243_v25  ;;  %898 = vmatprep.subr.bf16.mxu1 (!%p750_p5), %v897_v0  ;;  %v353_v25 = vld [vmem:[%s1436_s3 + $0x40] sm:$0xff] (!%p750_p5)  ;;  %v909_v30 = vpack.c.bf16 (!%p750_p5), %v411_v23, %v406_v22  ;;  %v410_v33 = vld [vmem:[%s1436_s3 + $0x208] sm:$0xff] (!%p750_p5)  ;;  %v347_v35 = vld [vmem:[%s1436_s3 + $0x10] sm:$0xff] (!%p750_p5) }
  0x28   : > { %872 = vmatpush3.bf16.msra.mxu0 %v871_v51  ;;  %v917_v34 = vpack.c.bf16 %v353_v25, %v348_v24  ;;  %v352_v36 = vld [vmem:[%s1436_s3 + $0x38] sm:$0xff]  ;;  %v358_v37 = vld [vmem:[%s1436_s3 + $0x68] sm:$0xff]  ;;  %v363_v38 = vld [vmem:[%s1436_s3 + $0x90] sm:$0xff]  ;;  %v911_v40 = vpack.c.bf16 %v410_v33, %v405_v31 }
  0x29   : > { %873 = vmatprep.subr.bf16.mxu0 %v1032_v29  ;;  %v919_v41 = vpack.c.bf16 %v352_v36, %v347_v35  ;;  %v921_v42 = vpack.c.bf16 %v363_v38, %v358_v37  ;;  %v357_v43 = vld [vmem:[%s1436_s3 + $0x60] sm:$0xff]  ;;  %v362_v44 = vld [vmem:[%s1436_s3 + $0x88] sm:$0xff]  ;;  %v368_v45 = vld [vmem:[%s1436_s3 + $0xb8] sm:$0xff] }
  0x2a   : > { %900 = vmatpush1.bf16.msra.mxu1 %v899_v6  ;;  %v373_v46 = vld [vmem:[%s1436_s3 + $0xe0] sm:$0xff]  ;;  %v923_v47 = vpack.c.bf16 %v362_v44, %v357_v43  ;;  %v367_v49 = vld [vmem:[%s1436_s3 + $0xb0] sm:$0xff]  ;;  %v372_v50 = vld [vmem:[%s1436_s3 + $0xd8] sm:$0xff] }
  0x2b   : > { %902 = vmatprep.subr.bf16.mxu1 %v901_v9  ;;  %v925_v48 = vpack.c.bf16 %v373_v46, %v368_v45  ;;  %v378_v51 = vld [vmem:[%s1436_s3 + $0x108] sm:$0xff]  ;;  %v383_v52 = vld [vmem:[%s1436_s3 + $0x130] sm:$0xff]  ;;  %v927_v53 = vpack.c.bf16 %v372_v50, %v367_v49  ;;  %v377_v55 = vld [vmem:[%s1436_s3 + $0x100] sm:$0xff] }
  0x2c   : > { %875 = vmatpush3.bf16.msra.mxu0 %v874_v62  ;;  %v929_v54 = vpack.c.bf16 %v383_v52, %v378_v51  ;;  %v382_v56 = vld [vmem:[%s1436_s3 + $0x128] sm:$0xff]  ;;  %v388_v57 = vld [vmem:[%s1436_s3 + $0x158] sm:$0xff]  ;;  %v393_v58 = vld [vmem:[%s1436_s3 + $0x180] sm:$0xff] }
  0x2d   : > { %876 = vmatprep.subr.bf16.mxu0 %v1032_v29  ;;  %v931_v59 = vpack.c.bf16 %v382_v56, %v377_v55  ;;  %v933_v60 = vpack.c.bf16 %v393_v58, %v388_v57  ;;  %v387_v61 = vld [vmem:[%s1436_s3 + $0x150] sm:$0xff]  ;;  %v392_v62 = vld [vmem:[%s1436_s3 + $0x178] sm:$0xff]  ;;  %v398_v63 = vld [vmem:[%s1436_s3 + $0x1a8] sm:$0xff] }
  0x2e   : > { %904 = vmatpush1.bf16.msra.mxu1 %v903_v15  ;;  %v249_v28 = vld [vmem:[#allocation2] sm:$0x3]  ;;  %v403_v0 = vld [vmem:[%s1436_s3 + $0x1d0] sm:$0xff]  ;;  %v935_v1 = vpack.c.bf16 %v392_v62, %v387_v61  ;;  %v402_v4 = vld [vmem:[%s1436_s3 + $0x1c8] sm:$0xff] }
  0x2f   : > { %906 = vmatprep.subr.bf16.mxu1 %v905_v18  ;;  %v250_v39 = vmul.f32 0.0625, %v249_v28  ;;  %v937_v2 = vpack.c.bf16 %v403_v0, %v398_v63  ;;  %v397_v3 = vld [vmem:[%s1436_s3 + $0x1a0] sm:$0xff]  ;;  %v408_v5 = vld [vmem:[%s1436_s3 + $0x1f8] sm:$0xff]  ;;  %v407_v9 = vld [vmem:[%s1436_s3 + $0x1f0] sm:$0xff] }
  0x30   : > { %878 = vmatpush3.bf16.msra.mxu0 %v877_v7  ;;  %v413_v6 = vld [vmem:[%s1436_s3 + $0x220] sm:$0xff]  ;;  %v939_v7 = vpack.c.bf16 %v402_v4, %v397_v3  ;;  %v412_v10 = vld [vmem:[%s1436_s3 + $0x218] sm:$0xff]  ;;  %v415_v15 = vld [vmem:[%s1436_s3 + $0x230] sm:$0xff] }
  0x31   : > { %879 = vmatprep.subr.bf16.mxu0 %v1032_v29  ;;  %v941_v8 = vpack.c.bf16 %v413_v6, %v408_v5  ;;  %v943_v11 = vpack.c.bf16 %v412_v10, %v407_v9  ;;  %v416_v12 = vld [vmem:[%s1436_s3 + $0x238] sm:$0xff]  ;;  %v421_v13 = vld [vmem:[%s1436_s3 + $0x260] sm:$0xff]  ;;  %v418_v17 = vld [vmem:[%s1436_s3 + $0x248] sm:$0xff] }
  0x32   : > { %908 = vmatpush1.bf16.msra.mxu1 %v907_v26  ;;  %v913_v14 = vpack.c.bf16 %v421_v13, %v416_v12  ;;  %v423_v19 = vld [vmem:[%s1436_s3 + $0x270] sm:$0xff]  ;;  %v417_v20 = vld [vmem:[%s1436_s3 + $0x240] sm:$0xff]  ;;  %v422_v21 = vld [vmem:[%s1436_s3 + $0x268] sm:$0xff] }
  0x33   : > { %910 = vmatprep.subr.bf16.mxu1 %v909_v30  ;;  %v945_v22 = vpack.c.bf16 %v423_v19, %v418_v17  ;;  %v947_v23 = vpack.c.bf16 %v422_v21, %v417_v20  ;;  %v751_v24 = vld [vmem:[%s1435_s2] ss:$0 sm:$0xff]  ;;  %v354_v26 = vld [vmem:[%s1436_s3 + $0x48] sm:$0xff]  ;;  %v364_v35 = vld [vmem:[%s1436_s3 + $0x98] sm:$0xff] }
  0x34   : > { %881 = vmatpush3.bf16.msra.mxu0 %v880_v16  ;;  %v420_v16 = vld [vmem:[%s1436_s3 + $0x258] sm:$0xff]  ;;  %v349_v25 = vld [vmem:[%s1436_s3 + $0x20] sm:$0xff]  ;;  %v374_v38 = vld [vmem:[%s1436_s3 + $0xe8] sm:$0xff] }
  0x35   : > { %882 = vmatprep.subr.bf16.mxu0 %v1032_v29  ;;  %v915_v18 = vpack.c.bf16 %v420_v16, %v415_v15  ;;  %v950_v31 = vpack.c.bf16 %v354_v26, %v349_v25  ;;  %v369_v37 = vld [vmem:[%s1436_s3 + $0xc0] sm:$0xff]  ;;  %v394_v43 = vld [vmem:[%s1436_s3 + $0x188] sm:$0xff]  ;;  %v399_v45 = vld [vmem:[%s1436_s3 + $0x1b0] sm:$0xff] }
  0x36   : > { %912 = vmatpush1.bf16.msra.mxu1 %v911_v40  ;;  %v379_v40 = vld [vmem:[%s1436_s3 + $0x110] sm:$0xff]  ;;  %v404_v46 = vld [vmem:[%s1436_s3 + $0x1d8] sm:$0xff]  ;;  %v414_v49 = vld [vmem:[%s1436_s3 + $0x228] sm:$0xff] }
  0x37   : > { %914 = vmatprep.subr.bf16.mxu1 %v913_v14  ;;  %v419_v51 = vld [vmem:[%s1436_s3 + $0x250] sm:$0xff]  ;;  %v424_v52 = vld [vmem:[%s1436_s3 + $0x278] sm:$0xff]  ;;  %v425_v58 = vld [vmem:[%s1437_s4] sm:$0x1f] }
  0x38   : > { %884 = vmatpush3.bf16.msra.mxu0 %v883_v27 }
  0x39   : > { %918 = vmatprep.subr.bf16.mxu0 %v917_v34  ;;  %v359_v34 = vld [vmem:[%s1436_s3 + $0x70] sm:$0xff] }
  0x3a   : > { %916 = vmatpush1.bf16.msra.mxu1 %v915_v18  ;;  %v953_v36 = vpack.c.bf16 %v364_v35, %v359_v34 }
  0x3b   : > { %824 = vmatmul.mubr.f32.vlgmr.msra.gmra.mrb[0].mxu0 %v250_v39  ;;  %949 = vmatprep.subr.bf16.mxu1 %v1032_v29  ;;  %v956_v39 = vpack.c.bf16 %v374_v38, %v369_v37 }
  0x3c   : > { %920 = vmatpush1.bf16.msra.mxu0 %v919_v41  ;;  %587 = vmatprep.mubr.f32.mxu0 %v1034_v32 }
  0x3d   : > { %922 = vmatprep.subr.bf16.mxu0 %v921_v42  ;;  %v389_v42 = vld [vmem:[%s1436_s3 + $0x160] sm:$0xff] }
  0x3e   : > { %v962_v44 = vpack.c.bf16 %v394_v43, %v389_v42 }
  0x40   : > { %924 = vmatpush1.bf16.msra.mxu0 %v923_v47  ;;  %v965_v47 = vpack.c.bf16 %v404_v46, %v399_v45 }
  0x41   : > { %926 = vmatprep.subr.bf16.mxu0 %v925_v48  ;;  %v409_v48 = vld [vmem:[%s1436_s3 + $0x200] sm:$0xff] }
  0x42   : > { %v968_v50 = vpack.c.bf16 %v414_v49, %v409_v48 }
  0x44   : > { %928 = vmatpush1.bf16.msra.mxu0 %v927_v53  ;;  %v971_v53 = vpack.c.bf16 %v424_v52, %v419_v51 }
  0x45   : > { %930 = vmatprep.subr.bf16.mxu0 %v929_v54  ;;  %v427_v54 = vlaneseq }
  0x47   : > { %v428_v55 = vshrl.u32 %v427_v54, 7 }
  0x48   : > { %932 = vmatpush1.bf16.msra.mxu0 %v931_v59 }
  0x49   : > { %934 = vmatprep.subr.bf16.mxu0 %v933_v60  ;;  %v429_v56 = vsub.s32 0, %v428_v55  ;;  %v437_v57 = vsub.s32 2, %v428_v55  ;;  %v433_v59 = vsub.s32 1, %v428_v55  ;;  %v1035_v60 = vmov 1983009808  }
  0x4a   : > { %v672_v61 = vunpack.c.l.s4 %v1035_v60  ;;  %v441_v62 = vsub.s32 3, %v428_v55  ;;  %v445_v17 = vsub.s32 4, %v428_v55 }
  0x4b   : > { %v430_v63 = vrot.slane %v425_v58, %v429_v56  ;;  %v438_v0 = vrot.slane %v425_v58, %v437_v57 }
  0x4c   : > { %936 = vmatpush1.bf16.msra.mxu0 %v935_v1  ;;  %v434_v1 = vrot.slane %v425_v58, %v433_v59  ;;  %v442_v3 = vrot.slane %v425_v58, %v441_v62  ;;  %v446_v18 = vrot.slane %v425_v58, %v445_v17 }
  0x4d   : > { %938 = vmatprep.subr.bf16.mxu0 %v937_v2  ;;  %v673_v2 = vunpack.c.0.s8 %v672_v61 }
  0x4f   : > { %v676_v10 = vsub.s32 %v673_v2, %v428_v55 }
  0x50   : > { %940 = vmatpush1.bf16.msra.mxu0 %v939_v7 }
  0x51   : > { %942 = vmatprep.subr.bf16.mxu0 %v941_v8 }
  0x54   : > { %944 = vmatpush1.bf16.msra.mxu0 %v943_v11 }
  0x55   : > { %946 = vmatprep.subr.bf16.mxu0 %v945_v22 }
  0x58   : > { %948 = vmatpush1.bf16.msra.mxu0 %v947_v23 }
 0x10e   : > { %v340_v27 = vpop.f32.mrb[0].mxu0 }
 0x10f   : > { %v341_v28 = vadd.f32 %v751_v24, %v340_v27  ;;  %v825_v30 = vpop.f32.mrb[1].mxu0 }
 0x111   : > { %v344_v33 = vmax.f32 %v341_v28, 0.0 }
 0x113   : > { %517 = vmatmul.mubr.f32.vlgmr.msra.gmra.mrb[0].mxu1 %v344_v33  ;;  %588 = vmatmul.mubr.f32.vlgmr.msra.gmra.mrb[2].mxu0 %v344_v33 }
 0x114   : > { %951 = vmatpush3.bf16.msra.mxu1 %v950_v31  ;;  %858 = vmatprep.mubr.msk.f32.mxu1 %vm1033_vm1, %v1034_v32  ;;  %v384_v32 = vld [vmem:[%s1436_s3 + $0x138] sm:$0xff] }
 0x115   : > { %952 = vmatprep.subr.bf16.mxu1 %v1032_v29  ;;  %v959_v41 = vpack.c.bf16 %v384_v32, %v379_v40 }
 0x118   : > { %954 = vmatpush3.bf16.msra.mxu1 %v953_v36 }
 0x119   : > { %955 = vmatprep.subr.bf16.mxu1 %v1032_v29 }
 0x11c   : > { %957 = vmatpush3.bf16.msra.mxu1 %v956_v39 }
 0x11d   : > { %958 = vmatprep.subr.bf16.mxu1 %v1032_v29 }
 0x120   : > { %960 = vmatpush3.bf16.msra.mxu1 %v959_v41 }
 0x121   : > { %961 = vmatprep.subr.bf16.mxu1 %v1032_v29 }
 0x124   : > { %963 = vmatpush3.bf16.msra.mxu1 %v962_v44 }
 0x125   : > { %964 = vmatprep.subr.bf16.mxu1 %v1032_v29 }
 0x128   : > { %966 = vmatpush3.bf16.msra.mxu1 %v965_v47 }
 0x129   : > { %967 = vmatprep.subr.bf16.mxu1 %v1032_v29 }
 0x12c   : > { %969 = vmatpush3.bf16.msra.mxu1 %v968_v50 }
 0x12d   : > { %970 = vmatprep.subr.bf16.mxu1 %v1032_v29 }
 0x130   : > { %972 = vmatpush3.bf16.msra.mxu1 %v971_v53 }
 0x133   : > { %859 = vmatmul.mubr.f32.vlgmr.msra.gmra.mrb[2].mxu1 %v344_v33 }
 0x1e6   : > { %v518_v29 = vpop.f32.mrb[0].mxu1  ;;  %v589_v4 = vpop.f32.mrb[2].mxu0 }
 0x1e7   : > { %v519_v5 = vadd.f32 %v518_v29, %v430_v63  ;;  %v590_v6 = vadd.f32 %v589_v4, %v438_v0  ;;  %v520_v7 = vpop.f32.mrb[1].mxu1  ;;  %v591_v8 = vpop.f32.mrb[3].mxu0 }
 0x1e8   : > { %v521_v9 = vadd.f32 %v520_v7, %v434_v1  ;;  %v592_v11 = vadd.f32 %v591_v8, %v442_v3 }
 0x1ea   : > { %v669_v12 = vcombine.low %v519_v5, %v521_v9  ;;  %v670_v13 = vcombine.low %v590_v6, %v592_v11 }
 0x1ec   : > { %v677_v14 = vrot.slane %v669_v12, %v676_v10  ;;  %v684_v15 = vrot.slane %v670_v13, %v676_v10 }
 0x1ee   : > { %v685_v16 = vcombine.low %v677_v14, %v684_v15 }
 0x1f0   : > { %695 = vst [vmem:[#allocation3] sm:$0xff] %v685_v16 }
 0x206   : > { %v660_v19 = vpop.f32.mrb[2].mxu1 }
 0x207   : > { %v661_v20 = vadd.f32 %v660_v19, %v446_v18  ;;  %v860_v21 = vpop.f32.mrb[3].mxu1 }
 0x209   : > { %752 = vst.sshfl [vmem:[#allocation3 + $0x8] sm:$0x3 pattern:$0x76325410] %v661_v20 }
 0x20a PF: > { %p977_p6 = scmp.eq.s32.totalorder %s1073_s19, 1  ;;  %s1036_s12 = smov [#allocation3]  }
 0x20b   : > { %s704_s13 = sshll.u32 %s1036_s12, 4  ;;  %s705_s13 = int_to_ptr.vmem [resolvable:$true] %s704_s13 }
 0x20c   : > { %s993_s14 = scalar_lea.vmem %s705_s13, 160  ;;  %p1000_p10 = scmp.lt.s32.totalorder %s705_s13, %s705_s13 }
 0x20d   : > { %p994_p7 = scmp.ne.s32.totalorder %s705_s13, %s993_s14  ;;  %p1001_p11 = scmp.lt.s32.totalorder %s993_s14, %s993_s14 }
 0x20f   : > { %p995_p8 = pnand %p994_p7, %p977_p6  ;;  %p1002_p12 = por %p1001_p11, %p1000_p10 }
 0x211   : > { %p996_p9 = pneg %p995_p8 }
 0x213   : > { %p1003_p13 = pnand %p1002_p12, %p996_p9 }
 0x215   : > { %1006 = shalt.err (!%p1003_p13)
}
 0x216   : > { %s1007_s17 = scalar_lea.hbm %s1438_s5, 160 }
 0x217   : > { %p1008_p0 = scmp.ne.s32.totalorder %s1438_s5, %s1007_s17  ;;  %p1013_p3 = scmp.lt.u32.totalorder %s1007_s17, %s1438_s5 }
 0x219   : > { %p1009_p1 = pnand %p1008_p0, %p977_p6 }
 0x21b   : > { %p1010_p2 = pneg %p1009_p1 }
 0x21d   : > { %p1015_p4 = pnand %p1013_p3, %p1010_p2 }
 0x21f   : > { %1018 = shalt.err (!%p1015_p4)
}
 0x220   : > { %974 = dma.vmem_to_hbm [thread:$0]  (%p977_p6), %s705_s13, 160, %s1438_s5, [#allocation4]  }
 0x221   : > { %1024 = dma.done.wait (%p977_p6), [#allocation4], 160  }
 0x222   : > { %1026 = vsyncadd (%p977_p6), [#allocation4], 4294967136 }
 0x223 PF: > { %s16_s18 = sadd.s32 1, %s1029_s18  }
 0x224   : > { %p13_p5 = scmp.ge.s32.totalorder %s16_s18, 4  }
 0x226   :  { %15 = sbr.rel (!%p13_p5) target bundleno = 1 (0x1), region = 75 }
 0x22d   :  { %717 = vsyncpa [#allocation4], 1 }
 0x22e   :  { %719 = vsyncpa [#allocation4 + $0x1], 1 }

// kernel: strong_classifier_forward.20
= control target key start
LH: loop header
LB: loop body
LE: loop exit
PB: predicated region body
PF: predicated region fallthrough
CT: control target
= control target key end

     0   :  { %s2901_s0 = inlined_call_operand.vmem [shape: f32[32,128], index: 0, kind: input, shape index: {}]   ;;  %s2902_s1 = inlined_call_operand.vmem [shape: bf16[32,128], index: 1, kind: input, shape index: {}]   ;;  %s2903_s2 = inlined_call_operand.vmem [shape: s32[32,1], index: 2, kind: input, shape index: {}]   ;;  %s2904_s3 = inlined_call_operand.vmem [shape: bf16[128,128], index: 3, kind: input, shape index: {}]   ;;  %s2905_s4 = inlined_call_operand.vmem [shape: f32[1,128], index: 4, kind: input, shape index: {}]   ;;  %s2906_s5 = inlined_call_operand.vmem [shape: f32[1,128], index: 5, kind: input, shape index: {}]   ;;  %s2907_s6 = inlined_call_operand.vmem [shape: f32[1,128], index: 6, kind: input, shape index: {}]   ;;  %s2908_s7 = inlined_call_operand.vmem [shape: bf16[128,256], index: 7, kind: input, shape index: {}]   ;;  %s2909_s8 = inlined_call_operand.vmem [shape: f32[1,256], index: 8, kind: input, shape index: {}]   ;;  %s2910_s9 = inlined_call_operand.vmem [shape: f32[31,128], index: 9, kind: input, shape index: {}]   ;;  %s2911_s10 = inlined_call_operand.vmem [shape: f32[1,128], index: 10, kind: input, shape index: {}]   ;;  %s2912_s11 = inlined_call_operand.vmem [shape: bf16[128,128], index: 11, kind: input, shape index: {}]   ;;  %s2913_s12 = inlined_call_operand.vmem [shape: f32[1,128], index: 12, kind: input, shape index: {}]   ;;  %s2914_s13 = inlined_call_operand.vmem [shape: f32[1,128], index: 13, kind: input, shape index: {}]   ;;  %s2915_s14 = inlined_call_operand.vmem [shape: f32[1,128], index: 14, kind: input, shape index: {}]   ;;  %s2916_s15 = inlined_call_operand.vmem [shape: bf16[128,256], index: 15, kind: input, shape index: {}]   ;;  %s2917_s16 = inlined_call_operand.vmem [shape: f32[1,256], index: 16, kind: input, shape index: {}]   ;;  %s2918_s17 = inlined_call_operand.vmem [shape: bf16[256,128], index: 17, kind: input, shape index: {}]   ;;  %s2919_s18 = inlined_call_operand.hbm [shape: f32[1,128], index: 18, kind: input, shape index: {}]   ;;  %s2920_s19 = inlined_call_operand.hbm [shape: f32[1,128], index: 19, kind: input, shape index: {}]   ;;  %s2921_s20 = inlined_call_operand.hbm [shape: f32[1,128], index: 20, kind: input, shape index: {}]   ;;  %s2922_s21 = inlined_call_operand.vmem [shape: f32[32,128], index: 21, kind: output, shape index: {}]  }
   0x1   :  { %2928 = sst [smem:[#allocation10_spill]] %s2901_s0 }
   0x2   :  { %2929 = sst [smem:[#allocation11_spill]] %s2902_s1 }
   0x3   :  { %2930 = sst [smem:[#allocation12_spill]] %s2903_s2 }
   0x4   :  { %2931 = sst [smem:[#allocation13_spill]] %s2904_s3 }
   0x5   :  { %2932 = sst [smem:[#allocation14_spill]] %s2905_s4 }
   0x6   :  { %2933 = sst [smem:[#allocation15_spill]] %s2906_s5 }
   0x7   :  { %2934 = sst [smem:[#allocation16_spill]] %s2917_s16 }
   0x8   :  { %2935 = sst [smem:[#allocation17_spill]] %s2922_s21 }
   0x9   :  { %26 = vsyncpa [#allocation4], 0 }
   0xa   :  { %27 = vsyncpa [#allocation6], 0  ;;  %s2448_s2 = smov 0  }
   0xb LB: > { %s2924_s25 = sadd.s32 4294967295, %s2330_s2   ;;  %p1881_p0 = scmp.ge.s32.totalorder %s2330_s2, 1  ;;  %s2330_s2 = sphi %s2448_s2, %s33_s2  }
   0xc   : > { %p520_p1 = scmp.lt.s32.totalorder %s2330_s2, 3  ;;  %p2458_p2 = scmp.eq.s32.totalorder %s2924_s25, 0 }
   0xd   : > { %s2332_s3 = smov [#allocation5]   ;;  %s2333_s29 = smov [#allocation3]  }
   0xe   : > { %s2936_s26 = scalar_select %p2458_p2, 1, 0 }
   0xf   : > { %p2462_p3 = pnand %p1881_p0, %p520_p1  ;;  %s589_s28 = sshll.u32 %s2332_s3, 4  ;;  %s590_s28 = int_to_ptr.vmem [resolvable:$true] %s589_s28 }
  0x10   : > { %s578_s0 = sshll.u32 %s2333_s29, 4  ;;  %s2334_s4 = smov [#allocation7]   ;;  %s2474_s0 = int_to_ptr.vmem [resolvable:$true] %s578_s0 }
  0x11   : > { %s2937_s27 = scalar_select %p2462_p3, 1, 0 }
  0x12   : > { %p2075_p4 = pneg %p2462_p3  ;;  %s600_s30 = sshll.u32 %s2334_s4, 4  ;;  %s2476_s30 = int_to_ptr.vmem [resolvable:$true] %s600_s30 }
  0x13   : > { %s2232_s1 = scalar_lea.hbm %s2920_s19, 16 }
  0x14   : > { %p2470_p5 = pnand %p2458_p2, %p2075_p4  ;;  %p2233_p6 = scmp.ne.s32.totalorder %s2920_s19, %s2232_s1 }
  0x15   : > { %p2239_p10 = scmp.lt.u32.totalorder %s2232_s1, %s2920_s19 }
  0x16   : > { %p2486_p7 = pneg %p2470_p5 }
  0x18   : > { %p2235_p8 = pnand %p2486_p7, %p2233_p6 }
  0x1a   : > { %p2236_p9 = pneg %p2235_p8 }
  0x1c   : > { %p2241_p11 = pnand %p2239_p10, %p2236_p9 }
  0x1e   : > { %2244 = shalt.err (!%p2241_p11)
}
  0x1f   : > { %s2245_s22 = scalar_lea.vmem %s590_s28, 16  ;;  %s2252_s23 = scalar_lea.vmem %s590_s28, 32 }
  0x20   : > { %p2246_p12 = scmp.ne.s32.totalorder %s590_s28, %s2245_s22  ;;  %p2253_p1 = scmp.lt.s32.totalorder %s590_s28, %s590_s28 }
  0x21   : > { %p2254_p4 = scmp.lt.s32.totalorder %s2252_s23, %s2245_s22 }
  0x22   : > { %p2248_p13 = pnand %p2246_p12, %p2486_p7 }
  0x23   : > { %p2255_p2 = por %p2254_p4, %p2253_p1 }
  0x24   : > { %p2249_p0 = pneg %p2248_p13 }
  0x26   : > { %p2256_p3 = pnand %p2255_p2, %p2249_p0 }
  0x28   : > { %2259 = shalt.err (!%p2256_p3)
}
  0x29   : > { %2081 = dma.hbm_to_vmem [thread:$0]  (!%p2470_p5), %s2920_s19, 16, %s590_s28, [#allocation6]  }
  0x2a   : > { %s2260_s4 = scalar_lea.hbm %s2919_s18, 16 }
  0x2b   : > { %p2261_p6 = scmp.ne.s32.totalorder %s2919_s18, %s2260_s4  ;;  %p2267_p2 = scmp.lt.u32.totalorder %s2260_s4, %s2919_s18 }
  0x2d   : > { %p2263_p8 = pnand %p2261_p6, %p2486_p7 }
  0x2f   : > { %p2264_p9 = pneg %p2263_p8 }
  0x31   : > { %p2269_p3 = pnand %p2267_p2, %p2264_p9 }
  0x33   : > { %2272 = shalt.err (!%p2269_p3)
}
  0x34   : > { %s2273_s28 = scalar_lea.vmem %s2474_s0, 16  ;;  %s2280_s16 = scalar_lea.vmem %s2474_s0, 32 }
  0x35   : > { %p2274_p10 = scmp.ne.s32.totalorder %s2474_s0, %s2273_s28  ;;  %p2281_p13 = scmp.lt.s32.totalorder %s2474_s0, %s2474_s0 }
  0x36   : > { %p2282_p0 = scmp.lt.s32.totalorder %s2280_s16, %s2273_s28 }
  0x37   : > { %p2276_p11 = pnand %p2274_p10, %p2486_p7 }
  0x38   : > { %p2283_p1 = por %p2282_p0, %p2281_p13 }
  0x39   : > { %p2277_p12 = pneg %p2276_p11 }
  0x3b   : > { %p2284_p4 = pnand %p2283_p1, %p2277_p12 }
  0x3d   : > { %2287 = shalt.err (!%p2284_p4)
}
  0x3e   : > { %2078 = dma.hbm_to_vmem [thread:$0]  (!%p2470_p5), %s2919_s18, 16, %s2474_s0, [#allocation4]  }
  0x3f   : > { %s2288_s1 = scalar_lea.hbm %s2921_s20, 16 }
  0x40   : > { %p2289_p6 = scmp.ne.s32.totalorder %s2921_s20, %s2288_s1  ;;  %p2295_p2 = scmp.lt.u32.totalorder %s2288_s1, %s2921_s20 }
  0x42   : > { %p2291_p8 = pnand %p2289_p6, %p2486_p7 }
  0x44   : > { %p2292_p9 = pneg %p2291_p8 }
  0x46   : > { %p2297_p3 = pnand %p2295_p2, %p2292_p9 }
  0x48   : > { %2300 = shalt.err (!%p2297_p3)
}
  0x49   : > { %s2301_s0 = scalar_lea.vmem %s2476_s30, 16  ;;  %s2308_s16 = scalar_lea.vmem %s2476_s30, 32 }
  0x4a   : > { %p2302_p10 = scmp.ne.s32.totalorder %s2476_s30, %s2301_s0  ;;  %p2309_p13 = scmp.lt.s32.totalorder %s2476_s30, %s2476_s30 }
  0x4b   : > { %p2310_p0 = scmp.lt.s32.totalorder %s2308_s16, %s2301_s0 }
  0x4c   : > { %p2304_p11 = pnand %p2302_p10, %p2486_p7 }
  0x4d   : > { %p2311_p1 = por %p2310_p0, %p2309_p13 }
  0x4e   : > { %p2305_p12 = pneg %p2304_p11 }
  0x50   : > { %p2312_p4 = pnand %p2311_p1, %p2305_p12 }
  0x52   : > { %2315 = shalt.err (!%p2312_p4)
}
  0x53   : > { %2084 = dma.hbm_to_vmem [thread:$0]  (!%p2470_p5), %s2921_s20, 16, %s2476_s30, [#allocation6]  }
  0x54   : > { %p2940_p6 = scmp.ne.s32.totalorder %s2937_s27, 0 }
  0x55   : > { %p2941_p7 = scmp.ne.s32.totalorder (!%p2940_p6), %s2936_s26, 0 }
  0x56   : > { %640 = sbr.rel (%p2940_p6) target bundleno = 2280 (0x8e8), region = 104 }
  0x5d   : > { %2321 = dma.done.wait (%p2941_p7), [#allocation4], 16  }
  0x5e   : > { %2323 = vsyncadd (%p2941_p7), [#allocation4], 4294967280 }
  0x5f   : > { %2325 = dma.done.wait (%p2941_p7), [#allocation6], 32  }
  0x60   : > { %2327 = vsyncadd (%p2941_p7), [#allocation6], 4294967264  ;;  %s2942_s5 = sadd.s32 4294967295, %s2330_s2   ;;  %v2335_v0 = vmov 0.0   ;;  %vm2336_vm0 = vmmov 0   ;;  %s2943_s3 = sld [smem:[#allocation13_spill]]  ;;  %v877_v24 = vlaneseq }
  0x61   : > { %s1890_s29 = sshll.u32 %s2942_s5, 1  ;;  %2023 = vmatprep.subr.bf16.mxu0 %v2335_v0  ;;  %1081 = vst [vmem:[#allocation2 + $0x8] sm:$0xff] %v2335_v0  ;;  %1082 = vst [vmem:[#allocation2 + $0x20] sm:$0xff] %v2335_v0  ;;  %2039 = vmatprep.mubr.msk.bf16.mxu0 %vm2336_vm0, %v2335_v0  ;;  %s2944_s0 = sld [smem:[#allocation11_spill]]  ;;  %v2116_v21 = vld [vmem:[%s2908_s7 + $0x4] ss:$8 sps:$4 sm:$0xff]  }
  0x62   : > { %p719_p5 = scmp.lt.s32.totalorder %s1890_s29, 3  ;;  %s2945_s21 = sld [smem:[#allocation10_spill]]  ;;  %v2118_v22 = vld [vmem:[%s2908_s7] ss:$8 sps:$4 sm:$0xff]   ;;  %v2119_v23 = vld [vmem:[%s2908_s7 + $0x14] ss:$8 sps:$4 sm:$0xff]   ;;  %1023 = vmatprep.subr.bf16.mxu1 %v2116_v21 }
  0x63   : > { %s2946_s30 = sld [smem:[#allocation14_spill]]  ;;  %1024 = vmatpush1.bf16.msra.mxu1 %v2118_v22  ;;  %v2629_v25 = vand.u32 127, %v877_v24  ;;  %v2121_v36 = vld [vmem:[%s2908_s7 + $0x10] ss:$8 sps:$4 sm:$0xff]   ;;  %v2122_v37 = vld [vmem:[%s2908_s7 + $0x24] ss:$8 sps:$4 sm:$0xff]  }
  0x64   : > { %s2952_s29 = smov (!%p719_p5, %s1890_s29), 3  ;;  %1025 = vmatprep.subr.bf16.mxu1 %v2119_v23  ;;  %v2124_v38 = vld [vmem:[%s2908_s7 + $0x20] ss:$8 sps:$4 sm:$0xff]   ;;  %v2125_v39 = vld [vmem:[%s2908_s7 + $0x34] ss:$8 sps:$4 sm:$0xff]   ;;  %v2337_v44 = vmov 0  }
  0x65   : > { %s1893_s1 = sshll.u32 %s2952_s29, 2  ;;  %s2604_s23 = sshll.u32 %s2952_s29, 3  ;;  %vm879_vm1 = vcmp.lt.s32.totalorder %v2629_v25, 80  ;;  %v2127_v40 = vld [vmem:[%s2908_s7 + $0x30] ss:$8 sps:$4 sm:$0xff]   ;;  %1055 = vmatprep.mubr.bf16.mxu1 %v2337_v44  ;;  %2106 = vset.pattern.permute.xlu1 %v2337_v44  ;;  %v2144_v22 = vld [vmem:[%s2912_s11 + $0x20] sm:$0xff]  }
  0x66   : > { %v2107_v1 = vld [vmem:[%s2943_s3] sm:$0xff]   ;;  %v2108_v2 = vld [vmem:[%s2943_s3 + $0x8] sm:$0xff]   ;;  %v2109_v3 = vld [vmem:[%s2943_s3 + $0x10] sm:$0xff]   ;;  %2105 = vset.pattern.permute.xlu0 %v2337_v44  ;;  %s2947_s22 = sld [smem:[#allocation12_spill]]  ;;  %s2949_s5 = sld [smem:[#allocation16_spill]] }
  0x67   : > { %2024 = vmatpush3.bf16.msra.mxu0 %v2107_v1  ;;  %s728_s16 = scalar_lea.vmem %s2944_s0, %s1893_s1  ;;  %v2110_v4 = vld [vmem:[%s2943_s3 + $0x18] sm:$0xff]   ;;  %v2111_v5 = vld [vmem:[%s2943_s3 + $0x20] sm:$0xff]   ;;  %v2112_v6 = vld [vmem:[%s2943_s3 + $0x28] sm:$0xff]   ;;  %1026 = vmatpush1.bf16.msra.mxu1 %v2121_v36  ;;  %s2950_s29 = sld [smem:[#allocation17_spill]] }
  0x68   : > { %2025 = vmatprep.subr.bf16.mxu0 %v2335_v0  ;;  %v2113_v7 = vld [vmem:[%s2943_s3 + $0x30] sm:$0xff]   ;;  %v2114_v8 = vld [vmem:[%s2943_s3 + $0x38] sm:$0xff]   ;;  %v2115_v9 = vld [vmem:[%s728_s16] sm:$0xff]   ;;  %s722_s24 = scalar_lea.vmem %s2945_s21, %s2604_s23  ;;  %1027 = vmatprep.subr.bf16.mxu1 %v2122_v37 }
  0x69   : > { %v743_v10 = vld [vmem:[%s722_s24] sm:$0xff]  ;;  %v744_v13 = vld [vmem:[%s722_s24 + $0x8] sm:$0xff]  ;;  %v2131_v43 = vld [vmem:[%s2908_s7 + $0x54] ss:$8 sps:$4 sm:$0xff]   ;;  %s2948_s24 = sld [smem:[#allocation15_spill]] }
  0x6a   : > { %v1907_v12 = vld [vmem:[%s2946_s30] ss:$0 sm:$0xff]  ;;  %v2128_v41 = vld [vmem:[%s2908_s7 + $0x44] ss:$8 sps:$4 sm:$0xff]   ;;  %v2133_v45 = vld [vmem:[%s2908_s7 + $0x50] ss:$8 sps:$4 sm:$0xff]  }
  0x6b   : > { %2026 = vmatpush3.bf16.msra.mxu0 %v2108_v2  ;;  %1028 = vmatpush1.bf16.msra.mxu1 %v2124_v38  ;;  %v2130_v42 = vld [vmem:[%s2908_s7 + $0x40] ss:$8 sps:$4 sm:$0xff]   ;;  %v2134_v46 = vld [vmem:[%s2908_s7 + $0x64] ss:$8 sps:$4 sm:$0xff]   ;;  %v2137_v48 = vld [vmem:[%s2908_s7 + $0x74] ss:$8 sps:$4 sm:$0xff]  }
  0x6c   : > { %2027 = vmatprep.subr.bf16.mxu0 %v2335_v0  ;;  %1029 = vmatprep.subr.bf16.mxu1 %v2125_v39  ;;  %v2136_v47 = vld [vmem:[%s2908_s7 + $0x60] ss:$8 sps:$4 sm:$0xff]   ;;  %v2139_v49 = vld [vmem:[%s2908_s7 + $0x70] ss:$8 sps:$4 sm:$0xff]   ;;  %s734_s28 = scalar_lea.vmem %s2947_s22, %s2604_s23 }
  0x6d   : > { %v1087_v50 = vld [vmem:[%s734_s28 + $0x8] sm:$0xff]  ;;  %v1086_v52 = vld [vmem:[%s734_s28] sm:$0xff]  ;;  %v2143_v21 = vld [vmem:[%s2912_s11 + $0x18] sm:$0xff]   ;;  %s740_s16 = scalar_lea.vmem %s2950_s29, %s2604_s23 }
  0x6e   : > { %v1093_v51 = vadd.s32 4294967295, %v1087_v50  ;;  %vm1122_vm2 = vcmp.ge.s32.totalorder %v1086_v52, 0  ;;  %vm1124_vm3 = vcmp.lt.s32.totalorder %v1086_v52, 2  ;;  %v1092_v53 = vadd.s32 4294967295, %v1086_v52  ;;  %v2145_v23 = vld [vmem:[%s2912_s11 + $0x28] sm:$0xff]  }
  0x6f   : > { %2028 = vmatpush3.bf16.msra.mxu0 %v2109_v3  ;;  %1030 = vmatpush1.bf16.msra.mxu1 %v2127_v40  ;;  %vm1126_vm6 = vmand %vm1122_vm2, %vm1124_vm3  ;;  %vm1123_vm8 = vcmp.ge.s32.totalorder %v1087_v50, 0  ;;  %vm1125_vm9 = vcmp.lt.s32.totalorder %v1087_v50, 2  ;;  %v1150_v55 = vadd.s32 1, %v1086_v52  ;;  %v1151_v58 = vadd.s32 1, %v1087_v50 }
  0x70   : > { %2029 = vmatprep.subr.bf16.mxu0 %v2335_v0  ;;  %1031 = vmatprep.subr.bf16.mxu1 %v2128_v41  ;;  %vm1095_vm4 = vcmp.ge.s32.totalorder %v1093_v51, 0  ;;  %vm1097_vm5 = vcmp.lt.s32.totalorder %v1093_v51, 2  ;;  %vm1094_vm10 = vcmp.ge.s32.totalorder %v1092_v53, 0  ;;  %vm1096_vm11 = vcmp.lt.s32.totalorder %v1092_v53, 2  ;;  %vm1127_vm13 = vmand %vm1123_vm8, %vm1125_vm9 }
  0x71   : > { %vm1099_vm7 = vmand %vm1095_vm4, %vm1097_vm5  ;;  %v1128_v56 = vsel %vm1126_vm6, 1, %v2337_v44  ;;  %vm1152_vm14 = vcmp.ge.s32.totalorder %v1150_v55, 0  ;;  %vm1154_vm15 = vcmp.lt.s32.totalorder %v1150_v55, 2  ;;  %v1129_v59 = vsel %vm1127_vm13, 1, %v2337_v44 }
  0x72   : > { %v1101_v54 = vsel %vm1099_vm7, 1, %v2337_v44  ;;  %vm1098_vm12 = vmand %vm1094_vm10, %vm1096_vm11  ;;  %vm1153_vm2 = vcmp.ge.s32.totalorder %v1151_v58, 0  ;;  %vm1155_vm3 = vcmp.lt.s32.totalorder %v1151_v58, 2  ;;  %v1089_v58 = vld [vmem:[%s2910_s9 + $0x10] sm:$0xff] }
  0x73   : > { %2030 = vmatpush3.bf16.msra.mxu0 %v2110_v4  ;;  %1032 = vmatpush1.bf16.msra.mxu1 %v2130_v42  ;;  %v1100_v57 = vsel %vm1098_vm12, 1, %v2337_v44  ;;  %vm1157_vm4 = vmand %vm1153_vm2, %vm1155_vm3 }
  0x74   : > { %2031 = vmatprep.subr.bf16.mxu0 %v2335_v0  ;;  %1033 = vmatprep.subr.bf16.mxu1 %v2131_v43  ;;  %v1159_v61 = vsel %vm1157_vm4, 1, %v2337_v44 }
  0x77   : > { %2032 = vmatpush3.bf16.msra.mxu0 %v2111_v5  ;;  %1034 = vmatpush1.bf16.msra.mxu1 %v2133_v45 }
  0x78   : > { %2033 = vmatprep.subr.bf16.mxu0 %v2335_v0  ;;  %1035 = vmatprep.subr.bf16.mxu1 %v2134_v46 }
  0x7b   : > { %2034 = vmatpush3.bf16.msra.mxu0 %v2112_v6  ;;  %1036 = vmatpush1.bf16.msra.mxu1 %v2136_v47 }
  0x7c   : > { %2035 = vmatprep.subr.bf16.mxu0 %v2335_v0  ;;  %1037 = vmatprep.subr.bf16.mxu1 %v2137_v48 }
  0x7f   : > { %2036 = vmatpush3.bf16.msra.mxu0 %v2113_v7  ;;  %1038 = vmatpush1.bf16.msra.mxu1 %v2139_v49  ;;  %v1908_v7 = vld [vmem:[%s2948_s24] ss:$0 sm:$0xff] }
  0x80   : > { %2037 = vmatprep.subr.bf16.mxu0 %v2335_v0 }
  0x83   : > { %2038 = vmatpush3.bf16.msra.mxu0 %v2114_v8 }
  0x84   : > { %2043 = vmatprep.subr.bf16.mxu0 %v2335_v0 }
  0x86   : > { %2040 = vmatmul.mubr.bf16.vlgmr.msra.gmra.mrb[0].mxu0 %v2115_v9 }
  0x87   : > { %2059 = vmatprep.mubr.msk.bf16.mxu0 %vm2336_vm0, %v2335_v0  ;;  %vm1156_vm0 = vmand %vm1152_vm14, %vm1154_vm15 }
  0x88   : > { %v1158_v60 = vsel %vm1156_vm0, 1, %v2337_v44 }
 0x159   : > { %v851_v11 = vpop.f32.mrb[0].mxu0 }
 0x15a   : > { %v858_v14 = vadd.f32 %v851_v11, %v743_v10  ;;  %v2041_v15 = vpop.f32.mrb[1].mxu0  ;;  %v1909_v11 = vld [vmem:[%s2907_s6] ss:$0 sm:$0xff] }
 0x15b   : > { %v854_v16 = vpop.f32.mrb[2].mxu0 }
 0x15c   : > { %v2613_v17 = vadd.f32 %v1907_v12, %v858_v14  ;;  %v859_v18 = vadd.f32 %v854_v16, %v744_v13  ;;  %v2042_v19 = vpop.f32.mrb[3].mxu0  ;;  %v2140_v16 = vld [vmem:[%s2912_s11] sm:$0xff]  }
 0x15d   : > { %2044 = vmatpush3.bf16.msra.mxu0 %v2140_v16  ;;  %v2142_v19 = vld [vmem:[%s2912_s11 + $0x10] sm:$0xff]   ;;  %v1928_v16 = vld [vmem:[%s2911_s10] ss:$0 sm:$0xff] }
 0x15e   : > { %871 = vadd.xlane.f32.xlu0 %v2613_v17  ;;  %v2616_v20 = vadd.f32 %v1907_v12, %v859_v18  ;;  %2045 = vmatprep.subr.bf16.mxu0 %v2335_v0  ;;  %v2141_v18 = vld [vmem:[%s2912_s11 + $0x8] sm:$0xff]  }
 0x161   : > { %2046 = vmatpush3.bf16.msra.mxu0 %v2141_v18 }
 0x162   : > { %873 = vadd.xlane.f32.xlu0 %v2616_v20  ;;  %2047 = vmatprep.subr.bf16.mxu0 %v2335_v0 }
 0x165   : > { %2048 = vmatpush3.bf16.msra.mxu0 %v2142_v19 }
 0x166   : > { %2049 = vmatprep.subr.bf16.mxu0 %v2335_v0 }
 0x169   : > { %2050 = vmatpush3.bf16.msra.mxu0 %v2143_v21 }
 0x16a   : > { %2051 = vmatprep.subr.bf16.mxu0 %v2335_v0 }
 0x16d   : > { %2052 = vmatpush3.bf16.msra.mxu0 %v2144_v22 }
 0x16e   : > { %2053 = vmatprep.subr.bf16.mxu0 %v2335_v0 }
 0x171   : > { %2054 = vmatpush3.bf16.msra.mxu0 %v2145_v23 }
 0x172   : > { %2055 = vmatprep.subr.bf16.mxu0 %v2335_v0 }
 0x178   : > { %1103 = vperm.xlu0 %2105, %v1100_v57  }
 0x1eb   : > { %v872_v26 = vpop.xlane.xlu0 %871 }
 0x1ec   : > { %v875_v27 = vmul.f32 0.0125, %v872_v26  ;;  %v2146_v26 = vld [vmem:[%s2912_s11 + $0x30] sm:$0xff]  }
 0x1ed   : > { %2056 = vmatpush3.bf16.msra.mxu0 %v2146_v26 }
 0x1ee   : > { %v880_v28 = vsub.f32 %v2613_v17, %v875_v27  ;;  %v2147_v27 = vld [vmem:[%s2912_s11 + $0x38] sm:$0xff]   ;;  %2057 = vmatprep.subr.bf16.mxu0 %v2335_v0 }
 0x1ef   : > { %v874_v29 = vpop.xlane.xlu0 %873 }
 0x1f0   : > { %v876_v30 = vmul.f32 0.0125, %v874_v29  ;;  %v2635_v31 = vsel %vm879_vm1, %v880_v28, 0.0  ;;  %v2739_v28 = vshrl.u32 %v877_v24, 7 }
 0x1f1   : > { %v884_v32 = vmul.f32 %v2635_v31, %v2635_v31  ;;  %2058 = vmatpush3.bf16.msra.mxu0 %v2147_v27 }
 0x1f2   : > { %v881_v33 = vsub.f32 %v2616_v20, %v876_v30  ;;  %v939_v29 = vsub.s32 1, %v2739_v28  ;;  %v931_v30 = vld [vmem:[%s2909_s8] sm:$0x3]  ;;  %v2748_v43 = vsub.s32 0, %v2739_v28  ;;  %v1142_v55 = vsub.s32 7, %v2739_v28 }
 0x1f3   : > { %886 = vadd.xlane.f32.xlu1 %v884_v32 }
 0x1f4   : > { %v2642_v34 = vsel %vm879_vm1, %v881_v33, 0.0  ;;  %v936_v45 = vrot.slane %v931_v30, %v2748_v43 }
 0x1f5   : > { %v885_v35 = vmul.f32 %v2642_v34, %v2642_v34 }
 0x1f7   : > { %888 = vadd.xlane.f32.xlu1 %v885_v35  ;;  %v1104_v57 = vpop.permute.xlu0 %1103 }
 0x1f8   : > { %vm1108_vm6 = vcmp.eq.s32.totalorder %v1104_v57, 1 }
 0x208   : > { %1106 = vperm.xlu1 %2106, %v1101_v54   ;;  %v1114_v54 = vsub.s32 6, %v2739_v28 }
 0x20c   : > { %1131 = vperm.xlu1 %2106, %v1128_v56   ;;  %v1088_v56 = vld [vmem:[%s2910_s9 + $0x8] sm:$0xff] }
 0x210   : > { %1134 = vperm.xlu1 %2106, %v1129_v59   ;;  %v1115_v59 = vrot.slane %v1088_v56, %v1114_v54 }
 0x214   : > { %1161 = vperm.xlu1 %2106, %v1158_v60   ;;  %v1143_v60 = vrot.slane %v1088_v56, %v1142_v55 }
 0x218   : > { %1164 = vperm.xlu1 %2106, %v1159_v61  }
 0x280   : > { %v887_v62 = vpop.xlane.xlu1 %886 }
 0x281   : > { %v890_v63 = vmul.f32 0.0125, %v887_v62 }
 0x283   : > { %v892_v1 = vadd.f32 1e-05, %v890_v63  ;;  %v1173_v63 = vrot.slane %v1089_v58, %v2748_v43 }
 0x284   : > { %v889_v2 = vpop.xlane.xlu1 %888 }
 0x285   : > { %2188 = vrsqrt.f32 %v892_v1  ;;  %v891_v3 = vmul.f32 0.0125, %v889_v2 }
 0x287   : > { %v893_v4 = vadd.f32 1e-05, %v891_v3 }
 0x288   : > { %v1107_v24 = vpop.permute.xlu1 %1106 }
 0x289   : > { %2190 = vrsqrt.f32 %v893_v4  ;;  %vm1109_vm8 = vcmp.eq.s32.totalorder %v1107_v24, 1 }
 0x28f   : > { %v2189_v5 = vpop.eup %2188 }
 0x290   : > { %v896_v6 = vmul.f32 %v2189_v5, %v2635_v31  ;;  %v940_v31 = vrot.slane %v931_v30, %v939_v29 }
 0x292   : > { %v904_v10 = vmul.f32 %v1908_v7, %v896_v6 }
 0x293   : > { %v2191_v8 = vpop.eup %2190 }
 0x294   : > { %v897_v9 = vmul.f32 %v2191_v8, %v2642_v34  ;;  %v912_v13 = vadd.f32 %v1909_v11, %v904_v10 }
 0x296   : > { %v905_v12 = vmul.f32 %v1908_v7, %v897_v9 }
 0x298   : > { %v913_v14 = vadd.f32 %v1909_v11, %v905_v12 }
 0x29a   : > { %v914_v15 = vpack.c.bf16 %v913_v14, %v912_v13 }
 0x29c   : > { %1056 = vmatmul.mubr.bf16.vlgmr.msra.gmra.mrb[0].mxu1 %v914_v15 }
 0x29d   : > { %1503 = vmatprep.mubr.bf16.mxu1 %v2337_v44  ;;  %v1132_v44 = vpop.permute.xlu1 %1131 }
 0x29e   : > { %vm1136_vm5 = vcmp.eq.s32.totalorder %v1132_v44, 1  ;;  %v1939_v44 = vld [vmem:[%s2913_s12] ss:$0 sm:$0xff] }
 0x2a1   : > { %v1135_v46 = vpop.permute.xlu1 %1134 }
 0x2a2   : > { %vm1137_vm7 = vcmp.eq.s32.totalorder %v1135_v46, 1 }
 0x2a5   : > { %v1162_v53 = vpop.permute.xlu1 %1161 }
 0x2a6   : > { %vm1166_vm9 = vcmp.eq.s32.totalorder %v1162_v53, 1  ;;  %v2153_v53 = vld [vmem:[%s2916_s15 + $0x14] ss:$8 sps:$4 sm:$0xff]  }
 0x2a9   : > { %v1165_v62 = vpop.permute.xlu1 %1164 }
 0x2aa   : > { %vm1167_vm10 = vcmp.eq.s32.totalorder %v1165_v62, 1 }
 0x36f   : > { %v1057_v32 = vpop.f32.mrb[0].mxu1 }
 0x370   : > { %v1059_v33 = vpop.f32.mrb[1].mxu1  ;;  %v1058_v47 = vadd.f32 %v1057_v32, %v936_v45 }
 0x371   : > { %v1060_v34 = vadd.f32 %v1059_v33, %v940_v31  ;;  %v1061_v35 = vpop.f32.mrb[2].mxu1 }
 0x372   : > { %v1063_v36 = vpop.f32.mrb[3].mxu1  ;;  %v1062_v50 = vadd.f32 %v1061_v35, %v936_v45 }
 0x373   : > { %v1926_v37 = vmul.f32 -1.442695, %v1060_v34  ;;  %v1064_v0 = vadd.f32 %v1063_v36, %v940_v31 }
 0x375   : > { %2192 = vpow2.f32 %v1926_v37  ;;  %v1927_v38 = vmul.f32 -1.442695, %v1064_v0 }
 0x377   : > { %2194 = vpow2.f32 %v1927_v38 }
 0x37f   : > { %v2193_v39 = vpop.eup %2192 }
 0x380   : > { %v1072_v40 = vadd.f32 1.0, %v2193_v39 }
 0x381   : > { %v2195_v41 = vpop.eup %2194 }
 0x382   : > { %2196 = vrcp.f32 %v1072_v40  ;;  %v1073_v42 = vadd.f32 1.0, %v2195_v41 }
 0x384   : > { %2198 = vrcp.f32 %v1073_v42 }
 0x38c   : > { %v2197_v48 = vpop.eup %2196 }
 0x38d   : > { %v1078_v49 = vmul.f32 %v2197_v48, %v1058_v47 }
 0x38e   : > { %v2199_v51 = vpop.eup %2198 }
 0x38f   : > { %1084 = vst [vmem:[#allocation2 + $0x10] sm:$0xff] %v1078_v49  ;;  %v1079_v52 = vmul.f32 %v2199_v51, %v1062_v50  ;;  %v1138_v61 = vsel %vm1136_vm5, %v1078_v49, 0.0 }
 0x390   : > { %v1144_v5 = vmul.f32 %v1143_v60, %v1138_v61 }
 0x391   : > { %1085 = vst [vmem:[#allocation2 + $0x18] sm:$0xff] %v1079_v52  ;;  %v1139_v2 = vsel %vm1137_vm7, %v1079_v52, 0.0  ;;  %v2148_v52 = vld [vmem:[%s2916_s15] ss:$8 sps:$4 sm:$0xff]  }
 0x392   : > { %v1145_v13 = vmul.f32 %v1143_v60, %v1139_v2  ;;  %v2154_v2 = vld [vmem:[%s2916_s15 + $0x20] ss:$8 sps:$4 sm:$0xff]  }
 0x396   : > { %v1090_v1 = vld [vmem:[#allocation2 + $0xf] sm:$0xff] }
 0x397   : > { %v1110_v3 = vsel %vm1108_vm6, %v1090_v1, 0.0  ;;  %v2156_v1 = vld [vmem:[%s2916_s15 + $0x24] ss:$8 sps:$4 sm:$0xff]  }
 0x398   : > { %v1091_v4 = vld [vmem:[#allocation2 + $0x17] sm:$0xff]  ;;  %v1116_v8 = vmul.f32 %v1115_v59, %v1110_v3 }
 0x399   : > { %v1148_v6 = vld [vmem:[#allocation2 + $0x11] sm:$0xff]  ;;  %v1149_v7 = vld [vmem:[#allocation2 + $0x19] sm:$0xff]  ;;  %v1111_v9 = vsel %vm1109_vm8, %v1091_v4, 0.0 }
 0x39a   : > { %v1168_v10 = vsel %vm1166_vm9, %v1148_v6, 0.0  ;;  %v1169_v11 = vsel %vm1167_vm10, %v1149_v7, 0.0  ;;  %v1117_v12 = vmul.f32 %v1115_v59, %v1111_v9  ;;  %v1146_v15 = vadd.f32 %v1144_v5, %v1116_v8  ;;  %v2159_v3 = vld [vmem:[%s2916_s15 + $0x34] ss:$8 sps:$4 sm:$0xff]   ;;  %v2157_v4 = vld [vmem:[%s2916_s15 + $0x30] ss:$8 sps:$4 sm:$0xff]  }
 0x39b   : > { %v1174_v14 = vmul.f32 %v1173_v63, %v1168_v10  ;;  %v1175_v19 = vmul.f32 %v1173_v63, %v1169_v11  ;;  %v2162_v5 = vld [vmem:[%s2916_s15 + $0x44] ss:$8 sps:$4 sm:$0xff]   ;;  %v2160_v6 = vld [vmem:[%s2916_s15 + $0x40] ss:$8 sps:$4 sm:$0xff]   ;;  %v2165_v7 = vld [vmem:[%s2916_s15 + $0x54] ss:$8 sps:$4 sm:$0xff]  }
 0x39c   : > { %v1147_v18 = vadd.f32 %v1145_v13, %v1117_v12  ;;  %v2163_v8 = vld [vmem:[%s2916_s15 + $0x50] ss:$8 sps:$4 sm:$0xff]   ;;  %v2168_v9 = vld [vmem:[%s2916_s15 + $0x64] ss:$8 sps:$4 sm:$0xff]   ;;  %v2166_v10 = vld [vmem:[%s2916_s15 + $0x60] ss:$8 sps:$4 sm:$0xff]  }
 0x39d   : > { %v1176_v21 = vadd.f32 %v1174_v14, %v1146_v15  ;;  %v2171_v11 = vld [vmem:[%s2916_s15 + $0x74] ss:$8 sps:$4 sm:$0xff]   ;;  %v2169_v12 = vld [vmem:[%s2916_s15 + $0x70] ss:$8 sps:$4 sm:$0xff]  }
 0x39e   : > { %v1177_v22 = vadd.f32 %v1175_v19, %v1147_v18 }
 0x39f   : > { %v1185_v23 = vadd.f32 %v1928_v16, %v1176_v21 }
 0x3a0   : > { %v1186_v26 = vadd.f32 %v1928_v16, %v1177_v22 }
 0x3a1   : > { %v1929_v27 = vmul.f32 -0.999995, %v1185_v23  ;;  %v1187_v38 = vmul.f32 0.999995, %v1185_v23  ;;  %v1940_v23 = vld [vmem:[%s2914_s13] ss:$0 sm:$0xff] }
 0x3a2   : > { %v1930_v30 = vmul.f32 -0.999995, %v1186_v26  ;;  %v1188_v0 = vmul.f32 0.999995, %v1186_v26 }
 0x3a3   : > { %v1191_v31 = vmul.f32 1.442695, %v1929_v27 }
 0x3a4   : > { %v1193_v32 = vmul.f32 1.442695, %v1930_v30 }
 0x3a5   : > { %2200 = vpow2.f32 %v1191_v31  ;;  %v1941_v31 = vld [vmem:[%s2915_s14] ss:$0 sm:$0xff] }
 0x3a6   : > { %2202 = vpow2.f32 %v1193_v32 }
 0x3af   : > { %v2201_v33 = vpop.eup %2200 }
 0x3b0   : > { %v1195_v34 = vadd.f32 1.0, %v2201_v33  ;;  %v2203_v35 = vpop.eup %2202 }
 0x3b1   : > { %v1196_v36 = vadd.f32 1.0, %v2203_v35 }
 0x3b2   : > { %2204 = vrcp.f32 %v1195_v34 }
 0x3b3   : > { %2206 = vrcp.f32 %v1196_v36  ;;  %v2172_v36 = vld [vmem:[%s2918_s17 + $0x40] sm:$0xff]  }
 0x3b4   : > { %2001 = vmatprep.subr.bf16.mxu0 %v2172_v36 }
 0x3bc   : > { %v2205_v37 = vpop.eup %2204 }
 0x3bd   : > { %v2207_v24 = vpop.eup %2206  ;;  %v1201_v39 = vmul.f32 %v2205_v37, %v1187_v38  ;;  %v2173_v37 = vld [vmem:[%s2918_s17] sm:$0xff]   ;;  %v2175_v38 = vld [vmem:[%s2918_s17 + $0x8] sm:$0xff]  }
 0x3be   : > { %v1202_v40 = vmul.f32 %v2207_v24, %v1188_v0  ;;  %v2174_v0 = vld [vmem:[%s2918_s17 + $0x48] sm:$0xff]   ;;  %v2176_v24 = vld [vmem:[%s2918_s17 + $0x50] sm:$0xff]  }
 0x3c0   : > { %v1203_v41 = vpack.c.bf16 %v1202_v40, %v1201_v39  ;;  %v2177_v39 = vld [vmem:[%s2918_s17 + $0x10] sm:$0xff]   ;;  %v2178_v40 = vld [vmem:[%s2918_s17 + $0x58] sm:$0xff]  }
 0x3c2   : > { %2060 = vmatmul.mubr.bf16.vlgmr.msra.gmra.mrb[4].mxu0 %v1203_v41  ;;  %v2179_v41 = vld [vmem:[%s2918_s17 + $0x18] sm:$0xff]  }
 0x3c3   : > { %2002 = vmatpush3.bf16.msra.mxu0 %v2173_v37 }
 0x3c4   : > { %2003 = vmatprep.subr.bf16.mxu0 %v2174_v0 }
 0x3c7   : > { %2004 = vmatpush3.bf16.msra.mxu0 %v2175_v38 }
 0x3c8   : > { %2005 = vmatprep.subr.bf16.mxu0 %v2176_v24 }
 0x3cb   : > { %2006 = vmatpush3.bf16.msra.mxu0 %v2177_v39 }
 0x3cc   : > { %2007 = vmatprep.subr.bf16.mxu0 %v2178_v40 }
 0x3cf   : > { %2008 = vmatpush3.bf16.msra.mxu0 %v2179_v41 }
 0x495   : > { %v1302_v42 = vpop.f32.mrb[4].mxu0 }
 0x496   : > { %v1309_v45 = vadd.f32 %v1302_v42, %v2613_v17  ;;  %v2061_v46 = vpop.f32.mrb[5].mxu0  ;;  %v2150_v17 = vld [vmem:[%s2916_s15 + $0x4] ss:$8 sps:$4 sm:$0xff]  }
 0x497   : > { %v1305_v47 = vpop.f32.mrb[6].mxu0  ;;  %1471 = vmatprep.subr.bf16.mxu1 %v2150_v17  ;;  %v2180_v42 = vld [vmem:[%s2918_s17 + $0x60] sm:$0xff]   ;;  %v2183_v46 = vld [vmem:[%s2918_s17 + $0x28] sm:$0xff]  }
 0x498   : > { %v2767_v48 = vadd.f32 %v1939_v44, %v1309_v45  ;;  %v1310_v49 = vadd.f32 %v1305_v47, %v2616_v20  ;;  %v2062_v50 = vpop.f32.mrb[7].mxu0  ;;  %1472 = vmatpush1.bf16.msra.mxu1 %v2148_v52  ;;  %v2151_v20 = vld [vmem:[%s2916_s15 + $0x10] ss:$8 sps:$4 sm:$0xff]   ;;  %2009 = vmatprep.subr.bf16.mxu0 %v2180_v42  ;;  %v2182_v45 = vld [vmem:[%s2918_s17 + $0x68] sm:$0xff]   ;;  %v1379_v17 = vld [vmem:[%s2949_s5] sm:$0x3] }
 0x499   : > { %1473 = vmatprep.subr.bf16.mxu1 %v2153_v53  ;;  %v2184_v47 = vld [vmem:[%s2918_s17 + $0x70] sm:$0xff]   ;;  %v2186_v50 = vld [vmem:[%s2918_s17 + $0x78] sm:$0xff]   ;;  %v1384_v53 = vrot.slane %v1379_v17, %v2748_v43 }
 0x49a   : > { %v2770_v51 = vadd.f32 %v1939_v44, %v1310_v49  ;;  %1322 = vadd.xlane.f32.xlu1 %v2767_v48  ;;  %v2181_v44 = vld [vmem:[%s2918_s17 + $0x20] sm:$0xff]   ;;  %v2185_v49 = vld [vmem:[%s2918_s17 + $0x30] sm:$0xff]   ;;  %v2187_v52 = vld [vmem:[%s2918_s17 + $0x38] sm:$0xff]  }
 0x49b   : > { %2010 = vmatpush3.bf16.msra.mxu0 %v2181_v44 }
 0x49c   : > { %1324 = vadd.xlane.f32.xlu0 %v2770_v51  ;;  %1474 = vmatpush1.bf16.msra.mxu1 %v2151_v20  ;;  %v1388_v20 = vrot.slane %v1379_v17, %v939_v29  ;;  %v1979_v17 = vld [vmem:[#allocation5] ss:$0 sm:$0xff] }
 0x49d   : > { %1475 = vmatprep.subr.bf16.mxu1 %v2156_v1  ;;  %2011 = vmatprep.subr.bf16.mxu0 %v2182_v45 }
 0x49f   : > { %2012 = vmatpush3.bf16.msra.mxu0 %v2183_v46 }
 0x4a0   : > { %1476 = vmatpush1.bf16.msra.mxu1 %v2154_v2  ;;  %2013 = vmatprep.subr.bf16.mxu0 %v2184_v47 }
 0x4a1   : > { %1477 = vmatprep.subr.bf16.mxu1 %v2159_v3 }
 0x4a3   : > { %2014 = vmatpush3.bf16.msra.mxu0 %v2185_v49 }
 0x4a4   : > { %1478 = vmatpush1.bf16.msra.mxu1 %v2157_v4  ;;  %2015 = vmatprep.subr.bf16.mxu0 %v2186_v50 }
 0x4a5   : > { %1479 = vmatprep.subr.bf16.mxu1 %v2162_v5 }
 0x4a7   : > { %2016 = vmatpush3.bf16.msra.mxu0 %v2187_v52 }
 0x4a8   : > { %1480 = vmatpush1.bf16.msra.mxu1 %v2160_v6 }
 0x4a9   : > { %1481 = vmatprep.subr.bf16.mxu1 %v2165_v7 }
 0x4ac   : > { %1482 = vmatpush1.bf16.msra.mxu1 %v2163_v8 }
 0x4ad   : > { %1483 = vmatprep.subr.bf16.mxu1 %v2168_v9 }
 0x4b0   : > { %1484 = vmatpush1.bf16.msra.mxu1 %v2166_v10 }
 0x4b1   : > { %1485 = vmatprep.subr.bf16.mxu1 %v2171_v11 }
 0x4b4   : > { %1486 = vmatpush1.bf16.msra.mxu1 %v2169_v12 }
 0x527   : > { %v1323_v54 = vpop.xlane.xlu1 %1322 }
 0x528   : > { %v1326_v55 = vmul.f32 0.0125, %v1323_v54 }
 0x529   : > { %v1325_v56 = vpop.xlane.xlu0 %1324 }
 0x52a   : > { %v1328_v57 = vsub.f32 %v2767_v48, %v1326_v55  ;;  %v1327_v58 = vmul.f32 0.0125, %v1325_v56 }
 0x52c   : > { %v1329_v59 = vsub.f32 %v2770_v51, %v1327_v58  ;;  %v1330_v60 = vsel %vm879_vm1, %v1328_v57, 0.0 }
 0x52d   : > { %v1332_v61 = vmul.f32 %v1330_v60, %v1330_v60 }
 0x52e   : > { %v1331_v62 = vsel %vm879_vm1, %v1329_v59, 0.0 }
 0x52f   : > { %1334 = vadd.xlane.f32.xlu1 %v1332_v61  ;;  %v1333_v63 = vmul.f32 %v1331_v62, %v1331_v62 }
 0x533   : > { %1336 = vadd.xlane.f32.xlu1 %v1333_v63 }
 0x5bc   : > { %v1335_v13 = vpop.xlane.xlu1 %1334 }
 0x5bd   : > { %v1338_v14 = vmul.f32 0.0125, %v1335_v13 }
 0x5bf   : > { %v1340_v15 = vadd.f32 1e-05, %v1338_v14 }
 0x5c0   : > { %v1337_v16 = vpop.xlane.xlu1 %1336 }
 0x5c1   : > { %2208 = vrsqrt.f32 %v1340_v15  ;;  %v1339_v18 = vmul.f32 0.0125, %v1337_v16 }
 0x5c3   : > { %v1341_v19 = vadd.f32 1e-05, %v1339_v18 }
 0x5c5   : > { %2210 = vrsqrt.f32 %v1341_v19 }
 0x5cb   : > { %v2209_v21 = vpop.eup %2208 }
 0x5cc   : > { %v1344_v22 = vmul.f32 %v2209_v21, %v1330_v60  ;;  %v1962_v21 = vld [vmem:[#allocation3] ss:$0 sm:$0xff] }
 0x5ce   : > { %v1352_v30 = vmul.f32 %v1940_v23, %v1344_v22 }
 0x5cf   : > { %v2211_v26 = vpop.eup %2210 }
 0x5d0   : > { %v1345_v27 = vmul.f32 %v2211_v26, %v1331_v62  ;;  %v1360_v33 = vadd.f32 %v1941_v31, %v1352_v30 }
 0x5d2   : > { %v1353_v32 = vmul.f32 %v1940_v23, %v1345_v27 }
 0x5d4   : > { %v1361_v34 = vadd.f32 %v1941_v31, %v1353_v32 }
 0x5d6   : > { %v1362_v35 = vpack.c.bf16 %v1361_v34, %v1360_v33 }
 0x5d8   : > { %1504 = vmatmul.mubr.bf16.vlgmr.msra.gmra.mrb[4].mxu1 %v1362_v35 }
 0x6ab   : > { %v1505_v54 = vpop.f32.mrb[4].mxu1 }
 0x6ac   : > { %v1506_v55 = vadd.f32 %v1505_v54, %v1384_v53  ;;  %v1507_v56 = vpop.f32.mrb[5].mxu1  ;;  %v1980_v54 = vld [vmem:[#allocation7] ss:$0 sm:$0xff] }
 0x6ad   : > { %v1508_v57 = vadd.f32 %v1507_v56, %v1388_v20  ;;  %v1509_v58 = vpop.f32.mrb[6].mxu1 }
 0x6ae   : > { %v1958_v59 = vmul.f32 -1.442695, %v1506_v55  ;;  %v1510_v60 = vadd.f32 %v1509_v58, %v1384_v53  ;;  %v1511_v61 = vpop.f32.mrb[7].mxu1 }
 0x6af   : > { %v1959_v62 = vmul.f32 -1.442695, %v1508_v57  ;;  %v1512_v63 = vadd.f32 %v1511_v61, %v1388_v20 }
 0x6b0   : > { %2212 = vpow2.f32 %v1958_v59  ;;  %v1960_v1 = vmul.f32 -1.442695, %v1510_v60 }
 0x6b1   : > { %2214 = vpow2.f32 %v1959_v62  ;;  %v1961_v2 = vmul.f32 -1.442695, %v1512_v63 }
 0x6b2   : > { %2216 = vpow2.f32 %v1960_v1 }
 0x6b3   : > { %2218 = vpow2.f32 %v1961_v2 }
 0x6ba   : > { %v2213_v43 = vpop.eup %2212 }
 0x6bb   : > { %v2215_v3 = vpop.eup %2214  ;;  %v1526_v28 = vadd.f32 1.0, %v2213_v43 }
 0x6bc   : > { %v2217_v29 = vpop.eup %2216  ;;  %v1527_v4 = vadd.f32 1.0, %v2215_v3 }
 0x6bd   : > { %v2219_v5 = vpop.eup %2218  ;;  %2220 = vrcp.f32 %v1526_v28  ;;  %v1528_v6 = vadd.f32 1.0, %v2217_v29 }
 0x6be   : > { %2222 = vrcp.f32 %v1527_v4  ;;  %v1529_v7 = vadd.f32 1.0, %v2219_v5 }
 0x6bf   : > { %2224 = vrcp.f32 %v1528_v6 }
 0x6c0   : > { %2226 = vrcp.f32 %v1529_v7 }
 0x6c7   : > { %v2221_v8 = vpop.eup %2220 }
 0x6c8   : > { %v2223_v9 = vpop.eup %2222  ;;  %v1538_v12 = vmul.f32 %v2221_v8, %v1506_v55 }
 0x6c9   : > { %v2225_v10 = vpop.eup %2224  ;;  %v1539_v14 = vmul.f32 %v2223_v9, %v1508_v57 }
 0x6ca   : > { %v2227_v11 = vpop.eup %2226  ;;  %v1540_v13 = vmul.f32 %v2225_v10, %v1510_v60 }
 0x6cb   : > { %v1541_v15 = vmul.f32 %v2227_v11, %v1512_v63 }
 0x6cc   : > { %v1542_v16 = vpack.c.bf16 %v1540_v13, %v1538_v12 }
 0x6cd   : > { %v1543_v18 = vpack.c.bf16 %v1541_v15, %v1539_v14 }
 0x6cf   : > { %1711 = vmatprep.mubr.bf16.mxu0 %v1543_v18 }
 0x6d0   : > { %1712 = vmatmul.mubr.bf16.vlgmr.msra.gmra.mrb[8].mxu0 %v1542_v16 }
 0x7a3   : > { %v2017_v19 = vpop.f32.mrb[8].mxu0 }
 0x7a4   : > { %v2018_v22 = vpop.f32.mrb[9].mxu0 }
 0x7a5   : > { %v2019_v23 = vadd.f32 %v2018_v22, %v2017_v19  ;;  %v2020_v26 = vpop.f32.mrb[10].mxu0 }
 0x7a6   : > { %v2021_v27 = vpop.f32.mrb[11].mxu0 }
 0x7a7   : > { %v1714_v30 = vadd.f32 %v2019_v23, %v1962_v21  ;;  %v2022_v31 = vadd.f32 %v2021_v27, %v2020_v26 }
 0x7a9   : > { %v1720_v32 = vmul.f32 0.5, %v1714_v30  ;;  %v1717_v33 = vadd.f32 %v2022_v31, %v1962_v21 }
 0x7ab   : > { %v1721_v34 = vmul.f32 0.5, %v1717_v33  ;;  %v1722_v35 = vadd.f32 %v1720_v32, %v2767_v48 }
 0x7ad   : > { %1726 = vadd.xlane.f32.xlu0 %v1722_v35  ;;  %v1723_v36 = vadd.f32 %v1721_v34, %v2770_v51 }
 0x7af   : > { %1728 = vadd.xlane.f32.xlu1 %v1723_v36 }
 0x83a   : > { %v1727_v37 = vpop.xlane.xlu0 %1726 }
 0x83b   : > { %v1730_v0 = vmul.f32 0.0125, %v1727_v37 }
 0x83c   : > { %v1729_v38 = vpop.xlane.xlu1 %1728 }
 0x83d   : > { %v1732_v24 = vsub.f32 %v1722_v35, %v1730_v0  ;;  %v1731_v39 = vmul.f32 0.0125, %v1729_v38 }
 0x83f   : > { %v1733_v40 = vsub.f32 %v1723_v36, %v1731_v39  ;;  %v1734_v41 = vsel %vm879_vm1, %v1732_v24, 0.0 }
 0x840   : > { %v1736_v42 = vmul.f32 %v1734_v41, %v1734_v41 }
 0x841   : > { %v1735_v44 = vsel %vm879_vm1, %v1733_v40, 0.0 }
 0x842   : > { %1738 = vadd.xlane.f32.xlu0 %v1736_v42  ;;  %v1737_v45 = vmul.f32 %v1735_v44, %v1735_v44 }
 0x844   : > { %1740 = vadd.xlane.f32.xlu1 %v1737_v45 }
 0x8cf   : > { %v1739_v48 = vpop.xlane.xlu0 %1738 }
 0x8d0   : > { %v1742_v51 = vmul.f32 0.0125, %v1739_v48 }
 0x8d1   : > { %v1741_v46 = vpop.xlane.xlu1 %1740 }
 0x8d2   : > { %v1744_v47 = vadd.f32 1e-05, %v1742_v51  ;;  %v1743_v49 = vmul.f32 0.0125, %v1741_v46 }
 0x8d4   : > { %2228 = vrsqrt.f32 %v1744_v47  ;;  %v1745_v50 = vadd.f32 1e-05, %v1743_v49 }
 0x8d6   : > { %2230 = vrsqrt.f32 %v1745_v50 }
 0x8de   : > { %v2229_v52 = vpop.eup %2228 }
 0x8df   : > { %v1748_v53 = vmul.f32 %v2229_v52, %v1734_v41 }
 0x8e0   : > { %v2231_v20 = vpop.eup %2230 }
 0x8e1   : > { %v1756_v55 = vmul.f32 %v1979_v17, %v1748_v53  ;;  %v1749_v25 = vmul.f32 %v2231_v20, %v1735_v44 }
 0x8e3   : > { %v1764_v56 = vadd.f32 %v1980_v54, %v1756_v55  ;;  %v1757_v57 = vmul.f32 %v1979_v17, %v1749_v25 }
 0x8e5   : > { %1766 = vst [vmem:[%s740_s16] sm:$0xff] %v1764_v56  ;;  %v1765_v58 = vadd.f32 %v1980_v54, %v1757_v57 }
 0x8e7   : > { %1767 = vst [vmem:[%s740_s16 + $0x8] sm:$0xff] %v1765_v58 }
 0x8e8 PF: > { %s33_s2 = sadd.s32 1, %s2330_s2  }
 0x8e9   : > { %p30_p8 = scmp.ge.s32.totalorder %s33_s2, 4  }
 0x8eb   :  { %32 = sbr.rel (!%p30_p8) target bundleno = 11 (0xb), region = 153 }
 0x8f2   :  { %1790 = vsyncpa [#allocation4], 1 }
 0x8f3   :  { %1792 = vsyncpa [#allocation4 + $0x1], 1 }
 0x8f4   :  { %1793 = vsyncpa [#allocation6], 1 }

</bundles_post_ra>
